<compile_context>
chip_gen: v7x
topology: tpu7x:2x2x1
jax: 0.10.0
libtpu: 0.0.40
codegen_flags: <defaults>
</compile_context>

<pallas_src>
import jax
import jax.numpy as jnp
from jax.experimental import pallas as pl
from jax.experimental.pallas import tpu as pltpu

SELU_ALPHA = 1.6732632423543772
SELU_SCALE = 1.0507009873554805
LANE = 128


def _selu_f32(x):
    # Clamp before exp so the discarded positive branch never produces inf.
    return SELU_SCALE * jnp.where(
        x > 0.0, x, SELU_ALPHA * (jnp.exp(jnp.minimum(x, 0.0)) - 1.0))


# --------------------------------------------------------------------------- #
# Kernel 1: conv-as-GEMM tile:  out = SELU(A @ W + b)
#   A (tm, K) bf16, W (K, 128) bf16 (constant over grid), b (1, 128) f32,
#   out (tm, 128) bf16.  Grid over M only, marked "parallel".
# --------------------------------------------------------------------------- #
def _conv_gemm_kernel(a_ref, w_ref, b_ref, o_ref):
    acc = jnp.dot(a_ref[...], w_ref[...], preferred_element_type=jnp.float32)
    o_ref[...] = _selu_f32(acc + b_ref[...]).astype(o_ref.dtype)


def conv_gemm(patches, w_mat, bias, *, tm):
    M, K = patches.shape
    N = w_mat.shape[1]
    assert M % tm == 0 and K % LANE == 0 and N == LANE
    return pl.pallas_call(
        _conv_gemm_kernel,
        out_shape=jax.ShapeDtypeStruct((M, N), jnp.bfloat16),
        grid=(M // tm,),
        in_specs=[
            pl.BlockSpec((tm, K), lambda i: (i, 0)),
            pl.BlockSpec((K, N), lambda i: (0, 0)),
            pl.BlockSpec((1, N), lambda i: (0, 0)),
        ],
        out_specs=pl.BlockSpec((tm, N), lambda i: (i, 0)),
        compiler_params=pltpu.CompilerParams(
            dimension_semantics=("parallel",)),
    )(patches, w_mat, bias)


# --------------------------------------------------------------------------- #
# Kernel 2: fused conv3 GEMM + flatten + FC stack.
#   p3 (M3, K3) bf16, rows ordered (position, batch); conv3 result is written to a
#   VMEM scratch, then fc1 is accumulated as 36 per-position matmuls (this IS the
#   flatten: fc1 weight columns were permuted to (position, channel) order once in
#   make_params).  fc2/fc3 follow in the same body.  All weights VMEM-resident.
# --------------------------------------------------------------------------- #
def _conv3_fc_kernel(p3_ref, w3_ref, b3_ref, w1_ref, b1_ref, w2_ref, b2_ref,
                     wf_ref, bf_ref, o_ref, c3_ref):
    # conv3 GEMM + SELU -> (M3, 128) bf16 scratch; padded rows/channels stay 0.
    c3 = jnp.dot(p3_ref[...], w3_ref[...], preferred_element_type=jnp.float32)
    c3_ref[...] = _selu_f32(c3 + b3_ref[...]).astype(c3_ref.dtype)

    B = o_ref.shape[0]
    n_pos = w1_ref.shape[0] // 64            # 36 spatial positions (6x6)
    acc1 = jnp.zeros((B, w1_ref.shape[1]), jnp.float32)
    for p in range(n_pos):                   # flatten + fc1, accumulated on MXU
        a = c3_ref[p * B:(p + 1) * B, 0:64]          # (B, 64) bf16
        w = w1_ref[p * 64:(p + 1) * 64, :]           # (64, 512) bf16
        acc1 = acc1 + jnp.dot(a, w, preferred_element_type=jnp.float32)

    a1 = _selu_f32(acc1 + b1_ref[...]).astype(jnp.bfloat16)
    a2 = _selu_f32(jnp.dot(a1, w2_ref[...], preferred_element_type=jnp.float32)
                   + b2_ref[...]).astype(jnp.bfloat16)
    o_ref[...] = (jnp.dot(a2, wf_ref[...], preferred_element_type=jnp.float32)
                  + bf_ref[...])


def conv3_fc(p3, params, batch):
    M3, _ = p3.shape
    w3, b3 = params["conv3_w"], params["conv3_b"]
    w1, b1 = params["fc1_w"], params["fc1_b"]
    w2, b2 = params["fc2_w"], params["fc2_b"]
    wf, bf = params["fc3_w"], params["fc3_b"]

    def full(shape):
        return pl.BlockSpec(shape, lambda i, _s=shape: (0,) * len(_s))

    return pl.pallas_call(
        _conv3_fc_kernel,
        out_shape=jax.ShapeDtypeStruct((batch, wf.shape[1]), jnp.float32),
        grid=(1,),
        in_specs=[full(p3.shape), full(w3.shape), full(b3.shape),
                  full(w1.shape), full(b1.shape),
                  full(w2.shape), full(b2.shape),
                  full(wf.shape), full(bf.shape)],
        out_specs=full((batch, wf.shape[1])),
        scratch_shapes=[pltpu.VMEM((M3, LANE), jnp.bfloat16)],
        compiler_params=pltpu.CompilerParams(
            dimension_semantics=("arbitrary",)),
    )(p3, w3, b3, w1, b1, w2, b2, wf, bf)


# --------------------------------------------------------------------------- #
# Plain-JAX glue (runs under jax.jit): im2col, padding, one-time param prep.
# --------------------------------------------------------------------------- #
def im2col_nhwc(x, kh, kw, stride):
    """x: (B, H, W, C) -> patches (B*Ho*Wo, kh*kw*C) in (kh, kw, C) feature order."""
    B, H, W, C = x.shape
    Ho = (H - kh) // stride + 1
    Wo = (W - kw) // stride + 1
    cols = []
    for i in range(kh):
        for j in range(kw):
            cols.append(x[:, i:i + Ho * stride:stride, j:j + Wo * stride:stride, :])
    p = jnp.stack(cols, axis=3)                       # (B, Ho, Wo, kh*kw, C)
    return p.reshape(B * Ho * Wo, kh * kw * C), Ho, Wo


def pad_axis(x, axis, mult):
    pad = (-x.shape[axis]) % mult
    if pad == 0:
        return x
    widths = [(0, 0)] * x.ndim
    widths[axis] = (0, pad)
    return jnp.pad(x, widths)


def orthogonal_init(key, shape, gain):
    """Deterministic orthogonal init matching nn.init.orthogonal_ semantics."""
    rows = shape[0]
    cols = 1
    for s in shape[1:]:
        cols *= s
    flat = jax.random.normal(key, (rows, cols), dtype=jnp.float32)
    transposed = rows < cols
    if transposed:
        flat = flat.T
    q, r = jnp.linalg.qr(flat)
    q = q * jnp.sign(jnp.diagonal(r))
    if transposed:
        q = q.T
    return (gain * q).reshape(shape)


def conv_w_to_matrix(w, cout_pad):
    """(O, Cin, kh, kw) -> (pad128(kh*kw*Cin), cout_pad) bf16, im2col (kh,kw,Cin) order."""
    O, C, kh, kw = w.shape
    w = jnp.transpose(w, (2, 3, 1, 0))                # (kh, kw, Cin, O)
    w = jnp.pad(w, ((0, 0), (0, 0), (0, 0), (0, cout_pad - O)))
    w = w.reshape(kh * kw * C, cout_pad)
    return pad_axis(w, 0, LANE).astype(jnp.bfloat16)


def make_params(key):
    gain = float(jnp.sqrt(2.0))
    ks = jax.random.split(key, 6)
    c1 = orthogonal_init(ks[0], (32, 3, 5, 5), gain)
    c2 = orthogonal_init(ks[1], (64, 32, 5, 5), gain)
    c3 = orthogonal_init(ks[2], (64, 64, 3, 3), gain)
    f1 = orthogonal_init(ks[3], (512, 2304), gain)
    f2 = orthogonal_init(ks[4], (256, 512), gain)
    f3 = orthogonal_init(ks[5], (256, 256), gain)

    # Conv weights as GEMM matrices with REAL Cin (no carried channel padding);
    # Cout padded to 128 lanes, K rows zero-padded to the next multiple of 128.
    w1 = conv_w_to_matrix(c1, cout_pad=LANE)          # ( 128, 128)  K: 75 -> 128
    w2 = conv_w_to_matrix(c2, cout_pad=LANE)          # ( 896, 128)  K: 800 -> 896
    w3 = conv_w_to_matrix(c3, cout_pad=LANE)          # ( 640, 128)  K: 576 -> 640

    # fc1: fold the PyTorch NCHW flatten (feature index c*36 + hw) into a one-time
    # column permutation to the kernel's (hw*64 + c) ordering; then store (in, out).
    f1_perm = f1.reshape(512, 64, 36).transpose(0, 2, 1).reshape(512, 2304)

    return {
        "conv1_w": w1, "conv1_b": jnp.zeros((1, LANE), jnp.float32),
        "conv2_w": w2, "conv2_b": jnp.zeros((1, LANE), jnp.float32),
        "conv3_w": w3, "conv3_b": jnp.zeros((1, LANE), jnp.float32),
        "fc1_w": jnp.asarray(f1_perm.T, jnp.bfloat16),   # (2304, 512)
        "fc1_b": jnp.zeros((1, 512), jnp.float32),
        "fc2_w": jnp.asarray(f2.T, jnp.bfloat16),        # (512, 256)
        "fc2_b": jnp.zeros((1, 256), jnp.float32),
        "fc3_w": jnp.asarray(f3.T, jnp.bfloat16),        # (256, 256)
        "fc3_b": jnp.zeros((1, 256), jnp.float32),
    }


def rnd_forward(x, params):
    """x: (B, 64, 64, 3) NHWC float32 -> (B, 256) float32 (== PyTorch RND.forward)."""
    B = x.shape[0]
    xb = x.astype(jnp.bfloat16)

    # conv1: 5x5 stride 2, 3 -> 32 (output lane-padded to 128), SELU
    p, Ho, Wo = im2col_nhwc(xb, 5, 5, 2)                        # (B*900, 75)
    p = pad_axis(pad_axis(p, 1, LANE), 0, 1024)                 # (2048, 128) @ B=2
    h = conv_gemm(p, params["conv1_w"], params["conv1_b"], tm=1024)
    h = h[:B * Ho * Wo, :32].reshape(B, Ho, Wo, 32)             # (B, 30, 30, 32)

    # conv2: 5x5 stride 2, 32 -> 64, SELU   (K = 25*32 = 800 -> 896, no channel pad)
    p, Ho, Wo = im2col_nhwc(h, 5, 5, 2)                         # (B*169, 800)
    p = pad_axis(pad_axis(p, 1, LANE), 0, 256)                  # (512, 896)
    h = conv_gemm(p, params["conv2_w"], params["conv2_b"], tm=256)
    h = h[:B * Ho * Wo, :64].reshape(B, Ho, Wo, 64)             # (B, 13, 13, 64)

    # conv3 (3x3 stride 2, 64 -> 64) + flatten + fc1/fc2/fc3, all in one kernel.
    # Patch rows are re-ordered (position, batch) so each spatial position is a
    # contiguous B-row slice inside the kernel.
    p, Ho, Wo = im2col_nhwc(h, 3, 3, 2)                         # (B*36, 576)
    K3 = p.shape[1]
    p = p.reshape(B, Ho * Wo, K3).transpose(1, 0, 2).reshape(Ho * Wo * B, K3)
    p = pad_axis(pad_axis(p, 1, LANE), 0, 16)                   # (80, 640) @ B=2
    return conv3_fc(p, params, B)                               # (B, 256) f32


if __name__ == "__main__":
    key = jax.random.PRNGKey(0)
    k_param, k_x = jax.random.split(key)
    params = make_params(k_param)
    # Spatial size 64 is dictated by the module: Flatten feeds Linear(2304, 512),
    # which requires a 64x64 input (-> 6x6x64 after the three strided convs).
    x = jax.random.normal(k_x, (2, 64, 64, 3), dtype=jnp.float32)

    fwd = jax.jit(rnd_forward)
    out = jax.block_until_ready(fwd(x, params))
    assert out.shape == (2, 256) and out.dtype == jnp.float32
    print("KERNEL_OK")
</pallas_src>

<mosaic_0001>
module attributes {stable_mosaic.version = 11 : i64} {
  func.func @_conv_gemm_kernel(%arg0: i32, %arg1: memref<1024x128xbf16, #tpu.memory_space<vmem>>, %arg2: memref<128x128xbf16, #tpu.memory_space<vmem>>, %arg3: memref<1x128xf32, #tpu.memory_space<vmem>>, %arg4: memref<1024x128xbf16, #tpu.memory_space<vmem>>) attributes {dimension_semantics = [#tpu.dimension_semantics<parallel>], iteration_bounds = array<i64: 2>, scalar_prefetch = 0 : i64, scratch_operands = 0 : i64, tpu.core_type = #tpu.core_type<tc>, window_params = [{transform_indices = @transform_0, window_bounds = array<i64: 1024, 128>}, {pipeline_mode = #tpu.pipeline_mode<synchronous>, transform_indices = @transform_1, window_bounds = array<i64: 128, 128>}, {pipeline_mode = #tpu.pipeline_mode<synchronous>, transform_indices = @transform_2, window_bounds = array<i64: 1, 128>}, {transform_indices = @transform_3, window_bounds = array<i64: 1024, 128>}]} {
    %c0 = arith.constant 0 : index
    %c0_0 = arith.constant 0 : index
    %0 = vector.load %arg1[%c0, %c0_0] : memref<1024x128xbf16, #tpu.memory_space<vmem>>, vector<1024x128xbf16>
    %c0_1 = arith.constant 0 : index
    %c0_2 = arith.constant 0 : index
    %1 = vector.load %arg2[%c0_1, %c0_2] : memref<128x128xbf16, #tpu.memory_space<vmem>>, vector<128x128xbf16>
    %cst = arith.constant dense<0.000000e+00> : vector<1024x128xf32>
    %2 = tpu.matmul %0, %1, %cst {dimension_numbers = #tpu.dot_dimension_numbers<[1], [0], [0], [1], [0, 0, 1, 1], [], []>} : vector<1024x128xbf16>, vector<128x128xbf16>, vector<1024x128xf32> -> vector<1024x128xf32>
    %c0_3 = arith.constant 0 : index
    %c0_4 = arith.constant 0 : index
    %3 = vector.load %arg3[%c0_3, %c0_4] : memref<1x128xf32, #tpu.memory_space<vmem>>, vector<1x128xf32>
    %4 = vector.broadcast %3 : vector<1x128xf32> to vector<1024x128xf32>
    %5 = arith.addf %2, %4 : vector<1024x128xf32>
    %cst_5 = arith.constant 0.000000e+00 : f32
    %6 = vector.broadcast %cst_5 : f32 to vector<1024x128xf32>
    %7 = arith.cmpf ogt, %5, %6 : vector<1024x128xf32>
    %cst_6 = arith.constant 0.000000e+00 : f32
    %8 = vector.broadcast %cst_6 : f32 to vector<1024x128xf32>
    %9 = arith.minimumf %5, %8 : vector<1024x128xf32>
    %10 = math.exp %9 : vector<1024x128xf32>
    %cst_7 = arith.constant 1.000000e+00 : f32
    %11 = vector.broadcast %cst_7 : f32 to vector<1024x128xf32>
    %12 = arith.subf %10, %11 : vector<1024x128xf32>
    %cst_8 = arith.constant 1.67326319 : f32
    %13 = vector.broadcast %cst_8 : f32 to vector<1024x128xf32>
    %14 = arith.mulf %13, %12 : vector<1024x128xf32>
    %15 = arith.select %7, %5, %14 : vector<1024x128xi1>, vector<1024x128xf32>
    %cst_9 = arith.constant 1.05070102 : f32
    %16 = vector.broadcast %cst_9 : f32 to vector<1024x128xf32>
    %17 = arith.mulf %16, %15 : vector<1024x128xf32>
    %18 = arith.truncf %17 : vector<1024x128xf32> to vector<1024x128xbf16>
    %c0_10 = arith.constant 0 : index
    %c0_11 = arith.constant 0 : index
    %19 = vector.load %arg4[%c0_10, %c0_11] : memref<1024x128xbf16, #tpu.memory_space<vmem>>, vector<1024x128xbf16>
    tpu.vector_store %arg4[%c0_10, %c0_11], %18 {strides = array<i32>} : memref<1024x128xbf16, #tpu.memory_space<vmem>>, vector<1024x128xbf16>,
    return
  }
  func.func @transform_0(%arg0: i32) -> (i32, i32) {
    %c0_i32 = arith.constant 0 : i32
    %c0_i32_0 = arith.constant 0 : i32
    return %arg0, %c0_i32 : i32, i32
  }
  func.func @transform_1(%arg0: i32) -> (i32, i32) {
    %c0_i32 = arith.constant 0 : i32
    %c0_i32_0 = arith.constant 0 : i32
    %c0_i32_1 = arith.constant 0 : i32
    return %c0_i32, %c0_i32_0 : i32, i32
  }
  func.func @transform_2(%arg0: i32) -> (i32, i32) {
    %c0_i32 = arith.constant 0 : i32
    %c0_i32_0 = arith.constant 0 : i32
    %c0_i32_1 = arith.constant 0 : i32
    return %c0_i32, %c0_i32_0 : i32, i32
  }
  func.func @transform_3(%arg0: i32) -> (i32, i32) {
    %c0_i32 = arith.constant 0 : i32
    %c0_i32_0 = arith.constant 0 : i32
    return %arg0, %c0_i32 : i32, i32
  }
}

module attributes {stable_mosaic.version = 11 : i64} {
  func.func @_conv_gemm_kernel(%arg0: i32, %arg1: memref<256x896xbf16, #tpu.memory_space<vmem>>, %arg2: memref<896x128xbf16, #tpu.memory_space<vmem>>, %arg3: memref<1x128xf32, #tpu.memory_space<vmem>>, %arg4: memref<256x128xbf16, #tpu.memory_space<vmem>>) attributes {dimension_semantics = [#tpu.dimension_semantics<parallel>], iteration_bounds = array<i64: 2>, scalar_prefetch = 0 : i64, scratch_operands = 0 : i64, tpu.core_type = #tpu.core_type<tc>, window_params = [{transform_indices = @transform_0, window_bounds = array<i64: 256, 896>}, {pipeline_mode = #tpu.pipeline_mode<synchronous>, transform_indices = @transform_1, window_bounds = array<i64: 896, 128>}, {pipeline_mode = #tpu.pipeline_mode<synchronous>, transform_indices = @transform_2, window_bounds = array<i64: 1, 128>}, {transform_indices = @transform_3, window_bounds = array<i64: 256, 128>}]} {
    %c0 = arith.constant 0 : index
    %c0_0 = arith.constant 0 : index
    %0 = vector.load %arg1[%c0, %c0_0] : memref<256x896xbf16, #tpu.memory_space<vmem>>, vector<256x896xbf16>
    %c0_1 = arith.constant 0 : index
    %c0_2 = arith.constant 0 : index
    %1 = vector.load %arg2[%c0_1, %c0_2] : memref<896x128xbf16, #tpu.memory_space<vmem>>, vector<896x128xbf16>
    %cst = arith.constant dense<0.000000e+00> : vector<256x128xf32>
    %2 = tpu.matmul %0, %1, %cst {dimension_numbers = #tpu.dot_dimension_numbers<[1], [0], [0], [1], [0, 0, 1, 1], [], []>} : vector<256x896xbf16>, vector<896x128xbf16>, vector<256x128xf32> -> vector<256x128xf32>
    %c0_3 = arith.constant 0 : index
    %c0_4 = arith.constant 0 : index
    %3 = vector.load %arg3[%c0_3, %c0_4] : memref<1x128xf32, #tpu.memory_space<vmem>>, vector<1x128xf32>
    %4 = vector.broadcast %3 : vector<1x128xf32> to vector<256x128xf32>
    %5 = arith.addf %2, %4 : vector<256x128xf32>
    %cst_5 = arith.constant 0.000000e+00 : f32
    %6 = vector.broadcast %cst_5 : f32 to vector<256x128xf32>
    %7 = arith.cmpf ogt, %5, %6 : vector<256x128xf32>
    %cst_6 = arith.constant 0.000000e+00 : f32
    %8 = vector.broadcast %cst_6 : f32 to vector<256x128xf32>
    %9 = arith.minimumf %5, %8 : vector<256x128xf32>
    %10 = math.exp %9 : vector<256x128xf32>
    %cst_7 = arith.constant 1.000000e+00 : f32
    %11 = vector.broadcast %cst_7 : f32 to vector<256x128xf32>
    %12 = arith.subf %10, %11 : vector<256x128xf32>
    %cst_8 = arith.constant 1.67326319 : f32
    %13 = vector.broadcast %cst_8 : f32 to vector<256x128xf32>
    %14 = arith.mulf %13, %12 : vector<256x128xf32>
    %15 = arith.select %7, %5, %14 : vector<256x128xi1>, vector<256x128xf32>
    %cst_9 = arith.constant 1.05070102 : f32
    %16 = vector.broadcast %cst_9 : f32 to vector<256x128xf32>
    %17 = arith.mulf %16, %15 : vector<256x128xf32>
    %18 = arith.truncf %17 : vector<256x128xf32> to vector<256x128xbf16>
    %c0_10 = arith.constant 0 : index
    %c0_11 = arith.constant 0 : index
    %19 = vector.load %arg4[%c0_10, %c0_11] : memref<256x128xbf16, #tpu.memory_space<vmem>>, vector<256x128xbf16>
    tpu.vector_store %arg4[%c0_10, %c0_11], %18 {strides = array<i32>} : memref<256x128xbf16, #tpu.memory_space<vmem>>, vector<256x128xbf16>,
    return
  }
  func.func @transform_0(%arg0: i32) -> (i32, i32) {
    %c0_i32 = arith.constant 0 : i32
    %c0_i32_0 = arith.constant 0 : i32
    return %arg0, %c0_i32 : i32, i32
  }
  func.func @transform_1(%arg0: i32) -> (i32, i32) {
    %c0_i32 = arith.constant 0 : i32
    %c0_i32_0 = arith.constant 0 : i32
    %c0_i32_1 = arith.constant 0 : i32
    return %c0_i32, %c0_i32_0 : i32, i32
  }
  func.func @transform_2(%arg0: i32) -> (i32, i32) {
    %c0_i32 = arith.constant 0 : i32
    %c0_i32_0 = arith.constant 0 : i32
    %c0_i32_1 = arith.constant 0 : i32
    return %c0_i32, %c0_i32_0 : i32, i32
  }
  func.func @transform_3(%arg0: i32) -> (i32, i32) {
    %c0_i32 = arith.constant 0 : i32
    %c0_i32_0 = arith.constant 0 : i32
    return %arg0, %c0_i32 : i32, i32
  }
}

module attributes {stable_mosaic.version = 11 : i64} {
  func.func @_conv3_fc_kernel(%arg0: i32, %arg1: memref<80x640xbf16, #tpu.memory_space<vmem>>, %arg2: memref<640x128xbf16, #tpu.memory_space<vmem>>, %arg3: memref<1x128xf32, #tpu.memory_space<vmem>>, %arg4: memref<2304x512xbf16, #tpu.memory_space<vmem>>, %arg5: memref<1x512xf32, #tpu.memory_space<vmem>>, %arg6: memref<512x256xbf16, #tpu.memory_space<vmem>>, %arg7: memref<1x256xf32, #tpu.memory_space<vmem>>, %arg8: memref<256x256xbf16, #tpu.memory_space<vmem>>, %arg9: memref<1x256xf32, #tpu.memory_space<vmem>>, %arg10: memref<2x256xf32, #tpu.memory_space<vmem>>, %arg11: memref<80x128xbf16, #tpu.memory_space<vmem>>) attributes {dimension_semantics = [#tpu.dimension_semantics<arbitrary>], iteration_bounds = array<i64: 1>, scalar_prefetch = 0 : i64, scratch_operands = 1 : i64, tpu.core_type = #tpu.core_type<tc>, window_params = [{pipeline_mode = #tpu.pipeline_mode<synchronous>, transform_indices = @transform_0, window_bounds = array<i64: 80, 640>}, {pipeline_mode = #tpu.pipeline_mode<synchronous>, transform_indices = @transform_1, window_bounds = array<i64: 640, 128>}, {pipeline_mode = #tpu.pipeline_mode<synchronous>, transform_indices = @transform_2, window_bounds = array<i64: 1, 128>}, {pipeline_mode = #tpu.pipeline_mode<synchronous>, transform_indices = @transform_3, window_bounds = array<i64: 2304, 512>}, {pipeline_mode = #tpu.pipeline_mode<synchronous>, transform_indices = @transform_4, window_bounds = array<i64: 1, 512>}, {pipeline_mode = #tpu.pipeline_mode<synchronous>, transform_indices = @transform_5, window_bounds = array<i64: 512, 256>}, {pipeline_mode = #tpu.pipeline_mode<synchronous>, transform_indices = @transform_6, window_bounds = array<i64: 1, 256>}, {pipeline_mode = #tpu.pipeline_mode<synchronous>, transform_indices = @transform_7, window_bounds = array<i64: 256, 256>}, {pipeline_mode = #tpu.pipeline_mode<synchronous>, transform_indices = @transform_8, window_bounds = array<i64: 1, 256>}, {pipeline_mode = #tpu.pipeline_mode<synchronous>, transform_indices = @transform_9, window_bounds = array<i64: 2, 256>}]} {
    %c0 = arith.constant 0 : index
    %c0_0 = arith.constant 0 : index
    %0 = vector.load %arg1[%c0, %c0_0] : memref<80x640xbf16, #tpu.memory_space<vmem>>, vector<80x640xbf16>
    %c0_1 = arith.constant 0 : index
    %c0_2 = arith.constant 0 : index
    %1 = vector.load %arg2[%c0_1, %c0_2] : memref<640x128xbf16, #tpu.memory_space<vmem>>, vector<640x128xbf16>
    %cst = arith.constant dense<0.000000e+00> : vector<80x128xf32>
    %2 = tpu.matmul %0, %1, %cst {dimension_numbers = #tpu.dot_dimension_numbers<[1], [0], [0], [1], [0, 0, 1, 1], [], []>} : vector<80x640xbf16>, vector<640x128xbf16>, vector<80x128xf32> -> vector<80x128xf32>
    %c0_3 = arith.constant 0 : index
    %c0_4 = arith.constant 0 : index
    %3 = vector.load %arg3[%c0_3, %c0_4] : memref<1x128xf32, #tpu.memory_space<vmem>>, vector<1x128xf32>
    %4 = vector.broadcast %3 : vector<1x128xf32> to vector<80x128xf32>
    %5 = arith.addf %2, %4 : vector<80x128xf32>
    %cst_5 = arith.constant 0.000000e+00 : f32
    %6 = vector.broadcast %cst_5 : f32 to vector<80x128xf32>
    %7 = arith.cmpf ogt, %5, %6 : vector<80x128xf32>
    %cst_6 = arith.constant 0.000000e+00 : f32
    %8 = vector.broadcast %cst_6 : f32 to vector<80x128xf32>
    %9 = arith.minimumf %5, %8 : vector<80x128xf32>
    %10 = math.exp %9 : vector<80x128xf32>
    %cst_7 = arith.constant 1.000000e+00 : f32
    %11 = vector.broadcast %cst_7 : f32 to vector<80x128xf32>
    %12 = arith.subf %10, %11 : vector<80x128xf32>
    %cst_8 = arith.constant 1.67326319 : f32
    %13 = vector.broadcast %cst_8 : f32 to vector<80x128xf32>
    %14 = arith.mulf %13, %12 : vector<80x128xf32>
    %15 = arith.select %7, %5, %14 : vector<80x128xi1>, vector<80x128xf32>
    %cst_9 = arith.constant 1.05070102 : f32
    %16 = vector.broadcast %cst_9 : f32 to vector<80x128xf32>
    %17 = arith.mulf %16, %15 : vector<80x128xf32>
    %18 = arith.truncf %17 : vector<80x128xf32> to vector<80x128xbf16>
    %c0_10 = arith.constant 0 : index
    %c0_11 = arith.constant 0 : index
    %19 = vector.load %arg11[%c0_10, %c0_11] : memref<80x128xbf16, #tpu.memory_space<vmem>>, vector<80x128xbf16>
    tpu.vector_store %arg11[%c0_10, %c0_11], %18 {strides = array<i32>} : memref<80x128xbf16, #tpu.memory_space<vmem>>, vector<80x128xbf16>,
    %cst_12 = arith.constant 0.000000e+00 : f32
    %20 = vector.broadcast %cst_12 : f32 to vector<2x512xf32>
    %c0_13 = arith.constant 0 : index
    %c0_14 = arith.constant 0 : index
    %21 = vector.load %arg11[%c0_13, %c0_14] : memref<80x128xbf16, #tpu.memory_space<vmem>>, vector<2x64xbf16>
    %c0_15 = arith.constant 0 : index
    %c0_16 = arith.constant 0 : index
    %22 = vector.load %arg4[%c0_15, %c0_16] : memref<2304x512xbf16, #tpu.memory_space<vmem>>, vector<64x512xbf16>
    %cst_17 = arith.constant dense<0.000000e+00> : vector<2x512xf32>
    %23 = tpu.matmul %21, %22, %cst_17 {dimension_numbers = #tpu.dot_dimension_numbers<[1], [0], [0], [1], [0, 0, 1, 1], [], []>} : vector<2x64xbf16>, vector<64x512xbf16>, vector<2x512xf32> -> vector<2x512xf32>
    %24 = arith.addf %20, %23 : vector<2x512xf32>
    %c2 = arith.constant 2 : index
    %c0_18 = arith.constant 0 : index
    %25 = vector.load %arg11[%c2, %c0_18] : memref<80x128xbf16, #tpu.memory_space<vmem>>, vector<2x64xbf16>
    %c64 = arith.constant 64 : index
    %c0_19 = arith.constant 0 : index
    %26 = vector.load %arg4[%c64, %c0_19] : memref<2304x512xbf16, #tpu.memory_space<vmem>>, vector<64x512xbf16>
    %cst_20 = arith.constant dense<0.000000e+00> : vector<2x512xf32>
    %27 = tpu.matmul %25, %26, %cst_20 {dimension_numbers = #tpu.dot_dimension_numbers<[1], [0], [0], [1], [0, 0, 1, 1], [], []>} : vector<2x64xbf16>, vector<64x512xbf16>, vector<2x512xf32> -> vector<2x512xf32>
    %28 = arith.addf %24, %27 : vector<2x512xf32>
    %c4 = arith.constant 4 : index
    %c0_21 = arith.constant 0 : index
    %29 = vector.load %arg11[%c4, %c0_21] : memref<80x128xbf16, #tpu.memory_space<vmem>>, vector<2x64xbf16>
    %c128 = arith.constant 128 : index
    %c0_22 = arith.constant 0 : index
    %30 = vector.load %arg4[%c128, %c0_22] : memref<2304x512xbf16, #tpu.memory_space<vmem>>, vector<64x512xbf16>
    %cst_23 = arith.constant dense<0.000000e+00> : vector<2x512xf32>
    %31 = tpu.matmul %29, %30, %cst_23 {dimension_numbers = #tpu.dot_dimension_numbers<[1], [0], [0], [1], [0, 0, 1, 1], [], []>} : vector<2x64xbf16>, vector<64x512xbf16>, vector<2x512xf32> -> vector<2x512xf32>
    %32 = arith.addf %28, %31 : vector<2x512xf32>
    %c6 = arith.constant 6 : index
    %c0_24 = arith.constant 0 : index
    %33 = vector.load %arg11[%c6, %c0_24] : memref<80x128xbf16, #tpu.memory_space<vmem>>, vector<2x64xbf16>
    %c192 = arith.constant 192 : index
    %c0_25 = arith.constant 0 : index
    %34 = vector.load %arg4[%c192, %c0_25] : memref<2304x512xbf16, #tpu.memory_space<vmem>>, vector<64x512xbf16>
    %cst_26 = arith.constant dense<0.000000e+00> : vector<2x512xf32>
    %35 = tpu.matmul %33, %34, %cst_26 {dimension_numbers = #tpu.dot_dimension_numbers<[1], [0], [0], [1], [0, 0, 1, 1], [], []>} : vector<2x64xbf16>, vector<64x512xbf16>, vector<2x512xf32> -> vector<2x512xf32>
    %36 = arith.addf %32, %35 : vector<2x512xf32>
    %c8 = arith.constant 8 : index
    %c0_27 = arith.constant 0 : index
    %37 = vector.load %arg11[%c8, %c0_27] : memref<80x128xbf16, #tpu.memory_space<vmem>>, vector<2x64xbf16>
    %c256 = arith.constant 256 : index
    %c0_28 = arith.constant 0 : index
    %38 = vector.load %arg4[%c256, %c0_28] : memref<2304x512xbf16, #tpu.memory_space<vmem>>, vector<64x512xbf16>
    %cst_29 = arith.constant dense<0.000000e+00> : vector<2x512xf32>
    %39 = tpu.matmul %37, %38, %cst_29 {dimension_numbers = #tpu.dot_dimension_numbers<[1], [0], [0], [1], [0, 0, 1, 1], [], []>} : vector<2x64xbf16>, vector<64x512xbf16>, vector<2x512xf32> -> vector<2x512xf32>
    %40 = arith.addf %36, %39 : vector<2x512xf32>
    %c10 = arith.constant 10 : index
    %c0_30 = arith.constant 0 : index
    %41 = vector.load %arg11[%c10, %c0_30] : memref<80x128xbf16, #tpu.memory_space<vmem>>, vector<2x64xbf16>
    %c320 = arith.constant 320 : index
    %c0_31 = arith.constant 0 : index
    %42 = vector.load %arg4[%c320, %c0_31] : memref<2304x512xbf16, #tpu.memory_space<vmem>>, vector<64x512xbf16>
    %cst_32 = arith.constant dense<0.000000e+00> : vector<2x512xf32>
    %43 = tpu.matmul %41, %42, %cst_32 {dimension_numbers = #tpu.dot_dimension_numbers<[1], [0], [0], [1], [0, 0, 1, 1], [], []>} : vector<2x64xbf16>, vector<64x512xbf16>, vector<2x512xf32> -> vector<2x512xf32>
    %44 = arith.addf %40, %43 : vector<2x512xf32>
    %c12 = arith.constant 12 : index
    %c0_33 = arith.constant 0 : index
    %45 = vector.load %arg11[%c12, %c0_33] : memref<80x128xbf16, #tpu.memory_space<vmem>>, vector<2x64xbf16>
    %c384 = arith.constant 384 : index
    %c0_34 = arith.constant 0 : index
    %46 = vector.load %arg4[%c384, %c0_34] : memref<2304x512xbf16, #tpu.memory_space<vmem>>, vector<64x512xbf16>
    %cst_35 = arith.constant dense<0.000000e+00> : vector<2x512xf32>
    %47 = tpu.matmul %45, %46, %cst_35 {dimension_numbers = #tpu.dot_dimension_numbers<[1], [0], [0], [1], [0, 0, 1, 1], [], []>} : vector<2x64xbf16>, vector<64x512xbf16>, vector<2x512xf32> -> vector<2x512xf32>
    %48 = arith.addf %44, %47 : vector<2x512xf32>
    %c14 = arith.constant 14 : index
    %c0_36 = arith.constant 0 : index
    %49 = vector.load %arg11[%c14, %c0_36] : memref<80x128xbf16, #tpu.memory_space<vmem>>, vector<2x64xbf16>
    %c448 = arith.constant 448 : index
    %c0_37 = arith.constant 0 : index
    %50 = vector.load %arg4[%c448, %c0_37] : memref<2304x512xbf16, #tpu.memory_space<vmem>>, vector<64x512xbf16>
    %cst_38 = arith.constant dense<0.000000e+00> : vector<2x512xf32>
    %51 = tpu.matmul %49, %50, %cst_38 {dimension_numbers = #tpu.dot_dimension_numbers<[1], [0], [0], [1], [0, 0, 1, 1], [], []>} : vector<2x64xbf16>, vector<64x512xbf16>, vector<2x512xf32> -> vector<2x512xf32>
    %52 = arith.addf %48, %51 : vector<2x512xf32>
    %c16 = arith.constant 16 : index
    %c0_39 = arith.constant 0 : index
    %53 = vector.load %arg11[%c16, %c0_39] : memref<80x128xbf16, #tpu.memory_space<vmem>>, vector<2x64xbf16>
    %c512 = arith.constant 512 : index
    %c0_40 = arith.constant 0 : index
    %54 = vector.load %arg4[%c512, %c0_40] : memref<2304x512xbf16, #tpu.memory_space<vmem>>, vector<64x512xbf16>
    %cst_41 = arith.constant dense<0.000000e+00> : vector<2x512xf32>
    %55 = tpu.matmul %53, %54, %cst_41 {dimension_numbers = #tpu.dot_dimension_numbers<[1], [0], [0], [1], [0, 0, 1, 1], [], []>} : vector<2x64xbf16>, vector<64x512xbf16>, vector<2x512xf32> -> vector<2x512xf32>
    %56 = arith.addf %52, %55 : vector<2x512xf32>
    %c18 = arith.constant 18 : index
    %c0_42 = arith.constant 0 : index
    %57 = vector.load %arg11[%c18, %c0_42] : memref<80x128xbf16, #tpu.memory_space<vmem>>, vector<2x64xbf16>
    %c576 = arith.constant 576 : index
    %c0_43 = arith.constant 0 : index
    %58 = vector.load %arg4[%c576, %c0_43] : memref<2304x512xbf16, #tpu.memory_space<vmem>>, vector<64x512xbf16>
    %cst_44 = arith.constant dense<0.000000e+00> : vector<2x512xf32>
    %59 = tpu.matmul %57, %58, %cst_44 {dimension_numbers = #tpu.dot_dimension_numbers<[1], [0], [0], [1], [0, 0, 1, 1], [], []>} : vector<2x64xbf16>, vector<64x512xbf16>, vector<2x512xf32> -> vector<2x512xf32>
    %60 = arith.addf %56, %59 : vector<2x512xf32>
    %c20 = arith.constant 20 : index
    %c0_45 = arith.constant 0 : index
    %61 = vector.load %arg11[%c20, %c0_45] : memref<80x128xbf16, #tpu.memory_space<vmem>>, vector<2x64xbf16>
    %c640 = arith.constant 640 : index
    %c0_46 = arith.constant 0 : index
    %62 = vector.load %arg4[%c640, %c0_46] : memref<2304x512xbf16, #tpu.memory_space<vmem>>, vector<64x512xbf16>
    %cst_47 = arith.constant dense<0.000000e+00> : vector<2x512xf32>
    %63 = tpu.matmul %61, %62, %cst_47 {dimension_numbers = #tpu.dot_dimension_numbers<[1], [0], [0], [1], [0, 0, 1, 1], [], []>} : vector<2x64xbf16>, vector<64x512xbf16>, vector<2x512xf32> -> vector<2x512xf32>
    %64 = arith.addf %60, %63 : vector<2x512xf32>
    %c22 = arith.constant 22 : index
    %c0_48 = arith.constant 0 : index
    %65 = vector.load %arg11[%c22, %c0_48] : memref<80x128xbf16, #tpu.memory_space<vmem>>, vector<2x64xbf16>
    %c704 = arith.constant 704 : index
    %c0_49 = arith.constant 0 : index
    %66 = vector.load %arg4[%c704, %c0_49] : memref<2304x512xbf16, #tpu.memory_space<vmem>>, vector<64x512xbf16>
    %cst_50 = arith.constant dense<0.000000e+00> : vector<2x512xf32>
    %67 = tpu.matmul %65, %66, %cst_50 {dimension_numbers = #tpu.dot_dimension_numbers<[1], [0], [0], [1], [0, 0, 1, 1], [], []>} : vector<2x64xbf16>, vector<64x512xbf16>, vector<2x512xf32> -> vector<2x512xf32>
    %68 = arith.addf %64, %67 : vector<2x512xf32>
    %c24 = arith.constant 24 : index
    %c0_51 = arith.constant 0 : index
    %69 = vector.load %arg11[%c24, %c0_51] : memref<80x128xbf16, #tpu.memory_space<vmem>>, vector<2x64xbf16>
    %c768 = arith.constant 768 : index
    %c0_52 = arith.constant 0 : index
    %70 = vector.load %arg4[%c768, %c0_52] : memref<2304x512xbf16, #tpu.memory_space<vmem>>, vector<64x512xbf16>
    %cst_53 = arith.constant dense<0.000000e+00> : vector<2x512xf32>
    %71 = tpu.matmul %69, %70, %cst_53 {dimension_numbers = #tpu.dot_dimension_numbers<[1], [0], [0], [1], [0, 0, 1, 1], [], []>} : vector<2x64xbf16>, vector<64x512xbf16>, vector<2x512xf32> -> vector<2x512xf32>
    %72 = arith.addf %68, %71 : vector<2x512xf32>
    %c26 = arith.constant 26 : index
    %c0_54 = arith.constant 0 : index
    %73 = vector.load %arg11[%c26, %c0_54] : memref<80x128xbf16, #tpu.memory_space<vmem>>, vector<2x64xbf16>
    %c832 = arith.constant 832 : index
    %c0_55 = arith.constant 0 : index
    %74 = vector.load %arg4[%c832, %c0_55] : memref<2304x512xbf16, #tpu.memory_space<vmem>>, vector<64x512xbf16>
    %cst_56 = arith.constant dense<0.000000e+00> : vector<2x512xf32>
    %75 = tpu.matmul %73, %74, %cst_56 {dimension_numbers = #tpu.dot_dimension_numbers<[1], [0], [0], [1], [0, 0, 1, 1], [], []>} : vector<2x64xbf16>, vector<64x512xbf16>, vector<2x512xf32> -> vector<2x512xf32>
    %76 = arith.addf %72, %75 : vector<2x512xf32>
    %c28 = arith.constant 28 : index
    %c0_57 = arith.constant 0 : index
    %77 = vector.load %arg11[%c28, %c0_57] : memref<80x128xbf16, #tpu.memory_space<vmem>>, vector<2x64xbf16>
    %c896 = arith.constant 896 : index
    %c0_58 = arith.constant 0 : index
    %78 = vector.load %arg4[%c896, %c0_58] : memref<2304x512xbf16, #tpu.memory_space<vmem>>, vector<64x512xbf16>
    %cst_59 = arith.constant dense<0.000000e+00> : vector<2x512xf32>
    %79 = tpu.matmul %77, %78, %cst_59 {dimension_numbers = #tpu.dot_dimension_numbers<[1], [0], [0], [1], [0, 0, 1, 1], [], []>} : vector<2x64xbf16>, vector<64x512xbf16>, vector<2x512xf32> -> vector<2x512xf32>
    %80 = arith.addf %76, %79 : vector<2x512xf32>
    %c30 = arith.constant 30 : index
    %c0_60 = arith.constant 0 : index
    %81 = vector.load %arg11[%c30, %c0_60] : memref<80x128xbf16, #tpu.memory_space<vmem>>, vector<2x64xbf16>
    %c960 = arith.constant 960 : index
    %c0_61 = arith.constant 0 : index
    %82 = vector.load %arg4[%c960, %c0_61] : memref<2304x512xbf16, #tpu.memory_space<vmem>>, vector<64x512xbf16>
    %cst_62 = arith.constant dense<0.000000e+00> : vector<2x512xf32>
    %83 = tpu.matmul %81, %82, %cst_62 {dimension_numbers = #tpu.dot_dimension_numbers<[1], [0], [0], [1], [0, 0, 1, 1], [], []>} : vector<2x64xbf16>, vector<64x512xbf16>, vector<2x512xf32> -> vector<2x512xf32>
    %84 = arith.addf %80, %83 : vector<2x512xf32>
    %c32 = arith.constant 32 : index
    %c0_63 = arith.constant 0 : index
    %85 = vector.load %arg11[%c32, %c0_63] : memref<80x128xbf16, #tpu.memory_space<vmem>>, vector<2x64xbf16>
    %c1024 = arith.constant 1024 : index
    %c0_64 = arith.constant 0 : index
    %86 = vector.load %arg4[%c1024, %c0_64] : memref<2304x512xbf16, #tpu.memory_space<vmem>>, vector<64x512xbf16>
    %cst_65 = arith.constant dense<0.000000e+00> : vector<2x512xf32>
    %87 = tpu.matmul %85, %86, %cst_65 {dimension_numbers = #tpu.dot_dimension_numbers<[1], [0], [0], [1], [0, 0, 1, 1], [], []>} : vector<2x64xbf16>, vector<64x512xbf16>, vector<2x512xf32> -> vector<2x512xf32>
    %88 = arith.addf %84, %87 : vector<2x512xf32>
    %c34 = arith.constant 34 : index
    %c0_66 = arith.constant 0 : index
    %89 = vector.load %arg11[%c34, %c0_66] : memref<80x128xbf16, #tpu.memory_space<vmem>>, vector<2x64xbf16>
    %c1088 = arith.constant 1088 : index
    %c0_67 = arith.constant 0 : index
    %90 = vector.load %arg4[%c1088, %c0_67] : memref<2304x512xbf16, #tpu.memory_space<vmem>>, vector<64x512xbf16>
    %cst_68 = arith.constant dense<0.000000e+00> : vector<2x512xf32>
    %91 = tpu.matmul %89, %90, %cst_68 {dimension_numbers = #tpu.dot_dimension_numbers<[1], [0], [0], [1], [0, 0, 1, 1], [], []>} : vector<2x64xbf16>, vector<64x512xbf16>, vector<2x512xf32> -> vector<2x512xf32>
    %92 = arith.addf %88, %91 : vector<2x512xf32>
    %c36 = arith.constant 36 : index
    %c0_69 = arith.constant 0 : index
    %93 = vector.load %arg11[%c36, %c0_69] : memref<80x128xbf16, #tpu.memory_space<vmem>>, vector<2x64xbf16>
    %c1152 = arith.constant 1152 : index
    %c0_70 = arith.constant 0 : index
    %94 = vector.load %arg4[%c1152, %c0_70] : memref<2304x512xbf16, #tpu.memory_space<vmem>>, vector<64x512xbf16>
    %cst_71 = arith.constant dense<0.000000e+00> : vector<2x512xf32>
    %95 = tpu.matmul %93, %94, %cst_71 {dimension_numbers = #tpu.dot_dimension_numbers<[1], [0], [0], [1], [0, 0, 1, 1], [], []>} : vector<2x64xbf16>, vector<64x512xbf16>, vector<2x512xf32> -> vector<2x512xf32>
    %96 = arith.addf %92, %95 : vector<2x512xf32>
    %c38 = arith.constant 38 : index
    %c0_72 = arith.constant 0 : index
    %97 = vector.load %arg11[%c38, %c0_72] : memref<80x128xbf16, #tpu.memory_space<vmem>>, vector<2x64xbf16>
    %c1216 = arith.constant 1216 : index
    %c0_73 = arith.constant 0 : index
    %98 = vector.load %arg4[%c1216, %c0_73] : memref<2304x512xbf16, #tpu.memory_space<vmem>>, vector<64x512xbf16>
    %cst_74 = arith.constant dense<0.000000e+00> : vector<2x512xf32>
    %99 = tpu.matmul %97, %98, %cst_74 {dimension_numbers = #tpu.dot_dimension_numbers<[1], [0], [0], [1], [0, 0, 1, 1], [], []>} : vector<2x64xbf16>, vector<64x512xbf16>, vector<2x512xf32> -> vector<2x512xf32>
    %100 = arith.addf %96, %99 : vector<2x512xf32>
    %c40 = arith.constant 40 : index
    %c0_75 = arith.constant 0 : index
    %101 = vector.load %arg11[%c40, %c0_75] : memref<80x128xbf16, #tpu.memory_space<vmem>>, vector<2x64xbf16>
    %c1280 = arith.constant 1280 : index
    %c0_76 = arith.constant 0 : index
    %102 = vector.load %arg4[%c1280, %c0_76] : memref<2304x512xbf16, #tpu.memory_space<vmem>>, vector<64x512xbf16>
    %cst_77 = arith.constant dense<0.000000e+00> : vector<2x512xf32>
    %103 = tpu.matmul %101, %102, %cst_77 {dimension_numbers = #tpu.dot_dimension_numbers<[1], [0], [0], [1], [0, 0, 1, 1], [], []>} : vector<2x64xbf16>, vector<64x512xbf16>, vector<2x512xf32> -> vector<2x512xf32>
    %104 = arith.addf %100, %103 : vector<2x512xf32>
    %c42 = arith.constant 42 : index
    %c0_78 = arith.constant 0 : index
    %105 = vector.load %arg11[%c42, %c0_78] : memref<80x128xbf16, #tpu.memory_space<vmem>>, vector<2x64xbf16>
    %c1344 = arith.constant 1344 : index
    %c0_79 = arith.constant 0 : index
    %106 = vector.load %arg4[%c1344, %c0_79] : memref<2304x512xbf16, #tpu.memory_space<vmem>>, vector<64x512xbf16>
    %cst_80 = arith.constant dense<0.000000e+00> : vector<2x512xf32>
    %107 = tpu.matmul %105, %106, %cst_80 {dimension_numbers = #tpu.dot_dimension_numbers<[1], [0], [0], [1], [0, 0, 1, 1], [], []>} : vector<2x64xbf16>, vector<64x512xbf16>, vector<2x512xf32> -> vector<2x512xf32>
    %108 = arith.addf %104, %107 : vector<2x512xf32>
    %c44 = arith.constant 44 : index
    %c0_81 = arith.constant 0 : index
    %109 = vector.load %arg11[%c44, %c0_81] : memref<80x128xbf16, #tpu.memory_space<vmem>>, vector<2x64xbf16>
    %c1408 = arith.constant 1408 : index
    %c0_82 = arith.constant 0 : index
    %110 = vector.load %arg4[%c1408, %c0_82] : memref<2304x512xbf16, #tpu.memory_space<vmem>>, vector<64x512xbf16>
    %cst_83 = arith.constant dense<0.000000e+00> : vector<2x512xf32>
    %111 = tpu.matmul %109, %110, %cst_83 {dimension_numbers = #tpu.dot_dimension_numbers<[1], [0], [0], [1], [0, 0, 1, 1], [], []>} : vector<2x64xbf16>, vector<64x512xbf16>, vector<2x512xf32> -> vector<2x512xf32>
    %112 = arith.addf %108, %111 : vector<2x512xf32>
    %c46 = arith.constant 46 : index
    %c0_84 = arith.constant 0 : index
    %113 = vector.load %arg11[%c46, %c0_84] : memref<80x128xbf16, #tpu.memory_space<vmem>>, vector<2x64xbf16>
    %c1472 = arith.constant 1472 : index
    %c0_85 = arith.constant 0 : index
    %114 = vector.load %arg4[%c1472, %c0_85] : memref<2304x512xbf16, #tpu.memory_space<vmem>>, vector<64x512xbf16>
    %cst_86 = arith.constant dense<0.000000e+00> : vector<2x512xf32>
    %115 = tpu.matmul %113, %114, %cst_86 {dimension_numbers = #tpu.dot_dimension_numbers<[1], [0], [0], [1], [0, 0, 1, 1], [], []>} : vector<2x64xbf16>, vector<64x512xbf16>, vector<2x512xf32> -> vector<2x512xf32>
    %116 = arith.addf %112, %115 : vector<2x512xf32>
    %c48 = arith.constant 48 : index
    %c0_87 = arith.constant 0 : index
    %117 = vector.load %arg11[%c48, %c0_87] : memref<80x128xbf16, #tpu.memory_space<vmem>>, vector<2x64xbf16>
    %c1536 = arith.constant 1536 : index
    %c0_88 = arith.constant 0 : index
    %118 = vector.load %arg4[%c1536, %c0_88] : memref<2304x512xbf16, #tpu.memory_space<vmem>>, vector<64x512xbf16>
    %cst_89 = arith.constant dense<0.000000e+00> : vector<2x512xf32>
    %119 = tpu.matmul %117, %118, %cst_89 {dimension_numbers = #tpu.dot_dimension_numbers<[1], [0], [0], [1], [0, 0, 1, 1], [], []>} : vector<2x64xbf16>, vector<64x512xbf16>, vector<2x512xf32> -> vector<2x512xf32>
    %120 = arith.addf %116, %119 : vector<2x512xf32>
    %c50 = arith.constant 50 : index
    %c0_90 = arith.constant 0 : index
    %121 = vector.load %arg11[%c50, %c0_90] : memref<80x128xbf16, #tpu.memory_space<vmem>>, vector<2x64xbf16>
    %c1600 = arith.constant 1600 : index
    %c0_91 = arith.constant 0 : index
    %122 = vector.load %arg4[%c1600, %c0_91] : memref<2304x512xbf16, #tpu.memory_space<vmem>>, vector<64x512xbf16>
    %cst_92 = arith.constant dense<0.000000e+00> : vector<2x512xf32>
    %123 = tpu.matmul %121, %122, %cst_92 {dimension_numbers = #tpu.dot_dimension_numbers<[1], [0], [0], [1], [0, 0, 1, 1], [], []>} : vector<2x64xbf16>, vector<64x512xbf16>, vector<2x512xf32> -> vector<2x512xf32>
    %124 = arith.addf %120, %123 : vector<2x512xf32>
    %c52 = arith.constant 52 : index
    %c0_93 = arith.constant 0 : index
    %125 = vector.load %arg11[%c52, %c0_93] : memref<80x128xbf16, #tpu.memory_space<vmem>>, vector<2x64xbf16>
    %c1664 = arith.constant 1664 : index
    %c0_94 = arith.constant 0 : index
    %126 = vector.load %arg4[%c1664, %c0_94] : memref<2304x512xbf16, #tpu.memory_space<vmem>>, vector<64x512xbf16>
    %cst_95 = arith.constant dense<0.000000e+00> : vector<2x512xf32>
    %127 = tpu.matmul %125, %126, %cst_95 {dimension_numbers = #tpu.dot_dimension_numbers<[1], [0], [0], [1], [0, 0, 1, 1], [], []>} : vector<2x64xbf16>, vector<64x512xbf16>, vector<2x512xf32> -> vector<2x512xf32>
    %128 = arith.addf %124, %127 : vector<2x512xf32>
    %c54 = arith.constant 54 : index
    %c0_96 = arith.constant 0 : index
    %129 = vector.load %arg11[%c54, %c0_96] : memref<80x128xbf16, #tpu.memory_space<vmem>>, vector<2x64xbf16>
    %c1728 = arith.constant 1728 : index
    %c0_97 = arith.constant 0 : index
    %130 = vector.load %arg4[%c1728, %c0_97] : memref<2304x512xbf16, #tpu.memory_space<vmem>>, vector<64x512xbf16>
    %cst_98 = arith.constant dense<0.000000e+00> : vector<2x512xf32>
    %131 = tpu.matmul %129, %130, %cst_98 {dimension_numbers = #tpu.dot_dimension_numbers<[1], [0], [0], [1], [0, 0, 1, 1], [], []>} : vector<2x64xbf16>, vector<64x512xbf16>, vector<2x512xf32> -> vector<2x512xf32>
    %132 = arith.addf %128, %131 : vector<2x512xf32>
    %c56 = arith.constant 56 : index
    %c0_99 = arith.constant 0 : index
    %133 = vector.load %arg11[%c56, %c0_99] : memref<80x128xbf16, #tpu.memory_space<vmem>>, vector<2x64xbf16>
    %c1792 = arith.constant 1792 : index
    %c0_100 = arith.constant 0 : index
    %134 = vector.load %arg4[%c1792, %c0_100] : memref<2304x512xbf16, #tpu.memory_space<vmem>>, vector<64x512xbf16>
    %cst_101 = arith.constant dense<0.000000e+00> : vector<2x512xf32>
    %135 = tpu.matmul %133, %134, %cst_101 {dimension_numbers = #tpu.dot_dimension_numbers<[1], [0], [0], [1], [0, 0, 1, 1], [], []>} : vector<2x64xbf16>, vector<64x512xbf16>, vector<2x512xf32> -> vector<2x512xf32>
    %136 = arith.addf %132, %135 : vector<2x512xf32>
    %c58 = arith.constant 58 : index
    %c0_102 = arith.constant 0 : index
    %137 = vector.load %arg11[%c58, %c0_102] : memref<80x128xbf16, #tpu.memory_space<vmem>>, vector<2x64xbf16>
    %c1856 = arith.constant 1856 : index
    %c0_103 = arith.constant 0 : index
    %138 = vector.load %arg4[%c1856, %c0_103] : memref<2304x512xbf16, #tpu.memory_space<vmem>>, vector<64x512xbf16>
    %cst_104 = arith.constant dense<0.000000e+00> : vector<2x512xf32>
    %139 = tpu.matmul %137, %138, %cst_104 {dimension_numbers = #tpu.dot_dimension_numbers<[1], [0], [0], [1], [0, 0, 1, 1], [], []>} : vector<2x64xbf16>, vector<64x512xbf16>, vector<2x512xf32> -> vector<2x512xf32>
    %140 = arith.addf %136, %139 : vector<2x512xf32>
    %c60 = arith.constant 60 : index
    %c0_105 = arith.constant 0 : index
    %141 = vector.load %arg11[%c60, %c0_105] : memref<80x128xbf16, #tpu.memory_space<vmem>>, vector<2x64xbf16>
    %c1920 = arith.constant 1920 : index
    %c0_106 = arith.constant 0 : index
    %142 = vector.load %arg4[%c1920, %c0_106] : memref<2304x512xbf16, #tpu.memory_space<vmem>>, vector<64x512xbf16>
    %cst_107 = arith.constant dense<0.000000e+00> : vector<2x512xf32>
    %143 = tpu.matmul %141, %142, %cst_107 {dimension_numbers = #tpu.dot_dimension_numbers<[1], [0], [0], [1], [0, 0, 1, 1], [], []>} : vector<2x64xbf16>, vector<64x512xbf16>, vector<2x512xf32> -> vector<2x512xf32>
    %144 = arith.addf %140, %143 : vector<2x512xf32>
    %c62 = arith.constant 62 : index
    %c0_108 = arith.constant 0 : index
    %145 = vector.load %arg11[%c62, %c0_108] : memref<80x128xbf16, #tpu.memory_space<vmem>>, vector<2x64xbf16>
    %c1984 = arith.constant 1984 : index
    %c0_109 = arith.constant 0 : index
    %146 = vector.load %arg4[%c1984, %c0_109] : memref<2304x512xbf16, #tpu.memory_space<vmem>>, vector<64x512xbf16>
    %cst_110 = arith.constant dense<0.000000e+00> : vector<2x512xf32>
    %147 = tpu.matmul %145, %146, %cst_110 {dimension_numbers = #tpu.dot_dimension_numbers<[1], [0], [0], [1], [0, 0, 1, 1], [], []>} : vector<2x64xbf16>, vector<64x512xbf16>, vector<2x512xf32> -> vector<2x512xf32>
    %148 = arith.addf %144, %147 : vector<2x512xf32>
    %c64_111 = arith.constant 64 : index
    %c0_112 = arith.constant 0 : index
    %149 = vector.load %arg11[%c64_111, %c0_112] : memref<80x128xbf16, #tpu.memory_space<vmem>>, vector<2x64xbf16>
    %c2048 = arith.constant 2048 : index
    %c0_113 = arith.constant 0 : index
    %150 = vector.load %arg4[%c2048, %c0_113] : memref<2304x512xbf16, #tpu.memory_space<vmem>>, vector<64x512xbf16>
    %cst_114 = arith.constant dense<0.000000e+00> : vector<2x512xf32>
    %151 = tpu.matmul %149, %150, %cst_114 {dimension_numbers = #tpu.dot_dimension_numbers<[1], [0], [0], [1], [0, 0, 1, 1], [], []>} : vector<2x64xbf16>, vector<64x512xbf16>, vector<2x512xf32> -> vector<2x512xf32>
    %152 = arith.addf %148, %151 : vector<2x512xf32>
    %c66 = arith.constant 66 : index
    %c0_115 = arith.constant 0 : index
    %153 = vector.load %arg11[%c66, %c0_115] : memref<80x128xbf16, #tpu.memory_space<vmem>>, vector<2x64xbf16>
    %c2112 = arith.constant 2112 : index
    %c0_116 = arith.constant 0 : index
    %154 = vector.load %arg4[%c2112, %c0_116] : memref<2304x512xbf16, #tpu.memory_space<vmem>>, vector<64x512xbf16>
    %cst_117 = arith.constant dense<0.000000e+00> : vector<2x512xf32>
    %155 = tpu.matmul %153, %154, %cst_117 {dimension_numbers = #tpu.dot_dimension_numbers<[1], [0], [0], [1], [0, 0, 1, 1], [], []>} : vector<2x64xbf16>, vector<64x512xbf16>, vector<2x512xf32> -> vector<2x512xf32>
    %156 = arith.addf %152, %155 : vector<2x512xf32>
    %c68 = arith.constant 68 : index
    %c0_118 = arith.constant 0 : index
    %157 = vector.load %arg11[%c68, %c0_118] : memref<80x128xbf16, #tpu.memory_space<vmem>>, vector<2x64xbf16>
    %c2176 = arith.constant 2176 : index
    %c0_119 = arith.constant 0 : index
    %158 = vector.load %arg4[%c2176, %c0_119] : memref<2304x512xbf16, #tpu.memory_space<vmem>>, vector<64x512xbf16>
    %cst_120 = arith.constant dense<0.000000e+00> : vector<2x512xf32>
    %159 = tpu.matmul %157, %158, %cst_120 {dimension_numbers = #tpu.dot_dimension_numbers<[1], [0], [0], [1], [0, 0, 1, 1], [], []>} : vector<2x64xbf16>, vector<64x512xbf16>, vector<2x512xf32> -> vector<2x512xf32>
    %160 = arith.addf %156, %159 : vector<2x512xf32>
    %c70 = arith.constant 70 : index
    %c0_121 = arith.constant 0 : index
    %161 = vector.load %arg11[%c70, %c0_121] : memref<80x128xbf16, #tpu.memory_space<vmem>>, vector<2x64xbf16>
    %c2240 = arith.constant 2240 : index
    %c0_122 = arith.constant 0 : index
    %162 = vector.load %arg4[%c2240, %c0_122] : memref<2304x512xbf16, #tpu.memory_space<vmem>>, vector<64x512xbf16>
    %cst_123 = arith.constant dense<0.000000e+00> : vector<2x512xf32>
    %163 = tpu.matmul %161, %162, %cst_123 {dimension_numbers = #tpu.dot_dimension_numbers<[1], [0], [0], [1], [0, 0, 1, 1], [], []>} : vector<2x64xbf16>, vector<64x512xbf16>, vector<2x512xf32> -> vector<2x512xf32>
    %164 = arith.addf %160, %163 : vector<2x512xf32>
    %c0_124 = arith.constant 0 : index
    %c0_125 = arith.constant 0 : index
    %165 = vector.load %arg5[%c0_124, %c0_125] : memref<1x512xf32, #tpu.memory_space<vmem>>, vector<1x512xf32>
    %166 = vector.broadcast %165 : vector<1x512xf32> to vector<2x512xf32>
    %167 = arith.addf %164, %166 : vector<2x512xf32>
    %cst_126 = arith.constant 0.000000e+00 : f32
    %168 = vector.broadcast %cst_126 : f32 to vector<2x512xf32>
    %169 = arith.cmpf ogt, %167, %168 : vector<2x512xf32>
    %cst_127 = arith.constant 0.000000e+00 : f32
    %170 = vector.broadcast %cst_127 : f32 to vector<2x512xf32>
    %171 = arith.minimumf %167, %170 : vector<2x512xf32>
    %172 = math.exp %171 : vector<2x512xf32>
    %cst_128 = arith.constant 1.000000e+00 : f32
    %173 = vector.broadcast %cst_128 : f32 to vector<2x512xf32>
    %174 = arith.subf %172, %173 : vector<2x512xf32>
    %cst_129 = arith.constant 1.67326319 : f32
    %175 = vector.broadcast %cst_129 : f32 to vector<2x512xf32>
    %176 = arith.mulf %175, %174 : vector<2x512xf32>
    %177 = arith.select %169, %167, %176 : vector<2x512xi1>, vector<2x512xf32>
    %cst_130 = arith.constant 1.05070102 : f32
    %178 = vector.broadcast %cst_130 : f32 to vector<2x512xf32>
    %179 = arith.mulf %178, %177 : vector<2x512xf32>
    %180 = arith.truncf %179 : vector<2x512xf32> to vector<2x512xbf16>
    %c0_131 = arith.constant 0 : index
    %c0_132 = arith.constant 0 : index
    %181 = vector.load %arg6[%c0_131, %c0_132] : memref<512x256xbf16, #tpu.memory_space<vmem>>, vector<512x256xbf16>
    %cst_133 = arith.constant dense<0.000000e+00> : vector<2x256xf32>
    %182 = tpu.matmul %180, %181, %cst_133 {dimension_numbers = #tpu.dot_dimension_numbers<[1], [0], [0], [1], [0, 0, 1, 1], [], []>} : vector<2x512xbf16>, vector<512x256xbf16>, vector<2x256xf32> -> vector<2x256xf32>
    %c0_134 = arith.constant 0 : index
    %c0_135 = arith.constant 0 : index
    %183 = vector.load %arg7[%c0_134, %c0_135] : memref<1x256xf32, #tpu.memory_space<vmem>>, vector<1x256xf32>
    %184 = vector.broadcast %183 : vector<1x256xf32> to vector<2x256xf32>
    %185 = arith.addf %182, %184 : vector<2x256xf32>
    %cst_136 = arith.constant 0.000000e+00 : f32
    %186 = vector.broadcast %cst_136 : f32 to vector<2x256xf32>
    %187 = arith.cmpf ogt, %185, %186 : vector<2x256xf32>
    %cst_137 = arith.constant 0.000000e+00 : f32
    %188 = vector.broadcast %cst_137 : f32 to vector<2x256xf32>
    %189 = arith.minimumf %185, %188 : vector<2x256xf32>
    %190 = math.exp %189 : vector<2x256xf32>
    %cst_138 = arith.constant 1.000000e+00 : f32
    %191 = vector.broadcast %cst_138 : f32 to vector<2x256xf32>
    %192 = arith.subf %190, %191 : vector<2x256xf32>
    %cst_139 = arith.constant 1.67326319 : f32
    %193 = vector.broadcast %cst_139 : f32 to vector<2x256xf32>
    %194 = arith.mulf %193, %192 : vector<2x256xf32>
    %195 = arith.select %187, %185, %194 : vector<2x256xi1>, vector<2x256xf32>
    %cst_140 = arith.constant 1.05070102 : f32
    %196 = vector.broadcast %cst_140 : f32 to vector<2x256xf32>
    %197 = arith.mulf %196, %195 : vector<2x256xf32>
    %198 = arith.truncf %197 : vector<2x256xf32> to vector<2x256xbf16>
    %c0_141 = arith.constant 0 : index
    %c0_142 = arith.constant 0 : index
    %199 = vector.load %arg8[%c0_141, %c0_142] : memref<256x256xbf16, #tpu.memory_space<vmem>>, vector<256x256xbf16>
    %cst_143 = arith.constant dense<0.000000e+00> : vector<2x256xf32>
    %200 = tpu.matmul %198, %199, %cst_143 {dimension_numbers = #tpu.dot_dimension_numbers<[1], [0], [0], [1], [0, 0, 1, 1], [], []>} : vector<2x256xbf16>, vector<256x256xbf16>, vector<2x256xf32> -> vector<2x256xf32>
    %c0_144 = arith.constant 0 : index
    %c0_145 = arith.constant 0 : index
    %201 = vector.load %arg9[%c0_144, %c0_145] : memref<1x256xf32, #tpu.memory_space<vmem>>, vector<1x256xf32>
    %202 = vector.broadcast %201 : vector<1x256xf32> to vector<2x256xf32>
    %203 = arith.addf %200, %202 : vector<2x256xf32>
    %c0_146 = arith.constant 0 : index
    %c0_147 = arith.constant 0 : index
    %204 = vector.load %arg10[%c0_146, %c0_147] : memref<2x256xf32, #tpu.memory_space<vmem>>, vector<2x256xf32>
    tpu.vector_store %arg10[%c0_146, %c0_147], %203 {strides = array<i32>} : memref<2x256xf32, #tpu.memory_space<vmem>>, vector<2x256xf32>,
    return
  }
  func.func @transform_0(%arg0: i32) -> (i32, i32) {
    %c0_i32 = arith.constant 0 : i32
    %c0_i32_0 = arith.constant 0 : i32
    %c0_i32_1 = arith.constant 0 : i32
    return %c0_i32, %c0_i32_0 : i32, i32
  }
  func.func @transform_1(%arg0: i32) -> (i32, i32) {
    %c0_i32 = arith.constant 0 : i32
    %c0_i32_0 = arith.constant 0 : i32
    %c0_i32_1 = arith.constant 0 : i32
    return %c0_i32, %c0_i32_0 : i32, i32
  }
  func.func @transform_2(%arg0: i32) -> (i32, i32) {
    %c0_i32 = arith.constant 0 : i32
    %c0_i32_0 = arith.constant 0 : i32
    %c0_i32_1 = arith.constant 0 : i32
    return %c0_i32, %c0_i32_0 : i32, i32
  }
  func.func @transform_3(%arg0: i32) -> (i32, i32) {
    %c0_i32 = arith.constant 0 : i32
    %c0_i32_0 = arith.constant 0 : i32
    %c0_i32_1 = arith.constant 0 : i32
    return %c0_i32, %c0_i32_0 : i32, i32
  }
  func.func @transform_4(%arg0: i32) -> (i32, i32) {
    %c0_i32 = arith.constant 0 : i32
    %c0_i32_0 = arith.constant 0 : i32
    %c0_i32_1 = arith.constant 0 : i32
    return %c0_i32, %c0_i32_0 : i32, i32
  }
  func.func @transform_5(%arg0: i32) -> (i32, i32) {
    %c0_i32 = arith.constant 0 : i32
    %c0_i32_0 = arith.constant 0 : i32
    %c0_i32_1 = arith.constant 0 : i32
    return %c0_i32, %c0_i32_0 : i32, i32
  }
  func.func @transform_6(%arg0: i32) -> (i32, i32) {
    %c0_i32 = arith.constant 0 : i32
    %c0_i32_0 = arith.constant 0 : i32
    %c0_i32_1 = arith.constant 0 : i32
    return %c0_i32, %c0_i32_0 : i32, i32
  }
  func.func @transform_7(%arg0: i32) -> (i32, i32) {
    %c0_i32 = arith.constant 0 : i32
    %c0_i32_0 = arith.constant 0 : i32
    %c0_i32_1 = arith.constant 0 : i32
    return %c0_i32, %c0_i32_0 : i32, i32
  }
  func.func @transform_8(%arg0: i32) -> (i32, i32) {
    %c0_i32 = arith.constant 0 : i32
    %c0_i32_0 = arith.constant 0 : i32
    %c0_i32_1 = arith.constant 0 : i32
    return %c0_i32, %c0_i32_0 : i32, i32
  }
  func.func @transform_9(%arg0: i32) -> (i32, i32) {
    %c0_i32 = arith.constant 0 : i32
    %c0_i32_0 = arith.constant 0 : i32
    %c0_i32_1 = arith.constant 0 : i32
    return %c0_i32, %c0_i32_0 : i32, i32
  }
}

</mosaic_0001>

<bundles_post_ra>
// kernel: rnd_forward.3
= control target key start
LH: loop header
LB: loop body
LE: loop exit
PB: predicated region body
PF: predicated region fallthrough
CT: control target
= control target key end

     0   :  { %s4472_s12 = smov 0   ;;  %s5978_s0 = inlined_call_operand.vmem [shape: bf16[2048,128], index: 0, kind: input, shape index: {}]   ;;  %s5979_s1 = inlined_call_operand.vmem [shape: bf16[128,128], index: 1, kind: input, shape index: {}]   ;;  %s5980_s2 = inlined_call_operand.vmem [shape: f32[1,128], index: 2, kind: input, shape index: {}]   ;;  %s5981_s3 = inlined_call_operand.vmem [shape: bf16[2048,128], index: 3, kind: output, shape index: {}]  }
   0x1 LB: > { %s3023_s13 = sadd.s32 4294967295, %s4450_s12   ;;  %p3027_p0 = scmp.ge.s32.totalorder %s4450_s12, 1  ;;  %s4450_s12 = sphi %s4472_s12, %s13_s12  }
   0x2   : > { %p138_p1 = scmp.lt.s32.totalorder %s4450_s12, 3 }
   0x4   : > { %p139_p2 = pnand %p3027_p0, %p138_p1 }
   0x6   : > { %142 = sbr.rel (%p139_p2) target bundleno = 577 (0x241), region = 32 }
   0xd   : > { %v4114_v0 = vld [vmem:[%s5979_s1] sm:$0xff]   ;;  %s3028_s16 = sshll.u32 %s3023_s13, 7  ;;  %v4115_v1 = vld [vmem:[%s5979_s1 + $0x8] sm:$0xff]   ;;  %v4116_v2 = vld [vmem:[%s5979_s1 + $0x10] sm:$0xff]  }
   0xe   : > { %p163_p3 = scmp.lt.s32.totalorder %s3028_s16, 255  ;;  %3946 = vmatprep.subr.bf16.mxu0 %v4114_v0  ;;  %4090 = vmatprep.subr.bf16.mxu1 %v4114_v0  ;;  %v4117_v3 = vld [vmem:[%s5979_s1 + $0x18] sm:$0xff]   ;;  %v4118_v6 = vld [vmem:[%s5979_s1 + $0x20] sm:$0xff]   ;;  %v4119_v7 = vld [vmem:[%s5979_s1 + $0x28] sm:$0xff]  }
   0xf   : > { %3947 = vmatpush3.bf16.msra.mxu0 %v4114_v0  ;;  %4098 = vmatpush3.bf16.msra.mxu1 %v4114_v0  ;;  %v4120_v8 = vld [vmem:[%s5979_s1 + $0x30] sm:$0xff]   ;;  %v4121_v9 = vld [vmem:[%s5979_s1 + $0x38] sm:$0xff]  }
  0x10   : > { %s6035_s16 = smov (!%p163_p3, %s3028_s16), 255  ;;  %3948 = vmatprep.subr.bf16.mxu0 %v4115_v1  ;;  %4091 = vmatprep.subr.bf16.mxu1 %v4115_v1 }
  0x11   : > { %s3029_s21 = sshll.u32 %s6035_s16, 2 }
  0x12   : > { %s4497_s24 = scalar_lea.vmem %s5978_s0, %s3029_s21  ;;  %s4700_s13 = scalar_lea.vmem %s5981_s3, %s3029_s21 }
  0x13   : > { %3949 = vmatpush3.bf16.msra.mxu0 %v4115_v1  ;;  %4099 = vmatpush3.bf16.msra.mxu1 %v4115_v1  ;;  %v4122_v4 = vld [vmem:[%s4497_s24] sm:$0xff]   ;;  %v4124_v10 = vld [vmem:[%s4497_s24 + $0x8] sm:$0xff]   ;;  %v4126_v12 = vld [vmem:[%s4497_s24 + $0x10] sm:$0xff]  }
  0x14   : > { %3950 = vmatprep.subr.bf16.mxu0 %v4116_v2  ;;  %4092 = vmatprep.subr.bf16.mxu1 %v4116_v2  ;;  %v4123_v5 = vld [vmem:[%s4497_s24 + $0x100] sm:$0xff]   ;;  %v4125_v11 = vld [vmem:[%s4497_s24 + $0x108] sm:$0xff]   ;;  %v4127_v13 = vld [vmem:[%s4497_s24 + $0x110] sm:$0xff]  }
  0x15   : > { %3962 = vmatprep.mubr.bf16.mxu0 %v4122_v4  ;;  %4026 = vmatprep.mubr.bf16.mxu1 %v4123_v5  ;;  %v4128_v14 = vld [vmem:[%s4497_s24 + $0x18] sm:$0xff]   ;;  %v4130_v16 = vld [vmem:[%s4497_s24 + $0x20] sm:$0xff]   ;;  %v4132_v18 = vld [vmem:[%s4497_s24 + $0x28] sm:$0xff]  }
  0x16   : > { %v4129_v15 = vld [vmem:[%s4497_s24 + $0x118] sm:$0xff]   ;;  %v4131_v17 = vld [vmem:[%s4497_s24 + $0x120] sm:$0xff]   ;;  %v4133_v19 = vld [vmem:[%s4497_s24 + $0x128] sm:$0xff]  }
  0x17   : > { %3951 = vmatpush3.bf16.msra.mxu0 %v4116_v2  ;;  %4100 = vmatpush3.bf16.msra.mxu1 %v4116_v2  ;;  %v4134_v20 = vld [vmem:[%s4497_s24 + $0x30] sm:$0xff]   ;;  %v4136_v22 = vld [vmem:[%s4497_s24 + $0x38] sm:$0xff]   ;;  %v4138_v24 = vld [vmem:[%s4497_s24 + $0x40] sm:$0xff]  }
  0x18   : > { %3952 = vmatprep.subr.bf16.mxu0 %v4117_v3  ;;  %4093 = vmatprep.subr.bf16.mxu1 %v4117_v3  ;;  %v4135_v21 = vld [vmem:[%s4497_s24 + $0x130] sm:$0xff]   ;;  %v4137_v23 = vld [vmem:[%s4497_s24 + $0x138] sm:$0xff]   ;;  %v4139_v25 = vld [vmem:[%s4497_s24 + $0x140] sm:$0xff]  }
  0x19   : > { %v4140_v26 = vld [vmem:[%s4497_s24 + $0x48] sm:$0xff]   ;;  %v4142_v28 = vld [vmem:[%s4497_s24 + $0x50] sm:$0xff]   ;;  %v4144_v30 = vld [vmem:[%s4497_s24 + $0x58] sm:$0xff]  }
  0x1a   : > { %v4141_v27 = vld [vmem:[%s4497_s24 + $0x148] sm:$0xff]   ;;  %v4143_v29 = vld [vmem:[%s4497_s24 + $0x150] sm:$0xff]   ;;  %v4145_v31 = vld [vmem:[%s4497_s24 + $0x158] sm:$0xff]  }
  0x1b   : > { %3953 = vmatpush3.bf16.msra.mxu0 %v4117_v3  ;;  %4101 = vmatpush3.bf16.msra.mxu1 %v4117_v3  ;;  %v4146_v32 = vld [vmem:[%s4497_s24 + $0x60] sm:$0xff]   ;;  %v4148_v34 = vld [vmem:[%s4497_s24 + $0x68] sm:$0xff]   ;;  %v4150_v36 = vld [vmem:[%s4497_s24 + $0x70] sm:$0xff]  }
  0x1c   : > { %3954 = vmatprep.subr.bf16.mxu0 %v4118_v6  ;;  %4094 = vmatprep.subr.bf16.mxu1 %v4118_v6  ;;  %v4147_v33 = vld [vmem:[%s4497_s24 + $0x160] sm:$0xff]   ;;  %v4149_v35 = vld [vmem:[%s4497_s24 + $0x168] sm:$0xff]   ;;  %v4151_v37 = vld [vmem:[%s4497_s24 + $0x170] sm:$0xff]  }
  0x1d   : > { %v4152_v38 = vld [vmem:[%s4497_s24 + $0x78] sm:$0xff]   ;;  %v4154_v40 = vld [vmem:[%s4497_s24 + $0x80] sm:$0xff]   ;;  %v4156_v42 = vld [vmem:[%s4497_s24 + $0x88] sm:$0xff]  }
  0x1e   : > { %v4153_v39 = vld [vmem:[%s4497_s24 + $0x178] sm:$0xff]   ;;  %v4155_v41 = vld [vmem:[%s4497_s24 + $0x180] sm:$0xff]   ;;  %v4157_v43 = vld [vmem:[%s4497_s24 + $0x188] sm:$0xff]  }
  0x1f   : > { %3955 = vmatpush3.bf16.msra.mxu0 %v4118_v6  ;;  %4102 = vmatpush3.bf16.msra.mxu1 %v4118_v6  ;;  %v4158_v44 = vld [vmem:[%s4497_s24 + $0x90] sm:$0xff]   ;;  %v4160_v46 = vld [vmem:[%s4497_s24 + $0x98] sm:$0xff]   ;;  %v4162_v48 = vld [vmem:[%s4497_s24 + $0xa0] sm:$0xff]  }
  0x20   : > { %3956 = vmatprep.subr.bf16.mxu0 %v4119_v7  ;;  %4095 = vmatprep.subr.bf16.mxu1 %v4119_v7  ;;  %v4159_v45 = vld [vmem:[%s4497_s24 + $0x190] sm:$0xff]   ;;  %v4161_v47 = vld [vmem:[%s4497_s24 + $0x198] sm:$0xff]   ;;  %v4163_v49 = vld [vmem:[%s4497_s24 + $0x1a0] sm:$0xff]  }
  0x21   : > { %v4164_v50 = vld [vmem:[%s4497_s24 + $0xa8] sm:$0xff]   ;;  %v4166_v52 = vld [vmem:[%s4497_s24 + $0xb0] sm:$0xff]   ;;  %v4168_v54 = vld [vmem:[%s4497_s24 + $0xb8] sm:$0xff]  }
  0x22   : > { %v4165_v51 = vld [vmem:[%s4497_s24 + $0x1a8] sm:$0xff]   ;;  %v4167_v53 = vld [vmem:[%s4497_s24 + $0x1b0] sm:$0xff]   ;;  %v4169_v55 = vld [vmem:[%s4497_s24 + $0x1b8] sm:$0xff]  }
  0x23   : > { %3957 = vmatpush3.bf16.msra.mxu0 %v4119_v7  ;;  %4103 = vmatpush3.bf16.msra.mxu1 %v4119_v7  ;;  %v4170_v56 = vld [vmem:[%s4497_s24 + $0xc0] sm:$0xff]   ;;  %v4172_v58 = vld [vmem:[%s4497_s24 + $0xc8] sm:$0xff]   ;;  %v4174_v60 = vld [vmem:[%s4497_s24 + $0xd0] sm:$0xff]  }
  0x24   : > { %3958 = vmatprep.subr.bf16.mxu0 %v4120_v8  ;;  %4096 = vmatprep.subr.bf16.mxu1 %v4120_v8  ;;  %v4171_v57 = vld [vmem:[%s4497_s24 + $0x1c0] sm:$0xff]   ;;  %v4173_v59 = vld [vmem:[%s4497_s24 + $0x1c8] sm:$0xff]   ;;  %v4175_v61 = vld [vmem:[%s4497_s24 + $0x1d0] sm:$0xff]  }
  0x25   : > { %v4176_v62 = vld [vmem:[%s4497_s24 + $0xd8] sm:$0xff]   ;;  %v4178_v0 = vld [vmem:[%s4497_s24 + $0xe0] sm:$0xff]   ;;  %v4180_v2 = vld [vmem:[%s4497_s24 + $0xe8] sm:$0xff]  }
  0x26   : > { %v4177_v63 = vld [vmem:[%s4497_s24 + $0x1d8] sm:$0xff]   ;;  %v4179_v1 = vld [vmem:[%s4497_s24 + $0x1e0] sm:$0xff]   ;;  %v4181_v3 = vld [vmem:[%s4497_s24 + $0x1e8] sm:$0xff]  }
  0x27   : > { %3959 = vmatpush3.bf16.msra.mxu0 %v4120_v8  ;;  %4104 = vmatpush3.bf16.msra.mxu1 %v4120_v8  ;;  %v4182_v4 = vld [vmem:[%s4497_s24 + $0xf0] sm:$0xff]   ;;  %v4184_v6 = vld [vmem:[%s4497_s24 + $0xf8] sm:$0xff]   ;;  %v4581_v8 = vld [vmem:[%s5980_s2] ss:$0 sm:$0xff] }
  0x28   : > { %3960 = vmatprep.subr.bf16.mxu0 %v4121_v9  ;;  %4097 = vmatprep.subr.bf16.mxu1 %v4121_v9  ;;  %v4183_v5 = vld [vmem:[%s4497_s24 + $0x1f0] sm:$0xff]   ;;  %v4185_v7 = vld [vmem:[%s4497_s24 + $0x1f8] sm:$0xff]  }
  0x2b   : > { %3961 = vmatpush3.bf16.msra.mxu0 %v4121_v9  ;;  %4105 = vmatpush3.bf16.msra.mxu1 %v4121_v9 }
  0x2e   : > { %3963 = vmatmul.mubr.bf16.vlgmr.msra.gmra.mrb[0].mxu0 %v4124_v10  ;;  %4027 = vmatmul.mubr.bf16.vlgmr.msra.gmra.mrb[0].mxu1 %v4125_v11 }
  0x2f   : > { %3966 = vmatprep.mubr.bf16.mxu0 %v4126_v12  ;;  %4030 = vmatprep.mubr.bf16.mxu1 %v4127_v13 }
  0x36   : > { %3967 = vmatmul.mubr.bf16.gmra.mrb[4].mxu0 %v4128_v14  ;;  %4031 = vmatmul.mubr.bf16.gmra.mrb[4].mxu1 %v4129_v15 }
  0x37   : > { %3970 = vmatprep.mubr.bf16.mxu0 %v4130_v16  ;;  %4034 = vmatprep.mubr.bf16.mxu1 %v4131_v17 }
  0x3e   : > { %3971 = vmatmul.mubr.bf16.gmra.mrb[8].mxu0 %v4132_v18  ;;  %4035 = vmatmul.mubr.bf16.gmra.mrb[8].mxu1 %v4133_v19 }
  0x3f   : > { %3974 = vmatprep.mubr.bf16.mxu0 %v4134_v20  ;;  %4038 = vmatprep.mubr.bf16.mxu1 %v4135_v21 }
  0x46   : > { %3975 = vmatmul.mubr.bf16.gmra.mrb[12].mxu0 %v4136_v22  ;;  %4039 = vmatmul.mubr.bf16.gmra.mrb[12].mxu1 %v4137_v23 }
  0x47   : > { %3978 = vmatprep.mubr.bf16.mxu0 %v4138_v24  ;;  %4042 = vmatprep.mubr.bf16.mxu1 %v4139_v25 }
  0x4e   : > { %3979 = vmatmul.mubr.bf16.gmra.mrb[16].mxu0 %v4140_v26  ;;  %4043 = vmatmul.mubr.bf16.gmra.mrb[16].mxu1 %v4141_v27 }
  0x4f   : > { %3982 = vmatprep.mubr.bf16.mxu0 %v4142_v28  ;;  %4046 = vmatprep.mubr.bf16.mxu1 %v4143_v29 }
  0x56   : > { %3983 = vmatmul.mubr.bf16.gmra.mrb[20].mxu0 %v4144_v30  ;;  %4047 = vmatmul.mubr.bf16.gmra.mrb[20].mxu1 %v4145_v31 }
  0x57   : > { %3986 = vmatprep.mubr.bf16.mxu0 %v4146_v32  ;;  %4050 = vmatprep.mubr.bf16.mxu1 %v4147_v33 }
  0x5e   : > { %3987 = vmatmul.mubr.bf16.gmra.mrb[24].mxu0 %v4148_v34  ;;  %4051 = vmatmul.mubr.bf16.gmra.mrb[24].mxu1 %v4149_v35 }
  0x5f   : > { %3990 = vmatprep.mubr.bf16.mxu0 %v4150_v36  ;;  %4054 = vmatprep.mubr.bf16.mxu1 %v4151_v37 }
  0x66   : > { %3991 = vmatmul.mubr.bf16.gmra.mrb[28].mxu0 %v4152_v38  ;;  %4055 = vmatmul.mubr.bf16.gmra.mrb[28].mxu1 %v4153_v39 }
  0x67   : > { %3994 = vmatprep.mubr.bf16.mxu0 %v4154_v40  ;;  %4058 = vmatprep.mubr.bf16.mxu1 %v4155_v41 }
  0x6e   : > { %3995 = vmatmul.mubr.bf16.gmra.mrb[32].mxu0 %v4156_v42  ;;  %4059 = vmatmul.mubr.bf16.gmra.mrb[32].mxu1 %v4157_v43 }
  0x6f   : > { %3998 = vmatprep.mubr.bf16.mxu0 %v4158_v44  ;;  %4062 = vmatprep.mubr.bf16.mxu1 %v4159_v45 }
  0x76   : > { %3999 = vmatmul.mubr.bf16.gmra.mrb[36].mxu0 %v4160_v46  ;;  %4063 = vmatmul.mubr.bf16.gmra.mrb[36].mxu1 %v4161_v47 }
  0x77   : > { %4002 = vmatprep.mubr.bf16.mxu0 %v4162_v48  ;;  %4066 = vmatprep.mubr.bf16.mxu1 %v4163_v49 }
  0x7e   : > { %4003 = vmatmul.mubr.bf16.gmra.mrb[40].mxu0 %v4164_v50  ;;  %4067 = vmatmul.mubr.bf16.gmra.mrb[40].mxu1 %v4165_v51 }
  0x7f   : > { %4006 = vmatprep.mubr.bf16.mxu0 %v4166_v52  ;;  %4070 = vmatprep.mubr.bf16.mxu1 %v4167_v53 }
  0x86   : > { %4007 = vmatmul.mubr.bf16.gmra.mrb[44].mxu0 %v4168_v54  ;;  %4071 = vmatmul.mubr.bf16.gmra.mrb[44].mxu1 %v4169_v55 }
  0x87   : > { %4010 = vmatprep.mubr.bf16.mxu0 %v4170_v56  ;;  %4074 = vmatprep.mubr.bf16.mxu1 %v4171_v57 }
  0x8e   : > { %4011 = vmatmul.mubr.bf16.gmra.mrb[48].mxu0 %v4172_v58  ;;  %4075 = vmatmul.mubr.bf16.gmra.mrb[48].mxu1 %v4173_v59 }
  0x8f   : > { %4014 = vmatprep.mubr.bf16.mxu0 %v4174_v60  ;;  %4078 = vmatprep.mubr.bf16.mxu1 %v4175_v61 }
  0x96   : > { %4015 = vmatmul.mubr.bf16.gmra.mrb[52].mxu0 %v4176_v62  ;;  %4079 = vmatmul.mubr.bf16.gmra.mrb[52].mxu1 %v4177_v63 }
  0x97   : > { %4018 = vmatprep.mubr.bf16.mxu0 %v4178_v0  ;;  %4082 = vmatprep.mubr.bf16.mxu1 %v4179_v1 }
  0x9e   : > { %4019 = vmatmul.mubr.bf16.gmra.mrb[56].mxu0 %v4180_v2  ;;  %4083 = vmatmul.mubr.bf16.gmra.mrb[56].mxu1 %v4181_v3 }
  0x9f   : > { %4022 = vmatprep.mubr.bf16.mxu0 %v4182_v4  ;;  %4086 = vmatprep.mubr.bf16.mxu1 %v4183_v5 }
  0xa6   : > { %4023 = vmatmul.mubr.bf16.gmra.mrb[60].mxu0 %v4184_v6  ;;  %4087 = vmatmul.mubr.bf16.gmra.mrb[60].mxu1 %v4185_v7 }
 0x101   : > { %v3964_v9 = vpop.f32.mrb[0].mxu0  ;;  %v4028_v10 = vpop.f32.mrb[0].mxu1 }
 0x102   : > { %v4584_v11 = vadd.f32 %v3964_v9, %v4581_v8  ;;  %v4587_v12 = vadd.f32 %v4028_v10, %v4581_v8  ;;  %v792_v13 = vpop.f32.mrb[1].mxu0  ;;  %v1048_v14 = vpop.f32.mrb[1].mxu1 }
 0x103   : > { %v4590_v15 = vadd.f32 %v4581_v8, %v792_v13  ;;  %v4593_v16 = vadd.f32 %v4581_v8, %v1048_v14  ;;  %v3965_v17 = vpop.f32.mrb[2].mxu0  ;;  %v4029_v18 = vpop.f32.mrb[2].mxu1 }
 0x104   : > { %v1433_v19 = vmin.f32 %v4584_v11, 0.0  ;;  %v1497_v20 = vmin.f32 %v4587_v12, 0.0  ;;  %v795_v21 = vpop.f32.mrb[3].mxu0  ;;  %v1051_v22 = vpop.f32.mrb[3].mxu1  ;;  %v4600_v27 = vadd.f32 %v3965_v17, %v4581_v8  ;;  %v4603_v28 = vadd.f32 %v4029_v18, %v4581_v8 }
 0x105   : > { %v1431_v23 = vmin.f32 %v4590_v15, 0.0  ;;  %v1495_v24 = vmin.f32 %v4593_v16, 0.0  ;;  %v4606_v31 = vadd.f32 %v4581_v8, %v795_v21  ;;  %v4609_v32 = vadd.f32 %v4581_v8, %v1051_v22 }
 0x106   : > { %v1563_v25 = vmul.f32 1.442695, %v1433_v19  ;;  %v1691_v26 = vmul.f32 1.442695, %v1497_v20  ;;  %v1434_v33 = vmin.f32 %v4600_v27, 0.0  ;;  %v1498_v34 = vmin.f32 %v4603_v28, 0.0 }
 0x107   : > { %v1559_v29 = vmul.f32 1.442695, %v1431_v23  ;;  %v1687_v30 = vmul.f32 1.442695, %v1495_v24  ;;  %v1432_v35 = vmin.f32 %v4606_v31, 0.0  ;;  %v1496_v39 = vmin.f32 %v4609_v32, 0.0 }
 0x108   : > { %4186 = vpow2.f32 %v1563_v25  ;;  %v1565_v38 = vmul.f32 1.442695, %v1434_v33  ;;  %v1693_v42 = vmul.f32 1.442695, %v1498_v34  ;;  %vm1305_vm0 = vcmp.gt.f32.partialorder %v4584_v11, 0.0 }
 0x109   : > { %4188 = vpow2.f32 %v1691_v26  ;;  %v3968_v36 = vpop.f32.mrb[4].mxu0  ;;  %v4032_v37 = vpop.f32.mrb[4].mxu1  ;;  %v1561_v43 = vmul.f32 1.442695, %v1432_v35  ;;  %v1689_v47 = vmul.f32 1.442695, %v1496_v39 }
 0x10a   : > { %4190 = vpow2.f32 %v1559_v29  ;;  %v808_v40 = vpop.f32.mrb[5].mxu0  ;;  %v1064_v41 = vpop.f32.mrb[5].mxu1  ;;  %v4616_v44 = vadd.f32 %v3968_v36, %v4581_v8  ;;  %v4619_v48 = vadd.f32 %v4032_v37, %v4581_v8  ;;  %vm1369_vm1 = vcmp.gt.f32.partialorder %v4587_v12, 0.0 }
 0x10b   : > { %4192 = vpow2.f32 %v1687_v30  ;;  %v3969_v45 = vpop.f32.mrb[6].mxu0  ;;  %v4033_v46 = vpop.f32.mrb[6].mxu1  ;;  %v4622_v49 = vadd.f32 %v4581_v8, %v808_v40  ;;  %v4626_v53 = vadd.f32 %v4581_v8, %v1064_v41  ;;  %vm1303_vm2 = vcmp.gt.f32.partialorder %v4590_v15, 0.0 }
 0x10c   : > { %4194 = vpow2.f32 %v1565_v38  ;;  %v811_v50 = vpop.f32.mrb[7].mxu0  ;;  %v1067_v51 = vpop.f32.mrb[7].mxu1  ;;  %v1437_v52 = vmin.f32 %v4616_v44, 0.0  ;;  %v1501_v54 = vmin.f32 %v4619_v48, 0.0  ;;  %v4634_v59 = vadd.f32 %v3969_v45, %v4581_v8 }
 0x10d   : > { %4196 = vpow2.f32 %v1693_v42  ;;  %v1435_v56 = vmin.f32 %v4622_v49, 0.0  ;;  %v1499_v58 = vmin.f32 %v4626_v53, 0.0  ;;  %v4637_v60 = vadd.f32 %v4033_v46, %v4581_v8 }
 0x10e   : > { %4198 = vpow2.f32 %v1561_v43  ;;  %v1571_v55 = vmul.f32 1.442695, %v1437_v52  ;;  %v1699_v57 = vmul.f32 1.442695, %v1501_v54  ;;  %vm1367_vm3 = vcmp.gt.f32.partialorder %v4593_v16, 0.0 }
 0x10f   : > { %4200 = vpow2.f32 %v1689_v47  ;;  %v1567_v61 = vmul.f32 1.442695, %v1435_v56  ;;  %vm1306_vm4 = vcmp.gt.f32.partialorder %v4600_v27, 0.0  ;;  %v1695_v1 = vmul.f32 1.442695, %v1499_v58 }
 0x110   : > { %4202 = vpow2.f32 %v1571_v55  ;;  %v1438_v2 = vmin.f32 %v4634_v59, 0.0  ;;  %v4648_v3 = vadd.f32 %v4581_v8, %v811_v50  ;;  %vm1370_vm5 = vcmp.gt.f32.partialorder %v4603_v28, 0.0 }
 0x111   : > { %v4641_v62 = vpop.f32.mrb[8].mxu0  ;;  %v4643_v63 = vpop.f32.mrb[8].mxu1  ;;  %4204 = vpow2.f32 %v1699_v57  ;;  %v1502_v9 = vmin.f32 %v4637_v60, 0.0  ;;  %vm1304_vm6 = vcmp.gt.f32.partialorder %v4606_v31, 0.0  ;;  %vm1368_vm7 = vcmp.gt.f32.partialorder %v4609_v32, 0.0 }
 0x112   : > { %v4187_v0 = vpop.eup %4186  ;;  %v4650_v4 = vpop.f32.mrb[9].mxu0  ;;  %4206 = vpow2.f32 %v1567_v61  ;;  %v1573_v18 = vmul.f32 1.442695, %v1438_v2  ;;  %v4667_v25 = vadd.f32 %v4581_v8, %v1067_v51  ;;  %v1436_v33 = vmin.f32 %v4648_v3, 0.0 }
 0x113   : > { %v4652_v5 = vpop.f32.mrb[9].mxu1  ;;  %v4189_v6 = vpop.eup %4188  ;;  %v3107_v7 = vadd.f32 -1.0, %v4187_v0  ;;  %4208 = vpow2.f32 %v1695_v1  ;;  %v1701_v24 = vmul.f32 1.442695, %v1502_v9  ;;  %vm1309_vm8 = vcmp.gt.f32.partialorder %v4616_v44, 0.0 }
 0x114   : > { %v4656_v10 = vpop.f32.mrb[10].mxu0  ;;  %v4658_v13 = vpop.f32.mrb[10].mxu1  ;;  %v3171_v17 = vadd.f32 -1.0, %v4189_v6  ;;  %4210 = vpow2.f32 %v1573_v18  ;;  %v1569_v61 = vmul.f32 1.442695, %v1436_v33  ;;  %vm1373_vm9 = vcmp.gt.f32.partialorder %v4619_v48, 0.0 }
 0x115   : > { %v4191_v14 = vpop.eup %4190  ;;  %v4661_v19 = vpop.f32.mrb[11].mxu0  ;;  %v1945_v22 = vmul.f32 1.6732632, %v3107_v7  ;;  %4212 = vpow2.f32 %v1701_v24  ;;  %vm1307_vm10 = vcmp.gt.f32.partialorder %v4622_v49, 0.0  ;;  %vm1371_vm11 = vcmp.gt.f32.partialorder %v4626_v53, 0.0 }
 0x116   : > { %v4663_v20 = vpop.f32.mrb[11].mxu1  ;;  %v4193_v21 = vpop.eup %4192  ;;  %v3105_v23 = vadd.f32 -1.0, %v4191_v14  ;;  %v2009_v29 = vmul.f32 1.6732632, %v3171_v17  ;;  %4214 = vpow2.f32 %v1569_v61  ;;  %vm1310_vm12 = vcmp.gt.f32.partialorder %v4634_v59, 0.0 }
 0x117   : > { %v4195_v26 = vpop.eup %4194  ;;  %v3169_v30 = vadd.f32 -1.0, %v4193_v21  ;;  %v2073_v35 = vsel %vm1305_vm0, %v4584_v11, %v1945_v22  ;;  %vm1374_vm13 = vcmp.gt.f32.partialorder %v4637_v60, 0.0  ;;  %vm1308_vm14 = vcmp.gt.f32.partialorder %v4648_v3, 0.0 }
 0x118   : > { %v4197_v34 = vpop.eup %4196  ;;  %v1943_v36 = vmul.f32 1.6732632, %v3105_v23  ;;  %v3108_v37 = vadd.f32 -1.0, %v4195_v26  ;;  %v2201_v39 = vmul.f32 1.050701, %v2073_v35  ;;  %v2137_v40 = vsel %vm1369_vm1, %v4587_v12, %v2009_v29 }
 0x119   : > { %v4199_v38 = vpop.eup %4198  ;;  %v2007_v41 = vmul.f32 1.6732632, %v3169_v30  ;;  %v3172_v42 = vadd.f32 -1.0, %v4197_v34  ;;  %v2265_v45 = vmul.f32 1.050701, %v2137_v40  ;;  %v4680_v50 = vpop.f32.mrb[12].mxu0 }
 0x11a   : > { %v4201_v43 = vpop.eup %4200  ;;  %v2071_v46 = vsel %vm1303_vm2, %v4590_v15, %v1943_v36  ;;  %v1946_v11 = vmul.f32 1.6732632, %v3108_v37  ;;  %v3106_v47 = vadd.f32 -1.0, %v4199_v38  ;;  %v4685_v55 = vpop.f32.mrb[12].mxu1  ;;  %vm1372_vm15 = vcmp.gt.f32.partialorder %v4667_v25, 0.0 }
 0x11b   : > { %v2199_v51 = vmul.f32 1.050701, %v2071_v46  ;;  %v2135_v52 = vsel %vm1367_vm3, %v4593_v16, %v2007_v41  ;;  %v2010_v54 = vmul.f32 1.6732632, %v3172_v42  ;;  %v3170_v12 = vadd.f32 -1.0, %v4201_v43  ;;  %v4203_v56 = vpop.eup %4202  ;;  %v4693_v7 = vpop.f32.mrb[13].mxu0 }
 0x11c   : > { %v2263_v57 = vmul.f32 1.050701, %v2135_v52  ;;  %v2074_v15 = vsel %vm1306_vm4, %v4600_v27, %v1946_v11  ;;  %v1944_v58 = vmul.f32 1.6732632, %v3106_v47  ;;  %v4205_v0 = vpop.eup %4204  ;;  %v3111_v6 = vadd.f32 -1.0, %v4203_v56  ;;  %v4707_v18 = vpop.f32.mrb[14].mxu0 }
 0x11d   : > { %v2202_v1 = vmul.f32 1.050701, %v2074_v15  ;;  %v2138_v2 = vsel %vm1370_vm5, %v4603_v28, %v2010_v54  ;;  %v2008_v16 = vmul.f32 1.6732632, %v3170_v12  ;;  %v4207_v9 = vpop.eup %4206  ;;  %v3175_v17 = vadd.f32 -1.0, %v4205_v0  ;;  %v4705_v28 = vpop.f32.mrb[13].mxu1 }
 0x11e   : > { %v2266_v27 = vmul.f32 1.050701, %v2138_v2  ;;  %v2072_v14 = vsel %vm1304_vm6, %v4606_v31, %v1944_v58  ;;  %v4209_v21 = vpop.eup %4208  ;;  %v1949_v26 = vmul.f32 1.6732632, %v3111_v6  ;;  %v4712_v29 = vpop.f32.mrb[14].mxu1  ;;  %v3109_v35 = vadd.f32 -1.0, %v4207_v9 }
 0x11f   : > { %v3499_v22 = vpack.c.bf16 %v2202_v1, %v2201_v39  ;;  %v2200_v23 = vmul.f32 1.050701, %v2072_v14  ;;  %v2136_v24 = vsel %vm1368_vm7, %v4609_v32, %v2008_v16  ;;  %v4714_v30 = vpop.f32.mrb[15].mxu0  ;;  %v2013_v34 = vmul.f32 1.6732632, %v3175_v17  ;;  %v4716_v36 = vpop.f32.mrb[15].mxu1 }
 0x120   : > { %v3659_v31 = vpack.c.bf16 %v2266_v27, %v2265_v45  ;;  %v2264_v33 = vmul.f32 1.050701, %v2136_v24  ;;  %v4211_v37 = vpop.eup %4210  ;;  %v2077_v32 = vsel %vm1309_vm8, %v4616_v44, %v1949_v26  ;;  %v1500_v39 = vmin.f32 %v4667_v25, 0.0 }
 0x121   : > { %3811 = vst [vmem:[%s4700_s13 + $0x8] sm:$0xff] %v3499_v22   ;;  %v3494_v38 = vpack.c.bf16 %v2200_v23, %v2199_v51  ;;  %v4213_v40 = vpop.eup %4212  ;;  %v2141_v42 = vsel %vm1373_vm9, %v4619_v48, %v2013_v34  ;;  %v3173_v43 = vadd.f32 -1.0, %v4209_v21  ;;  %v4727_v45 = vpop.f32.mrb[16].mxu0  ;;  %v1947_v11 = vmul.f32 1.6732632, %v3109_v35 }
 0x122   : > { %3843 = vst [vmem:[%s4700_s13 + $0x108] sm:$0xff] %v3659_v31   ;;  %v3654_v41 = vpack.c.bf16 %v2264_v33, %v2263_v57  ;;  %v4729_v46 = vpop.f32.mrb[16].mxu1  ;;  %v3112_v44 = vadd.f32 -1.0, %v4211_v37  ;;  %v3176_v47 = vadd.f32 -1.0, %v4213_v40  ;;  %v2205_v51 = vmul.f32 1.050701, %v2077_v32  ;;  %v4215_v14 = vpop.eup %4214 }
 0x123   : > { %3495 = vst [vmem:[%s4700_s13] sm:$0xff] %v3494_v38   ;;  %v1697_v52 = vmul.f32 1.442695, %v1500_v39  ;;  %v4737_v48 = vadd.f32 %v4641_v62, %v4581_v8  ;;  %v4741_v54 = vadd.f32 %v4643_v63, %v4581_v8  ;;  %v4743_v12 = vpop.f32.mrb[17].mxu0  ;;  %v4745_v56 = vpop.f32.mrb[17].mxu1  ;;  %v2269_v57 = vmul.f32 1.050701, %v2141_v42 }
 0x124   : > { %3842 = vst [vmem:[%s4700_s13 + $0x100] sm:$0xff] %v3654_v41   ;;  %v1950_v15 = vmul.f32 1.6732632, %v3112_v44  ;;  %v2014_v58 = vmul.f32 1.6732632, %v3176_v47  ;;  %v4749_v1 = vpop.f32.mrb[18].mxu0  ;;  %v2075_v63 = vsel %vm1307_vm10, %v4622_v49, %v1947_v11  ;;  %v4767_v23 = vadd.f32 %v4581_v8, %v4650_v4 }
 0x125   : > { %v2011_v61 = vmul.f32 1.6732632, %v3173_v43  ;;  %4216 = vpow2.f32 %v1697_v52  ;;  %v1441_v0 = vmin.f32 %v4737_v48, 0.0  ;;  %v4751_v62 = vpop.f32.mrb[18].mxu1  ;;  %v1505_v6 = vmin.f32 %v4741_v54, 0.0  ;;  %v4761_v9 = vpop.f32.mrb[19].mxu0 }
 0x126   : > { %v2078_v2 = vsel %vm1310_vm12, %v4634_v59, %v1950_v15  ;;  %v2142_v16 = vsel %vm1374_vm13, %v4637_v60, %v2014_v58  ;;  %v4763_v27 = vpop.f32.mrb[19].mxu1  ;;  %v3110_v49 = vadd.f32 -1.0, %v4215_v14  ;;  %v4771_v59 = vadd.f32 %v4581_v8, %v4652_v5 }
 0x127   : > { %v2206_v17 = vmul.f32 1.050701, %v2078_v2  ;;  %v2270_v21 = vmul.f32 1.050701, %v2142_v16  ;;  %v1579_v22 = vmul.f32 1.442695, %v1441_v0  ;;  %v4775_v60 = vadd.f32 %v4656_v10, %v4581_v8 }
 0x128   : > { %v1707_v24 = vmul.f32 1.442695, %v1505_v6  ;;  %v2203_v26 = vmul.f32 1.050701, %v2075_v63  ;;  %v1948_v35 = vmul.f32 1.6732632, %v3110_v49  ;;  %v2139_v10 = vsel %vm1371_vm11, %v4626_v53, %v2011_v61 }
 0x129   : > { %v3509_v31 = vpack.c.bf16 %v2206_v17, %v2205_v51  ;;  %v3669_v33 = vpack.c.bf16 %v2270_v21, %v2269_v57  ;;  %4218 = vpow2.f32 %v1579_v22  ;;  %v4777_v34 = vpop.f32.mrb[20].mxu0  ;;  %v4779_v4 = vpop.f32.mrb[20].mxu1  ;;  %v1439_v5 = vmin.f32 %v4767_v23, 0.0 }
 0x12a   : > { %4220 = vpow2.f32 %v1707_v24  ;;  %v4783_v37 = vpop.f32.mrb[21].mxu0  ;;  %v4785_v38 = vpop.f32.mrb[21].mxu1  ;;  %v1503_v32 = vmin.f32 %v4771_v59, 0.0  ;;  %v1442_v39 = vmin.f32 %v4775_v60, 0.0  ;;  %v4796_v40 = vadd.f32 %v4658_v13, %v4581_v8 }
 0x12b   : > { %3813 = vst [vmem:[%s4700_s13 + $0x18] sm:$0xff] %v3509_v31   ;;  %3845 = vst [vmem:[%s4700_s13 + $0x118] sm:$0xff] %v3669_v33   ;;  %v4798_v41 = vpop.f32.mrb[22].mxu0  ;;  %v4800_v42 = vpop.f32.mrb[22].mxu1  ;;  %v2076_v43 = vsel %vm1308_vm14, %v4648_v3, %v1948_v35  ;;  %v1575_v11 = vmul.f32 1.442695, %v1439_v5  ;;  %v4805_v53 = vadd.f32 %v4581_v8, %v4661_v19  ;;  %v4809_v44 = vadd.f32 %v4581_v8, %v4663_v20 }
 0x12c   : > { %v4811_v47 = vpop.f32.mrb[23].mxu0  ;;  %v4813_v51 = vpop.f32.mrb[23].mxu1  ;;  %v2204_v13 = vmul.f32 1.050701, %v2076_v43  ;;  %v1703_v52 = vmul.f32 1.442695, %v1503_v32  ;;  %v4817_v3 = vadd.f32 %v4680_v50, %v4581_v8  ;;  %v4827_v6 = vadd.f32 %v4685_v55, %v4581_v8 }
 0x12d   : > { %v1581_v57 = vmul.f32 1.442695, %v1442_v39  ;;  %4222 = vpow2.f32 %v1575_v11  ;;  %v1506_v19 = vmin.f32 %v4796_v40, 0.0  ;;  %v2267_v58 = vmul.f32 1.050701, %v2139_v10 }
 0x12e   : > { %v3504_v61 = vpack.c.bf16 %v2204_v13, %v2203_v26  ;;  %4224 = vpow2.f32 %v1703_v52  ;;  %v1440_v20 = vmin.f32 %v4805_v53, 0.0  ;;  %v1504_v2 = vmin.f32 %v4809_v44, 0.0 }
 0x12f   : > { %v4217_v15 = vpop.eup %4216  ;;  %4226 = vpow2.f32 %v1581_v57  ;;  %v1709_v63 = vmul.f32 1.442695, %v1506_v19  ;;  %v1445_v50 = vmin.f32 %v4817_v3, 0.0  ;;  %v4835_v49 = vadd.f32 %v4581_v8, %v4693_v7 }
 0x130   : > { %v3174_v0 = vadd.f32 -1.0, %v4217_v15  ;;  %3812 = vst [vmem:[%s4700_s13 + $0x10] sm:$0xff] %v3504_v61   ;;  %v1577_v16 = vmul.f32 1.442695, %v1440_v20  ;;  %v1705_v22 = vmul.f32 1.442695, %v1504_v2  ;;  %v4863_v20 = vadd.f32 %v4707_v18, %v4581_v8 }
 0x131   : > { %v4829_v14 = vpop.f32.mrb[24].mxu0  ;;  %v4831_v17 = vpop.f32.mrb[24].mxu1  ;;  %4228 = vpow2.f32 %v1709_v63  ;;  %vm1313_vm0 = vcmp.gt.f32.partialorder %v4737_v48, 0.0  ;;  %v1587_v55 = vmul.f32 1.442695, %v1445_v50  ;;  %v1509_v33 = vmin.f32 %v4827_v6, 0.0 }
 0x132   : > { %v2012_v21 = vmul.f32 1.6732632, %v3174_v0  ;;  %v4837_v24 = vpop.f32.mrb[25].mxu0  ;;  %v4839_v26 = vpop.f32.mrb[25].mxu1  ;;  %4230 = vpow2.f32 %v1577_v16  ;;  %vm1377_vm1 = vcmp.gt.f32.partialorder %v4741_v54, 0.0  ;;  %vm1311_vm2 = vcmp.gt.f32.partialorder %v4767_v23, 0.0 }
 0x133   : > { %v4219_v31 = vpop.eup %4218  ;;  %v4843_v35 = vpop.f32.mrb[26].mxu0  ;;  %4232 = vpow2.f32 %v1705_v22  ;;  %v1715_v52 = vmul.f32 1.442695, %v1509_v33  ;;  %v1443_v19 = vmin.f32 %v4835_v49, 0.0  ;;  %vm1375_vm3 = vcmp.gt.f32.partialorder %v4771_v59, 0.0 }
 0x134   : > { %v4845_v5 = vpop.f32.mrb[26].mxu1  ;;  %v4221_v10 = vpop.eup %4220  ;;  %v2140_v7 = vsel %vm1372_vm15, %v4667_v25, %v2012_v21  ;;  %v3115_v32 = vadd.f32 -1.0, %v4219_v31  ;;  %4234 = vpow2.f32 %v1587_v55  ;;  %v4859_v25 = vadd.f32 %v4581_v8, %v4705_v28 }
 0x135   : > { %v4851_v39 = vpop.f32.mrb[27].mxu0  ;;  %v4853_v43 = vpop.f32.mrb[27].mxu1  ;;  %v2268_v11 = vmul.f32 1.050701, %v2140_v7  ;;  %v3179_v13 = vadd.f32 -1.0, %v4221_v10  ;;  %4236 = vpow2.f32 %v1715_v52  ;;  %v4872_v28 = vadd.f32 %v4712_v29, %v4581_v8 }
 0x136   : > { %v1953_v57 = vmul.f32 1.6732632, %v3115_v32  ;;  %v1583_v2 = vmul.f32 1.442695, %v1443_v19  ;;  %v1507_v16 = vmin.f32 %v4859_v25, 0.0  ;;  %vm1314_vm4 = vcmp.gt.f32.partialorder %v4775_v60, 0.0 }
 0x137   : > { %v3664_v15 = vpack.c.bf16 %v2268_v11, %v2267_v58  ;;  %v2017_v61 = vmul.f32 1.6732632, %v3179_v13  ;;  %v4223_v0 = vpop.eup %4222  ;;  %vm1378_vm5 = vcmp.gt.f32.partialorder %v4796_v40, 0.0  ;;  %vm1312_vm6 = vcmp.gt.f32.partialorder %v4805_v53, 0.0 }
 0x138   : > { %v2081_v63 = vsel %vm1313_vm0, %v4737_v48, %v1953_v57  ;;  %v4225_v58 = vpop.eup %4224  ;;  %v3113_v50 = vadd.f32 -1.0, %v4223_v0  ;;  %vm1376_vm7 = vcmp.gt.f32.partialorder %v4809_v44, 0.0  ;;  %v1711_v55 = vmul.f32 1.442695, %v1507_v16 }
 0x139   : > { %3844 = vst [vmem:[%s4700_s13 + $0x110] sm:$0xff] %v3664_v15   ;;  %v4878_v18 = vpop.f32.mrb[28].mxu0  ;;  %v4880_v48 = vpop.f32.mrb[28].mxu1  ;;  %v2209_v22 = vmul.f32 1.050701, %v2081_v63  ;;  %v2145_v29 = vsel %vm1377_vm1, %v4741_v54, %v2017_v61  ;;  %v3177_v31 = vadd.f32 -1.0, %v4225_v58  ;;  %4238 = vpow2.f32 %v1583_v2 }
 0x13a   : > { %v4227_v21 = vpop.eup %4226  ;;  %v4886_v33 = vpop.f32.mrb[29].mxu0  ;;  %v1951_v10 = vmul.f32 1.6732632, %v3113_v50  ;;  %v1446_v32 = vmin.f32 %v4863_v20, 0.0  ;;  %vm1317_vm8 = vcmp.gt.f32.partialorder %v4817_v3, 0.0  ;;  %4240 = vpow2.f32 %v1711_v55 }
 0x13b   : > { %v3116_v7 = vadd.f32 -1.0, %v4227_v21  ;;  %v4889_v11 = vpop.f32.mrb[29].mxu1  ;;  %v4229_v13 = vpop.eup %4228  ;;  %v2015_v52 = vmul.f32 1.6732632, %v3177_v31  ;;  %v1510_v54 = vmin.f32 %v4872_v28, 0.0  ;;  %v4904_v55 = vadd.f32 %v4581_v8, %v4714_v30 }
 0x13c   : > { %5982 = vst [vmem:[#allocation2_spill] sm:$0xff] %v4889_v11  ;;  %v4893_v57 = vpop.f32.mrb[30].mxu0  ;;  %v4895_v19 = vpop.f32.mrb[30].mxu1  ;;  %v2079_v61 = vsel %vm1311_vm2, %v4767_v23, %v1951_v10  ;;  %v3180_v63 = vadd.f32 -1.0, %v4229_v13  ;;  %v1589_v2 = vmul.f32 1.442695, %v1446_v32 }
 0x13d   : > { %5983 = vst [vmem:[#allocation3_spill] sm:$0xff] %v4893_v57  ;;  %5984 = vst [vmem:[#allocation4_spill] sm:$0xff] %v4895_v19  ;;  %v4231_v15 = vpop.eup %4230  ;;  %v1954_v0 = vmul.f32 1.6732632, %v3116_v7  ;;  %v4900_v16 = vpop.f32.mrb[31].mxu0  ;;  %v2143_v30 = vsel %vm1375_vm3, %v4771_v59, %v2015_v52  ;;  %vm1381_vm9 = vcmp.gt.f32.partialorder %v4827_v6, 0.0 }
 0x13e   : > { %5985 = vst [vmem:[#allocation5_spill] sm:$0xff] %v4900_v16  ;;  %v4233_v58 = vpop.eup %4232  ;;  %v2273_v50 = vmul.f32 1.050701, %v2145_v29  ;;  %v3114_v21 = vadd.f32 -1.0, %v4231_v15  ;;  %v1717_v31 = vmul.f32 1.442695, %v1510_v54  ;;  %4242 = vpow2.f32 %v1589_v2 }
 0x13f   : > { %v4906_v57 = vpop.f32.mrb[31].mxu1  ;;  %v4235_v19 = vpop.eup %4234  ;;  %v2207_v11 = vmul.f32 1.050701, %v2079_v61  ;;  %v2082_v23 = vsel %vm1314_vm4, %v4775_v60, %v1954_v0  ;;  %v2018_v10 = vmul.f32 1.6732632, %v3180_v63  ;;  %v3178_v7 = vadd.f32 -1.0, %v4233_v58 }
 0x140   : > { %v2210_v32 = vmul.f32 1.050701, %v2082_v23  ;;  %v1952_v13 = vmul.f32 1.6732632, %v3114_v21  ;;  %v3119_v16 = vadd.f32 -1.0, %v4235_v19  ;;  %v4237_v29 = vpop.eup %4236  ;;  %4244 = vpow2.f32 %v1717_v31 }
 0x141   : > { %v2146_v54 = vsel %vm1378_vm5, %v4796_v40, %v2018_v10  ;;  %v2016_v15 = vmul.f32 1.6732632, %v3178_v7  ;;  %v4917_v61 = vpop.f32.mrb[32].mxu0  ;;  %v4919_v60 = vpop.f32.mrb[32].mxu1  ;;  %v3183_v21 = vadd.f32 -1.0, %v4237_v29  ;;  %v1444_v31 = vmin.f32 %v4904_v55, 0.0 }
 0x142   : > { %v3519_v0 = vpack.c.bf16 %v2210_v32, %v2209_v22  ;;  %v2274_v63 = vmul.f32 1.050701, %v2146_v54  ;;  %v2080_v19 = vsel %vm1312_vm6, %v4805_v53, %v1952_v13  ;;  %v1957_v2 = vmul.f32 1.6732632, %v3119_v16  ;;  %v4924_v58 = vpop.f32.mrb[33].mxu0  ;;  %v4926_v59 = vpop.f32.mrb[33].mxu1 }
 0x143   : > { %v2208_v52 = vmul.f32 1.050701, %v2080_v19  ;;  %v2144_v40 = vsel %vm1376_vm7, %v4809_v44, %v2016_v15  ;;  %v4932_v22 = vpop.f32.mrb[34].mxu0  ;;  %v4934_v23 = vpop.f32.mrb[34].mxu1  ;;  %v2271_v10 = vmul.f32 1.050701, %v2143_v30  ;;  %v4939_v7 = vadd.f32 %v4581_v8, %v4716_v36 }
 0x144   : > { %3815 = vst [vmem:[%s4700_s13 + $0x28] sm:$0xff] %v3519_v0   ;;  %v3679_v53 = vpack.c.bf16 %v2274_v63, %v2273_v50  ;;  %v2272_v16 = vmul.f32 1.050701, %v2144_v40  ;;  %v4941_v32 = vpop.f32.mrb[35].mxu0  ;;  %v4943_v44 = vpop.f32.mrb[35].mxu1  ;;  %v2085_v54 = vsel %vm1317_vm8, %v4817_v3, %v1957_v2  ;;  %v4954_v36 = vadd.f32 %v4727_v45, %v4581_v8 }
 0x145   : > { %v4239_v13 = vpop.eup %4238  ;;  %v3514_v29 = vpack.c.bf16 %v2208_v52, %v2207_v11  ;;  %v2021_v50 = vmul.f32 1.6732632, %v3183_v21  ;;  %v1585_v0 = vmul.f32 1.442695, %v1444_v31  ;;  %v1508_v63 = vmin.f32 %v4939_v7, 0.0 }
 0x146   : > { %v4241_v30 = vpop.eup %4240  ;;  %3847 = vst [vmem:[%s4700_s13 + $0x128] sm:$0xff] %v3679_v53   ;;  %v3674_v15 = vpack.c.bf16 %v2272_v16, %v2271_v10  ;;  %v3117_v11 = vadd.f32 -1.0, %v4239_v13  ;;  %v4959_v3 = vadd.f32 %v4729_v46, %v4581_v8  ;;  %v4961_v2 = vmul.f32 1.050701, %v2085_v54 }
 0x147   : > { %3814 = vst [vmem:[%s4700_s13 + $0x20] sm:$0xff] %v3514_v29   ;;  %4246 = vpow2.f32 %v1585_v0  ;;  %v1713_v19 = vmul.f32 1.442695, %v1508_v63  ;;  %vm1315_vm10 = vcmp.gt.f32.partialorder %v4835_v49, 0.0  ;;  %vm1318_vm11 = vcmp.gt.f32.partialorder %v4863_v20, 0.0 }
 0x148   : > { %3846 = vst [vmem:[%s4700_s13 + $0x120] sm:$0xff] %v3674_v15   ;;  %v1449_v52 = vmin.f32 %v4954_v36, 0.0  ;;  %v4243_v21 = vpop.eup %4242  ;;  %v2149_v31 = vsel %vm1381_vm9, %v4827_v6, %v2021_v50  ;;  %vm1379_vm12 = vcmp.gt.f32.partialorder %v4859_v25, 0.0  ;;  %v3181_v10 = vadd.f32 -1.0, %v4241_v30 }
 0x149   : > { %v4966_v40 = vpop.f32.mrb[36].mxu0  ;;  %v4968_v45 = vpop.f32.mrb[36].mxu1  ;;  %4248 = vpow2.f32 %v1713_v19  ;;  %v1513_v46 = vmin.f32 %v4959_v3, 0.0  ;;  %v3120_v29 = vadd.f32 -1.0, %v4243_v21  ;;  %vm1382_vm13 = vcmp.gt.f32.partialorder %v4872_v28, 0.0 }
 0x14a   : > { %5986 = vst [vmem:[#allocation6_spill] sm:$0xff] %v4968_v45  ;;  %v4973_v53 = vpop.f32.mrb[37].mxu0  ;;  %v4975_v16 = vpop.f32.mrb[37].mxu1  ;;  %v1595_v54 = vmul.f32 1.442695, %v1449_v52  ;;  %v4980_v15 = vadd.f32 %v4581_v8, %v4743_v12  ;;  %v4988_v19 = vadd.f32 %v4581_v8, %v4745_v56  ;;  %vm1316_vm14 = vcmp.gt.f32.partialorder %v4904_v55, 0.0 }
 0x14b   : > { %5987 = vst [vmem:[#allocation7_spill] sm:$0xff] %v4973_v53  ;;  %5988 = vst [vmem:[#allocation8_spill] sm:$0xff] %v4975_v16  ;;  %v4245_v13 = vpop.eup %4244  ;;  %v4982_v6 = vpop.f32.mrb[38].mxu0  ;;  %v1955_v30 = vmul.f32 1.6732632, %v3117_v11  ;;  %vm1380_vm15 = vcmp.gt.f32.partialorder %v4939_v7, 0.0 }
 0x14c   : > { %5989 = vst [vmem:[#allocation9_spill] sm:$0xff] %v4982_v6  ;;  %v4984_v50 = vpop.f32.mrb[38].mxu1  ;;  %v3184_v0 = vadd.f32 -1.0, %v4245_v13  ;;  %v1723_v63 = vmul.f32 1.442695, %v1513_v46  ;;  %v4990_v16 = vpop.f32.mrb[39].mxu0  ;;  %4250 = vpow2.f32 %v1595_v54  ;;  %v5006_v13 = vadd.f32 %v4751_v62, %v4581_v8 }
 0x14d   : > { %v2277_v21 = vmul.f32 1.050701, %v2149_v31  ;;  %v1958_v53 = vmul.f32 1.6732632, %v3120_v29  ;;  %v1447_v52 = vmin.f32 %v4980_v15, 0.0  ;;  %v4993_v12 = vpop.f32.mrb[39].mxu1  ;;  %v5002_v31 = vadd.f32 %v4749_v1, %v4581_v8 }
 0x14e   : > { %v2019_v45 = vmul.f32 1.6732632, %v3181_v10  ;;  %v2022_v6 = vmul.f32 1.6732632, %v3184_v0  ;;  %4252 = vpow2.f32 %v1723_v63  ;;  %v1511_v11 = vmin.f32 %v4988_v19, 0.0 }
 0x14f   : > { %v2086_v56 = vsel %vm1318_vm11, %v4863_v20, %v1958_v53  ;;  %v1591_v46 = vmul.f32 1.442695, %v1447_v52  ;;  %v5013_v0 = vadd.f32 %v4581_v8, %v4761_v9  ;;  %v1450_v1 = vmin.f32 %v5002_v31, 0.0 }
 0x150   : > { %v2214_v10 = vmul.f32 1.050701, %v2086_v56  ;;  %v2150_v29 = vsel %vm1382_vm13, %v4872_v28, %v2022_v6  ;;  %v1719_v54 = vmul.f32 1.442695, %v1511_v11  ;;  %v2083_v28 = vsel %vm1315_vm10, %v4835_v49, %v1955_v30 }
 0x151   : > { %v2278_v20 = vmul.f32 1.050701, %v2150_v29  ;;  %4254 = vpow2.f32 %v1591_v46  ;;  %v5017_v53 = vpop.f32.mrb[40].mxu0  ;;  %v5019_v62 = vpop.f32.mrb[40].mxu1  ;;  %v1514_v9 = vmin.f32 %v5006_v13, 0.0  ;;  %v2147_v56 = vsel %vm1379_vm12, %v4859_v25, %v2019_v45 }
 0x152   : > { %5990 = vst [vmem:[#allocation10_spill] sm:$0xff] %v5017_v53  ;;  %5991 = vst [vmem:[#allocation11_spill] sm:$0xff] %v5019_v62  ;;  %v4247_v63 = vpop.eup %4246  ;;  %v3529_v6 = vpack.c.bf16 %v2214_v10, %v4961_v2  ;;  %4256 = vpow2.f32 %v1719_v54  ;;  %v5026_v52 = vpop.f32.mrb[41].mxu0  ;;  %v1597_v62 = vmul.f32 1.442695, %v1450_v1  ;;  %vm1321_vm0 = vcmp.gt.f32.partialorder %v4954_v36, 0.0 }
 0x153   : > { %v5028_v11 = vpop.f32.mrb[41].mxu1  ;;  %v3689_v46 = vpack.c.bf16 %v2278_v20, %v2277_v21  ;;  %v3118_v29 = vadd.f32 -1.0, %v4247_v63  ;;  %v5033_v53 = vpop.f32.mrb[42].mxu0  ;;  %v1725_v30 = vmul.f32 1.442695, %v1514_v9  ;;  %v1448_v10 = vmin.f32 %v5013_v0, 0.0 }
 0x154   : > { %5992 = vst [vmem:[#allocation12_spill] sm:$0xff] %v5033_v53  ;;  %v5035_v49 = vpop.f32.mrb[42].mxu1  ;;  %v4249_v2 = vpop.eup %4248  ;;  %3817 = vst [vmem:[%s4700_s13 + $0x38] sm:$0xff] %v3529_v6   ;;  %v5042_v54 = vadd.f32 %v4581_v8, %v4763_v27  ;;  %v5046_v25 = vadd.f32 %v4777_v34, %v4581_v8  ;;  %v2211_v20 = vmul.f32 1.050701, %v2083_v28  ;;  %4258 = vpow2.f32 %v1597_v62 }
 0x155   : > { %5993 = vst [vmem:[#allocation13_spill] sm:$0xff] %v5035_v49  ;;  %v5048_v45 = vpop.f32.mrb[43].mxu0  ;;  %v5050_v21 = vpop.f32.mrb[43].mxu1  ;;  %3849 = vst [vmem:[%s4700_s13 + $0x138] sm:$0xff] %v3689_v46   ;;  %v1956_v1 = vmul.f32 1.6732632, %v3118_v29  ;;  %4260 = vpow2.f32 %v1725_v30  ;;  %v5060_v28 = vadd.f32 %v4779_v4, %v4581_v8 }
 0x156   : > { %5994 = vst [vmem:[#allocation14_spill] sm:$0xff] %v5048_v45  ;;  %5995 = vst [vmem:[#allocation15_spill] sm:$0xff] %v5050_v21  ;;  %v3182_v63 = vadd.f32 -1.0, %v4249_v2  ;;  %v2275_v6 = vmul.f32 1.050701, %v2147_v56  ;;  %v1512_v49 = vmin.f32 %v5042_v54, 0.0  ;;  %v4251_v27 = vpop.eup %4250 }
 0x157   : > { %v1593_v9 = vmul.f32 1.442695, %v1448_v10  ;;  %v2084_v34 = vsel %vm1316_vm14, %v4904_v55, %v1956_v1  ;;  %v1453_v45 = vmin.f32 %v5046_v25, 0.0  ;;  %v3123_v62 = vadd.f32 -1.0, %v4251_v27 }
 0x158   : > { %v2020_v53 = vmul.f32 1.6732632, %v3182_v63  ;;  %v4253_v46 = vpop.eup %4252  ;;  %v2212_v29 = vmul.f32 1.050701, %v2084_v34  ;;  %v1721_v56 = vmul.f32 1.442695, %v1512_v49 }
 0x159   : > { %4262 = vpow2.f32 %v1593_v9  ;;  %vm1385_vm1 = vcmp.gt.f32.partialorder %v4959_v3, 0.0  ;;  %v3187_v30 = vadd.f32 -1.0, %v4253_v46  ;;  %v1603_v55 = vmul.f32 1.442695, %v1453_v45  ;;  %v5066_v10 = vpop.f32.mrb[44].mxu0  ;;  %v5068_v1 = vpop.f32.mrb[44].mxu1 }
 0x15a   : > { %v2148_v2 = vsel %vm1380_vm15, %v4939_v7, %v2020_v53  ;;  %v3524_v4 = vpack.c.bf16 %v2212_v29, %v2211_v20  ;;  %v1961_v21 = vmul.f32 1.6732632, %v3123_v62  ;;  %4264 = vpow2.f32 %v1721_v56  ;;  %v5070_v27 = vpop.f32.mrb[45].mxu0  ;;  %v5072_v49 = vpop.f32.mrb[45].mxu1 }
 0x15b   : > { %v2276_v63 = vmul.f32 1.050701, %v2148_v2  ;;  %5996 = vst [vmem:[#allocation16_spill] sm:$0xff] %v5072_v49  ;;  %v4255_v9 = vpop.eup %4254  ;;  %v2025_v34 = vmul.f32 1.6732632, %v3187_v30  ;;  %4266 = vpow2.f32 %v1603_v55  ;;  %v1517_v7 = vmin.f32 %v5060_v28, 0.0 }
 0x15c   : > { %v5077_v53 = vadd.f32 %v4581_v8, %v4783_v37  ;;  %v5079_v45 = vpop.f32.mrb[46].mxu0  ;;  %v5081_v20 = vpop.f32.mrb[46].mxu1  ;;  %3816 = vst [vmem:[%s4700_s13 + $0x30] sm:$0xff] %v3524_v4   ;;  %vm1319_vm2 = vcmp.gt.f32.partialorder %v4980_v15, 0.0  ;;  %v3121_v62 = vadd.f32 -1.0, %v4255_v9  ;;  %v5087_v56 = vadd.f32 %v4581_v8, %v4785_v38 }
 0x15d   : > { %5997 = vst [vmem:[#allocation17_spill] sm:$0xff] %v5079_v45  ;;  %5998 = vst [vmem:[#allocation18_spill] sm:$0xff] %v5081_v20  ;;  %v4257_v46 = vpop.eup %4256  ;;  %v3684_v29 = vpack.c.bf16 %v2276_v63, %v2275_v6  ;;  %v5089_v2 = vpop.f32.mrb[47].mxu0  ;;  %v2089_v37 = vsel %vm1321_vm0, %v4954_v36, %v1961_v21  ;;  %vm1383_vm3 = vcmp.gt.f32.partialorder %v4988_v19, 0.0  ;;  %vm1322_vm4 = vcmp.gt.f32.partialorder %v5002_v31, 0.0 }
 0x15e   : > { %5999 = vst [vmem:[#allocation19_spill] sm:$0xff] %v5089_v2  ;;  %v5091_v30 = vpop.f32.mrb[47].mxu1  ;;  %v1731_v6 = vmul.f32 1.442695, %v1517_v7  ;;  %v2153_v55 = vsel %vm1385_vm1, %v4959_v3, %v2025_v34  ;;  %v1959_v8 = vmul.f32 1.6732632, %v3121_v62  ;;  %v4259_v63 = vpop.eup %4258 }
 0x15f   : > { %6000 = vst [vmem:[#allocation20_spill] sm:$0xff] %v5091_v30  ;;  %3848 = vst [vmem:[%s4700_s13 + $0x130] sm:$0xff] %v3684_v29   ;;  %v3185_v38 = vadd.f32 -1.0, %v4257_v46  ;;  %v1451_v4 = vmin.f32 %v5077_v53, 0.0  ;;  %vm1386_vm5 = vcmp.gt.f32.partialorder %v5006_v13, 0.0  ;;  %vm1320_vm6 = vcmp.gt.f32.partialorder %v5013_v0, 0.0  ;;  %v4261_v21 = vpop.eup %4260 }
 0x160   : > { %4268 = vpow2.f32 %v1731_v6  ;;  %v1515_v36 = vmin.f32 %v5087_v56, 0.0  ;;  %v2217_v9 = vmul.f32 1.050701, %v2089_v37  ;;  %v3124_v7 = vadd.f32 -1.0, %v4259_v63  ;;  %v5109_v3 = vld [vmem:[%s5980_s2] ss:$0 sm:$0xff] }
 0x161   : > { %v1599_v29 = vmul.f32 1.442695, %v1451_v4  ;;  %v5113_v34 = vadd.f32 %v5109_v3, %v4798_v41  ;;  %v2281_v46 = vmul.f32 1.050701, %v2153_v55  ;;  %v2087_v62 = vsel %vm1319_vm2, %v4980_v15, %v1959_v8  ;;  %v5118_v2 = vpop.f32.mrb[48].mxu0  ;;  %v5121_v20 = vpop.f32.mrb[48].mxu1 }
 0x162   : > { %v3188_v6 = vadd.f32 -1.0, %v4261_v21  ;;  %v1727_v30 = vmul.f32 1.442695, %v1515_v36  ;;  %v2023_v4 = vmul.f32 1.6732632, %v3185_v38  ;;  %vm1384_vm7 = vcmp.gt.f32.partialorder %v5042_v54, 0.0 }
 0x163   : > { %v4263_v37 = vpop.eup %4262  ;;  %v1962_v63 = vmul.f32 1.6732632, %v3124_v7  ;;  %4270 = vpow2.f32 %v1599_v29  ;;  %6001 = vst [vmem:[#allocation21_spill] sm:$0xff] %v5121_v20  ;;  %v1454_v55 = vmin.f32 %v5113_v34, 0.0  ;;  %v5124_v49 = vpop.f32.mrb[49].mxu0  ;;  %v5133_v21 = vadd.f32 %v5109_v3, %v4800_v42 }
 0x164   : > { %v2026_v45 = vmul.f32 1.6732632, %v3188_v6  ;;  %v3122_v41 = vadd.f32 -1.0, %v4263_v37  ;;  %4272 = vpow2.f32 %v1727_v30  ;;  %6002 = vst [vmem:[#allocation22_spill] sm:$0xff] %v5124_v49  ;;  %v5126_v15 = vpop.f32.mrb[49].mxu1  ;;  %v4265_v8 = vpop.eup %4264  ;;  %v5137_v7 = vadd.f32 %v5109_v3, %v4811_v47 }
 0x165   : > { %6003 = vst [vmem:[#allocation23_spill] sm:$0xff] %v5126_v15  ;;  %v2215_v36 = vmul.f32 1.050701, %v2087_v62  ;;  %v2090_v38 = vsel %vm1322_vm4, %v5002_v31, %v1962_v63  ;;  %v5139_v30 = vpop.f32.mrb[50].mxu0  ;;  %v5141_v29 = vpop.f32.mrb[50].mxu1  ;;  %v3186_v31 = vadd.f32 -1.0, %v4265_v8  ;;  %v2151_v42 = vsel %vm1383_vm3, %v4988_v19, %v2023_v4 }
 0x166   : > { %6004 = vst [vmem:[#allocation24_spill] sm:$0xff] %v5139_v30  ;;  %6005 = vst [vmem:[#allocation25_spill] sm:$0xff] %v5141_v29  ;;  %v4267_v6 = vpop.eup %4266  ;;  %v2218_v37 = vmul.f32 1.050701, %v2090_v38  ;;  %v2154_v62 = vsel %vm1386_vm5, %v5006_v13, %v2026_v45  ;;  %v1960_v15 = vmul.f32 1.6732632, %v3122_v41  ;;  %v5157_v19 = vadd.f32 %v5109_v3, %v4813_v51 }
 0x167   : > { %v2282_v63 = vmul.f32 1.050701, %v2154_v62  ;;  %v3127_v47 = vadd.f32 -1.0, %v4267_v6  ;;  %v1605_v49 = vmul.f32 1.442695, %v1454_v55  ;;  %v1518_v30 = vmin.f32 %v5133_v21, 0.0 }
 0x168   : > { %v3539_v20 = vpack.c.bf16 %v2218_v37, %v2217_v9  ;;  %v2088_v38 = vsel %vm1320_vm6, %v5013_v0, %v1960_v15  ;;  %v2024_v29 = vmul.f32 1.6732632, %v3186_v31  ;;  %v5153_v13 = vpop.f32.mrb[51].mxu0  ;;  %v5159_v4 = vpop.f32.mrb[51].mxu1  ;;  %v1452_v15 = vmin.f32 %v5137_v7, 0.0 }
 0x169   : > { %v3699_v45 = vpack.c.bf16 %v2282_v63, %v2281_v46  ;;  %v2216_v41 = vmul.f32 1.050701, %v2088_v38  ;;  %4274 = vpow2.f32 %v1605_v49  ;;  %v1733_v55 = vmul.f32 1.442695, %v1518_v30 }
 0x16a   : > { %v4269_v9 = vpop.eup %4268  ;;  %3819 = vst [vmem:[%s4700_s13 + $0x48] sm:$0xff] %v3539_v20   ;;  %v2152_v0 = vsel %vm1384_vm7, %v5042_v54, %v2024_v29  ;;  %v2279_v8 = vmul.f32 1.050701, %v2151_v42  ;;  %v1965_v51 = vmul.f32 1.6732632, %v3127_v47  ;;  %v1516_v63 = vmin.f32 %v5157_v19, 0.0 }
 0x16b   : > { %3851 = vst [vmem:[%s4700_s13 + $0x148] sm:$0xff] %v3699_v45   ;;  %v3534_v46 = vpack.c.bf16 %v2216_v41, %v2215_v36  ;;  %v2280_v49 = vmul.f32 1.050701, %v2152_v0  ;;  %v3191_v6 = vadd.f32 -1.0, %v4269_v9  ;;  %4276 = vpow2.f32 %v1733_v55 }
 0x16c   : > { %v1601_v37 = vmul.f32 1.442695, %v1452_v15  ;;  %v5171_v54 = vadd.f32 %v5109_v3, %v4829_v14  ;;  %v5175_v36 = vadd.f32 %v5109_v3, %v4831_v17  ;;  %v5179_v42 = vadd.f32 %v5109_v3, %v4837_v24 }
 0x16d   : > { %v4271_v62 = vpop.eup %4270  ;;  %3818 = vst [vmem:[%s4700_s13 + $0x40] sm:$0xff] %v3534_v46   ;;  %v3694_v31 = vpack.c.bf16 %v2280_v49, %v2279_v8  ;;  %v2029_v20 = vmul.f32 1.6732632, %v3191_v6  ;;  %vm1325_vm8 = vcmp.gt.f32.partialorder %v5046_v25, 0.0  ;;  %vm1389_vm9 = vcmp.gt.f32.partialorder %v5060_v28, 0.0  ;;  %v5201_v49 = vpop.f32.mrb[52].mxu0 }
 0x16e   : > { %v4273_v30 = vpop.eup %4272  ;;  %v3125_v29 = vadd.f32 -1.0, %v4271_v62  ;;  %4278 = vpow2.f32 %v1601_v37  ;;  %v1729_v47 = vmul.f32 1.442695, %v1516_v63  ;;  %v2093_v14 = vsel %vm1325_vm8, %v5046_v25, %v1965_v51  ;;  %v5209_v37 = vpop.f32.mrb[53].mxu0 }
 0x16f   : > { %3850 = vst [vmem:[%s4700_s13 + $0x140] sm:$0xff] %v3694_v31   ;;  %vm1323_vm10 = vcmp.gt.f32.partialorder %v5077_v53, 0.0  ;;  %v1457_v45 = vmin.f32 %v5171_v54, 0.0  ;;  %v3189_v41 = vadd.f32 -1.0, %v4273_v30  ;;  %vm1326_vm11 = vcmp.gt.f32.partialorder %v5113_v34, 0.0 }
 0x170   : > { %v1963_v38 = vmul.f32 1.6732632, %v3125_v29  ;;  %4280 = vpow2.f32 %v1729_v47  ;;  %v1521_v17 = vmin.f32 %v5175_v36, 0.0  ;;  %v2157_v24 = vsel %vm1389_vm9, %v5060_v28, %v2029_v20  ;;  %v5203_v28 = vpop.f32.mrb[52].mxu1 }
 0x171   : > { %vm1387_vm12 = vcmp.gt.f32.partialorder %v5087_v56, 0.0  ;;  %vm1390_vm13 = vcmp.gt.f32.partialorder %v5133_v21, 0.0  ;;  %v1611_v9 = vmul.f32 1.442695, %v1457_v45  ;;  %v1455_v25 = vmin.f32 %v5179_v42, 0.0  ;;  %v5222_v45 = vpop.f32.mrb[53].mxu1 }
 0x172   : > { %v5195_v0 = vadd.f32 %v5109_v3, %v4839_v26  ;;  %v2221_v15 = vmul.f32 1.050701, %v2093_v14  ;;  %v1739_v8 = vmul.f32 1.442695, %v1521_v17  ;;  %v5199_v46 = vadd.f32 %v5109_v3, %v4843_v35 }
 0x173   : > { %v4275_v55 = vpop.eup %4274  ;;  %v2091_v6 = vsel %vm1323_vm10, %v5077_v53, %v1963_v38  ;;  %vm1324_vm14 = vcmp.gt.f32.partialorder %v5137_v7, 0.0  ;;  %4282 = vpow2.f32 %v1611_v9  ;;  %v1607_v26 = vmul.f32 1.442695, %v1455_v25 }
 0x174   : > { %v3128_v51 = vadd.f32 -1.0, %v4275_v55  ;;  %v2285_v62 = vmul.f32 1.050701, %v2157_v24  ;;  %v2027_v31 = vmul.f32 1.6732632, %v3189_v41  ;;  %4284 = vpow2.f32 %v1739_v8 }
 0x175   : > { %v1519_v35 = vmin.f32 %v5195_v0, 0.0  ;;  %v4277_v20 = vpop.eup %4276  ;;  %4286 = vpow2.f32 %v1607_v26  ;;  %v1458_v30 = vmin.f32 %v5199_v46, 0.0  ;;  %v5215_v53 = vadd.f32 %v5109_v3, %v4845_v5 }
 0x176   : > { %v1966_v63 = vmul.f32 1.6732632, %v3128_v51  ;;  %v2219_v29 = vmul.f32 1.050701, %v2091_v6  ;;  %v3192_v47 = vadd.f32 -1.0, %v4277_v20  ;;  %vm1388_vm15 = vcmp.gt.f32.partialorder %v5157_v19, 0.0 }
 0x177   : > { %v1735_v14 = vmul.f32 1.442695, %v1519_v35  ;;  %v5220_v38 = vadd.f32 %v5109_v3, %v4851_v39  ;;  %v1613_v24 = vmul.f32 1.442695, %v1458_v30  ;;  %v1522_v5 = vmin.f32 %v5215_v53, 0.0  ;;  %v5234_v51 = vpop.f32.mrb[54].mxu0 }
 0x178   : > { %v4279_v41 = vpop.eup %4278  ;;  %v2094_v17 = vsel %vm1326_vm11, %v5113_v34, %v1966_v63  ;;  %v5230_v9 = vadd.f32 %v5109_v3, %v4853_v43  ;;  %v2030_v55 = vmul.f32 1.6732632, %v3192_v47  ;;  %vm1329_vm0 = vcmp.gt.f32.partialorder %v5171_v54, 0.0  ;;  %v5236_v34 = vpop.f32.mrb[54].mxu1 }
 0x179   : > { %v2222_v25 = vmul.f32 1.050701, %v2094_v17  ;;  %v3126_v8 = vadd.f32 -1.0, %v4279_v41  ;;  %4288 = vpow2.f32 %v1735_v14  ;;  %v1741_v39 = vmul.f32 1.442695, %v1522_v5 }
 0x17a   : > { %4290 = vpow2.f32 %v1613_v24  ;;  %v1456_v6 = vmin.f32 %v5220_v38, 0.0  ;;  %v4281_v26 = vpop.eup %4280  ;;  %v2155_v43 = vsel %vm1387_vm12, %v5087_v56, %v2027_v31  ;;  %v2158_v20 = vsel %vm1390_vm13, %v5133_v21, %v2030_v55 }
 0x17b   : > { %v3549_v35 = vpack.c.bf16 %v2222_v25, %v2221_v15  ;;  %v1964_v63 = vmul.f32 1.6732632, %v3126_v8  ;;  %v2286_v30 = vmul.f32 1.050701, %v2158_v20  ;;  %v3190_v47 = vadd.f32 -1.0, %v4281_v26  ;;  %v5257_v15 = vpop.f32.mrb[55].mxu0 }
 0x17c   : > { %4292 = vpow2.f32 %v1741_v39  ;;  %v1609_v14 = vmul.f32 1.442695, %v1456_v6  ;;  %v1520_v17 = vmin.f32 %v5230_v9, 0.0  ;;  %v5251_v56 = vadd.f32 %v5109_v3, %v4878_v18  ;;  %v5261_v39 = vpop.f32.mrb[55].mxu1 }
 0x17d   : > { %3821 = vst [vmem:[%s4700_s13 + $0x58] sm:$0xff] %v3549_v35   ;;  %v2092_v41 = vsel %vm1324_vm14, %v5137_v7, %v1964_v63  ;;  %v5255_v21 = vadd.f32 %v5109_v3, %v4880_v48  ;;  %v4283_v31 = vpop.eup %4282  ;;  %v3709_v24 = vpack.c.bf16 %v2286_v30, %v2285_v62  ;;  %v2028_v25 = vmul.f32 1.6732632, %v3190_v47 }
 0x17e   : > { %v2220_v5 = vmul.f32 1.050701, %v2092_v41  ;;  %4294 = vpow2.f32 %v1609_v14  ;;  %v4285_v55 = vpop.eup %4284  ;;  %v3131_v7 = vadd.f32 -1.0, %v4283_v31  ;;  %vm1393_vm1 = vcmp.gt.f32.partialorder %v5175_v36, 0.0 }
 0x17f   : > { %v1737_v8 = vmul.f32 1.442695, %v1520_v17  ;;  %v1461_v18 = vmin.f32 %v5251_v56, 0.0  ;;  %v4287_v6 = vpop.eup %4286  ;;  %v2283_v48 = vmul.f32 1.050701, %v2155_v43  ;;  %3853 = vst [vmem:[%s4700_s13 + $0x158] sm:$0xff] %v3709_v24   ;;  %v2156_v62 = vsel %vm1388_vm15, %v5157_v19, %v2028_v25 }
 0x180   : > { %v3544_v26 = vpack.c.bf16 %v2220_v5, %v2219_v29  ;;  %v3195_v35 = vadd.f32 -1.0, %v4285_v55  ;;  %v2284_v20 = vmul.f32 1.050701, %v2156_v62  ;;  %v1969_v63 = vmul.f32 1.6732632, %v3131_v7 }
 0x181   : > { %v3129_v30 = vadd.f32 -1.0, %v4287_v6  ;;  %4296 = vpow2.f32 %v1737_v8  ;;  %v1619_v14 = vmul.f32 1.442695, %v1461_v18  ;;  %v1525_v41 = vmin.f32 %v5255_v21, 0.0  ;;  %v5288_v18 = vpop.f32.mrb[56].mxu0 }
 0x182   : > { %3820 = vst [vmem:[%s4700_s13 + $0x50] sm:$0xff] %v3544_v26   ;;  %v2033_v47 = vmul.f32 1.6732632, %v3195_v35  ;;  %v5271_v43 = vadd.f32 %v5109_v3, %v4886_v33  ;;  %v3704_v17 = vpack.c.bf16 %v2284_v20, %v2283_v48  ;;  %v2097_v19 = vsel %vm1329_vm0, %v5171_v54, %v1969_v63  ;;  %v6006_v33 = vld [vmem:[#allocation2_spill] sm:$0xff]  ;;  %v5293_v20 = vpop.f32.mrb[56].mxu1 }
 0x183   : > { %v4289_v29 = vpop.eup %4288  ;;  %vm1327_vm2 = vcmp.gt.f32.partialorder %v5179_v42, 0.0  ;;  %v1967_v31 = vmul.f32 1.6732632, %v3129_v30  ;;  %vm1391_vm3 = vcmp.gt.f32.partialorder %v5195_v0, 0.0  ;;  %vm1330_vm4 = vcmp.gt.f32.partialorder %v5199_v46, 0.0 }
 0x184   : > { %v4291_v24 = vpop.eup %4290  ;;  %v2161_v5 = vsel %vm1393_vm1, %v5175_v36, %v2033_v47  ;;  %4298 = vpow2.f32 %v1619_v14  ;;  %v5284_v25 = vadd.f32 %v5109_v3, %v6006_v33  ;;  %3852 = vst [vmem:[%s4700_s13 + $0x150] sm:$0xff] %v3704_v17   ;;  %v3193_v55 = vadd.f32 -1.0, %v4289_v29  ;;  %v5302_v17 = vpop.f32.mrb[57].mxu1 }
 0x185   : > { %v2095_v54 = vsel %vm1327_vm2, %v5179_v42, %v1967_v31  ;;  %v3132_v7 = vadd.f32 -1.0, %v4291_v24  ;;  %v1747_v8 = vmul.f32 1.442695, %v1525_v41  ;;  %v2225_v48 = vmul.f32 1.050701, %v2097_v19  ;;  %v5295_v42 = vpop.f32.mrb[57].mxu0 }
 0x186   : > { %v4293_v6 = vpop.eup %4292  ;;  %v2289_v36 = vmul.f32 1.050701, %v2161_v5  ;;  %vm1394_vm5 = vcmp.gt.f32.partialorder %v5215_v53, 0.0  ;;  %v1459_v26 = vmin.f32 %v5271_v43, 0.0  ;;  %vm1328_vm6 = vcmp.gt.f32.partialorder %v5220_v38, 0.0  ;;  %v6007_v41 = vld [vmem:[#allocation3_spill] sm:$0xff] }
 0x187   : > { %v1970_v62 = vmul.f32 1.6732632, %v3132_v7  ;;  %v3196_v35 = vadd.f32 -1.0, %v4293_v6  ;;  %4300 = vpow2.f32 %v1747_v8  ;;  %v2223_v30 = vmul.f32 1.050701, %v2095_v54  ;;  %v5307_v33 = vpop.f32.mrb[58].mxu0 }
 0x188   : > { %v4295_v63 = vpop.eup %4294  ;;  %v1615_v47 = vmul.f32 1.442695, %v1459_v26  ;;  %v1523_v14 = vmin.f32 %v5284_v25, 0.0  ;;  %v5300_v29 = vadd.f32 %v5109_v3, %v6007_v41  ;;  %v2031_v19 = vmul.f32 1.6732632, %v3193_v55  ;;  %v5310_v8 = vpop.f32.mrb[58].mxu1 }
 0x189   : > { %v2098_v31 = vsel %vm1330_vm4, %v5199_v46, %v1970_v62  ;;  %v2034_v24 = vmul.f32 1.6732632, %v3196_v35  ;;  %v3130_v5 = vadd.f32 -1.0, %v4295_v63  ;;  %vm1392_vm7 = vcmp.gt.f32.partialorder %v5230_v9, 0.0  ;;  %6008 = vst [vmem:[#allocation2_spill] sm:$0xff] %v5310_v8  ;;  %v6009_v62 = vld [vmem:[#allocation4_spill] sm:$0xff] }
 0x18a   : > { %v2226_v7 = vmul.f32 1.050701, %v2098_v31  ;;  %4302 = vpow2.f32 %v1615_v47  ;;  %v1743_v54 = vmul.f32 1.442695, %v1523_v14  ;;  %v1462_v46 = vmin.f32 %v5300_v29, 0.0 }
 0x18b   : > { %v4297_v6 = vpop.eup %4296  ;;  %v2162_v55 = vsel %vm1394_vm5, %v5215_v53, %v2034_v24  ;;  %v1968_v26 = vmul.f32 1.6732632, %v3130_v5  ;;  %v5318_v35 = vadd.f32 %v5109_v3, %v6009_v62  ;;  %v2159_v47 = vsel %vm1391_vm3, %v5195_v0, %v2031_v19 }
 0x18c   : > { %v3559_v63 = vpack.c.bf16 %v2226_v7, %v2225_v48  ;;  %v2290_v41 = vmul.f32 1.050701, %v2162_v55  ;;  %v3194_v31 = vadd.f32 -1.0, %v4297_v6  ;;  %4304 = vpow2.f32 %v1743_v54  ;;  %v6010_v7 = vld [vmem:[#allocation5_spill] sm:$0xff]  ;;  %v5338_v55 = vpop.f32.mrb[59].mxu1 }
 0x18d   : > { %v2096_v53 = vsel %vm1328_vm6, %v5220_v38, %v1968_v26  ;;  %v1621_v14 = vmul.f32 1.442695, %v1462_v46  ;;  %v1526_v24 = vmin.f32 %v5318_v35, 0.0  ;;  %v5330_v54 = vadd.f32 %v5109_v3, %v6010_v7  ;;  %v5336_v38 = vpop.f32.mrb[59].mxu0 }
 0x18e   : > { %v4299_v5 = vpop.eup %4298  ;;  %3823 = vst [vmem:[%s4700_s13 + $0x68] sm:$0xff] %v3559_v63   ;;  %v3719_v62 = vpack.c.bf16 %v2290_v41, %v2289_v36  ;;  %v2224_v8 = vmul.f32 1.050701, %v2096_v53  ;;  %v2032_v48 = vmul.f32 1.6732632, %v3194_v31  ;;  %v5334_v19 = vadd.f32 %v5109_v3, %v4906_v57 }
 0x18f   : > { %v3135_v6 = vadd.f32 -1.0, %v4299_v5  ;;  %4306 = vpow2.f32 %v1621_v14  ;;  %v1749_v0 = vmul.f32 1.442695, %v1526_v24  ;;  %v1460_v46 = vmin.f32 %v5330_v54, 0.0 }
 0x190   : > { %3855 = vst [vmem:[%s4700_s13 + $0x168] sm:$0xff] %v3719_v62   ;;  %v3554_v36 = vpack.c.bf16 %v2224_v8, %v2223_v30  ;;  %v2160_v26 = vsel %vm1392_vm7, %v5230_v9, %v2032_v48  ;;  %v2287_v41 = vmul.f32 1.050701, %v2159_v47  ;;  %v1524_v14 = vmin.f32 %v5334_v19, 0.0 }
 0x191   : > { %v4301_v63 = vpop.eup %4300  ;;  %v2288_v31 = vmul.f32 1.050701, %v2160_v26  ;;  %4308 = vpow2.f32 %v1749_v0  ;;  %v1617_v53 = vmul.f32 1.442695, %v1460_v46  ;;  %v5349_v24 = vadd.f32 %v5109_v3, %v4917_v61 }
 0x192   : > { %3822 = vst [vmem:[%s4700_s13 + $0x60] sm:$0xff] %v3554_v36   ;;  %v3199_v57 = vadd.f32 -1.0, %v4301_v63  ;;  %v1973_v8 = vmul.f32 1.6732632, %v3135_v6  ;;  %v5353_v9 = vadd.f32 %v5109_v3, %v4919_v60  ;;  %v5357_v47 = vadd.f32 %v5109_v3, %v4924_v58 }
 0x193   : > { %v3714_v30 = vpack.c.bf16 %v2288_v31, %v2287_v41  ;;  %4310 = vpow2.f32 %v1617_v53  ;;  %v1745_v48 = vmul.f32 1.442695, %v1524_v14  ;;  %vm1333_vm8 = vcmp.gt.f32.partialorder %v5251_v56, 0.0  ;;  %v5383_v14 = vpop.f32.mrb[60].mxu0 }
 0x194   : > { %v4303_v5 = vpop.eup %4302  ;;  %v2037_v62 = vmul.f32 1.6732632, %v3199_v57  ;;  %vm1397_vm9 = vcmp.gt.f32.partialorder %v5255_v21, 0.0  ;;  %v1465_v7 = vmin.f32 %v5349_v24, 0.0  ;;  %vm1331_vm10 = vcmp.gt.f32.partialorder %v5271_v43, 0.0 }
 0x195   : > { %3854 = vst [vmem:[%s4700_s13 + $0x160] sm:$0xff] %v3714_v30   ;;  %v3133_v61 = vadd.f32 -1.0, %v4303_v5  ;;  %vm1334_vm11 = vcmp.gt.f32.partialorder %v5300_v29, 0.0  ;;  %4312 = vpow2.f32 %v1745_v48  ;;  %v1529_v60 = vmin.f32 %v5353_v9, 0.0  ;;  %v5385_v30 = vpop.f32.mrb[60].mxu1 }
 0x196   : > { %v4305_v6 = vpop.eup %4304  ;;  %v2101_v58 = vsel %vm1333_vm8, %v5251_v56, %v1973_v8  ;;  %v2165_v0 = vsel %vm1397_vm9, %v5255_v21, %v2037_v62  ;;  %v1463_v26 = vmin.f32 %v5357_v47, 0.0  ;;  %v1627_v63 = vmul.f32 1.442695, %v1465_v7 }
 0x197   : > { %v1971_v36 = vmul.f32 1.6732632, %v3133_v61  ;;  %v3197_v46 = vadd.f32 -1.0, %v4305_v6  ;;  %v1755_v41 = vmul.f32 1.442695, %v1529_v60  ;;  %v5371_v31 = vadd.f32 %v5109_v3, %v4926_v59  ;;  %v5394_v61 = vpop.f32.mrb[61].mxu1 }
 0x198   : > { %vm1395_vm12 = vcmp.gt.f32.partialorder %v5284_v25, 0.0  ;;  %vm1398_vm13 = vcmp.gt.f32.partialorder %v5318_v35, 0.0  ;;  %v1623_v53 = vmul.f32 1.442695, %v1463_v26  ;;  %v5377_v56 = vadd.f32 %v5109_v3, %v4932_v22 }
 0x199   : > { %v4307_v57 = vpop.eup %4306  ;;  %v5381_v21 = vadd.f32 %v5109_v3, %v4934_v23  ;;  %v2229_v59 = vmul.f32 1.050701, %v2101_v58  ;;  %v2099_v8 = vsel %vm1331_vm10, %v5271_v43, %v1971_v36  ;;  %4314 = vpow2.f32 %v1627_v63  ;;  %v5392_v23 = vpop.f32.mrb[61].mxu0 }
 0x19a   : > { %v3136_v5 = vadd.f32 -1.0, %v4307_v57  ;;  %v2293_v48 = vmul.f32 1.050701, %v2165_v0  ;;  %vm1332_vm14 = vcmp.gt.f32.partialorder %v5330_v54, 0.0  ;;  %4316 = vpow2.f32 %v1755_v41 }
 0x19b   : > { %v4309_v62 = vpop.eup %4308  ;;  %v1527_v22 = vmin.f32 %v5371_v31, 0.0  ;;  %v2035_v7 = vmul.f32 1.6732632, %v3197_v46  ;;  %4318 = vpow2.f32 %v1623_v53  ;;  %v2227_v58 = vmul.f32 1.050701, %v2099_v8 }
 0x19c   : > { %v1974_v6 = vmul.f32 1.6732632, %v3136_v5  ;;  %v3200_v60 = vadd.f32 -1.0, %v4309_v62  ;;  %v1466_v43 = vmin.f32 %v5377_v56, 0.0  ;;  %v1530_v36 = vmin.f32 %v5381_v21, 0.0 }
 0x19d   : > { %v1751_v26 = vmul.f32 1.442695, %v1527_v22  ;;  %v4311_v0 = vpop.eup %4310  ;;  %v5403_v57 = vadd.f32 %v5109_v3, %v4941_v32  ;;  %v5407_v46 = vadd.f32 %v5109_v3, %v4943_v44  ;;  %vm1396_vm15 = vcmp.gt.f32.partialorder %v5334_v19, 0.0 }
 0x19e   : > { %v2102_v63 = vsel %vm1334_vm11, %v5300_v29, %v1974_v6  ;;  %v2038_v41 = vmul.f32 1.6732632, %v3200_v60  ;;  %v3134_v8 = vadd.f32 -1.0, %v4311_v0  ;;  %v1629_v5 = vmul.f32 1.442695, %v1466_v43  ;;  %v5414_v6 = vpop.f32.mrb[62].mxu0 }
 0x19f   : > { %v2230_v53 = vmul.f32 1.050701, %v2102_v63  ;;  %4320 = vpow2.f32 %v1751_v26  ;;  %v4313_v62 = vpop.eup %4312  ;;  %v1757_v29 = vmul.f32 1.442695, %v1530_v36  ;;  %v1464_v32 = vmin.f32 %v5403_v57, 0.0  ;;  %v5416_v60 = vpop.f32.mrb[62].mxu1 }
 0x1a0   : > { %v2166_v22 = vsel %vm1398_vm13, %v5318_v35, %v2038_v41  ;;  %v1972_v0 = vmul.f32 1.6732632, %v3134_v8  ;;  %v3198_v26 = vadd.f32 -1.0, %v4313_v62  ;;  %v2163_v43 = vsel %vm1395_vm12, %v5284_v25, %v2035_v7  ;;  %v5424_v41 = vpop.f32.mrb[63].mxu0 }
 0x1a1   : > { %v3569_v44 = vpack.c.bf16 %v2230_v53, %v2229_v59  ;;  %v2294_v63 = vmul.f32 1.050701, %v2166_v22  ;;  %vm1337_vm0 = vcmp.gt.f32.partialorder %v5349_v24, 0.0  ;;  %vm1401_vm1 = vcmp.gt.f32.partialorder %v5353_v9, 0.0  ;;  %v5434_v22 = vpop.f32.mrb[63].mxu1 }
 0x1a2   : > { %4322 = vpow2.f32 %v1629_v5  ;;  %v1625_v35 = vmul.f32 1.442695, %v1464_v32  ;;  %v1528_v36 = vmin.f32 %v5407_v46, 0.0  ;;  %v2100_v53 = vsel %vm1332_vm14, %v5330_v54, %v1972_v0  ;;  %6011 = vst [vmem:[#allocation3_spill] sm:$0xff] %v5434_v22 }
 0x1a3   : > { %3825 = vst [vmem:[%s4700_s13 + $0x78] sm:$0xff] %v3569_v44   ;;  %v3729_v59 = vpack.c.bf16 %v2294_v63, %v2293_v48  ;;  %v2036_v8 = vmul.f32 1.6732632, %v3198_v26  ;;  %4324 = vpow2.f32 %v1757_v29  ;;  %v4315_v25 = vpop.eup %4314  ;;  %v2228_v7 = vmul.f32 1.050701, %v2100_v53  ;;  %v6012_v29 = vld [vmem:[#allocation6_spill] sm:$0xff] }
 0x1a4   : > { %4326 = vpow2.f32 %v1625_v35  ;;  %v1753_v62 = vmul.f32 1.442695, %v1528_v36  ;;  %v5432_v5 = vadd.f32 %v5109_v3, %v4966_v40  ;;  %v4317_v32 = vpop.eup %4316  ;;  %v2291_v44 = vmul.f32 1.050701, %v2163_v43 }
 0x1a5   : > { %3857 = vst [vmem:[%s4700_s13 + $0x178] sm:$0xff] %v3729_v59   ;;  %v2164_v54 = vsel %vm1396_vm15, %v5334_v19, %v2036_v8  ;;  %v3139_v48 = vadd.f32 -1.0, %v4315_v25  ;;  %v5442_v63 = vadd.f32 %v5109_v3, %v6012_v29  ;;  %v4319_v0 = vpop.eup %4318  ;;  %v3564_v26 = vpack.c.bf16 %v2228_v7, %v2227_v58  ;;  %v6013_v59 = vld [vmem:[#allocation7_spill] sm:$0xff] }
 0x1a6   : > { %v2292_v35 = vmul.f32 1.050701, %v2164_v54  ;;  %v3203_v40 = vadd.f32 -1.0, %v4317_v32  ;;  %4328 = vpow2.f32 %v1753_v62  ;;  %v3137_v53 = vadd.f32 -1.0, %v4319_v0 }
 0x1a7   : > { %v1977_v36 = vmul.f32 1.6732632, %v3139_v48  ;;  %v1469_v43 = vmin.f32 %v5432_v5, 0.0  ;;  %v5447_v22 = vadd.f32 %v5109_v3, %v6013_v59  ;;  %3824 = vst [vmem:[%s4700_s13 + $0x70] sm:$0xff] %v3564_v26   ;;  %vm1335_vm2 = vcmp.gt.f32.partialorder %v5357_v47, 0.0 }
 0x1a8   : > { %v3724_v19 = vpack.c.bf16 %v2292_v35, %v2291_v44  ;;  %v2041_v8 = vmul.f32 1.6732632, %v3203_v40  ;;  %v1533_v25 = vmin.f32 %v5442_v63, 0.0  ;;  %v1975_v7 = vmul.f32 1.6732632, %v3137_v53  ;;  %v6014_v35 = vld [vmem:[#allocation8_spill] sm:$0xff] }
 0x1a9   : > { %v4321_v58 = vpop.eup %4320  ;;  %vm1399_vm3 = vcmp.gt.f32.partialorder %v5371_v31, 0.0  ;;  %vm1338_vm4 = vcmp.gt.f32.partialorder %v5377_v56, 0.0  ;;  %v1635_v62 = vmul.f32 1.442695, %v1469_v43  ;;  %vm1402_vm5 = vcmp.gt.f32.partialorder %v5381_v21, 0.0 }
 0x1aa   : > { %3856 = vst [vmem:[%s4700_s13 + $0x170] sm:$0xff] %v3724_v19   ;;  %v3201_v32 = vadd.f32 -1.0, %v4321_v58  ;;  %vm1336_vm6 = vcmp.gt.f32.partialorder %v5403_v57, 0.0  ;;  %v1763_v54 = vmul.f32 1.442695, %v1533_v25  ;;  %v2105_v44 = vsel %vm1337_vm0, %v5349_v24, %v1977_v36 }
 0x1ab   : > { %v2169_v48 = vsel %vm1401_vm1, %v5353_v9, %v2041_v8  ;;  %4330 = vpow2.f32 %v1635_v62  ;;  %v1467_v29 = vmin.f32 %v5447_v22, 0.0  ;;  %v2103_v26 = vsel %vm1335_vm2, %v5357_v47, %v1975_v7  ;;  %v6015_v9 = vld [vmem:[#allocation9_spill] sm:$0xff] }
 0x1ac   : > { %v4323_v0 = vpop.eup %4322  ;;  %vm1400_vm7 = vcmp.gt.f32.partialorder %v5407_v46, 0.0  ;;  %4332 = vpow2.f32 %v1763_v54  ;;  %v5470_v40 = vadd.f32 %v5109_v3, %v6014_v35  ;;  %v2039_v36 = vmul.f32 1.6732632, %v3201_v32 }
 0x1ad   : > { %v4325_v24 = vpop.eup %4324  ;;  %v3140_v53 = vadd.f32 -1.0, %v4323_v0  ;;  %v1631_v43 = vmul.f32 1.442695, %v1467_v29  ;;  %v5474_v59 = vadd.f32 %v5109_v3, %v6015_v9  ;;  %v2233_v8 = vmul.f32 1.050701, %v2105_v44 }
 0x1ae   : > { %v4327_v19 = vpop.eup %4326  ;;  %v2297_v25 = vmul.f32 1.050701, %v2169_v48  ;;  %v3204_v58 = vadd.f32 -1.0, %v4325_v24  ;;  %v1531_v47 = vmin.f32 %v5470_v40, 0.0  ;;  %v2231_v7 = vmul.f32 1.050701, %v2103_v26 }
 0x1af   : > { %v1978_v62 = vmul.f32 1.6732632, %v3140_v53  ;;  %v3138_v54 = vadd.f32 -1.0, %v4327_v19  ;;  %v5479_v35 = vadd.f32 %v5109_v3, %v4984_v50  ;;  %4334 = vpow2.f32 %v1631_v43 }
 0x1b0   : > { %v4329_v32 = vpop.eup %4328  ;;  %v2042_v0 = vmul.f32 1.6732632, %v3204_v58  ;;  %v1759_v29 = vmul.f32 1.442695, %v1531_v47  ;;  %v1470_v9 = vmin.f32 %v5474_v59, 0.0  ;;  %v2167_v44 = vsel %vm1399_vm3, %v5371_v31, %v2039_v36 }
 0x1b1   : > { %v2106_v48 = vsel %vm1338_vm4, %v5377_v56, %v1978_v62  ;;  %v1976_v26 = vmul.f32 1.6732632, %v3138_v54  ;;  %v3202_v24 = vadd.f32 -1.0, %v4329_v32  ;;  %v1534_v36 = vmin.f32 %v5479_v35, 0.0 }
 0x1b2   : > { %v2234_v53 = vmul.f32 1.050701, %v2106_v48  ;;  %v2170_v50 = vsel %vm1402_vm5, %v5381_v21, %v2042_v0  ;;  %4336 = vpow2.f32 %v1759_v29  ;;  %v1637_v43 = vmul.f32 1.442695, %v1470_v9 }
 0x1b3   : > { %v2298_v19 = vmul.f32 1.050701, %v2170_v50  ;;  %v2104_v58 = vsel %vm1336_vm6, %v5403_v57, %v1976_v26  ;;  %v2040_v31 = vmul.f32 1.6732632, %v3202_v24  ;;  %v5497_v62 = vadd.f32 %v5109_v3, %v4990_v16  ;;  %v6016_v50 = vld [vmem:[#allocation10_spill] sm:$0xff] }
 0x1b4   : > { %v3579_v56 = vpack.c.bf16 %v2234_v53, %v2233_v8  ;;  %v2232_v47 = vmul.f32 1.050701, %v2104_v58  ;;  %4338 = vpow2.f32 %v1637_v43  ;;  %v1765_v0 = vmul.f32 1.442695, %v1534_v36 }
 0x1b5   : > { %v4331_v21 = vpop.eup %4330  ;;  %v3739_v54 = vpack.c.bf16 %v2298_v19, %v2297_v25  ;;  %v2168_v32 = vsel %vm1400_vm7, %v5407_v46, %v2040_v31  ;;  %v5504_v57 = vadd.f32 %v5109_v3, %v4993_v12  ;;  %v2295_v8 = vmul.f32 1.050701, %v2167_v44 }
 0x1b6   : > { %v4333_v29 = vpop.eup %4332  ;;  %3827 = vst [vmem:[%s4700_s13 + $0x88] sm:$0xff] %v3579_v56   ;;  %v3574_v9 = vpack.c.bf16 %v2232_v47, %v2231_v7  ;;  %v2296_v48 = vmul.f32 1.050701, %v2168_v32  ;;  %v3143_v16 = vadd.f32 -1.0, %v4331_v21  ;;  %4340 = vpow2.f32 %v1765_v0  ;;  %v6017_v7 = vld [vmem:[#allocation11_spill] sm:$0xff] }
 0x1b7   : > { %3859 = vst [vmem:[%s4700_s13 + $0x188] sm:$0xff] %v3739_v54   ;;  %v3207_v26 = vadd.f32 -1.0, %v4333_v29  ;;  %v1468_v25 = vmin.f32 %v5497_v62, 0.0  ;;  %v1532_v53 = vmin.f32 %v5504_v57, 0.0  ;;  %v5513_v12 = vadd.f32 %v5109_v3, %v6016_v50 }
 0x1b8   : > { %3826 = vst [vmem:[%s4700_s13 + $0x80] sm:$0xff] %v3574_v9   ;;  %v3734_v24 = vpack.c.bf16 %v2296_v48, %v2295_v8  ;;  %v1981_v46 = vmul.f32 1.6732632, %v3143_v16  ;;  %v5517_v19 = vadd.f32 %v5109_v3, %v6017_v7  ;;  %v5522_v36 = vadd.f32 %v5109_v3, %v5026_v52 }
 0x1b9   : > { %v2045_v44 = vmul.f32 1.6732632, %v3207_v26  ;;  %v1633_v43 = vmul.f32 1.442695, %v1468_v25  ;;  %v4335_v58 = vpop.eup %4334  ;;  %v1761_v31 = vmul.f32 1.442695, %v1532_v53 }
 0x1ba   : > { %3858 = vst [vmem:[%s4700_s13 + $0x180] sm:$0xff] %v3734_v24   ;;  %vm1341_vm8 = vcmp.gt.f32.partialorder %v5432_v5, 0.0  ;;  %vm1405_vm9 = vcmp.gt.f32.partialorder %v5442_v63, 0.0  ;;  %v1473_v56 = vmin.f32 %v5513_v12, 0.0  ;;  %vm1339_vm10 = vcmp.gt.f32.partialorder %v5447_v22, 0.0 }
 0x1bb   : > { %4342 = vpow2.f32 %v1633_v43  ;;  %v2109_v21 = vsel %vm1341_vm8, %v5432_v5, %v1981_v46  ;;  %v2173_v54 = vsel %vm1405_vm9, %v5442_v63, %v2045_v44  ;;  %v3141_v32 = vadd.f32 -1.0, %v4335_v58  ;;  %v6018_v63 = vld [vmem:[#allocation12_spill] sm:$0xff] }
 0x1bc   : > { %v4337_v47 = vpop.eup %4336  ;;  %4344 = vpow2.f32 %v1761_v31  ;;  %vm1403_vm11 = vcmp.gt.f32.partialorder %v5470_v40, 0.0  ;;  %vm1342_vm12 = vcmp.gt.f32.partialorder %v5474_v59, 0.0  ;;  %v1643_v52 = vmul.f32 1.442695, %v1473_v56 }
 0x1bd   : > { %v1537_v0 = vmin.f32 %v5517_v19, 0.0  ;;  %v3205_v8 = vadd.f32 -1.0, %v4337_v47  ;;  %v1471_v9 = vmin.f32 %v5522_v36, 0.0  ;;  %v5536_v5 = vadd.f32 %v5109_v3, %v5028_v11 }
 0x1be   : > { %v4339_v29 = vpop.eup %4338  ;;  %v5540_v48 = vadd.f32 %v5109_v3, %v6018_v63  ;;  %v2237_v16 = vmul.f32 1.050701, %v2109_v21  ;;  %v2301_v26 = vmul.f32 1.050701, %v2173_v54  ;;  %4346 = vpow2.f32 %v1643_v52  ;;  %v6019_v21 = vld [vmem:[#allocation13_spill] sm:$0xff]  ;;  %v6021_v63 = vld [vmem:[#allocation15_spill] sm:$0xff] }
 0x1bf   : > { %v3144_v25 = vadd.f32 -1.0, %v4339_v29  ;;  %vm1406_vm13 = vcmp.gt.f32.partialorder %v5479_v35, 0.0  ;;  %v1771_v24 = vmul.f32 1.442695, %v1537_v0  ;;  %v1639_v46 = vmul.f32 1.442695, %v1471_v9 }
 0x1c0   : > { %v1535_v53 = vmin.f32 %v5536_v5, 0.0  ;;  %v4341_v50 = vpop.eup %4340  ;;  %v1979_v44 = vmul.f32 1.6732632, %v3141_v32  ;;  %vm1340_vm14 = vcmp.gt.f32.partialorder %v5497_v62, 0.0  ;;  %v1474_v11 = vmin.f32 %v5540_v48, 0.0  ;;  %v6020_v0 = vld [vmem:[#allocation14_spill] sm:$0xff] }
 0x1c1   : > { %v1982_v43 = vmul.f32 1.6732632, %v3144_v25  ;;  %v2043_v7 = vmul.f32 1.6732632, %v3205_v8  ;;  %v3208_v58 = vadd.f32 -1.0, %v4341_v50  ;;  %vm1404_vm15 = vcmp.gt.f32.partialorder %v5504_v57, 0.0 }
 0x1c2   : > { %4348 = vpow2.f32 %v1771_v24  ;;  %v1767_v31 = vmul.f32 1.442695, %v1535_v53  ;;  %v1645_v47 = vmul.f32 1.442695, %v1474_v11  ;;  %v5552_v54 = vadd.f32 %v5109_v3, %v6019_v21 }
 0x1c3   : > { %v2110_v56 = vsel %vm1342_vm12, %v5474_v59, %v1982_v43  ;;  %4350 = vpow2.f32 %v1639_v46  ;;  %v2046_v52 = vmul.f32 1.6732632, %v3208_v58  ;;  %v5556_v29 = vadd.f32 %v5109_v3, %v6020_v0 }
 0x1c4   : > { %v2238_v32 = vmul.f32 1.050701, %v2110_v56  ;;  %4352 = vpow2.f32 %v1767_v31  ;;  %v2107_v9 = vsel %vm1339_vm10, %v5447_v22, %v1979_v44  ;;  %v1538_v59 = vmin.f32 %v5552_v54, 0.0 }
 0x1c5   : > { %v4343_v8 = vpop.eup %4342  ;;  %4354 = vpow2.f32 %v1645_v47  ;;  %v5564_v25 = vadd.f32 %v5109_v3, %v6021_v63  ;;  %v2171_v46 = vsel %vm1403_vm11, %v5470_v40, %v2043_v7  ;;  %v2174_v50 = vsel %vm1406_vm13, %v5479_v35, %v2046_v52 }
 0x1c6   : > { %v4345_v24 = vpop.eup %4344  ;;  %v3589_v53 = vpack.c.bf16 %v2238_v32, %v2237_v16  ;;  %v3142_v43 = vadd.f32 -1.0, %v4343_v8  ;;  %v2302_v11 = vmul.f32 1.050701, %v2174_v50  ;;  %vm1345_vm0 = vcmp.gt.f32.partialorder %v5513_v12, 0.0 }
 0x1c7   : > { %v3206_v22 = vadd.f32 -1.0, %v4345_v24  ;;  %v1773_v44 = vmul.f32 1.442695, %v1538_v59  ;;  %v1472_v58 = vmin.f32 %v5556_v29, 0.0  ;;  %v2235_v31 = vmul.f32 1.050701, %v2107_v9 }
 0x1c8   : > { %3829 = vst [vmem:[%s4700_s13 + $0x98] sm:$0xff] %v3589_v53   ;;  %v1980_v56 = vmul.f32 1.6732632, %v3142_v43  ;;  %vm1409_vm1 = vcmp.gt.f32.partialorder %v5517_v19, 0.0  ;;  %v1536_v40 = vmin.f32 %v5564_v25, 0.0  ;;  %v5579_v16 = vadd.f32 %v5109_v3, %v5066_v10  ;;  %v4347_v35 = vpop.eup %4346 }
 0x1c9   : > { %v3749_v7 = vpack.c.bf16 %v2302_v11, %v2301_v26  ;;  %v2044_v47 = vmul.f32 1.6732632, %v3206_v22  ;;  %4356 = vpow2.f32 %v1773_v44  ;;  %v1641_v21 = vmul.f32 1.442695, %v1472_v58 }
 0x1ca   : > { %v2299_v32 = vmul.f32 1.050701, %v2171_v46  ;;  %v2108_v52 = vsel %vm1340_vm14, %v5497_v62, %v1980_v56  ;;  %v3147_v0 = vadd.f32 -1.0, %v4347_v35  ;;  %v1769_v8 = vmul.f32 1.442695, %v1536_v40 }
 0x1cb   : > { %3861 = vst [vmem:[%s4700_s13 + $0x198] sm:$0xff] %v3749_v7   ;;  %v2236_v9 = vmul.f32 1.050701, %v2108_v52  ;;  %v2172_v59 = vsel %vm1404_vm15, %v5504_v57, %v2044_v47  ;;  %4358 = vpow2.f32 %v1641_v21  ;;  %v1477_v10 = vmin.f32 %v5579_v16, 0.0  ;;  %v5592_v62 = vld [vmem:[%s5980_s2] ss:$0 sm:$0xff] }
 0x1cc   : > { %v4349_v3 = vpop.eup %4348  ;;  %v2300_v26 = vmul.f32 1.050701, %v2172_v59  ;;  %v1985_v63 = vmul.f32 1.6732632, %v3147_v0  ;;  %4360 = vpow2.f32 %v1769_v8  ;;  %v5596_v24 = vadd.f32 %v5592_v62, %v5068_v1  ;;  %v6022_v47 = vld [vmem:[#allocation16_spill] sm:$0xff] }
 0x1cd   : > { %v4351_v46 = vpop.eup %4350  ;;  %v3584_v57 = vpack.c.bf16 %v2236_v9, %v2235_v31  ;;  %v3211_v53 = vadd.f32 -1.0, %v4349_v3  ;;  %v1651_v50 = vmul.f32 1.442695, %v1477_v10  ;;  %v5600_v43 = vadd.f32 %v5592_v62, %v5070_v27 }
 0x1ce   : > { %v4353_v11 = vpop.eup %4352  ;;  %v3744_v22 = vpack.c.bf16 %v2300_v26, %v2299_v32  ;;  %vm1343_vm2 = vcmp.gt.f32.partialorder %v5522_v36, 0.0  ;;  %v3145_v44 = vadd.f32 -1.0, %v4351_v46  ;;  %vm1407_vm3 = vcmp.gt.f32.partialorder %v5536_v5, 0.0 }
 0x1cf   : > { %v4355_v58 = vpop.eup %4354  ;;  %3828 = vst [vmem:[%s4700_s13 + $0x90] sm:$0xff] %v3584_v57   ;;  %v2049_v1 = vmul.f32 1.6732632, %v3211_v53  ;;  %v3209_v56 = vadd.f32 -1.0, %v4353_v11  ;;  %vm1346_vm4 = vcmp.gt.f32.partialorder %v5540_v48, 0.0  ;;  %4362 = vpow2.f32 %v1651_v50  ;;  %v6023_v57 = vld [vmem:[#allocation17_spill] sm:$0xff] }
 0x1d0   : > { %3860 = vst [vmem:[%s4700_s13 + $0x190] sm:$0xff] %v3744_v22   ;;  %v2113_v27 = vsel %vm1345_vm0, %v5513_v12, %v1985_v63  ;;  %v3148_v31 = vadd.f32 -1.0, %v4355_v58  ;;  %vm1410_vm5 = vcmp.gt.f32.partialorder %v5552_v54, 0.0  ;;  %v1541_v40 = vmin.f32 %v5596_v24, 0.0 }
 0x1d1   : > { %v2177_v35 = vsel %vm1409_vm1, %v5517_v19, %v2049_v1  ;;  %vm1344_vm6 = vcmp.gt.f32.partialorder %v5556_v29, 0.0  ;;  %v1475_v7 = vmin.f32 %v5600_v43, 0.0  ;;  %v5619_v21 = vadd.f32 %v5592_v62, %v6022_v47 }
 0x1d2   : > { %v1983_v32 = vmul.f32 1.6732632, %v3145_v44  ;;  %v1986_v52 = vmul.f32 1.6732632, %v3148_v31  ;;  %vm1408_vm7 = vcmp.gt.f32.partialorder %v5564_v25, 0.0  ;;  %v5628_v53 = vadd.f32 %v5592_v62, %v6023_v57 }
 0x1d3   : > { %v1779_v12 = vmul.f32 1.442695, %v1541_v40  ;;  %v4357_v0 = vpop.eup %4356  ;;  %v2241_v8 = vmul.f32 1.050701, %v2113_v27  ;;  %v2047_v9 = vmul.f32 1.6732632, %v3209_v56 }
 0x1d4   : > { %v1647_v59 = vmul.f32 1.442695, %v1475_v7  ;;  %v2305_v10 = vmul.f32 1.050701, %v2177_v35  ;;  %v2114_v19 = vsel %vm1346_vm4, %v5540_v48, %v1986_v52  ;;  %v3212_v3 = vadd.f32 -1.0, %v4357_v0  ;;  %v6024_v48 = vld [vmem:[#allocation18_spill] sm:$0xff] }
 0x1d5   : > { %4364 = vpow2.f32 %v1779_v12  ;;  %v4359_v26 = vpop.eup %4358  ;;  %v2242_v63 = vmul.f32 1.050701, %v2114_v19  ;;  %v1539_v46 = vmin.f32 %v5619_v21, 0.0  ;;  %v2111_v11 = vsel %vm1343_vm2, %v5522_v36, %v1983_v32  ;;  %v6025_v7 = vld [vmem:[#allocation19_spill] sm:$0xff] }
 0x1d6   : > { %4366 = vpow2.f32 %v1647_v59  ;;  %v4361_v50 = vpop.eup %4360  ;;  %v2050_v22 = vmul.f32 1.6732632, %v3212_v3  ;;  %v3146_v44 = vadd.f32 -1.0, %v4359_v26  ;;  %v5635_v58 = vadd.f32 %v5592_v62, %v6024_v48  ;;  %v6027_v48 = vld [vmem:[#allocation21_spill] sm:$0xff] }
 0x1d7   : > { %v2175_v1 = vsel %vm1407_vm3, %v5536_v5, %v2047_v9  ;;  %v3599_v56 = vpack.c.bf16 %v2242_v63, %v2241_v8  ;;  %v3210_v27 = vadd.f32 -1.0, %v4361_v50  ;;  %v1775_v31 = vmul.f32 1.442695, %v1539_v46 }
 0x1d8   : > { %v2178_v40 = vsel %vm1410_vm5, %v5552_v54, %v2050_v22  ;;  %v1984_v35 = vmul.f32 1.6732632, %v3146_v44  ;;  %v1478_v36 = vmin.f32 %v5628_v53, 0.0  ;;  %v5646_v47 = vadd.f32 %v5592_v62, %v6025_v7 }
 0x1d9   : > { %v4363_v32 = vpop.eup %4362  ;;  %3831 = vst [vmem:[%s4700_s13 + $0xa8] sm:$0xff] %v3599_v56   ;;  %v2306_v52 = vmul.f32 1.050701, %v2178_v40  ;;  %v2048_v12 = vmul.f32 1.6732632, %v3210_v27  ;;  %4368 = vpow2.f32 %v1775_v31  ;;  %v1542_v5 = vmin.f32 %v5635_v58, 0.0 }
 0x1da   : > { %v2239_v0 = vmul.f32 1.050701, %v2111_v11  ;;  %v2303_v8 = vmul.f32 1.050701, %v2175_v1  ;;  %v2112_v54 = vsel %vm1344_vm6, %v5556_v29, %v1984_v35  ;;  %v1653_v9 = vmul.f32 1.442695, %v1478_v36 }
 0x1db   : > { %v3759_v59 = vpack.c.bf16 %v2306_v52, %v2305_v10  ;;  %v2240_v19 = vmul.f32 1.050701, %v2112_v54  ;;  %v2176_v3 = vsel %vm1408_vm7, %v5564_v25, %v2048_v12  ;;  %v1781_v26 = vmul.f32 1.442695, %v1542_v5  ;;  %v6026_v11 = vld [vmem:[#allocation20_spill] sm:$0xff]  ;;  %v6028_v12 = vld [vmem:[#allocation22_spill] sm:$0xff] }
 0x1dc   : > { %v2304_v63 = vmul.f32 1.050701, %v2176_v3  ;;  %v3151_v46 = vadd.f32 -1.0, %v4363_v32  ;;  %4370 = vpow2.f32 %v1653_v9  ;;  %v1476_v57 = vmin.f32 %v5646_v47, 0.0 }
 0x1dd   : > { %3863 = vst [vmem:[%s4700_s13 + $0x1a8] sm:$0xff] %v3759_v59   ;;  %v3594_v50 = vpack.c.bf16 %v2240_v19, %v2239_v0  ;;  %4372 = vpow2.f32 %v1781_v26  ;;  %v5660_v29 = vadd.f32 %v5592_v62, %v6026_v11  ;;  %v5664_v10 = vadd.f32 %v5592_v62, %v5118_v2  ;;  %v6029_v0 = vld [vmem:[#allocation23_spill] sm:$0xff]  ;;  %v6030_v59 = vld [vmem:[#allocation24_spill] sm:$0xff] }
 0x1de   : > { %v3754_v22 = vpack.c.bf16 %v2304_v63, %v2303_v8  ;;  %v1649_v44 = vmul.f32 1.442695, %v1476_v57  ;;  %v5668_v1 = vadd.f32 %v5592_v62, %v6027_v48  ;;  %vm1349_vm8 = vcmp.gt.f32.partialorder %v5579_v16, 0.0 }
 0x1df   : > { %v4365_v25 = vpop.eup %4364  ;;  %3830 = vst [vmem:[%s4700_s13 + $0xa0] sm:$0xff] %v3594_v50   ;;  %v1540_v31 = vmin.f32 %v5660_v29, 0.0  ;;  %vm1413_vm9 = vcmp.gt.f32.partialorder %v5596_v24, 0.0  ;;  %v1481_v2 = vmin.f32 %v5664_v10, 0.0  ;;  %v1989_v40 = vmul.f32 1.6732632, %v3151_v46 }
 0x1e0   : > { %v4367_v56 = vpop.eup %4366  ;;  %v3215_v27 = vadd.f32 -1.0, %v4365_v25  ;;  %3862 = vst [vmem:[%s4700_s13 + $0x1a0] sm:$0xff] %v3754_v22   ;;  %4374 = vpow2.f32 %v1649_v44  ;;  %v1545_v7 = vmin.f32 %v5668_v1, 0.0  ;;  %v5679_v5 = vadd.f32 %v5592_v62, %v6028_v12 }
 0x1e1   : > { %v3149_v35 = vadd.f32 -1.0, %v4367_v56  ;;  %v1777_v36 = vmul.f32 1.442695, %v1540_v31  ;;  %v1659_v52 = vmul.f32 1.442695, %v1481_v2  ;;  %v5683_v8 = vadd.f32 %v5592_v62, %v6029_v0  ;;  %v6031_v56 = vld [vmem:[#allocation25_spill] sm:$0xff] }
 0x1e2   : > { %v2053_v32 = vmul.f32 1.6732632, %v3215_v27  ;;  %vm1347_vm10 = vcmp.gt.f32.partialorder %v5600_v43, 0.0  ;;  %v1787_v9 = vmul.f32 1.442695, %v1545_v7  ;;  %v5688_v19 = vadd.f32 %v5592_v62, %v6030_v59 }
 0x1e3   : > { %v4369_v54 = vpop.eup %4368  ;;  %4376 = vpow2.f32 %v1777_v36  ;;  %vm1411_vm11 = vcmp.gt.f32.partialorder %v5619_v21, 0.0  ;;  %vm1350_vm12 = vcmp.gt.f32.partialorder %v5628_v53, 0.0  ;;  %v2117_v26 = vsel %vm1349_vm8, %v5579_v16, %v1989_v40 }
 0x1e4   : > { %v3213_v3 = vadd.f32 -1.0, %v4369_v54  ;;  %4378 = vpow2.f32 %v1659_v52  ;;  %vm1414_vm13 = vcmp.gt.f32.partialorder %v5635_v58, 0.0  ;;  %v1479_v63 = vmin.f32 %v5679_v5, 0.0 }
 0x1e5   : > { %4380 = vpow2.f32 %v1787_v9  ;;  %v2181_v57 = vsel %vm1413_vm9, %v5596_v24, %v2053_v32  ;;  %v1987_v50 = vmul.f32 1.6732632, %v3149_v35  ;;  %vm1348_vm14 = vcmp.gt.f32.partialorder %v5646_v47, 0.0 }
 0x1e6   : > { %v4371_v46 = vpop.eup %4370  ;;  %v2051_v11 = vmul.f32 1.6732632, %v3213_v3  ;;  %v1543_v25 = vmin.f32 %v5683_v8, 0.0  ;;  %v1655_v48 = vmul.f32 1.442695, %v1479_v63  ;;  %v1482_v16 = vmin.f32 %v5688_v19, 0.0 }
 0x1e7   : > { %v4373_v22 = vpop.eup %4372  ;;  %v3152_v44 = vadd.f32 -1.0, %v4371_v46  ;;  %v5705_v27 = vadd.f32 %v5592_v62, %v6031_v56  ;;  %v2245_v31 = vmul.f32 1.050701, %v2117_v26  ;;  %v5709_v24 = vadd.f32 %v5592_v62, %v5153_v13 }
 0x1e8   : > { %v3216_v2 = vadd.f32 -1.0, %v4373_v22  ;;  %v1783_v40 = vmul.f32 1.442695, %v1543_v25  ;;  %v2309_v35 = vmul.f32 1.050701, %v2181_v57  ;;  %vm1412_vm15 = vcmp.gt.f32.partialorder %v5660_v29, 0.0 }
 0x1e9   : > { %v1990_v36 = vmul.f32 1.6732632, %v3152_v44  ;;  %4382 = vpow2.f32 %v1655_v48  ;;  %v1661_v7 = vmul.f32 1.442695, %v1482_v16  ;;  %v2115_v52 = vsel %vm1347_vm10, %v5600_v43, %v1987_v50 }
 0x1ea   : > { %v4375_v32 = vpop.eup %4374  ;;  %v2054_v12 = vmul.f32 1.6732632, %v3216_v2  ;;  %4384 = vpow2.f32 %v1783_v40  ;;  %v1546_v0 = vmin.f32 %v5705_v27, 0.0  ;;  %v2179_v13 = vsel %vm1411_vm11, %v5619_v21, %v2051_v11 }
 0x1eb   : > { %v2118_v54 = vsel %vm1350_vm12, %v5628_v53, %v1990_v36  ;;  %v3150_v9 = vadd.f32 -1.0, %v4375_v32  ;;  %4386 = vpow2.f32 %v1661_v7  ;;  %vm1353_vm0 = vcmp.gt.f32.partialorder %v5664_v10, 0.0 }
 0x1ec   : > { %v2246_v59 = vmul.f32 1.050701, %v2118_v54  ;;  %v2182_v3 = vsel %vm1414_vm13, %v5635_v58, %v2054_v12  ;;  %v1789_v43 = vmul.f32 1.442695, %v1546_v0  ;;  %v1480_v26 = vmin.f32 %v5709_v24, 0.0 }
 0x1ed   : > { %v4377_v63 = vpop.eup %4376  ;;  %v2310_v46 = vmul.f32 1.050701, %v2182_v3  ;;  %v1988_v21 = vmul.f32 1.6732632, %v3150_v9  ;;  %v5729_v57 = vadd.f32 %v5592_v62, %v5159_v4  ;;  %v5733_v53 = vadd.f32 %v5592_v62, %v5201_v49 }
 0x1ee   : > { %v4379_v50 = vpop.eup %4378  ;;  %v3609_v11 = vpack.c.bf16 %v2246_v59, %v2245_v31  ;;  %v3214_v58 = vadd.f32 -1.0, %v4377_v63  ;;  %vm1417_vm1 = vcmp.gt.f32.partialorder %v5668_v1, 0.0  ;;  %4388 = vpow2.f32 %v1789_v43 }
 0x1ef   : > { %v1657_v25 = vmul.f32 1.442695, %v1480_v26  ;;  %v4381_v22 = vpop.eup %4380  ;;  %v2243_v44 = vmul.f32 1.050701, %v2115_v52  ;;  %v3769_v48 = vpack.c.bf16 %v2310_v46, %v2309_v35  ;;  %v2116_v4 = vsel %vm1348_vm14, %v5646_v47, %v1988_v21 }
 0x1f0   : > { %v3155_v16 = vadd.f32 -1.0, %v4379_v50  ;;  %3833 = vst [vmem:[%s4700_s13 + $0xb8] sm:$0xff] %v3609_v11   ;;  %v2244_v56 = vmul.f32 1.050701, %v2116_v4  ;;  %v2052_v49 = vmul.f32 1.6732632, %v3214_v58  ;;  %v5748_v52 = vadd.f32 %v5592_v62, %v5203_v28 }
 0x1f1   : > { %v3219_v2 = vadd.f32 -1.0, %v4381_v22  ;;  %4390 = vpow2.f32 %v1657_v25  ;;  %v2307_v31 = vmul.f32 1.050701, %v2179_v13  ;;  %3865 = vst [vmem:[%s4700_s13 + $0x1b8] sm:$0xff] %v3769_v48   ;;  %v1544_v36 = vmin.f32 %v5729_v57, 0.0 }
 0x1f2   : > { %v1993_v40 = vmul.f32 1.6732632, %v3155_v16  ;;  %v1485_v7 = vmin.f32 %v5733_v53, 0.0  ;;  %v3604_v32 = vpack.c.bf16 %v2244_v56, %v2243_v44  ;;  %v2180_v35 = vsel %vm1412_vm15, %v5660_v29, %v2052_v49 }
 0x1f3   : > { %v2057_v47 = vmul.f32 1.6732632, %v3219_v2  ;;  %v4383_v12 = vpop.eup %4382  ;;  %v2308_v0 = vmul.f32 1.050701, %v2180_v35  ;;  %v1785_v54 = vmul.f32 1.442695, %v1544_v36  ;;  %v5766_v50 = vadd.f32 %v5592_v62, %v5209_v37 }
 0x1f4   : > { %v1667_v13 = vmul.f32 1.442695, %v1485_v7  ;;  %v4385_v9 = vpop.eup %4384  ;;  %3832 = vst [vmem:[%s4700_s13 + $0xb0] sm:$0xff] %v3604_v32   ;;  %vm1351_vm2 = vcmp.gt.f32.partialorder %v5679_v5, 0.0  ;;  %v3153_v59 = vadd.f32 -1.0, %v4383_v12  ;;  %vm1415_vm3 = vcmp.gt.f32.partialorder %v5683_v8, 0.0 }
 0x1f5   : > { %vm1354_vm4 = vcmp.gt.f32.partialorder %v5688_v19, 0.0  ;;  %v4387_v29 = vpop.eup %4386  ;;  %v3764_v3 = vpack.c.bf16 %v2308_v0, %v2307_v31  ;;  %v2121_v28 = vsel %vm1353_vm0, %v5664_v10, %v1993_v40  ;;  %v3217_v43 = vadd.f32 -1.0, %v4385_v9 }
 0x1f6   : > { %4392 = vpow2.f32 %v1785_v54  ;;  %v1991_v26 = vmul.f32 1.6732632, %v3153_v59  ;;  %v3156_v63 = vadd.f32 -1.0, %v4387_v29  ;;  %v1549_v46 = vmin.f32 %v5748_v52, 0.0 }
 0x1f7   : > { %4394 = vpow2.f32 %v1667_v13  ;;  %3864 = vst [vmem:[%s4700_s13 + $0x1b0] sm:$0xff] %v3764_v3   ;;  %v2185_v21 = vsel %vm1417_vm1, %v5668_v1, %v2057_v47  ;;  %vm1418_vm5 = vcmp.gt.f32.partialorder %v5705_v27, 0.0  ;;  %vm1352_vm6 = vcmp.gt.f32.partialorder %v5709_v24, 0.0 }
 0x1f8   : > { %v4389_v10 = vpop.eup %4388  ;;  %v1994_v11 = vmul.f32 1.6732632, %v3156_v63  ;;  %v1795_v58 = vmul.f32 1.442695, %v1549_v46  ;;  %v5770_v25 = vadd.f32 %v5592_v62, %v5222_v45  ;;  %v5774_v22 = vadd.f32 %v5592_v62, %v5234_v51 }
 0x1f9   : > { %v2249_v1 = vmul.f32 1.050701, %v2121_v28  ;;  %v2119_v44 = vsel %vm1351_vm2, %v5679_v5, %v1991_v26  ;;  %v2055_v48 = vmul.f32 1.6732632, %v3217_v43  ;;  %v3220_v4 = vadd.f32 -1.0, %v4389_v10 }
 0x1fa   : > { %v2313_v16 = vmul.f32 1.050701, %v2185_v21  ;;  %v2122_v56 = vsel %vm1354_vm4, %v5688_v19, %v1994_v11  ;;  %4396 = vpow2.f32 %v1795_v58  ;;  %v1483_v45 = vmin.f32 %v5766_v50, 0.0 }
 0x1fb   : > { %v4391_v37 = vpop.eup %4390  ;;  %v2250_v49 = vmul.f32 1.050701, %v2122_v56  ;;  %v2058_v2 = vmul.f32 1.6732632, %v3220_v4  ;;  %v5785_v31 = vadd.f32 %v5592_v62, %v5236_v34  ;;  %v2247_v5 = vmul.f32 1.050701, %v2119_v44 }
 0x1fc   : > { %v3154_v51 = vadd.f32 -1.0, %v4391_v37  ;;  %v1663_v40 = vmul.f32 1.442695, %v1483_v45  ;;  %v1547_v36 = vmin.f32 %v5770_v25, 0.0  ;;  %v1486_v7 = vmin.f32 %v5774_v22, 0.0 }
 0x1fd   : > { %v2183_v19 = vsel %vm1415_vm3, %v5683_v8, %v2055_v48  ;;  %v3619_v32 = vpack.c.bf16 %v2250_v49, %v2249_v1  ;;  %v2186_v35 = vsel %vm1418_vm5, %v5705_v27, %v2058_v2  ;;  %v1550_v9 = vmin.f32 %v5785_v31, 0.0 }
 0x1fe   : > { %v1992_v47 = vmul.f32 1.6732632, %v3154_v51  ;;  %v2314_v12 = vmul.f32 1.050701, %v2186_v35  ;;  %4398 = vpow2.f32 %v1663_v40  ;;  %v1791_v34 = vmul.f32 1.442695, %v1547_v36 }
 0x1ff   : > { %v1669_v0 = vmul.f32 1.442695, %v1486_v7  ;;  %3835 = vst [vmem:[%s4700_s13 + $0xc8] sm:$0xff] %v3619_v32   ;;  %v5802_v8 = vadd.f32 %v5592_v62, %v5257_v15  ;;  %v5806_v27 = vadd.f32 %v5592_v62, %v5261_v39  ;;  %vm1416_vm7 = vcmp.gt.f32.partialorder %v5729_v57, 0.0 }
 0x200   : > { %v4393_v54 = vpop.eup %4392  ;;  %v2120_v13 = vsel %vm1352_vm6, %v5709_v24, %v1992_v47  ;;  %v3779_v29 = vpack.c.bf16 %v2314_v12, %v2313_v16  ;;  %4400 = vpow2.f32 %v1791_v34  ;;  %v1797_v24 = vmul.f32 1.442695, %v1550_v9 }
 0x201   : > { %v4395_v59 = vpop.eup %4394  ;;  %v2248_v3 = vmul.f32 1.050701, %v2120_v13  ;;  %v3218_v28 = vadd.f32 -1.0, %v4393_v54  ;;  %4402 = vpow2.f32 %v1669_v0  ;;  %v2311_v43 = vmul.f32 1.050701, %v2183_v19 }
 0x202   : > { %3867 = vst [vmem:[%s4700_s13 + $0x1c8] sm:$0xff] %v3779_v29   ;;  %v1484_v15 = vmin.f32 %v5802_v8, 0.0  ;;  %v3159_v46 = vadd.f32 -1.0, %v4395_v59  ;;  %4404 = vpow2.f32 %v1797_v24  ;;  %v1548_v39 = vmin.f32 %v5806_v27, 0.0  ;;  %v6032_v29 = vld [vmem:[#allocation2_spill] sm:$0xff] }
 0x203   : > { %v3614_v26 = vpack.c.bf16 %v2248_v3, %v2247_v5  ;;  %v2056_v63 = vmul.f32 1.6732632, %v3218_v28  ;;  %v5814_v21 = vadd.f32 %v5592_v62, %v5288_v18  ;;  %v5820_v1 = vadd.f32 %v5592_v62, %v5293_v20 }
 0x204   : > { %v4397_v10 = vpop.eup %4396  ;;  %v1665_v58 = vmul.f32 1.442695, %v1484_v15  ;;  %v5824_v44 = vadd.f32 %v5592_v62, %v5295_v42  ;;  %v1793_v37 = vmul.f32 1.442695, %v1548_v39  ;;  %vm1357_vm8 = vcmp.gt.f32.partialorder %v5733_v53, 0.0 }
 0x205   : > { %3834 = vst [vmem:[%s4700_s13 + $0xc0] sm:$0xff] %v3614_v26   ;;  %v2184_v11 = vsel %vm1416_vm7, %v5729_v57, %v2056_v63  ;;  %v3223_v4 = vadd.f32 -1.0, %v4397_v10  ;;  %vm1421_vm9 = vcmp.gt.f32.partialorder %v5748_v52, 0.0  ;;  %v1489_v18 = vmin.f32 %v5814_v21, 0.0 }
 0x206   : > { %v2312_v48 = vmul.f32 1.050701, %v2184_v11  ;;  %4406 = vpow2.f32 %v1665_v58  ;;  %v1997_v16 = vmul.f32 1.6732632, %v3159_v46  ;;  %vm1355_vm10 = vcmp.gt.f32.partialorder %v5766_v50, 0.0 }
 0x207   : > { %4408 = vpow2.f32 %v1793_v37  ;;  %v2061_v56 = vmul.f32 1.6732632, %v3223_v4  ;;  %v1675_v42 = vmul.f32 1.442695, %v1489_v18  ;;  %v1553_v45 = vmin.f32 %v5820_v1, 0.0 }
 0x208   : > { %v3774_v57 = vpack.c.bf16 %v2312_v48, %v2311_v43  ;;  %v4399_v20 = vpop.eup %4398  ;;  %v1487_v49 = vmin.f32 %v5824_v44, 0.0  ;;  %vm1419_vm11 = vcmp.gt.f32.partialorder %v5770_v25, 0.0  ;;  %vm1358_vm12 = vcmp.gt.f32.partialorder %v5774_v22, 0.0 }
 0x209   : > { %v3157_v2 = vadd.f32 -1.0, %v4399_v20  ;;  %v5837_v51 = vadd.f32 %v5592_v62, %v5302_v17  ;;  %v5841_v5 = vadd.f32 %v5592_v62, %v5307_v33  ;;  %vm1422_vm13 = vcmp.gt.f32.partialorder %v5785_v31, 0.0 }
 0x20a   : > { %3866 = vst [vmem:[%s4700_s13 + $0x1c0] sm:$0xff] %v3774_v57   ;;  %v4401_v40 = vpop.eup %4400  ;;  %4410 = vpow2.f32 %v1675_v42  ;;  %v1803_v36 = vmul.f32 1.442695, %v1553_v45  ;;  %v1671_v7 = vmul.f32 1.442695, %v1487_v49  ;;  %v2125_v32 = vsel %vm1357_vm8, %v5733_v53, %v1997_v16 }
 0x20b   : > { %v4403_v19 = vpop.eup %4402  ;;  %v1995_v35 = vmul.f32 1.6732632, %v3157_v2  ;;  %v3221_v47 = vadd.f32 -1.0, %v4401_v40  ;;  %v1551_v17 = vmin.f32 %v5837_v51, 0.0  ;;  %v2189_v33 = vsel %vm1421_vm9, %v5748_v52, %v2061_v56 }
 0x20c   : > { %v3160_v12 = vadd.f32 -1.0, %v4403_v19  ;;  %vm1356_vm14 = vcmp.gt.f32.partialorder %v5802_v8, 0.0  ;;  %4412 = vpow2.f32 %v1803_v36  ;;  %v1490_v34 = vmin.f32 %v5841_v5, 0.0  ;;  %v4405_v0 = vpop.eup %4404 }
 0x20d   : > { %v2123_v54 = vsel %vm1355_vm10, %v5766_v50, %v1995_v35  ;;  %vm1420_vm15 = vcmp.gt.f32.partialorder %v5806_v27, 0.0  ;;  %4414 = vpow2.f32 %v1671_v7  ;;  %v1799_v53 = vmul.f32 1.442695, %v1551_v17 }
 0x20e   : > { %v2059_v13 = vmul.f32 1.6732632, %v3221_v47  ;;  %v1998_v9 = vmul.f32 1.6732632, %v3160_v12  ;;  %v3224_v59 = vadd.f32 -1.0, %v4405_v0  ;;  %v5859_v52 = vadd.f32 %v5592_v62, %v6032_v29 }
 0x20f   : > { %v2253_v3 = vmul.f32 1.050701, %v2125_v32  ;;  %v2317_v28 = vmul.f32 1.050701, %v2189_v33  ;;  %v1677_v24 = vmul.f32 1.442695, %v1490_v34  ;;  %v5863_v43 = vadd.f32 %v5592_v62, %v5336_v38 }
 0x210   : > { %v4407_v26 = vpop.eup %4406  ;;  %v2251_v50 = vmul.f32 1.050701, %v2123_v54  ;;  %v2126_v63 = vsel %vm1358_vm12, %v5774_v22, %v1998_v9  ;;  %v2062_v15 = vmul.f32 1.6732632, %v3224_v59  ;;  %4416 = vpow2.f32 %v1799_v53 }
 0x211   : > { %v4409_v46 = vpop.eup %4408  ;;  %v2254_v39 = vmul.f32 1.050701, %v2126_v63  ;;  %v3158_v10 = vadd.f32 -1.0, %v4407_v26  ;;  %4418 = vpow2.f32 %v1677_v24  ;;  %v1554_v11 = vmin.f32 %v5859_v52, 0.0 }
 0x212   : > { %v2187_v38 = vsel %vm1419_vm11, %v5770_v25, %v2059_v13  ;;  %v2190_v58 = vsel %vm1422_vm13, %v5785_v31, %v2062_v15  ;;  %v3222_v48 = vadd.f32 -1.0, %v4409_v46  ;;  %v1488_v22 = vmin.f32 %v5863_v43, 0.0 }
 0x213   : > { %v3629_v4 = vpack.c.bf16 %v2254_v39, %v2253_v3  ;;  %v2318_v37 = vmul.f32 1.050701, %v2190_v58  ;;  %v1996_v18 = vmul.f32 1.6732632, %v3158_v10  ;;  %v1805_v57 = vmul.f32 1.442695, %v1554_v11 }
 0x214   : > { %v4411_v16 = vpop.eup %4410  ;;  %v2060_v20 = vmul.f32 1.6732632, %v3222_v48  ;;  %v1673_v56 = vmul.f32 1.442695, %v1488_v22  ;;  %v5878_v42 = vadd.f32 %v5592_v62, %v5338_v55  ;;  %v5882_v25 = vadd.f32 %v5592_v62, %v5383_v14 }
 0x215   : > { %3837 = vst [vmem:[%s4700_s13 + $0xd8] sm:$0xff] %v3629_v4   ;;  %v3789_v31 = vpack.c.bf16 %v2318_v37, %v2317_v28  ;;  %v2124_v45 = vsel %vm1356_vm14, %v5802_v8, %v1996_v18  ;;  %v3163_v49 = vadd.f32 -1.0, %v4411_v16  ;;  %4420 = vpow2.f32 %v1805_v57 }
 0x216   : > { %v4413_v2 = vpop.eup %4412  ;;  %v2315_v40 = vmul.f32 1.050701, %v2187_v38  ;;  %v2252_v36 = vmul.f32 1.050701, %v2124_v45  ;;  %v2188_v55 = vsel %vm1420_vm15, %v5806_v27, %v2060_v20  ;;  %4422 = vpow2.f32 %v1673_v56 }
 0x217   : > { %v4415_v7 = vpop.eup %4414  ;;  %3869 = vst [vmem:[%s4700_s13 + $0x1d8] sm:$0xff] %v3789_v31   ;;  %v2316_v14 = vmul.f32 1.050701, %v2188_v55  ;;  %v2001_v19 = vmul.f32 1.6732632, %v3163_v49  ;;  %v3227_v32 = vadd.f32 -1.0, %v4413_v2  ;;  %v5900_v53 = vadd.f32 %v5592_v62, %v5385_v30 }
 0x218   : > { %v1552_v35 = vmin.f32 %v5878_v42, 0.0  ;;  %v3624_v8 = vpack.c.bf16 %v2252_v36, %v2251_v50  ;;  %v3161_v47 = vadd.f32 -1.0, %v4415_v7  ;;  %v1493_v17 = vmin.f32 %v5882_v25, 0.0  ;;  %v6033_v2 = vld [vmem:[#allocation3_spill] sm:$0xff] }
 0x219   : > { %v3784_v33 = vpack.c.bf16 %v2316_v14, %v2315_v40  ;;  %vm1361_vm0 = vcmp.gt.f32.partialorder %v5814_v21, 0.0  ;;  %v2065_v12 = vmul.f32 1.6732632, %v3227_v32  ;;  %vm1425_vm1 = vcmp.gt.f32.partialorder %v5820_v1, 0.0 }
 0x21a   : > { %v1801_v34 = vmul.f32 1.442695, %v1552_v35  ;;  %v4417_v27 = vpop.eup %4416  ;;  %3836 = vst [vmem:[%s4700_s13 + $0xd0] sm:$0xff] %v3624_v8   ;;  %v2129_v0 = vsel %vm1361_vm0, %v5814_v21, %v2001_v19  ;;  %v1999_v54 = vmul.f32 1.6732632, %v3161_v47  ;;  %v5906_v29 = vadd.f32 %v5592_v62, %v5392_v23 }
 0x21b   : > { %v4419_v13 = vpop.eup %4418  ;;  %3868 = vst [vmem:[%s4700_s13 + $0x1d0] sm:$0xff] %v3784_v33   ;;  %v2193_v9 = vsel %vm1425_vm1, %v5820_v1, %v2065_v12  ;;  %v1683_v59 = vmul.f32 1.442695, %v1493_v17  ;;  %vm1359_vm2 = vcmp.gt.f32.partialorder %v5824_v44, 0.0  ;;  %vm1362_vm3 = vcmp.gt.f32.partialorder %v5841_v5, 0.0 }
 0x21c   : > { %4424 = vpow2.f32 %v1801_v34  ;;  %v3164_v21 = vadd.f32 -1.0, %v4419_v13  ;;  %v2257_v3 = vmul.f32 1.050701, %v2129_v0  ;;  %v3225_v28 = vadd.f32 -1.0, %v4417_v27 }
 0x21d   : > { %vm1426_vm4 = vcmp.gt.f32.partialorder %v5859_v52, 0.0  ;;  %v1557_v30 = vmin.f32 %v5900_v53, 0.0  ;;  %v2321_v24 = vmul.f32 1.050701, %v2193_v9  ;;  %v2127_v1 = vsel %vm1359_vm2, %v5824_v44, %v1999_v54 }
 0x21e   : > { %v2002_v26 = vmul.f32 1.6732632, %v3164_v21  ;;  %v1491_v50 = vmin.f32 %v5906_v29, 0.0  ;;  %4426 = vpow2.f32 %v1683_v59  ;;  %v5916_v15 = vadd.f32 %v5592_v62, %v5394_v61 }
 0x21f   : > { %v4421_v63 = vpop.eup %4420  ;;  %v1811_v23 = vmul.f32 1.442695, %v1557_v30  ;;  %v5920_v46 = vadd.f32 %v5592_v62, %v5414_v6  ;;  %v5927_v38 = vadd.f32 %v5592_v62, %v5416_v60  ;;  %v2063_v58 = vmul.f32 1.6732632, %v3225_v28 }
 0x220   : > { %v4423_v39 = vpop.eup %4422  ;;  %v2130_v10 = vsel %vm1362_vm3, %v5841_v5, %v2002_v26  ;;  %v3228_v44 = vadd.f32 -1.0, %v4421_v63  ;;  %v1679_v11 = vmul.f32 1.442695, %v1491_v50  ;;  %v2255_v22 = vmul.f32 1.050701, %v2127_v1 }
 0x221   : > { %v2258_v48 = vmul.f32 1.050701, %v2130_v10  ;;  %v3162_v61 = vadd.f32 -1.0, %v4423_v39  ;;  %4428 = vpow2.f32 %v1811_v23  ;;  %vm1360_vm5 = vcmp.gt.f32.partialorder %v5863_v43, 0.0 }
 0x222   : > { %v2066_v4 = vmul.f32 1.6732632, %v3228_v44  ;;  %v1555_v6 = vmin.f32 %v5916_v15, 0.0  ;;  %4430 = vpow2.f32 %v1679_v11  ;;  %v1494_v5 = vmin.f32 %v5920_v46, 0.0 }
 0x223   : > { %v3639_v37 = vpack.c.bf16 %v2258_v48, %v2257_v3  ;;  %v2000_v18 = vmul.f32 1.6732632, %v3162_v61  ;;  %v1558_v16 = vmin.f32 %v5927_v38, 0.0  ;;  %v5938_v20 = vadd.f32 %v5592_v62, %v5424_v41 }
 0x224   : > { %v2194_v60 = vsel %vm1426_vm4, %v5859_v52, %v2066_v4  ;;  %v1807_v57 = vmul.f32 1.442695, %v1555_v6  ;;  %v1685_v49 = vmul.f32 1.442695, %v1494_v5  ;;  %v5944_v40 = vadd.f32 %v5592_v62, %v6033_v2 }
 0x225   : > { %3839 = vst [vmem:[%s4700_s13 + $0xe8] sm:$0xff] %v3639_v37   ;;  %v2322_v31 = vmul.f32 1.050701, %v2194_v60  ;;  %v2128_v45 = vsel %vm1360_vm5, %v5863_v43, %v2000_v18  ;;  %v1813_v55 = vmul.f32 1.442695, %v1558_v16  ;;  %vm1423_vm6 = vcmp.gt.f32.partialorder %v5837_v51, 0.0 }
 0x226   : > { %v4425_v56 = vpop.eup %4424  ;;  %v2256_v36 = vmul.f32 1.050701, %v2128_v45  ;;  %4432 = vpow2.f32 %v1807_v57  ;;  %v1492_v7 = vmin.f32 %v5938_v20, 0.0  ;;  %v2191_v14 = vsel %vm1423_vm6, %v5837_v51, %v2063_v58 }
 0x227   : > { %v3226_v52 = vadd.f32 -1.0, %v4425_v56  ;;  %v3799_v41 = vpack.c.bf16 %v2322_v31, %v2321_v24  ;;  %4434 = vpow2.f32 %v1685_v49  ;;  %vm1424_vm7 = vcmp.gt.f32.partialorder %v5878_v42, 0.0 }
 0x228   : > { %v3634_v43 = vpack.c.bf16 %v2256_v36, %v2255_v22  ;;  %4436 = vpow2.f32 %v1813_v55  ;;  %v4427_v32 = vpop.eup %4426  ;;  %v1681_v62 = vmul.f32 1.442695, %v1492_v7  ;;  %v1556_v35 = vmin.f32 %v5944_v40, 0.0 }
 0x229   : > { %v2064_v19 = vmul.f32 1.6732632, %v3226_v52  ;;  %3871 = vst [vmem:[%s4700_s13 + $0x1e8] sm:$0xff] %v3799_v41   ;;  %v2319_v17 = vmul.f32 1.050701, %v2191_v14  ;;  %v3167_v51 = vadd.f32 -1.0, %v4427_v32 }
 0x22a   : > { %3838 = vst [vmem:[%s4700_s13 + $0xe0] sm:$0xff] %v3634_v43   ;;  %4438 = vpow2.f32 %v1681_v62  ;;  %v1809_v12 = vmul.f32 1.442695, %v1556_v35  ;;  %vm1365_vm8 = vcmp.gt.f32.partialorder %v5882_v25, 0.0  ;;  %vm1429_vm9 = vcmp.gt.f32.partialorder %v5900_v53, 0.0 }
 0x22b   : > { %v2192_v8 = vsel %vm1424_vm7, %v5878_v42, %v2064_v19  ;;  %v4429_v47 = vpop.eup %4428  ;;  %v2005_v13 = vmul.f32 1.6732632, %v3167_v51  ;;  %vm1363_vm10 = vcmp.gt.f32.partialorder %v5906_v29, 0.0  ;;  %vm1366_vm11 = vcmp.gt.f32.partialorder %v5920_v46, 0.0 }
 0x22c   : > { %v2320_v33 = vmul.f32 1.050701, %v2192_v8  ;;  %v3231_v34 = vadd.f32 -1.0, %v4429_v47  ;;  %v4431_v27 = vpop.eup %4430  ;;  %4440 = vpow2.f32 %v1809_v12  ;;  %vm1430_vm12 = vcmp.gt.f32.partialorder %v5927_v38, 0.0 }
 0x22d   : > { %v3165_v59 = vadd.f32 -1.0, %v4431_v27  ;;  %v2133_v24 = vsel %vm1365_vm8, %v5882_v25, %v2005_v13  ;;  %vm1427_vm13 = vcmp.gt.f32.partialorder %v5916_v15, 0.0  ;;  %vm1364_vm14 = vcmp.gt.f32.partialorder %v5938_v20, 0.0 }
 0x22e   : > { %v3794_v0 = vpack.c.bf16 %v2320_v33, %v2319_v17  ;;  %v2069_v9 = vmul.f32 1.6732632, %v3231_v34  ;;  %v2261_v58 = vmul.f32 1.050701, %v2133_v24  ;;  %vm1428_vm15 = vcmp.gt.f32.partialorder %v5944_v40, 0.0 }
 0x22f   : > { %v2003_v26 = vmul.f32 1.6732632, %v3165_v59 }
 0x230   : > { %3870 = vst [vmem:[%s4700_s13 + $0x1e0] sm:$0xff] %v3794_v0   ;;  %v4433_v54 = vpop.eup %4432  ;;  %v2197_v1 = vsel %vm1429_vm9, %v5900_v53, %v2069_v9 }
 0x231   : > { %v4435_v21 = vpop.eup %4434  ;;  %v3229_v28 = vadd.f32 -1.0, %v4433_v54  ;;  %v2325_v25 = vmul.f32 1.050701, %v2197_v1  ;;  %v2131_v61 = vsel %vm1363_vm10, %v5906_v29, %v2003_v26 }
 0x232   : > { %v4437_v3 = vpop.eup %4436  ;;  %v3168_v30 = vadd.f32 -1.0, %v4435_v21 }
 0x233   : > { %v3232_v42 = vadd.f32 -1.0, %v4437_v3  ;;  %v2067_v39 = vmul.f32 1.6732632, %v3229_v28 }
 0x234   : > { %v2006_v50 = vmul.f32 1.6732632, %v3168_v30  ;;  %v4439_v63 = vpop.eup %4438 }
 0x235   : > { %v2070_v23 = vmul.f32 1.6732632, %v3232_v42  ;;  %v3166_v44 = vadd.f32 -1.0, %v4439_v63  ;;  %v2195_v37 = vsel %vm1427_vm13, %v5916_v15, %v2067_v39 }
 0x236   : > { %v2134_v10 = vsel %vm1366_vm11, %v5920_v46, %v2006_v50  ;;  %v4441_v11 = vpop.eup %4440  ;;  %v2323_v16 = vmul.f32 1.050701, %v2195_v37 }
 0x237   : > { %v2262_v48 = vmul.f32 1.050701, %v2134_v10  ;;  %v2198_v53 = vsel %vm1430_vm12, %v5927_v38, %v2070_v23  ;;  %v2004_v4 = vmul.f32 1.6732632, %v3166_v44  ;;  %v3230_v6 = vadd.f32 -1.0, %v4441_v11 }
 0x238   : > { %v2326_v22 = vmul.f32 1.050701, %v2198_v53  ;;  %v2259_v38 = vmul.f32 1.050701, %v2131_v61 }
 0x239   : > { %v3649_v46 = vpack.c.bf16 %v2262_v48, %v2261_v58  ;;  %v2132_v5 = vsel %vm1364_vm14, %v5938_v20, %v2004_v4  ;;  %v2068_v60 = vmul.f32 1.6732632, %v3230_v6 }
 0x23a   : > { %v3809_v18 = vpack.c.bf16 %v2326_v22, %v2325_v25  ;;  %v2260_v57 = vmul.f32 1.050701, %v2132_v5 }
 0x23b   : > { %3841 = vst [vmem:[%s4700_s13 + $0xf8] sm:$0xff] %v3649_v46   ;;  %v2196_v29 = vsel %vm1428_vm15, %v5944_v40, %v2068_v60 }
 0x23c   : > { %3873 = vst [vmem:[%s4700_s13 + $0x1f8] sm:$0xff] %v3809_v18   ;;  %v3644_v56 = vpack.c.bf16 %v2260_v57, %v2259_v38  ;;  %v2324_v31 = vmul.f32 1.050701, %v2196_v29 }
 0x23e   : > { %3840 = vst [vmem:[%s4700_s13 + $0xf0] sm:$0xff] %v3644_v56   ;;  %v3804_v45 = vpack.c.bf16 %v2324_v31, %v2323_v16 }
 0x240   : > { %3872 = vst [vmem:[%s4700_s13 + $0x1f0] sm:$0xff] %v3804_v45  }
 0x241 PF: > { %s13_s12 = sadd.s32 1, %s4450_s12  }
 0x242   : > { %p10_p4 = scmp.ge.s32.totalorder %s13_s12, 4  }
 0x244   :  { %12 = sbr.rel (!%p10_p4) target bundleno = 1 (0x1), region = 62 }

// kernel: rnd_forward.4
= control target key start
LH: loop header
LB: loop body
LE: loop exit
PB: predicated region body
PF: predicated region fallthrough
CT: control target
= control target key end

     0   :  { %s3565_s12 = smov 0   ;;  %s4365_s0 = inlined_call_operand.vmem [shape: bf16[512,896], index: 0, kind: input, shape index: {}]   ;;  %s4366_s1 = inlined_call_operand.vmem [shape: bf16[896,128], index: 1, kind: input, shape index: {}]   ;;  %s4367_s2 = inlined_call_operand.vmem [shape: f32[1,128], index: 2, kind: input, shape index: {}]   ;;  %s4368_s3 = inlined_call_operand.vmem [shape: bf16[512,128], index: 3, kind: output, shape index: {}]  }
   0x1 LB: > { %s2453_s13 = sadd.s32 4294967295, %s3543_s12   ;;  %p2457_p0 = scmp.ge.s32.totalorder %s3543_s12, 1  ;;  %s3543_s12 = sphi %s3565_s12, %s13_s12  }
   0x2   : > { %p139_p1 = scmp.lt.s32.totalorder %s3543_s12, 3 }
   0x4   : > { %p140_p2 = pnand %p2457_p0, %p139_p1 }
   0x5   : > { %v3257_v0 = vld [vmem:[%s4366_s1 + $0x40] sm:$0xff] (!%p140_p2)   ;;  %s2458_s16 = sshll.u32 (!%p140_p2), %s2453_s13, 5  ;;  %v3259_v2 = vld [vmem:[%s4366_s1 + $0x48] sm:$0xff] (!%p140_p2)   ;;  %v3261_v4 = vld [vmem:[%s4366_s1 + $0x50] sm:$0xff] (!%p140_p2)  }
   0x6   : > { %143 = sbr.rel (%p140_p2) target bundleno = 513 (0x201), region = 32  ;;  %v3258_v1 = vld [vmem:[%s4366_s1] sm:$0xff] (!%p140_p2)   ;;  %2824 = vmatprep.subr.bf16.mxu0 (!%p140_p2), %v3257_v0  ;;  %3232 = vmatprep.subr.bf16.mxu1 (!%p140_p2), %v3257_v0  ;;  %p165_p3 = scmp.lt.s32.totalorder (!%p140_p2), %s2458_s16, 63  ;;  %v3260_v3 = vld [vmem:[%s4366_s1 + $0x8] sm:$0xff] (!%p140_p2)   ;;  %v3262_v5 = vld [vmem:[%s4366_s1 + $0x10] sm:$0xff] (!%p140_p2)  }
   0x7   : > { %2825 = vmatpush3.bf16.msra.mxu0 (!%p140_p2), %v3258_v1  ;;  %3240 = vmatpush3.bf16.msra.mxu1 (!%p140_p2), %v3258_v1  ;;  %v3263_v6 = vld [vmem:[%s4366_s1 + $0x58] sm:$0xff] (!%p140_p2)   ;;  %v3265_v8 = vld [vmem:[%s4366_s1 + $0x60] sm:$0xff] (!%p140_p2)   ;;  %v3267_v10 = vld [vmem:[%s4366_s1 + $0x68] sm:$0xff] (!%p140_p2)  }
   0x8   : > { %2826 = vmatprep.subr.bf16.mxu0 (!%p140_p2), %v3259_v2  ;;  %3233 = vmatprep.subr.bf16.mxu1 (!%p140_p2), %v3259_v2  ;;  %v3264_v7 = vld [vmem:[%s4366_s1 + $0x18] sm:$0xff] (!%p140_p2)   ;;  %v3266_v9 = vld [vmem:[%s4366_s1 + $0x20] sm:$0xff] (!%p140_p2)   ;;  %v3268_v13 = vld [vmem:[%s4366_s1 + $0x28] sm:$0xff] (!%p140_p2)  }
   0x9   : > { %v3269_v14 = vld [vmem:[%s4366_s1 + $0x70] sm:$0xff] (!%p140_p2)   ;;  %v3271_v16 = vld [vmem:[%s4366_s1 + $0x78] sm:$0xff] (!%p140_p2)   ;;  %v3279_v18 = vld [vmem:[%s4366_s1 + $0xc0] sm:$0xff] (!%p140_p2)  }
   0xa   : > { %v3270_v15 = vld [vmem:[%s4366_s1 + $0x30] sm:$0xff] (!%p140_p2)   ;;  %v3272_v17 = vld [vmem:[%s4366_s1 + $0x38] sm:$0xff] (!%p140_p2)   ;;  %v3280_v21 = vld [vmem:[%s4366_s1 + $0x140] sm:$0xff] (!%p140_p2)  }
   0xb   : > { %2827 = vmatpush3.bf16.msra.mxu0 (!%p140_p2), %v3260_v3  ;;  %3241 = vmatpush3.bf16.msra.mxu1 (!%p140_p2), %v3260_v3  ;;  %v3281_v22 = vld [vmem:[%s4366_s1 + $0x80] sm:$0xff] (!%p140_p2)   ;;  %v3283_v24 = vld [vmem:[%s4366_s1 + $0xc8] sm:$0xff] (!%p140_p2)   ;;  %v3291_v32 = vld [vmem:[%s4366_s1 + $0xd0] sm:$0xff] (!%p140_p2)  }
   0xc   : > { %2828 = vmatprep.subr.bf16.mxu0 (!%p140_p2), %v3261_v4  ;;  %3234 = vmatprep.subr.bf16.mxu1 (!%p140_p2), %v3261_v4  ;;  %v3282_v23 = vld [vmem:[%s4366_s1 + $0x100] sm:$0xff] (!%p140_p2)   ;;  %v3294_v27 = vld [vmem:[%s4366_s1 + $0x148] sm:$0xff] (!%p140_p2)   ;;  %v3292_v33 = vld [vmem:[%s4366_s1 + $0x90] sm:$0xff] (!%p140_p2)  }
   0xd   : > { %s4370_s16 = smov (!%p165_p3, %s2458_s16), 63  ;;  %v3284_v28 = vld [vmem:[%s4366_s1 + $0x88] sm:$0xff]   ;;  %v3293_v34 = vld [vmem:[%s4366_s1 + $0xd8] sm:$0xff]   ;;  %v3303_v38 = vld [vmem:[%s4366_s1 + $0xe0] sm:$0xff]  }
   0xe   : > { %s3248_s29 = smul.u32 28, %s4370_s16  ;;  %v3296_v29 = vld [vmem:[%s4366_s1 + $0x108] sm:$0xff]   ;;  %v3295_v37 = vld [vmem:[%s4366_s1 + $0x98] sm:$0xff]   ;;  %v3314_v41 = vld [vmem:[%s4366_s1 + $0x150] sm:$0xff]   ;;  %s2461_s8 = sshll.u32 %s4370_s16, 2 }
   0xf   : > { %2829 = vmatpush3.bf16.msra.mxu0 %v3262_v5  ;;  %3242 = vmatpush3.bf16.msra.mxu1 %v3262_v5  ;;  %v3304_v42 = vld [vmem:[%s4366_s1 + $0xa0] sm:$0xff]   ;;  %v3305_v43 = vld [vmem:[%s4366_s1 + $0xe8] sm:$0xff]   ;;  %v3316_v44 = vld [vmem:[%s4366_s1 + $0x110] sm:$0xff]   ;;  %s4148_s11 = scalar_lea.vmem %s4368_s3, %s2461_s8 }
  0x10   : > { %2830 = vmatprep.subr.bf16.mxu0 %v3263_v6  ;;  %3235 = vmatprep.subr.bf16.mxu1 %v3263_v6  ;;  %s3606_s9 = scalar_lea.vmem %s4365_s0, %s3248_s29  ;;  %v3306_v47 = vld [vmem:[%s4366_s1 + $0xa8] sm:$0xff]   ;;  %v3313_v48 = vld [vmem:[%s4366_s1 + $0xf0] sm:$0xff]   ;;  %v3325_v51 = vld [vmem:[%s4366_s1 + $0x158] sm:$0xff]  }
  0x11   : > { %v3275_v11 = vld [vmem:[%s3606_s9 + $0x4] ss:$28 sps:$4 sm:$0xff]   ;;  %v3285_v25 = vld [vmem:[%s3606_s9 + $0x3c] ss:$28 sps:$4 sm:$0xff]   ;;  %v3297_v35 = vld [vmem:[%s3606_s9 + $0x74] ss:$28 sps:$4 sm:$0xff]  }
  0x12   : > { %v3278_v12 = vld [vmem:[%s3606_s9 + $0x2a4] ss:$28 sps:$4 sm:$0xff]   ;;  %1369 = vmatprep.mubr.bf16.mxu0 %v3275_v11  ;;  %v3287_v26 = vld [vmem:[%s3606_s9 + $0x2dc] ss:$28 sps:$4 sm:$0xff]   ;;  %v3299_v36 = vld [vmem:[%s3606_s9 + $0x314] ss:$28 sps:$4 sm:$0xff]  }
  0x13   : > { %2831 = vmatpush3.bf16.msra.mxu0 %v3264_v7  ;;  %3243 = vmatpush3.bf16.msra.mxu1 %v3264_v7  ;;  %v3273_v19 = vld [vmem:[%s3606_s9] ss:$28 sps:$4 sm:$0xff]   ;;  %v3289_v30 = vld [vmem:[%s3606_s9 + $0x38] ss:$28 sps:$4 sm:$0xff]   ;;  %v3301_v39 = vld [vmem:[%s3606_s9 + $0x70] ss:$28 sps:$4 sm:$0xff]  }
  0x14   : > { %2832 = vmatprep.subr.bf16.mxu0 %v3265_v8  ;;  %3236 = vmatprep.subr.bf16.mxu1 %v3265_v8  ;;  %v3276_v20 = vld [vmem:[%s3606_s9 + $0x2a0] ss:$28 sps:$4 sm:$0xff]   ;;  %v3290_v31 = vld [vmem:[%s3606_s9 + $0x2d8] ss:$28 sps:$4 sm:$0xff]   ;;  %v3302_v40 = vld [vmem:[%s3606_s9 + $0x310] ss:$28 sps:$4 sm:$0xff]  }
  0x15   : > { %1465 = vmatprep.mubr.bf16.mxu1 %v3278_v12  ;;  %v3307_v45 = vld [vmem:[%s3606_s9 + $0xac] ss:$28 sps:$4 sm:$0xff]   ;;  %v3315_v52 = vld [vmem:[%s4366_s1 + $0xb0] sm:$0xff]   ;;  %v3327_v53 = vld [vmem:[%s4366_s1 + $0x118] sm:$0xff]  }
  0x16   : > { %v3309_v46 = vld [vmem:[%s3606_s9 + $0x34c] ss:$28 sps:$4 sm:$0xff]   ;;  %v3319_v54 = vld [vmem:[%s3606_s9 + $0xe4] ss:$28 sps:$4 sm:$0xff]   ;;  %v3317_v55 = vld [vmem:[%s4366_s1 + $0xf8] sm:$0xff]  }
  0x17   : > { %2833 = vmatpush3.bf16.msra.mxu0 %v3266_v9  ;;  %3244 = vmatpush3.bf16.msra.mxu1 %v3266_v9  ;;  %v3311_v49 = vld [vmem:[%s3606_s9 + $0xa8] ss:$28 sps:$4 sm:$0xff]   ;;  %v3318_v57 = vld [vmem:[%s4366_s1 + $0xb8] sm:$0xff]   ;;  %v3334_v6 = vld [vmem:[%s3606_s9 + $0x154] ss:$28 sps:$4 sm:$0xff]  }
  0x18   : > { %2834 = vmatprep.subr.bf16.mxu0 %v3267_v10  ;;  %3237 = vmatprep.subr.bf16.mxu1 %v3267_v10  ;;  %v3312_v50 = vld [vmem:[%s3606_s9 + $0x348] ss:$28 sps:$4 sm:$0xff]   ;;  %v3324_v62 = vld [vmem:[%s3606_s9 + $0xe0] ss:$28 sps:$4 sm:$0xff]   ;;  %v3332_v4 = vld [vmem:[%s3606_s9 + $0x118] ss:$28 sps:$4 sm:$0xff]  }
  0x19   : > { %v3323_v56 = vld [vmem:[%s3606_s9 + $0xc] ss:$28 sps:$4 sm:$0xff]   ;;  %v3326_v58 = vld [vmem:[%s4366_s1 + $0x180] sm:$0xff]   ;;  %v3328_v63 = vld [vmem:[%s3606_s9 + $0x11c] ss:$28 sps:$4 sm:$0xff]  }
  0x1a   : > { %v3321_v59 = vld [vmem:[%s3606_s9 + $0x8] ss:$28 sps:$4 sm:$0xff]   ;;  %v3333_v5 = vld [vmem:[%s3606_s9 + $0x40] ss:$28 sps:$4 sm:$0xff]   ;;  %v3357_v7 = vld [vmem:[%s4366_s1 + $0x190] sm:$0xff]  }
  0x1b   : > { %2835 = vmatpush3.bf16.msra.mxu0 %v3268_v13  ;;  %3245 = vmatpush3.bf16.msra.mxu1 %v3268_v13  ;;  %v3340_v60 = vld [vmem:[%s4366_s1 + $0x160] sm:$0xff]   ;;  %v3342_v1 = vld [vmem:[%s4366_s1 + $0x188] sm:$0xff]   ;;  %v3336_v8 = vld [vmem:[%s3606_s9 + $0x7c] ss:$28 sps:$4 sm:$0xff]  }
  0x1c   : > { %2836 = vmatprep.subr.bf16.mxu0 %v3269_v14  ;;  %3238 = vmatprep.subr.bf16.mxu1 %v3269_v14  ;;  %v3341_v61 = vld [vmem:[%s4366_s1 + $0x120] sm:$0xff]   ;;  %v3349_v2 = vld [vmem:[%s4366_s1 + $0x168] sm:$0xff]   ;;  %v3364_v9 = vld [vmem:[%s4366_s1 + $0x170] sm:$0xff]  }
  0x1d   : > { %v3330_v0 = vld [vmem:[%s3606_s9 + $0x44] ss:$28 sps:$4 sm:$0xff]   ;;  %v3350_v3 = vld [vmem:[%s4366_s1 + $0x128] sm:$0xff]   ;;  %v3365_v10 = vld [vmem:[%s4366_s1 + $0x130] sm:$0xff]  }
  0x1e   : > { %v3338_v11 = vld [vmem:[%s3606_s9 + $0x150] ss:$28 sps:$4 sm:$0xff]   ;;  %v3339_v12 = vld [vmem:[%s3606_s9 + $0x78] ss:$28 sps:$4 sm:$0xff]  }
  0x1f   : > { %2837 = vmatpush3.bf16.msra.mxu0 %v3270_v15  ;;  %3246 = vmatpush3.bf16.msra.mxu1 %v3270_v15  ;;  %v3343_v13 = vld [vmem:[%s3606_s9 + $0x18c] ss:$28 sps:$4 sm:$0xff]   ;;  %v3345_v14 = vld [vmem:[%s3606_s9 + $0xb4] ss:$28 sps:$4 sm:$0xff]   ;;  %v3372_v15 = vld [vmem:[%s4366_s1 + $0x178] sm:$0xff]  }
  0x20   : > { %2838 = vmatprep.subr.bf16.mxu0 %v3271_v16  ;;  %3239 = vmatprep.subr.bf16.mxu1 %v3271_v16  ;;  %v3373_v16 = vld [vmem:[%s4366_s1 + $0x198] sm:$0xff]  }
  0x23   : > { %2839 = vmatpush3.bf16.msra.mxu0 %v3272_v17  ;;  %3247 = vmatpush3.bf16.msra.mxu1 %v3272_v17  ;;  %v3374_v17 = vld [vmem:[%s4366_s1 + $0x138] sm:$0xff]  }
  0x24   : > { %2936 = vmatprep.subr.bf16.mxu1 %v3279_v18  ;;  %3048 = vmatprep.subr.bf16.mxu0 %v3280_v21  ;;  %v3347_v18 = vld [vmem:[%s3606_s9 + $0x188] ss:$28 sps:$4 sm:$0xff]  }
  0x25   : > { %v3353_v21 = vld [vmem:[%s3606_s9 + $0xec] ss:$28 sps:$4 sm:$0xff]  }
  0x26   : > { %1370 = vmatmul.mubr.bf16.vlgmr.msra.gmra.mrb[0].mxu0 %v3273_v19  ;;  %1466 = vmatmul.mubr.bf16.vlgmr.msra.gmra.mrb[0].mxu1 %v3276_v20  ;;  %v3348_v19 = vld [vmem:[%s3606_s9 + $0xb0] ss:$28 sps:$4 sm:$0xff]   ;;  %v3351_v20 = vld [vmem:[%s3606_s9 + $0x1c4] ss:$28 sps:$4 sm:$0xff]  }
  0x27   : > { %2937 = vmatpush3.bf16.msra.mxu1 %v3281_v22  ;;  %3049 = vmatpush3.bf16.msra.mxu0 %v3282_v23  ;;  %v3387_v22 = vld [vmem:[%s4366_s1 + $0x1a0] sm:$0xff]  }
  0x28   : > { %2938 = vmatprep.subr.bf16.mxu1 %v3283_v24  ;;  %1377 = vmatprep.mubr.bf16.mxu0 %v3285_v25  ;;  %v3355_v23 = vld [vmem:[%s3606_s9 + $0x1c0] ss:$28 sps:$4 sm:$0xff]   ;;  %v3356_v24 = vld [vmem:[%s3606_s9 + $0xe8] ss:$28 sps:$4 sm:$0xff]  }
  0x29   : > { %1473 = vmatprep.mubr.bf16.mxu1 %v3287_v26  ;;  %3050 = vmatprep.subr.bf16.mxu0 %v3294_v27  ;;  %v3400_v25 = vld [vmem:[%s4366_s1 + $0x1a8] sm:$0xff]   ;;  %v3358_v26 = vld [vmem:[%s3606_s9 + $0x1fc] ss:$28 sps:$4 sm:$0xff]   ;;  %v3360_v27 = vld [vmem:[%s3606_s9 + $0x124] ss:$28 sps:$4 sm:$0xff]  }
  0x2b   : > { %2939 = vmatpush3.bf16.msra.mxu1 %v3284_v28  ;;  %3051 = vmatpush3.bf16.msra.mxu0 %v3296_v29  ;;  %v3413_v28 = vld [vmem:[%s4366_s1 + $0x1b0] sm:$0xff]  }
  0x2c   : > { %2940 = vmatprep.subr.bf16.mxu1 %v3291_v32  ;;  %3052 = vmatprep.subr.bf16.mxu0 %v3314_v41  ;;  %v3362_v29 = vld [vmem:[%s3606_s9 + $0x1f8] ss:$28 sps:$4 sm:$0xff]  }
  0x2d   : > { %v3368_v32 = vld [vmem:[%s3606_s9 + $0x15c] ss:$28 sps:$4 sm:$0xff]   ;;  %v3385_v41 = vld [vmem:[%s3606_s9 + $0x14] ss:$28 sps:$4 sm:$0xff]  }
  0x2e   : > { %1378 = vmatmul.mubr.bf16.gmra.mrb[4].mxu0 %v3289_v30  ;;  %1474 = vmatmul.mubr.bf16.gmra.mrb[4].mxu1 %v3290_v31  ;;  %v3363_v30 = vld [vmem:[%s3606_s9 + $0x120] ss:$28 sps:$4 sm:$0xff]   ;;  %v3366_v31 = vld [vmem:[%s3606_s9 + $0x234] ss:$28 sps:$4 sm:$0xff]  }
  0x2f   : > { %2941 = vmatpush3.bf16.msra.mxu1 %v3292_v33  ;;  %1385 = vmatprep.mubr.bf16.mxu0 %v3297_v35  ;;  %v3426_v33 = vld [vmem:[%s4366_s1 + $0x1b8] sm:$0xff]  }
  0x30   : > { %2942 = vmatprep.subr.bf16.mxu1 %v3293_v34  ;;  %1481 = vmatprep.mubr.bf16.mxu1 %v3299_v36  ;;  %v3370_v34 = vld [vmem:[%s3606_s9 + $0x230] ss:$28 sps:$4 sm:$0xff]   ;;  %v3371_v35 = vld [vmem:[%s3606_s9 + $0x158] ss:$28 sps:$4 sm:$0xff]  }
  0x31   : > { %3053 = vmatpush3.bf16.msra.mxu0 %v3316_v44  ;;  %v3375_v36 = vld [vmem:[%s3606_s9 + $0x26c] ss:$28 sps:$4 sm:$0xff]   ;;  %v3388_v44 = vld [vmem:[%s3606_s9 + $0x204] ss:$28 sps:$4 sm:$0xff]  }
  0x32   : > { %3054 = vmatprep.subr.bf16.mxu0 %v3325_v51  ;;  %v3399_v51 = vld [vmem:[%s3606_s9 + $0x80] ss:$28 sps:$4 sm:$0xff]  }
  0x33   : > { %2943 = vmatpush3.bf16.msra.mxu1 %v3295_v37  ;;  %v3377_v37 = vld [vmem:[%s3606_s9 + $0x194] ss:$28 sps:$4 sm:$0xff]  }
  0x34   : > { %2944 = vmatprep.subr.bf16.mxu1 %v3303_v38  ;;  %v3379_v38 = vld [vmem:[%s3606_s9 + $0x268] ss:$28 sps:$4 sm:$0xff]  }
  0x35   : > { %3055 = vmatpush3.bf16.msra.mxu0 %v3327_v53  ;;  %v3403_v53 = vld [vmem:[%s3606_s9 + $0xbc] ss:$28 sps:$4 sm:$0xff]  }
  0x36   : > { %1386 = vmatmul.mubr.bf16.gmra.mrb[8].mxu0 %v3301_v39  ;;  %1482 = vmatmul.mubr.bf16.gmra.mrb[8].mxu1 %v3302_v40  ;;  %v3380_v39 = vld [vmem:[%s3606_s9 + $0x190] ss:$28 sps:$4 sm:$0xff]  }
  0x37   : > { %2945 = vmatpush3.bf16.msra.mxu1 %v3304_v42  ;;  %1393 = vmatprep.mubr.bf16.mxu0 %v3307_v45  ;;  %v3381_v40 = vld [vmem:[%s3606_s9 + $0x1cc] ss:$28 sps:$4 sm:$0xff]  }
  0x38   : > { %2946 = vmatprep.subr.bf16.mxu1 %v3305_v43  ;;  %1489 = vmatprep.mubr.bf16.mxu1 %v3309_v46  ;;  %v3383_v42 = vld [vmem:[%s3606_s9 + $0x10] ss:$28 sps:$4 sm:$0xff]   ;;  %v3386_v43 = vld [vmem:[%s3606_s9 + $0x1c8] ss:$28 sps:$4 sm:$0xff]   ;;  %v3392_v46 = vld [vmem:[%s3606_s9 + $0x200] ss:$28 sps:$4 sm:$0xff]  }
  0x39   : > { %3056 = vmatprep.subr.bf16.mxu0 %v3340_v60  ;;  %v3390_v45 = vld [vmem:[%s3606_s9 + $0x4c] ss:$28 sps:$4 sm:$0xff]   ;;  %v3414_v60 = vld [vmem:[%s3606_s9 + $0x2e4] ss:$28 sps:$4 sm:$0xff]  }
  0x3a   : > { %3057 = vmatpush3.bf16.msra.mxu0 %v3341_v61  ;;  %v3416_v61 = vld [vmem:[%s3606_s9 + $0x12c] ss:$28 sps:$4 sm:$0xff]  }
  0x3b   : > { %2947 = vmatpush3.bf16.msra.mxu1 %v3306_v47  ;;  %3058 = vmatprep.subr.bf16.mxu0 %v3349_v2  ;;  %v3393_v47 = vld [vmem:[%s3606_s9 + $0x48] ss:$28 sps:$4 sm:$0xff]   ;;  %v3424_v2 = vld [vmem:[%s3606_s9 + $0x318] ss:$28 sps:$4 sm:$0xff]  }
  0x3c   : > { %2948 = vmatprep.subr.bf16.mxu1 %v3313_v48  ;;  %v3394_v48 = vld [vmem:[%s3606_s9 + $0x23c] ss:$28 sps:$4 sm:$0xff]  }
  0x3e   : > { %1394 = vmatmul.mubr.bf16.gmra.mrb[12].mxu0 %v3311_v49  ;;  %1490 = vmatmul.mubr.bf16.gmra.mrb[12].mxu1 %v3312_v50  ;;  %v3396_v49 = vld [vmem:[%s3606_s9 + $0x84] ss:$28 sps:$4 sm:$0xff]   ;;  %v3398_v50 = vld [vmem:[%s3606_s9 + $0x238] ss:$28 sps:$4 sm:$0xff]  }
  0x3f   : > { %2949 = vmatpush3.bf16.msra.mxu1 %v3315_v52  ;;  %1401 = vmatprep.mubr.bf16.mxu0 %v3319_v54  ;;  %v3401_v52 = vld [vmem:[%s3606_s9 + $0x274] ss:$28 sps:$4 sm:$0xff]  }
  0x40   : > { %2950 = vmatprep.subr.bf16.mxu1 %v3317_v55  ;;  %1530 = vmatprep.mubr.bf16.mxu1 %v3323_v56  ;;  %v3405_v54 = vld [vmem:[%s3606_s9 + $0x270] ss:$28 sps:$4 sm:$0xff]   ;;  %v3406_v55 = vld [vmem:[%s3606_s9 + $0xb8] ss:$28 sps:$4 sm:$0xff]  }
  0x41   : > { %3059 = vmatpush3.bf16.msra.mxu0 %v3350_v3  ;;  %v3407_v56 = vld [vmem:[%s3606_s9 + $0x2ac] ss:$28 sps:$4 sm:$0xff]   ;;  %v3425_v3 = vld [vmem:[%s3606_s9 + $0x160] ss:$28 sps:$4 sm:$0xff]  }
  0x42   : > { %3060 = vmatprep.subr.bf16.mxu0 %v3364_v9  ;;  %v3435_v9 = vld [vmem:[%s3606_s9 + $0x18] ss:$28 sps:$4 sm:$0xff]  }
  0x43   : > { %2951 = vmatpush3.bf16.msra.mxu1 %v3318_v57  ;;  %v3409_v57 = vld [vmem:[%s3606_s9 + $0xf4] ss:$28 sps:$4 sm:$0xff]  }
  0x44   : > { %3184 = vmatprep.subr.bf16.mxu1 %v3326_v58 }
  0x45   : > { %3061 = vmatpush3.bf16.msra.mxu0 %v3365_v10  ;;  %v3436_v10 = vld [vmem:[%s3606_s9 + $0x1d0] ss:$28 sps:$4 sm:$0xff]  }
  0x46   : > { %1402 = vmatmul.mubr.bf16.gmra.mrb[16].mxu0 %v3324_v62  ;;  %1531 = vmatmul.mubr.bf16.vlgmr.msra.gmra.mrb[16].mxu1 %v3321_v59  ;;  %v3412_v59 = vld [vmem:[%s3606_s9 + $0xf0] ss:$28 sps:$4 sm:$0xff]   ;;  %v3418_v62 = vld [vmem:[%s3606_s9 + $0x2e0] ss:$28 sps:$4 sm:$0xff]  }
  0x47   : > { %3185 = vmatpush3.bf16.msra.mxu1 %v3326_v58  ;;  %1409 = vmatprep.mubr.bf16.mxu0 %v3328_v63  ;;  %v3411_v58 = vld [vmem:[%s3606_s9 + $0x2a8] ss:$28 sps:$4 sm:$0xff]  }
  0x48   : > { %1538 = vmatprep.mubr.bf16.mxu1 %v3330_v0  ;;  %3186 = vmatprep.subr.bf16.mxu1 %v3342_v1  ;;  %v3419_v63 = vld [vmem:[%s3606_s9 + $0x128] ss:$28 sps:$4 sm:$0xff]   ;;  %v3420_v0 = vld [vmem:[%s3606_s9 + $0x31c] ss:$28 sps:$4 sm:$0xff]  }
  0x49   : > { %3062 = vmatprep.subr.bf16.mxu0 %v3372_v15  ;;  %v3442_v15 = vld [vmem:[%s3606_s9 + $0xc0] ss:$28 sps:$4 sm:$0xff]  }
  0x4a   : > { %3063 = vmatpush3.bf16.msra.mxu0 %v3374_v17  ;;  %v3445_v17 = vld [vmem:[%s3606_s9 + $0xf8] ss:$28 sps:$4 sm:$0xff]  }
  0x4b   : > { %3187 = vmatpush3.bf16.msra.mxu1 %v3342_v1  ;;  %v3422_v1 = vld [vmem:[%s3606_s9 + $0x164] ss:$28 sps:$4 sm:$0xff]  }
  0x4c   : > { %3188 = vmatprep.subr.bf16.mxu1 %v3357_v7 }
  0x4e   : > { %1410 = vmatmul.mubr.bf16.gmra.mrb[20].mxu0 %v3332_v4  ;;  %1539 = vmatmul.mubr.bf16.gmra.mrb[20].mxu1 %v3333_v5  ;;  %v3427_v4 = vld [vmem:[%s3606_s9 + $0x354] ss:$28 sps:$4 sm:$0xff]   ;;  %v3429_v5 = vld [vmem:[%s3606_s9 + $0x19c] ss:$28 sps:$4 sm:$0xff]  }
  0x4f   : > { %1417 = vmatprep.mubr.bf16.mxu0 %v3334_v6  ;;  %1546 = vmatprep.mubr.bf16.mxu1 %v3336_v8  ;;  %v3431_v6 = vld [vmem:[%s3606_s9 + $0x350] ss:$28 sps:$4 sm:$0xff]  }
  0x50   : > { %3189 = vmatpush3.bf16.msra.mxu1 %v3357_v7  ;;  %v3432_v7 = vld [vmem:[%s3606_s9 + $0x198] ss:$28 sps:$4 sm:$0xff]  }
  0x51   : > { %3190 = vmatprep.subr.bf16.mxu1 %v3373_v16  ;;  %v3433_v8 = vld [vmem:[%s3606_s9 + $0x1d4] ss:$28 sps:$4 sm:$0xff]  }
  0x54   : > { %3191 = vmatpush3.bf16.msra.mxu1 %v3373_v16  ;;  %v3443_v16 = vld [vmem:[%s3606_s9 + $0x244] ss:$28 sps:$4 sm:$0xff]  }
  0x55   : > { %3192 = vmatprep.subr.bf16.mxu1 %v3387_v22 }
  0x56   : > { %1418 = vmatmul.mubr.bf16.gmra.mrb[24].mxu0 %v3338_v11  ;;  %1547 = vmatmul.mubr.bf16.gmra.mrb[24].mxu1 %v3339_v12  ;;  %v3437_v11 = vld [vmem:[%s3606_s9 + $0x50] ss:$28 sps:$4 sm:$0xff]  }
  0x57   : > { %1425 = vmatprep.mubr.bf16.mxu0 %v3343_v13  ;;  %1554 = vmatprep.mubr.bf16.mxu1 %v3345_v14  ;;  %v3438_v12 = vld [vmem:[%s3606_s9 + $0x20c] ss:$28 sps:$4 sm:$0xff]  }
  0x58   : > { %3193 = vmatpush3.bf16.msra.mxu1 %v3387_v22  ;;  %v3440_v13 = vld [vmem:[%s3606_s9 + $0x88] ss:$28 sps:$4 sm:$0xff]   ;;  %v3451_v22 = vld [vmem:[%s3606_s9 + $0x278] ss:$28 sps:$4 sm:$0xff]  }
  0x59   : > { %3194 = vmatprep.subr.bf16.mxu1 %v3400_v25  ;;  %v3441_v14 = vld [vmem:[%s3606_s9 + $0x208] ss:$28 sps:$4 sm:$0xff]  }
  0x5c   : > { %3195 = vmatpush3.bf16.msra.mxu1 %v3400_v25  ;;  %v3455_v25 = vld [vmem:[%s3606_s9 + $0x1d8] ss:$28 sps:$4 sm:$0xff]  }
  0x5d   : > { %3196 = vmatprep.subr.bf16.mxu1 %v3413_v28 }
  0x5e   : > { %1426 = vmatmul.mubr.bf16.gmra.mrb[28].mxu0 %v3347_v18  ;;  %1555 = vmatmul.mubr.bf16.gmra.mrb[28].mxu1 %v3348_v19  ;;  %v3446_v18 = vld [vmem:[%s3606_s9 + $0x240] ss:$28 sps:$4 sm:$0xff]   ;;  %v3447_v19 = vld [vmem:[%s3606_s9 + $0x130] ss:$28 sps:$4 sm:$0xff]  }
  0x5f   : > { %1433 = vmatprep.mubr.bf16.mxu0 %v3351_v20  ;;  %1562 = vmatprep.mubr.bf16.mxu1 %v3353_v21  ;;  %v3448_v20 = vld [vmem:[%s3606_s9 + $0x27c] ss:$28 sps:$4 sm:$0xff]   ;;  %v3450_v21 = vld [vmem:[%s3606_s9 + $0x168] ss:$28 sps:$4 sm:$0xff]  }
  0x60   : > { %3197 = vmatpush3.bf16.msra.mxu1 %v3413_v28  ;;  %v3458_v28 = vld [vmem:[%s3606_s9 + $0x2ec] ss:$28 sps:$4 sm:$0xff]  }
  0x61   : > { %3198 = vmatprep.subr.bf16.mxu1 %v3426_v33 }
  0x64   : > { %3199 = vmatpush3.bf16.msra.mxu1 %v3426_v33  ;;  %v3465_v33 = vld [vmem:[%s3606_s9 + $0x2b8] ss:$28 sps:$4 sm:$0xff]  }
  0x66   : > { %1434 = vmatmul.mubr.bf16.gmra.mrb[32].mxu0 %v3355_v23  ;;  %1563 = vmatmul.mubr.bf16.gmra.mrb[32].mxu1 %v3356_v24  ;;  %v3452_v23 = vld [vmem:[%s3606_s9 + $0x1a0] ss:$28 sps:$4 sm:$0xff]   ;;  %v3453_v24 = vld [vmem:[%s3606_s9 + $0x2b4] ss:$28 sps:$4 sm:$0xff]  }
  0x67   : > { %1441 = vmatprep.mubr.bf16.mxu0 %v3358_v26  ;;  %1570 = vmatprep.mubr.bf16.mxu1 %v3360_v27  ;;  %v3456_v26 = vld [vmem:[%s3606_s9 + $0x2b0] ss:$28 sps:$4 sm:$0xff]  }
  0x68   : > { %v3457_v27 = vld [vmem:[%s3606_s9 + $0x210] ss:$28 sps:$4 sm:$0xff]  }
  0x6e   : > { %1442 = vmatmul.mubr.bf16.gmra.mrb[36].mxu0 %v3362_v29  ;;  %1571 = vmatmul.mubr.bf16.gmra.mrb[36].mxu1 %v3363_v30  ;;  %v3460_v29 = vld [vmem:[%s3606_s9 + $0x248] ss:$28 sps:$4 sm:$0xff]  }
  0x6f   : > { %1449 = vmatprep.mubr.bf16.mxu0 %v3366_v31  ;;  %1578 = vmatprep.mubr.bf16.mxu1 %v3368_v32  ;;  %v3461_v30 = vld [vmem:[%s3606_s9 + $0x2e8] ss:$28 sps:$4 sm:$0xff]   ;;  %v3462_v31 = vld [vmem:[%s3606_s9 + $0x280] ss:$28 sps:$4 sm:$0xff]  }
  0x70   : > { %v3463_v32 = vld [vmem:[%s3606_s9 + $0x324] ss:$28 sps:$4 sm:$0xff]  }
  0x76   : > { %1450 = vmatmul.mubr.bf16.gmra.mrb[40].mxu0 %v3370_v34  ;;  %1579 = vmatmul.mubr.bf16.gmra.mrb[40].mxu1 %v3371_v35  ;;  %v3466_v34 = vld [vmem:[%s3606_s9 + $0x320] ss:$28 sps:$4 sm:$0xff]   ;;  %v3467_v35 = vld [vmem:[%s3606_s9 + $0x2f0] ss:$28 sps:$4 sm:$0xff]  }
  0x77   : > { %1457 = vmatprep.mubr.bf16.mxu0 %v3375_v36  ;;  %1586 = vmatprep.mubr.bf16.mxu1 %v3377_v37  ;;  %v3468_v36 = vld [vmem:[%s3606_s9 + $0x35c] ss:$28 sps:$4 sm:$0xff]   ;;  %v3470_v37 = vld [vmem:[%s3606_s9 + $0x328] ss:$28 sps:$4 sm:$0xff]  }
  0x7e   : > { %1458 = vmatmul.mubr.bf16.gmra.mrb[44].mxu0 %v3379_v38  ;;  %1587 = vmatmul.mubr.bf16.gmra.mrb[44].mxu1 %v3380_v39 }
  0x7f   : > { %1594 = vmatprep.mubr.bf16.mxu1 %v3381_v40  ;;  %1691 = vmatprep.mubr.bf16.mxu0 %v3385_v41 }
  0x86   : > { %1595 = vmatmul.mubr.bf16.gmra.mrb[48].mxu1 %v3386_v43  ;;  %1692 = vmatmul.mubr.bf16.vlgmr.msra.gmra.mrb[48].mxu0 %v3383_v42  ;;  %v3471_v42 = vld [vmem:[%s3606_s9 + $0x358] ss:$28 sps:$4 sm:$0xff]   ;;  %v3472_v43 = vld [vmem:[%s3606_s9 + $0x360] ss:$28 sps:$4 sm:$0xff]  }
  0x87   : > { %1602 = vmatprep.mubr.bf16.mxu1 %v3388_v44  ;;  %1699 = vmatprep.mubr.bf16.mxu0 %v3390_v45 }
  0x8e   : > { %1603 = vmatmul.mubr.bf16.gmra.mrb[52].mxu1 %v3392_v46  ;;  %1700 = vmatmul.mubr.bf16.gmra.mrb[52].mxu0 %v3393_v47 }
  0x8f   : > { %1610 = vmatprep.mubr.bf16.mxu1 %v3394_v48  ;;  %1707 = vmatprep.mubr.bf16.mxu0 %v3396_v49 }
  0x96   : > { %1611 = vmatmul.mubr.bf16.gmra.mrb[56].mxu1 %v3398_v50  ;;  %1708 = vmatmul.mubr.bf16.gmra.mrb[56].mxu0 %v3399_v51 }
  0x97   : > { %1618 = vmatprep.mubr.bf16.mxu1 %v3401_v52  ;;  %1715 = vmatprep.mubr.bf16.mxu0 %v3403_v53 }
  0x9e   : > { %1619 = vmatmul.mubr.bf16.gmra.mrb[60].mxu1 %v3405_v54  ;;  %1716 = vmatmul.mubr.bf16.gmra.mrb[60].mxu0 %v3406_v55 }
  0x9f   : > { %1626 = vmatprep.mubr.bf16.mxu1 %v3407_v56  ;;  %1723 = vmatprep.mubr.bf16.mxu0 %v3409_v57 }
  0xa6   : > { %1627 = vmatmul.mubr.bf16.gmra.mrb[64].mxu1 %v3411_v58  ;;  %1724 = vmatmul.mubr.bf16.gmra.mrb[64].mxu0 %v3412_v59 }
  0xa7   : > { %1634 = vmatprep.mubr.bf16.mxu1 %v3414_v60  ;;  %1731 = vmatprep.mubr.bf16.mxu0 %v3416_v61 }
  0xae   : > { %1635 = vmatmul.mubr.bf16.gmra.mrb[68].mxu1 %v3418_v62  ;;  %1732 = vmatmul.mubr.bf16.gmra.mrb[68].mxu0 %v3419_v63 }
  0xaf   : > { %1642 = vmatprep.mubr.bf16.mxu1 %v3420_v0  ;;  %1739 = vmatprep.mubr.bf16.mxu0 %v3422_v1 }
  0xb6   : > { %1643 = vmatmul.mubr.bf16.gmra.mrb[72].mxu1 %v3424_v2  ;;  %1740 = vmatmul.mubr.bf16.gmra.mrb[72].mxu0 %v3425_v3 }
  0xb7   : > { %1650 = vmatprep.mubr.bf16.mxu1 %v3427_v4  ;;  %1747 = vmatprep.mubr.bf16.mxu0 %v3429_v5 }
  0xbe   : > { %1651 = vmatmul.mubr.bf16.gmra.mrb[76].mxu1 %v3431_v6  ;;  %1748 = vmatmul.mubr.bf16.gmra.mrb[76].mxu0 %v3432_v7 }
  0xbf   : > { %1755 = vmatprep.mubr.bf16.mxu0 %v3433_v8  ;;  %3200 = vmatprep.mubr.bf16.mxu1 %v3435_v9 }
  0xc6   : > { %1756 = vmatmul.mubr.bf16.gmra.mrb[80].mxu0 %v3436_v10  ;;  %3201 = vmatmul.mubr.bf16.vlgmr.msra.gmra.mrb[80].mxu1 %v3437_v11 }
  0xc7   : > { %1763 = vmatprep.mubr.bf16.mxu0 %v3438_v12  ;;  %3204 = vmatprep.mubr.bf16.mxu1 %v3440_v13 }
  0xce   : > { %1764 = vmatmul.mubr.bf16.gmra.mrb[84].mxu0 %v3441_v14  ;;  %3205 = vmatmul.mubr.bf16.gmra.mrb[84].mxu1 %v3442_v15 }
  0xcf   : > { %1771 = vmatprep.mubr.bf16.mxu0 %v3443_v16  ;;  %3208 = vmatprep.mubr.bf16.mxu1 %v3445_v17 }
  0xd6   : > { %1772 = vmatmul.mubr.bf16.gmra.mrb[88].mxu0 %v3446_v18  ;;  %3209 = vmatmul.mubr.bf16.gmra.mrb[88].mxu1 %v3447_v19 }
  0xd7   : > { %1779 = vmatprep.mubr.bf16.mxu0 %v3448_v20  ;;  %3212 = vmatprep.mubr.bf16.mxu1 %v3450_v21 }
  0xde   : > { %1780 = vmatmul.mubr.bf16.gmra.mrb[92].mxu0 %v3451_v22  ;;  %3213 = vmatmul.mubr.bf16.gmra.mrb[92].mxu1 %v3452_v23 }
  0xdf   : > { %1787 = vmatprep.mubr.bf16.mxu0 %v3453_v24  ;;  %3216 = vmatprep.mubr.bf16.mxu1 %v3455_v25  ;;  %v3880_v24 = vld [vmem:[%s4367_s2] ss:$0 sm:$0xff] }
  0xe6   : > { %1788 = vmatmul.mubr.bf16.gmra.mrb[96].mxu0 %v3456_v26  ;;  %3217 = vmatmul.mubr.bf16.gmra.mrb[96].mxu1 %v3457_v27 }
  0xe7   : > { %1795 = vmatprep.mubr.bf16.mxu0 %v3458_v28  ;;  %3220 = vmatprep.mubr.bf16.mxu1 %v3460_v29 }
  0xee   : > { %1796 = vmatmul.mubr.bf16.gmra.mrb[100].mxu0 %v3461_v30  ;;  %3221 = vmatmul.mubr.bf16.gmra.mrb[100].mxu1 %v3462_v31 }
  0xef   : > { %1803 = vmatprep.mubr.bf16.mxu0 %v3463_v32  ;;  %3224 = vmatprep.mubr.bf16.mxu1 %v3465_v33 }
  0xf6   : > { %1804 = vmatmul.mubr.bf16.gmra.mrb[104].mxu0 %v3466_v34  ;;  %3225 = vmatmul.mubr.bf16.gmra.mrb[104].mxu1 %v3467_v35 }
  0xf7   : > { %1811 = vmatprep.mubr.bf16.mxu0 %v3468_v36  ;;  %3228 = vmatprep.mubr.bf16.mxu1 %v3470_v37 }
  0xf9   : > { %v2840_v38 = vpop.f32.mrb[0].mxu0  ;;  %v2912_v39 = vpop.f32.mrb[0].mxu1 }
  0xfa   : > { %v2841_v40 = vpop.f32.mrb[1].mxu0  ;;  %v2913_v41 = vpop.f32.mrb[1].mxu1 }
  0xfb   : > { %v2842_v44 = vadd.f32 %v2841_v40, %v2840_v38  ;;  %v2843_v45 = vpop.f32.mrb[2].mxu0  ;;  %v3861_v46 = vadd.f32 %v2913_v41, %v2912_v39  ;;  %v2915_v47 = vpop.f32.mrb[2].mxu1 }
  0xfc   : > { %v2844_v48 = vpop.f32.mrb[3].mxu0  ;;  %v2916_v49 = vpop.f32.mrb[3].mxu1 }
  0xfd   : > { %v2845_v50 = vadd.f32 %v2844_v48, %v2843_v45  ;;  %v3863_v51 = vadd.f32 %v2916_v49, %v2915_v47  ;;  %v1372_v29 = vadd.f32 %v2842_v44, %v3880_v24 }
  0xfe   : > { %1812 = vmatmul.mubr.bf16.gmra.mrb[108].mxu0 %v3471_v42  ;;  %3229 = vmatmul.mubr.bf16.gmra.mrb[108].mxu1 %v3472_v43 }
  0xff   : > { %v1375_v36 = vadd.f32 %v2845_v50, %v3880_v24 }
 0x101   : > { %v2846_v52 = vpop.f32.mrb[4].mxu0  ;;  %v2918_v53 = vpop.f32.mrb[4].mxu1 }
 0x102   : > { %v2847_v54 = vpop.f32.mrb[5].mxu0  ;;  %v2919_v55 = vpop.f32.mrb[5].mxu1 }
 0x103   : > { %v2848_v56 = vadd.f32 %v2847_v54, %v2846_v52  ;;  %v2849_v57 = vpop.f32.mrb[6].mxu0  ;;  %v3865_v58 = vadd.f32 %v2919_v55, %v2918_v53  ;;  %v2921_v59 = vpop.f32.mrb[6].mxu1 }
 0x104   : > { %v2850_v60 = vpop.f32.mrb[7].mxu0  ;;  %v2922_v61 = vpop.f32.mrb[7].mxu1 }
 0x105   : > { %v2851_v62 = vadd.f32 %v2850_v60, %v2849_v57  ;;  %v3867_v63 = vadd.f32 %v2922_v61, %v2921_v59  ;;  %v1380_v44 = vadd.f32 %v2848_v56, %v3880_v24 }
 0x107   : > { %v1383_v50 = vadd.f32 %v2851_v62, %v3880_v24 }
 0x109   : > { %v2852_v0 = vpop.f32.mrb[8].mxu0  ;;  %v2924_v1 = vpop.f32.mrb[8].mxu1 }
 0x10a   : > { %v2853_v2 = vpop.f32.mrb[9].mxu0  ;;  %v2925_v3 = vpop.f32.mrb[9].mxu1 }
 0x10b   : > { %v2854_v4 = vadd.f32 %v2853_v2, %v2852_v0  ;;  %v2855_v5 = vpop.f32.mrb[10].mxu0  ;;  %v3869_v6 = vadd.f32 %v2925_v3, %v2924_v1  ;;  %v2927_v7 = vpop.f32.mrb[10].mxu1 }
 0x10c   : > { %v2856_v8 = vpop.f32.mrb[11].mxu0  ;;  %v2928_v9 = vpop.f32.mrb[11].mxu1 }
 0x10d   : > { %v2857_v10 = vadd.f32 %v2856_v8, %v2855_v5  ;;  %v3871_v11 = vadd.f32 %v2928_v9, %v2927_v7  ;;  %v1388_v56 = vadd.f32 %v2854_v4, %v3880_v24 }
 0x10f   : > { %v1391_v62 = vadd.f32 %v2857_v10, %v3880_v24 }
 0x111   : > { %v2858_v12 = vpop.f32.mrb[12].mxu0  ;;  %v2930_v13 = vpop.f32.mrb[12].mxu1 }
 0x112   : > { %v2859_v14 = vpop.f32.mrb[13].mxu0  ;;  %v2931_v15 = vpop.f32.mrb[13].mxu1 }
 0x113   : > { %v2860_v16 = vadd.f32 %v2859_v14, %v2858_v12  ;;  %v2861_v17 = vpop.f32.mrb[14].mxu0  ;;  %v3873_v18 = vadd.f32 %v2931_v15, %v2930_v13  ;;  %v2933_v19 = vpop.f32.mrb[14].mxu1 }
 0x114   : > { %v2862_v20 = vpop.f32.mrb[15].mxu0  ;;  %v2934_v21 = vpop.f32.mrb[15].mxu1 }
 0x115   : > { %v2863_v22 = vadd.f32 %v2862_v20, %v2861_v17  ;;  %v3875_v23 = vadd.f32 %v2934_v21, %v2933_v19  ;;  %v1396_v4 = vadd.f32 %v2860_v16, %v3880_v24 }
 0x117   : > { %v1399_v10 = vadd.f32 %v2863_v22, %v3880_v24 }
 0x119   : > { %v2864_v25 = vpop.f32.mrb[16].mxu0  ;;  %v2952_v26 = vpop.f32.mrb[16].mxu1 }
 0x11a   : > { %v2865_v27 = vpop.f32.mrb[17].mxu0  ;;  %v2953_v28 = vpop.f32.mrb[17].mxu1 }
 0x11b   : > { %v3883_v30 = vadd.f32 %v2865_v27, %v2864_v25  ;;  %v2954_v31 = vadd.f32 %v2953_v28, %v2952_v26  ;;  %v2867_v32 = vpop.f32.mrb[18].mxu0  ;;  %v2955_v33 = vpop.f32.mrb[18].mxu1 }
 0x11c   : > { %v2868_v34 = vpop.f32.mrb[19].mxu0  ;;  %v2956_v35 = vpop.f32.mrb[19].mxu1 }
 0x11d   : > { %v3886_v37 = vadd.f32 %v2954_v31, %v1372_v29  ;;  %v2869_v38 = vadd.f32 %v2868_v34, %v2867_v32  ;;  %v2957_v39 = vadd.f32 %v2956_v35, %v2955_v33  ;;  %v1404_v16 = vadd.f32 %v3883_v30, %v3880_v24 }
 0x11f   : > { %v3888_v40 = vadd.f32 %v2957_v39, %v1375_v36 }
 0x121   : > { %v2870_v41 = vpop.f32.mrb[20].mxu0  ;;  %v2958_v42 = vpop.f32.mrb[20].mxu1 }
 0x122   : > { %v2871_v43 = vpop.f32.mrb[21].mxu0  ;;  %v2959_v45 = vpop.f32.mrb[21].mxu1 }
 0x123   : > { %v3891_v47 = vadd.f32 %v2871_v43, %v2870_v41  ;;  %v2960_v48 = vadd.f32 %v2959_v45, %v2958_v42  ;;  %v2873_v49 = vpop.f32.mrb[22].mxu0  ;;  %v2961_v52 = vpop.f32.mrb[22].mxu1 }
 0x124   : > { %v2874_v53 = vpop.f32.mrb[23].mxu0  ;;  %v2962_v54 = vpop.f32.mrb[23].mxu1 }
 0x125   : > { %v3894_v55 = vadd.f32 %v2960_v48, %v1380_v44  ;;  %v2875_v57 = vadd.f32 %v2874_v53, %v2873_v49  ;;  %v2963_v59 = vadd.f32 %v2962_v54, %v2961_v52  ;;  %v1407_v53 = vadd.f32 %v2869_v38, %v3880_v24 }
 0x126   : > { %v1412_v30 = vadd.f32 %v3891_v47, %v3880_v24 }
 0x127   : > { %v3896_v60 = vadd.f32 %v2963_v59, %v1383_v50 }
 0x129   : > { %v2876_v61 = vpop.f32.mrb[24].mxu0  ;;  %v2964_v0 = vpop.f32.mrb[24].mxu1 }
 0x12a   : > { %v2877_v1 = vpop.f32.mrb[25].mxu0  ;;  %v2965_v2 = vpop.f32.mrb[25].mxu1 }
 0x12b   : > { %v3899_v3 = vadd.f32 %v2877_v1, %v2876_v61  ;;  %v2966_v5 = vadd.f32 %v2965_v2, %v2964_v0  ;;  %v2879_v7 = vpop.f32.mrb[26].mxu0  ;;  %v2967_v8 = vpop.f32.mrb[26].mxu1 }
 0x12c   : > { %v2880_v9 = vpop.f32.mrb[27].mxu0  ;;  %v2968_v12 = vpop.f32.mrb[27].mxu1 }
 0x12d   : > { %v3902_v13 = vadd.f32 %v2966_v5, %v1388_v56  ;;  %v2881_v14 = vadd.f32 %v2880_v9, %v2879_v7  ;;  %v2969_v15 = vadd.f32 %v2968_v12, %v2967_v8  ;;  %v1420_v47 = vadd.f32 %v3899_v3, %v3880_v24 }
 0x12f   : > { %v3904_v17 = vadd.f32 %v2969_v15, %v1391_v62  ;;  %v1415_v62 = vadd.f32 %v2875_v57, %v3880_v24 }
 0x131   : > { %v2882_v19 = vpop.f32.mrb[28].mxu0  ;;  %v2970_v20 = vpop.f32.mrb[28].mxu1 }
 0x132   : > { %v2883_v21 = vpop.f32.mrb[29].mxu0  ;;  %v2971_v25 = vpop.f32.mrb[29].mxu1 }
 0x133   : > { %v3907_v26 = vadd.f32 %v2883_v21, %v2882_v19  ;;  %v2972_v27 = vadd.f32 %v2971_v25, %v2970_v20  ;;  %v2885_v28 = vpop.f32.mrb[30].mxu0  ;;  %v2973_v29 = vpop.f32.mrb[30].mxu1 }
 0x134   : > { %v2886_v31 = vpop.f32.mrb[31].mxu0  ;;  %v2974_v32 = vpop.f32.mrb[31].mxu1 }
 0x135   : > { %v3910_v33 = vadd.f32 %v2972_v27, %v1396_v4  ;;  %v2887_v34 = vadd.f32 %v2886_v31, %v2885_v28  ;;  %v2975_v35 = vadd.f32 %v2974_v32, %v2973_v29 }
 0x137   : > { %v3912_v36 = vadd.f32 %v2975_v35, %v1399_v10 }
 0x139   : > { %v2888_v39 = vpop.f32.mrb[32].mxu0  ;;  %v2976_v41 = vpop.f32.mrb[32].mxu1 }
 0x13a   : > { %v2889_v42 = vpop.f32.mrb[33].mxu0  ;;  %v2977_v43 = vpop.f32.mrb[33].mxu1 }
 0x13b   : > { %v3916_v45 = vadd.f32 %v2889_v42, %v2888_v39  ;;  %v2978_v44 = vadd.f32 %v2977_v43, %v2976_v41  ;;  %v2891_v48 = vpop.f32.mrb[34].mxu0  ;;  %v2979_v49 = vpop.f32.mrb[34].mxu1  ;;  %v1423_v39 = vadd.f32 %v2881_v14, %v3880_v24 }
 0x13c   : > { %v2892_v52 = vpop.f32.mrb[35].mxu0  ;;  %v2980_v22 = vpop.f32.mrb[35].mxu1 }
 0x13d   : > { %v3919_v54 = vadd.f32 %v2978_v44, %v1404_v16  ;;  %v2893_v50 = vadd.f32 %v2892_v52, %v2891_v48  ;;  %v2981_v59 = vadd.f32 %v2980_v22, %v2979_v49  ;;  %v1428_v52 = vadd.f32 %v3907_v26, %v3880_v24 }
 0x13f   : > { %v3921_v61 = vadd.f32 %v2981_v59, %v1407_v53 }
 0x141   : > { %v2894_v0 = vpop.f32.mrb[36].mxu0  ;;  %v2982_v1 = vpop.f32.mrb[36].mxu1 }
 0x142   : > { %v2895_v2 = vpop.f32.mrb[37].mxu0  ;;  %v2983_v56 = vpop.f32.mrb[37].mxu1 }
 0x143   : > { %v3925_v5 = vadd.f32 %v2895_v2, %v2894_v0  ;;  %v2984_v7 = vadd.f32 %v2983_v56, %v2982_v1  ;;  %v2897_v8 = vpop.f32.mrb[38].mxu0  ;;  %v2985_v9 = vpop.f32.mrb[38].mxu1  ;;  %v1431_v2 = vadd.f32 %v2887_v34, %v3880_v24  ;;  %v1439_v34 = vadd.f32 %v2893_v50, %v3880_v24 }
 0x144   : > { %v2898_v12 = vpop.f32.mrb[39].mxu0  ;;  %v2986_v38 = vpop.f32.mrb[39].mxu1 }
 0x145   : > { %v3928_v15 = vadd.f32 %v2984_v7, %v1412_v30  ;;  %v2899_v19 = vadd.f32 %v2898_v12, %v2897_v8  ;;  %v2987_v20 = vadd.f32 %v2986_v38, %v2985_v9  ;;  %v1444_v50 = vadd.f32 %v3925_v5, %v3880_v24 }
 0x147   : > { %v3930_v21 = vadd.f32 %v2987_v20, %v1415_v62  ;;  %v1436_v62 = vadd.f32 %v3916_v45, %v3880_v24 }
 0x149   : > { %v2900_v25 = vpop.f32.mrb[40].mxu0  ;;  %v2988_v4 = vpop.f32.mrb[40].mxu1 }
 0x14a   : > { %v2901_v27 = vpop.f32.mrb[41].mxu0  ;;  %v2989_v28 = vpop.f32.mrb[41].mxu1 }
 0x14b   : > { %v3934_v29 = vadd.f32 %v2901_v27, %v2900_v25  ;;  %v2990_v31 = vadd.f32 %v2989_v28, %v2988_v4  ;;  %v2903_v32 = vpop.f32.mrb[42].mxu0  ;;  %v2991_v10 = vpop.f32.mrb[42].mxu1 }
 0x14c   : > { %v2904_v35 = vpop.f32.mrb[43].mxu0  ;;  %v2992_v57 = vpop.f32.mrb[43].mxu1 }
 0x14d   : > { %v3937_v41 = vadd.f32 %v2990_v31, %v1420_v47  ;;  %v3939_v42 = vadd.f32 %v2904_v35, %v2903_v32  ;;  %v2993_v43 = vadd.f32 %v2992_v57, %v2991_v10 }
 0x14f   : > { %v3941_v16 = vadd.f32 %v2993_v43, %v1423_v39 }
 0x151   : > { %v2906_v44 = vpop.f32.mrb[44].mxu0  ;;  %v2994_v48 = vpop.f32.mrb[44].mxu1 }
 0x152   : > { %v2907_v49 = vpop.f32.mrb[45].mxu0  ;;  %v2995_v3 = vpop.f32.mrb[45].mxu1 }
 0x153   : > { %v3945_v22 = vadd.f32 %v2907_v49, %v2906_v44  ;;  %v2996_v53 = vadd.f32 %v2995_v3, %v2994_v48  ;;  %v2909_v59 = vpop.f32.mrb[46].mxu0  ;;  %v2997_v0 = vpop.f32.mrb[46].mxu1 }
 0x154   : > { %v2910_v14 = vpop.f32.mrb[47].mxu0  ;;  %v2998_v1 = vpop.f32.mrb[47].mxu1 }
 0x155   : > { %v3948_v56 = vadd.f32 %v2996_v53, %v1428_v52  ;;  %v3950_v30 = vadd.f32 %v2910_v14, %v2909_v59  ;;  %v2999_v7 = vadd.f32 %v2998_v1, %v2997_v0  ;;  %v1447_v59 = vadd.f32 %v2899_v19, %v3880_v24 }
 0x156   : > { %v1452_v19 = vadd.f32 %v3934_v29, %v3880_v24 }
 0x157   : > { %v3952_v8 = vadd.f32 %v2999_v7, %v1431_v2 }
 0x159   : > { %v3000_v9 = vpop.f32.mrb[48].mxu1  ;;  %v3064_v12 = vpop.f32.mrb[48].mxu0 }
 0x15a   : > { %v3001_v38 = vpop.f32.mrb[49].mxu1  ;;  %v3065_v26 = vpop.f32.mrb[49].mxu0 }
 0x15b   : > { %v3002_v20 = vadd.f32 %v3001_v38, %v3000_v9  ;;  %v3066_v25 = vadd.f32 %v3065_v26, %v3064_v12  ;;  %v3003_v4 = vpop.f32.mrb[50].mxu1  ;;  %v3067_v27 = vpop.f32.mrb[50].mxu0 }
 0x15c   : > { %v3004_v28 = vpop.f32.mrb[51].mxu1  ;;  %v3068_v47 = vpop.f32.mrb[51].mxu0 }
 0x15d   : > { %v3957_v31 = vadd.f32 %v3002_v20, %v1436_v62  ;;  %v3005_v32 = vadd.f32 %v3004_v28, %v3003_v4  ;;  %v3069_v10 = vadd.f32 %v3068_v47, %v3067_v27  ;;  %v3960_v35 = vadd.f32 %v3066_v25, %v3886_v37 }
 0x15f   : > { %v3962_v57 = vadd.f32 %v3005_v32, %v1439_v34  ;;  %v3965_v39 = vadd.f32 %v3069_v10, %v3888_v40 }
 0x161   : > { %v3006_v45 = vpop.f32.mrb[52].mxu1  ;;  %v3070_v43 = vpop.f32.mrb[52].mxu0 }
 0x162   : > { %v3007_v44 = vpop.f32.mrb[53].mxu1  ;;  %v3071_v48 = vpop.f32.mrb[53].mxu0 }
 0x163   : > { %v3008_v49 = vadd.f32 %v3007_v44, %v3006_v45  ;;  %v3072_v3 = vadd.f32 %v3071_v48, %v3070_v43  ;;  %v3009_v52 = vpop.f32.mrb[54].mxu1  ;;  %v3073_v53 = vpop.f32.mrb[54].mxu0 }
 0x164   : > { %v3010_v37 = vpop.f32.mrb[55].mxu1  ;;  %v3074_v0 = vpop.f32.mrb[55].mxu0 }
 0x165   : > { %v3970_v14 = vadd.f32 %v3008_v49, %v1444_v50  ;;  %v3011_v1 = vadd.f32 %v3010_v37, %v3009_v52  ;;  %v3075_v40 = vadd.f32 %v3074_v0, %v3073_v53  ;;  %v3973_v2 = vadd.f32 %v3072_v3, %v3894_v55 }
 0x166   : > { %v1455_v55 = vadd.f32 %v3939_v42, %v3880_v24  ;;  %v1460_v42 = vadd.f32 %v3945_v22, %v3880_v24 }
 0x167   : > { %v3975_v7 = vadd.f32 %v3011_v1, %v1447_v59  ;;  %v3978_v9 = vadd.f32 %v3075_v40, %v3896_v60 }
 0x169   : > { %v3012_v5 = vpop.f32.mrb[56].mxu1  ;;  %v3076_v12 = vpop.f32.mrb[56].mxu0 }
 0x16a   : > { %v3013_v38 = vpop.f32.mrb[57].mxu1  ;;  %v3077_v26 = vpop.f32.mrb[57].mxu0 }
 0x16b   : > { %v3014_v62 = vadd.f32 %v3013_v38, %v3012_v5  ;;  %v3078_v20 = vadd.f32 %v3077_v26, %v3076_v12  ;;  %v3015_v25 = vpop.f32.mrb[58].mxu1  ;;  %v3079_v4 = vpop.f32.mrb[58].mxu0 }
 0x16c   : > { %v3016_v27 = vpop.f32.mrb[59].mxu1  ;;  %v3080_v34 = vpop.f32.mrb[59].mxu0 }
 0x16d   : > { %v3984_v28 = vadd.f32 %v3014_v62, %v1452_v19  ;;  %v3017_v60 = vadd.f32 %v3016_v27, %v3015_v25  ;;  %v3081_v47 = vadd.f32 %v3080_v34, %v3079_v4  ;;  %v3987_v32 = vadd.f32 %v3078_v20, %v3902_v13 }
 0x16e   : > { %v1463_v13 = vadd.f32 %v3950_v30, %v3880_v24  ;;  %v1468_v30 = vadd.f32 %v3861_v46, %v3880_v24 }
 0x16f   : > { %v3989_v10 = vadd.f32 %v3017_v60, %v1455_v55  ;;  %v3992_v29 = vadd.f32 %v3081_v47, %v3904_v17 }
 0x171   : > { %v3018_v45 = vpop.f32.mrb[60].mxu1  ;;  %v3082_v43 = vpop.f32.mrb[60].mxu0 }
 0x172   : > { %v3019_v44 = vpop.f32.mrb[61].mxu1  ;;  %v3083_v48 = vpop.f32.mrb[61].mxu0 }
 0x173   : > { %v3020_v50 = vadd.f32 %v3019_v44, %v3018_v45  ;;  %v3084_v49 = vadd.f32 %v3083_v48, %v3082_v43  ;;  %v3021_v3 = vpop.f32.mrb[62].mxu1  ;;  %v3085_v52 = vpop.f32.mrb[62].mxu0 }
 0x174   : > { %v3022_v53 = vpop.f32.mrb[63].mxu1  ;;  %v3086_v59 = vpop.f32.mrb[63].mxu0 }
 0x175   : > { %v3998_v37 = vadd.f32 %v3020_v50, %v1460_v42  ;;  %v3023_v17 = vadd.f32 %v3022_v53, %v3021_v3  ;;  %v3087_v0 = vadd.f32 %v3086_v59, %v3085_v52  ;;  %v4001_v1 = vadd.f32 %v3084_v49, %v3910_v33 }
 0x176   : > { %v1471_v33 = vadd.f32 %v3863_v51, %v3880_v24  ;;  %v1476_v51 = vadd.f32 %v3865_v58, %v3880_v24 }
 0x177   : > { %v4003_v40 = vadd.f32 %v3023_v17, %v1463_v13  ;;  %v4006_v22 = vadd.f32 %v3087_v0, %v3912_v36 }
 0x179   : > { %v3024_v5 = vpop.f32.mrb[64].mxu1  ;;  %v3088_v12 = vpop.f32.mrb[64].mxu0 }
 0x17a   : > { %v3025_v38 = vpop.f32.mrb[65].mxu1  ;;  %v3089_v26 = vpop.f32.mrb[65].mxu0 }
 0x17b   : > { %v3026_v19 = vadd.f32 %v3025_v38, %v3024_v5  ;;  %v3090_v62 = vadd.f32 %v3089_v26, %v3088_v12  ;;  %v3027_v20 = vpop.f32.mrb[66].mxu1  ;;  %v3091_v25 = vpop.f32.mrb[66].mxu0 }
 0x17c   : > { %v3028_v4 = vpop.f32.mrb[67].mxu1  ;;  %v3092_v55 = vpop.f32.mrb[67].mxu0 }
 0x17d   : > { %v4012_v27 = vadd.f32 %v3026_v19, %v1468_v30  ;;  %v3029_v36 = vadd.f32 %v3028_v4, %v3027_v20  ;;  %v3093_v34 = vadd.f32 %v3092_v55, %v3091_v25  ;;  %v4015_v60 = vadd.f32 %v3090_v62, %v3919_v54 }
 0x17e   : > { %v1479_v54 = vadd.f32 %v3867_v63, %v3880_v24  ;;  %v1484_v63 = vadd.f32 %v3869_v6, %v3880_v24 }
 0x17f   : > { %v4017_v47 = vadd.f32 %v3029_v36, %v1471_v33  ;;  %v4020_v46 = vadd.f32 %v3093_v34, %v3921_v61 }
 0x181   : > { %v3030_v45 = vpop.f32.mrb[68].mxu1  ;;  %v3094_v43 = vpop.f32.mrb[68].mxu0 }
 0x182   : > { %v3031_v44 = vpop.f32.mrb[69].mxu1  ;;  %v3095_v48 = vpop.f32.mrb[69].mxu0 }
 0x183   : > { %v3032_v42 = vadd.f32 %v3031_v44, %v3030_v45  ;;  %v3096_v50 = vadd.f32 %v3095_v48, %v3094_v43  ;;  %v3033_v49 = vpop.f32.mrb[70].mxu1  ;;  %v3097_v3 = vpop.f32.mrb[70].mxu0 }
 0x184   : > { %v3034_v52 = vpop.f32.mrb[71].mxu1  ;;  %v3098_v13 = vpop.f32.mrb[71].mxu0 }
 0x185   : > { %v4026_v53 = vadd.f32 %v3032_v42, %v1476_v51  ;;  %v3035_v61 = vadd.f32 %v3034_v52, %v3033_v49  ;;  %v3099_v59 = vadd.f32 %v3098_v13, %v3097_v3  ;;  %v4029_v17 = vadd.f32 %v3096_v50, %v3928_v15 }
 0x186   : > { %v1487_v15 = vadd.f32 %v3871_v11, %v3880_v24  ;;  %v1492_v11 = vadd.f32 %v3873_v18, %v3880_v24 }
 0x187   : > { %v4031_v0 = vadd.f32 %v3035_v61, %v1479_v54  ;;  %v4034_v58 = vadd.f32 %v3099_v59, %v3930_v21 }
 0x189   : > { %v3036_v5 = vpop.f32.mrb[72].mxu1  ;;  %v3100_v12 = vpop.f32.mrb[72].mxu0 }
 0x18a   : > { %v3037_v38 = vpop.f32.mrb[73].mxu1  ;;  %v3101_v26 = vpop.f32.mrb[73].mxu0 }
 0x18b   : > { %v3038_v30 = vadd.f32 %v3037_v38, %v3036_v5  ;;  %v3102_v19 = vadd.f32 %v3101_v26, %v3100_v12  ;;  %v3039_v62 = vpop.f32.mrb[74].mxu1  ;;  %v3103_v20 = vpop.f32.mrb[74].mxu0 }
 0x18c   : > { %v3040_v25 = vpop.f32.mrb[75].mxu1  ;;  %v3104_v33 = vpop.f32.mrb[75].mxu0 }
 0x18d   : > { %v4040_v4 = vadd.f32 %v3038_v30, %v1484_v63  ;;  %v3041_v21 = vadd.f32 %v3040_v25, %v3039_v62  ;;  %v3105_v55 = vadd.f32 %v3104_v33, %v3103_v20  ;;  %v4043_v36 = vadd.f32 %v3102_v19, %v3937_v41 }
 0x18e   : > { %v1495_v41 = vadd.f32 %v3875_v23, %v3880_v24 }
 0x18f   : > { %v4045_v34 = vadd.f32 %v3041_v21, %v1487_v15  ;;  %v4048_v6 = vadd.f32 %v3105_v55, %v3941_v16 }
 0x191   : > { %v3042_v45 = vpop.f32.mrb[76].mxu1  ;;  %v3106_v43 = vpop.f32.mrb[76].mxu0 }
 0x192   : > { %v3043_v44 = vpop.f32.mrb[77].mxu1  ;;  %v3107_v48 = vpop.f32.mrb[77].mxu0 }
 0x193   : > { %v3044_v51 = vadd.f32 %v3043_v44, %v3042_v45  ;;  %v3108_v42 = vadd.f32 %v3107_v48, %v3106_v43  ;;  %v3045_v50 = vpop.f32.mrb[78].mxu1  ;;  %v3109_v49 = vpop.f32.mrb[78].mxu0 }
 0x194   : > { %v3046_v3 = vpop.f32.mrb[79].mxu1  ;;  %v3110_v54 = vpop.f32.mrb[79].mxu0 }
 0x195   : > { %v4054_v52 = vadd.f32 %v3044_v51, %v1492_v11  ;;  %v3047_v16 = vadd.f32 %v3046_v3, %v3045_v50  ;;  %v3111_v13 = vadd.f32 %v3110_v54, %v3109_v49  ;;  %v4057_v61 = vadd.f32 %v3108_v42, %v3948_v56 }
 0x197   : > { %v4059_v59 = vadd.f32 %v3047_v16, %v1495_v41  ;;  %v4062_v18 = vadd.f32 %v3111_v13, %v3952_v8 }
 0x199   : > { %v3112_v5 = vpop.f32.mrb[80].mxu0  ;;  %v3202_v12 = vpop.f32.mrb[80].mxu1 }
 0x19a   : > { %v4065_v38 = vadd.f32 %v3202_v12, %v3973_v2  ;;  %v3113_v23 = vpop.f32.mrb[81].mxu0  ;;  %v1854_v24 = vpop.f32.mrb[81].mxu1 }
 0x19b   : > { %v3114_v26 = vadd.f32 %v3113_v23, %v3112_v5  ;;  %v4068_v63 = vadd.f32 %v1854_v24, %v3960_v35  ;;  %v3115_v30 = vpop.f32.mrb[82].mxu0  ;;  %v3203_v19 = vpop.f32.mrb[82].mxu1 }
 0x19c   : > { %v2015_v56 = vmin.f32 %v4065_v38, 0.0  ;;  %v4072_v62 = vadd.f32 %v3203_v19, %v3978_v9  ;;  %v3116_v8 = vpop.f32.mrb[83].mxu0  ;;  %v1857_v20 = vpop.f32.mrb[83].mxu1  ;;  %vm1983_vm0 = vcmp.gt.f32.partialorder %v4065_v38, 0.0 }
 0x19d   : > { %v2013_v15 = vmin.f32 %v4068_v63, 0.0  ;;  %v3117_v25 = vadd.f32 %v3116_v8, %v3115_v30  ;;  %v4076_v2 = vadd.f32 %v1857_v20, %v3965_v39  ;;  %v4080_v35 = vadd.f32 %v3114_v26, %v3957_v31 }
 0x19e   : > { %v2049_v33 = vmul.f32 1.442695, %v2015_v56  ;;  %v2016_v21 = vmin.f32 %v4072_v62, 0.0  ;;  %vm1981_vm1 = vcmp.gt.f32.partialorder %v4068_v63, 0.0  ;;  %vm1984_vm2 = vcmp.gt.f32.partialorder %v4072_v62, 0.0 }
 0x19f   : > { %v2045_v55 = vmul.f32 1.442695, %v2013_v15  ;;  %v2014_v45 = vmin.f32 %v4076_v2, 0.0  ;;  %v4084_v9 = vadd.f32 %v3117_v25, %v3962_v57  ;;  %vm1982_vm3 = vcmp.gt.f32.partialorder %v4076_v2, 0.0 }
 0x1a0   : > { %3473 = vpow2.f32 %v2049_v33  ;;  %v2051_v43 = vmul.f32 1.442695, %v2016_v21 }
 0x1a1   : > { %3475 = vpow2.f32 %v2045_v55  ;;  %v2047_v44 = vmul.f32 1.442695, %v2014_v45  ;;  %v3118_v48 = vpop.f32.mrb[84].mxu0  ;;  %v3206_v11 = vpop.f32.mrb[84].mxu1 }
 0x1a2   : > { %3477 = vpow2.f32 %v2051_v43  ;;  %v4087_v39 = vadd.f32 %v3206_v11, %v4001_v1  ;;  %v3119_v51 = vpop.f32.mrb[85].mxu0  ;;  %v1870_v42 = vpop.f32.mrb[85].mxu1 }
 0x1a3   : > { %3479 = vpow2.f32 %v2047_v44  ;;  %v3120_v31 = vadd.f32 %v3119_v51, %v3118_v48  ;;  %v4090_v50 = vadd.f32 %v1870_v42, %v3987_v32  ;;  %v3121_v49 = vpop.f32.mrb[86].mxu0  ;;  %v3207_v57 = vpop.f32.mrb[86].mxu1 }
 0x1a4   : > { %v2019_v41 = vmin.f32 %v4087_v39, 0.0  ;;  %v4094_v3 = vadd.f32 %v3207_v57, %v4006_v22  ;;  %v3122_v54 = vpop.f32.mrb[87].mxu0  ;;  %v1873_v16 = vpop.f32.mrb[87].mxu1  ;;  %vm1987_vm4 = vcmp.gt.f32.partialorder %v4087_v39, 0.0 }
 0x1a5   : > { %v2017_v13 = vmin.f32 %v4090_v50, 0.0  ;;  %v3123_v1 = vadd.f32 %v3122_v54, %v3121_v49  ;;  %v4098_v5 = vadd.f32 %v1873_v16, %v3992_v29  ;;  %v4102_v32 = vadd.f32 %v3120_v31, %v3970_v14 }
 0x1a6   : > { %v2057_v12 = vmul.f32 1.442695, %v2019_v41  ;;  %v2020_v23 = vmin.f32 %v4094_v3, 0.0  ;;  %vm1985_vm5 = vcmp.gt.f32.partialorder %v4090_v50, 0.0  ;;  %vm1988_vm6 = vcmp.gt.f32.partialorder %v4094_v3, 0.0 }
 0x1a7   : > { %v2053_v24 = vmul.f32 1.442695, %v2017_v13  ;;  %v2018_v26 = vmin.f32 %v4098_v5, 0.0  ;;  %v4106_v22 = vadd.f32 %v3123_v1, %v3975_v7  ;;  %vm1986_vm7 = vcmp.gt.f32.partialorder %v4098_v5, 0.0 }
 0x1a8   : > { %3481 = vpow2.f32 %v2057_v12  ;;  %v2059_v30 = vmul.f32 1.442695, %v2020_v23 }
 0x1a9   : > { %3483 = vpow2.f32 %v2053_v24  ;;  %v2055_v19 = vmul.f32 1.442695, %v2018_v26  ;;  %v3124_v56 = vpop.f32.mrb[88].mxu0  ;;  %v3210_v8 = vpop.f32.mrb[88].mxu1 }
 0x1aa   : > { %v3474_v29 = vpop.eup %3473  ;;  %3485 = vpow2.f32 %v2059_v30  ;;  %v4111_v14 = vadd.f32 %v3210_v8, %v4029_v17  ;;  %v3125_v20 = vpop.f32.mrb[89].mxu0 }
 0x1ab   : > { %v1886_v15 = vpop.f32.mrb[89].mxu1  ;;  %v3476_v25 = vpop.eup %3475  ;;  %v2633_v7 = vadd.f32 -1.0, %v3474_v29  ;;  %3487 = vpow2.f32 %v2055_v19  ;;  %v4113_v33 = vadd.f32 %v3125_v20, %v3124_v56 }
 0x1ac   : > { %v4116_v21 = vadd.f32 %v1886_v15, %v4015_v60  ;;  %v3127_v55 = vpop.f32.mrb[90].mxu0  ;;  %v3211_v45 = vpop.f32.mrb[90].mxu1  ;;  %v2631_v44 = vadd.f32 -1.0, %v3476_v25  ;;  %v2023_v48 = vmin.f32 %v4111_v14, 0.0  ;;  %vm1991_vm8 = vcmp.gt.f32.partialorder %v4111_v14, 0.0 }
 0x1ad   : > { %v3478_v43 = vpop.eup %3477  ;;  %v4121_v17 = vadd.f32 %v3211_v45, %v4034_v58  ;;  %v3128_v11 = vpop.f32.mrb[91].mxu0  ;;  %v2143_v31 = vmul.f32 1.6732632, %v2633_v7 }
 0x1ae   : > { %v1889_v51 = vpop.f32.mrb[91].mxu1  ;;  %v3480_v42 = vpop.eup %3479  ;;  %v2634_v49 = vadd.f32 -1.0, %v3478_v43  ;;  %v2021_v60 = vmin.f32 %v4116_v21, 0.0  ;;  %v2141_v57 = vmul.f32 1.6732632, %v2631_v44  ;;  %v4140_v15 = vadd.f32 %v3128_v11, %v3127_v55 }
 0x1af   : > { %v2632_v41 = vadd.f32 -1.0, %v3480_v42  ;;  %v2065_v54 = vmul.f32 1.442695, %v2023_v48  ;;  %v2175_v58 = vsel %vm1983_vm0, %v4065_v38, %v2143_v31  ;;  %v2024_v1 = vmin.f32 %v4121_v17, 0.0 }
 0x1b0   : > { %v2144_v16 = vmul.f32 1.6732632, %v2634_v49  ;;  %v2061_v13 = vmul.f32 1.442695, %v2021_v60  ;;  %v2207_v12 = vmul.f32 1.050701, %v2175_v58  ;;  %v2173_v23 = vsel %vm1981_vm1, %v4068_v63, %v2141_v57 }
 0x1b1   : > { %v2142_v24 = vmul.f32 1.6732632, %v2632_v41  ;;  %3489 = vpow2.f32 %v2065_v54  ;;  %v2205_v26 = vmul.f32 1.050701, %v2173_v23  ;;  %v2067_v19 = vmul.f32 1.442695, %v2024_v1 }
 0x1b2   : > { %v2176_v30 = vsel %vm1984_vm2, %v4072_v62, %v2144_v16  ;;  %3491 = vpow2.f32 %v2061_v13  ;;  %v3130_v38 = vpop.f32.mrb[92].mxu0  ;;  %v3214_v56 = vpop.f32.mrb[92].mxu1  ;;  %v4143_v63 = vadd.f32 %v1889_v51, %v4020_v46  ;;  %vm1989_vm9 = vcmp.gt.f32.partialorder %v4116_v21, 0.0 }
 0x1b3   : > { %v3482_v8 = vpop.eup %3481  ;;  %v2208_v29 = vmul.f32 1.050701, %v2176_v30  ;;  %v2174_v20 = vsel %vm1982_vm3, %v4076_v2, %v2142_v24  ;;  %v3131_v25 = vpop.f32.mrb[93].mxu0  ;;  %3493 = vpow2.f32 %v2067_v19  ;;  %v4151_v44 = vadd.f32 %v3214_v56, %v4057_v61 }
 0x1b4   : > { %v1902_v7 = vpop.f32.mrb[93].mxu1  ;;  %v3484_v45 = vpop.eup %3483  ;;  %v2206_v62 = vmul.f32 1.050701, %v2174_v20  ;;  %v2637_v43 = vadd.f32 -1.0, %v3482_v8  ;;  %v2022_v51 = vmin.f32 %v4143_v63, 0.0  ;;  %vm1992_vm10 = vcmp.gt.f32.partialorder %v4121_v17, 0.0 }
 0x1b5   : > { %v3133_v2 = vpop.f32.mrb[94].mxu0  ;;  %v3215_v55 = vpop.f32.mrb[94].mxu1  ;;  %v2737_v46 = vpack.c.bf16 %v2208_v29, %v2207_v12  ;;  %v2635_v11 = vadd.f32 -1.0, %v3484_v45  ;;  %v2027_v16 = vmin.f32 %v4151_v44, 0.0  ;;  %v4162_v12 = vadd.f32 %v3131_v25, %v3130_v38 }
 0x1b6   : > { %v3486_v48 = vpop.eup %3485  ;;  %v3134_v42 = vpop.f32.mrb[95].mxu0  ;;  %v2732_v60 = vpack.c.bf16 %v2206_v62, %v2205_v26  ;;  %v2147_v57 = vmul.f32 1.6732632, %v2637_v43  ;;  %v2063_v58 = vmul.f32 1.442695, %v2022_v51  ;;  %v4165_v23 = vadd.f32 %v1902_v7, %v4043_v36 }
 0x1b7   : > { %v1905_v31 = vpop.f32.mrb[95].mxu1  ;;  %v3488_v49 = vpop.eup %3487  ;;  %v2638_v41 = vadd.f32 -1.0, %v3486_v48  ;;  %2809 = vst [vmem:[%s4148_s11 + $0x8] sm:$0xff] %v2737_v46   ;;  %v2145_v61 = vmul.f32 1.6732632, %v2635_v11  ;;  %v4177_v25 = vadd.f32 %v3215_v55, %v4062_v18  ;;  %vm1990_vm11 = vcmp.gt.f32.partialorder %v4143_v63, 0.0 }
 0x1b8   : > { %v2636_v54 = vadd.f32 -1.0, %v3488_v49  ;;  %2733 = vst [vmem:[%s4148_s11] sm:$0xff] %v2732_v60   ;;  %v2179_v13 = vsel %vm1987_vm4, %v4087_v39, %v2147_v57  ;;  %3495 = vpow2.f32 %v2063_v58  ;;  %v2073_v39 = vmul.f32 1.442695, %v2027_v16 }
 0x1b9   : > { %v2148_v1 = vmul.f32 1.6732632, %v2638_v41  ;;  %v2211_v24 = vmul.f32 1.050701, %v2179_v13  ;;  %v2177_v26 = vsel %vm1985_vm5, %v4090_v50, %v2145_v61  ;;  %v3136_v38 = vpop.f32.mrb[96].mxu0  ;;  %v2025_v20 = vmin.f32 %v4165_v23, 0.0 }
 0x1ba   : > { %v2146_v30 = vmul.f32 1.6732632, %v2636_v54  ;;  %v2209_v19 = vmul.f32 1.050701, %v2177_v26  ;;  %v3218_v50 = vpop.f32.mrb[96].mxu1  ;;  %v3137_v7 = vpop.f32.mrb[97].mxu0  ;;  %3497 = vpow2.f32 %v2073_v39  ;;  %v4183_v61 = vadd.f32 %v1905_v31, %v4048_v6 }
 0x1bb   : > { %v2180_v56 = vsel %vm1988_vm6, %v4094_v3, %v2148_v1  ;;  %v3490_v8 = vpop.eup %3489  ;;  %v4179_v3 = vadd.f32 %v3134_v42, %v3133_v2  ;;  %v1918_v48 = vpop.f32.mrb[97].mxu1  ;;  %v2028_v41 = vmin.f32 %v4177_v25, 0.0  ;;  %v4188_v42 = vadd.f32 %v3218_v50, %v4102_v32 }
 0x1bc   : > { %v2212_v29 = vmul.f32 1.050701, %v2180_v56  ;;  %v2178_v36 = vsel %vm1986_vm7, %v4098_v5, %v2146_v30  ;;  %v3492_v45 = vpop.eup %3491  ;;  %v2641_v43 = vadd.f32 -1.0, %v3490_v8  ;;  %v3139_v46 = vpop.f32.mrb[98].mxu0  ;;  %v2069_v5 = vmul.f32 1.442695, %v2025_v20 }
 0x1bd   : > { %v2210_v62 = vmul.f32 1.050701, %v2178_v36  ;;  %v2639_v51 = vadd.f32 -1.0, %v3492_v45  ;;  %v3219_v49 = vpop.f32.mrb[98].mxu1  ;;  %v3140_v60 = vpop.f32.mrb[99].mxu0  ;;  %v2026_v13 = vmin.f32 %v4183_v61, 0.0  ;;  %v4201_v56 = vadd.f32 %v1918_v48, %v4080_v35 }
 0x1be   : > { %v2747_v11 = vpack.c.bf16 %v2212_v29, %v2211_v24  ;;  %v3494_v57 = vpop.eup %3493  ;;  %v2151_v55 = vmul.f32 1.6732632, %v2641_v43  ;;  %v1921_v54 = vpop.f32.mrb[99].mxu1  ;;  %3499 = vpow2.f32 %v2069_v5  ;;  %v2075_v16 = vmul.f32 1.442695, %v2028_v41 }
 0x1bf   : > { %v2742_v18 = vpack.c.bf16 %v2210_v62, %v2209_v19  ;;  %v2642_v2 = vadd.f32 -1.0, %v3494_v57  ;;  %v2149_v1 = vmul.f32 1.6732632, %v2639_v51  ;;  %v2071_v24 = vmul.f32 1.442695, %v2026_v13 }
 0x1c0   : > { %2811 = vst [vmem:[%s4148_s11 + $0x18] sm:$0xff] %v2747_v11   ;;  %v2183_v58 = vsel %vm1991_vm8, %v4111_v14, %v2151_v55  ;;  %3501 = vpow2.f32 %v2075_v16  ;;  %v2031_v32 = vmin.f32 %v4188_v42, 0.0  ;;  %v4198_v19 = vadd.f32 %v3137_v7, %v3136_v38 }
 0x1c1   : > { %2810 = vst [vmem:[%s4148_s11 + $0x10] sm:$0xff] %v2742_v18   ;;  %v2152_v6 = vmul.f32 1.6732632, %v2642_v2  ;;  %v2215_v31 = vmul.f32 1.050701, %v2183_v58  ;;  %v3142_v26 = vpop.f32.mrb[100].mxu0  ;;  %v4204_v39 = vadd.f32 %v3219_v49, %v4106_v22  ;;  %3503 = vpow2.f32 %v2071_v24 }
 0x1c2   : > { %v3496_v30 = vpop.eup %3495  ;;  %v3222_v8 = vpop.f32.mrb[100].mxu1  ;;  %v2081_v50 = vmul.f32 1.442695, %v2031_v32  ;;  %v2181_v62 = vsel %vm1989_vm9, %v4116_v21, %v2149_v1  ;;  %vm1995_vm12 = vcmp.gt.f32.partialorder %v4151_v44, 0.0  ;;  %v2029_v35 = vmin.f32 %v4201_v56, 0.0 }
 0x1c3   : > { %v2184_v14 = vsel %vm1992_vm10, %v4121_v17, %v2152_v6  ;;  %v3143_v29 = vpop.f32.mrb[101].mxu0  ;;  %v2640_v20 = vadd.f32 -1.0, %v3496_v30  ;;  %v1934_v45 = vpop.f32.mrb[101].mxu1  ;;  %v2032_v17 = vmin.f32 %v4204_v39, 0.0  ;;  %v4212_v11 = vadd.f32 %v3140_v60, %v3139_v46 }
 0x1c4   : > { %v2216_v36 = vmul.f32 1.050701, %v2184_v14  ;;  %v3145_v22 = vpop.f32.mrb[102].mxu0  ;;  %v3223_v38 = vpop.f32.mrb[102].mxu1  ;;  %3505 = vpow2.f32 %v2081_v50  ;;  %v2077_v57 = vmul.f32 1.442695, %v2029_v35  ;;  %v4215_v18 = vadd.f32 %v1921_v54, %v4084_v9 }
 0x1c5   : > { %v3498_v7 = vpop.eup %3497  ;;  %v2150_v48 = vmul.f32 1.6732632, %v2640_v20  ;;  %v3146_v51 = vpop.f32.mrb[103].mxu0  ;;  %v2083_v21 = vmul.f32 1.442695, %v2032_v17  ;;  %v1782_v41 = vadd.f32 %v4162_v12, %v3998_v37  ;;  %v3144_v2 = vadd.f32 %v3143_v29, %v3142_v26 }
 0x1c6   : > { %v2757_v43 = vpack.c.bf16 %v2216_v36, %v2215_v31  ;;  %v1937_v5 = vpop.f32.mrb[103].mxu1  ;;  %v2645_v49 = vadd.f32 -1.0, %v3498_v7  ;;  %v1774_v46 = vadd.f32 %v4113_v33, %v3984_v28  ;;  %v2213_v58 = vmul.f32 1.050701, %v2181_v62 }
 0x1c7   : > { %v2182_v55 = vsel %vm1990_vm11, %v4143_v63, %v2150_v48  ;;  %3507 = vpow2.f32 %v2077_v57  ;;  %v2030_v9 = vmin.f32 %v4215_v18, 0.0  ;;  %v4226_v54 = vadd.f32 %v3222_v8, %v1782_v41 }
 0x1c8   : > { %2813 = vst [vmem:[%s4148_s11 + $0x28] sm:$0xff] %v2757_v43   ;;  %v3500_v60 = vpop.eup %3499  ;;  %v2214_v16 = vmul.f32 1.050701, %v2182_v55  ;;  %v2155_v13 = vmul.f32 1.6732632, %v2645_v49  ;;  %3509 = vpow2.f32 %v2083_v21  ;;  %vm1993_vm13 = vcmp.gt.f32.partialorder %v4165_v23, 0.0 }
 0x1c9   : > { %v2643_v1 = vadd.f32 -1.0, %v3500_v60  ;;  %v4228_v63 = vpop.f32.mrb[104].mxu0  ;;  %v3226_v6 = vpop.f32.mrb[104].mxu1  ;;  %v4231_v12 = vadd.f32 %v1934_v45, %v1774_v46  ;;  %v1785_v28 = vadd.f32 %v4179_v3, %v4003_v40  ;;  %v2079_v30 = vmul.f32 1.442695, %v2030_v9 }
 0x1ca   : > { %v2752_v37 = vpack.c.bf16 %v2214_v16, %v2213_v58  ;;  %v4235_v33 = vpop.f32.mrb[105].mxu0  ;;  %v4237_v31 = vpop.f32.mrb[105].mxu1  ;;  %v2187_v32 = vsel %vm1995_vm12, %v4151_v44, %v2155_v13  ;;  %v4242_v14 = vadd.f32 %v3146_v51, %v3145_v22  ;;  %vm1996_vm14 = vcmp.gt.f32.partialorder %v4177_v25, 0.0 }
 0x1cb   : > { %v3502_v24 = vpop.eup %3501  ;;  %v2153_v26 = vmul.f32 1.6732632, %v2643_v1  ;;  %vm1994_vm15 = vcmp.gt.f32.partialorder %v4183_v61, 0.0  ;;  %v2035_v40 = vmin.f32 %v4226_v54, 0.0  ;;  %v3151_v3 = vpop.f32.mrb[106].mxu0  ;;  %vm1999_vm0 = vcmp.gt.f32.partialorder %v4188_v42, 0.0 }
 0x1cc   : > { %2812 = vst [vmem:[%s4148_s11 + $0x20] sm:$0xff] %v2752_v37   ;;  %v2646_v8 = vadd.f32 -1.0, %v3502_v24  ;;  %v4248_v29 = vpop.f32.mrb[106].mxu1  ;;  %v3504_v36 = vpop.eup %3503  ;;  %3511 = vpow2.f32 %v2079_v30  ;;  %v2033_v44 = vmin.f32 %v4231_v12, 0.0  ;;  %v4252_v20 = vadd.f32 %v3223_v38, %v1785_v28 }
 0x1cd   : > { %v3152_v50 = vpop.f32.mrb[107].mxu0  ;;  %v4254_v45 = vpop.f32.mrb[107].mxu1  ;;  %v2219_v62 = vmul.f32 1.050701, %v2187_v32  ;;  %v2644_v17 = vadd.f32 -1.0, %v3504_v36  ;;  %v1777_v22 = vadd.f32 %v4140_v15, %v3989_v10  ;;  %v2185_v43 = vsel %vm1993_vm13, %v4165_v23, %v2153_v26 }
 0x1ce   : > { %v2156_v35 = vmul.f32 1.6732632, %v2646_v8  ;;  %v3506_v7 = vpop.eup %3505  ;;  %v2089_v48 = vmul.f32 1.442695, %v2035_v40  ;;  %v2085_v51 = vmul.f32 1.442695, %v2033_v44  ;;  %v1798_v15 = vadd.f32 %v3144_v2, %v4026_v53 }
 0x1cf   : > { %v2036_v49 = vmin.f32 %v4252_v20, 0.0  ;;  %v2154_v57 = vmul.f32 1.6732632, %v2644_v17  ;;  %v2649_v21 = vadd.f32 -1.0, %v3506_v7  ;;  %v4265_v55 = vadd.f32 %v1937_v5, %v1777_v22 }
 0x1d0   : > { %v2188_v38 = vsel %vm1996_vm14, %v4177_v25, %v2156_v35  ;;  %3513 = vpow2.f32 %v2089_v48  ;;  %v2217_v58 = vmul.f32 1.050701, %v2185_v43  ;;  %v4283_v26 = vadd.f32 %v3226_v6, %v1798_v15 }
 0x1d1   : > { %v2220_v41 = vmul.f32 1.050701, %v2188_v38  ;;  %v2091_v10 = vmul.f32 1.442695, %v2036_v49  ;;  %v3154_v46 = vpop.f32.mrb[108].mxu0  ;;  %v4268_v60 = vpop.f32.mrb[108].mxu1  ;;  %v2186_v16 = vsel %vm1994_vm15, %v4183_v61, %v2154_v57  ;;  %3515 = vpow2.f32 %v2085_v51 }
 0x1d2   : > { %v3508_v23 = vpop.eup %3507  ;;  %v2159_v13 = vmul.f32 1.6732632, %v2649_v21  ;;  %v3155_v25 = vpop.f32.mrb[109].mxu0  ;;  %v2218_v37 = vmul.f32 1.050701, %v2186_v16  ;;  %v2034_v32 = vmin.f32 %v4265_v55, 0.0  ;;  %v3150_v44 = vadd.f32 %v4235_v33, %v4228_v63 }
 0x1d3   : > { %v4273_v5 = vpop.f32.mrb[109].mxu1  ;;  %v3510_v1 = vpop.eup %3509  ;;  %v2767_v9 = vpack.c.bf16 %v2220_v41, %v2219_v62  ;;  %v2647_v28 = vadd.f32 -1.0, %v3508_v23  ;;  %3517 = vpow2.f32 %v2091_v10  ;;  %vm1997_vm1 = vcmp.gt.f32.partialorder %v4201_v56, 0.0 }
 0x1d4   : > { %v4275_v53 = vpop.f32.mrb[110].mxu0  ;;  %v4277_v2 = vpop.f32.mrb[110].mxu1  ;;  %v2191_v24 = vsel %vm1999_vm0, %v4188_v42, %v2159_v13  ;;  %v2650_v61 = vadd.f32 -1.0, %v3510_v1  ;;  %v2762_v40 = vpack.c.bf16 %v2218_v37, %v2217_v58  ;;  %vm2000_vm2 = vcmp.gt.f32.partialorder %v4204_v39, 0.0 }
 0x1d5   : > { %v4285_v30 = vpop.f32.mrb[111].mxu0  ;;  %v4287_v8 = vpop.f32.mrb[111].mxu1  ;;  %2815 = vst [vmem:[%s4148_s11 + $0x38] sm:$0xff] %v2767_v9   ;;  %v2157_v36 = vmul.f32 1.6732632, %v2647_v28  ;;  %v2039_v35 = vmin.f32 %v4283_v26, 0.0  ;;  %v1790_v22 = vadd.f32 %v4198_v19, %v4012_v27  ;;  %v1801_v7 = vadd.f32 %v4242_v14, %v4031_v0 }
 0x1d6   : > { %v2160_v42 = vmul.f32 1.6732632, %v2650_v61  ;;  %v2087_v62 = vmul.f32 1.442695, %v2034_v32  ;;  %v3512_v6 = vpop.eup %3511  ;;  %2814 = vst [vmem:[%s4148_s11 + $0x30] sm:$0xff] %v2762_v40   ;;  %v3153_v43 = vadd.f32 %v3152_v50, %v3151_v3  ;;  %v1793_v0 = vadd.f32 %v4212_v11, %v4017_v47 }
 0x1d7   : > { %v2223_v17 = vmul.f32 1.050701, %v2191_v24  ;;  %v2189_v48 = vsel %vm1997_vm1, %v4201_v56, %v2157_v36  ;;  %v2648_v33 = vadd.f32 -1.0, %v3512_v6  ;;  %v2097_v49 = vmul.f32 1.442695, %v2039_v35 }
 0x1d8   : > { %v2192_v63 = vsel %vm2000_vm2, %v4204_v39, %v2160_v42  ;;  %3519 = vpow2.f32 %v2087_v62  ;;  %v4303_v38 = vadd.f32 %v4237_v31, %v1790_v22  ;;  %v4306_v57 = vadd.f32 %v4248_v29, %v1801_v7 }
 0x1d9   : > { %v2224_v51 = vmul.f32 1.050701, %v2192_v63  ;;  %v2158_v27 = vmul.f32 1.6732632, %v2648_v33  ;;  %v3156_v19 = vadd.f32 %v3155_v25, %v3154_v46  ;;  %v1806_v56 = vadd.f32 %v3150_v44, %v4040_v4 }
 0x1da   : > { %v3514_v14 = vpop.eup %3513  ;;  %vm1998_vm3 = vcmp.gt.f32.partialorder %v4215_v18, 0.0  ;;  %3521 = vpow2.f32 %v2097_v49  ;;  %v2037_v3 = vmin.f32 %v4303_v38, 0.0  ;;  %v2221_v50 = vmul.f32 1.050701, %v2189_v48 }
 0x1db   : > { %v2777_v39 = vpack.c.bf16 %v2224_v51, %v2223_v17  ;;  %v3516_v31 = vpop.eup %3515  ;;  %v2190_v29 = vsel %vm1998_vm3, %v4215_v18, %v2158_v27  ;;  %v2653_v21 = vadd.f32 -1.0, %v3514_v14  ;;  %v2040_v41 = vmin.f32 %v4306_v57, 0.0 }
 0x1dc   : > { %v2222_v47 = vmul.f32 1.050701, %v2190_v29  ;;  %v2651_v11 = vadd.f32 -1.0, %v3516_v31  ;;  %v2093_v4 = vmul.f32 1.442695, %v2037_v3  ;;  %v4317_v15 = vadd.f32 %v4254_v45, %v1793_v0 }
 0x1dd   : > { %v3518_v10 = vpop.eup %3517  ;;  %2817 = vst [vmem:[%s4148_s11 + $0x48] sm:$0xff] %v2777_v39   ;;  %v2163_v46 = vmul.f32 1.6732632, %v2653_v21  ;;  %v2099_v58 = vmul.f32 1.442695, %v2040_v41  ;;  %v1814_v16 = vadd.f32 %v3156_v19, %v4054_v52  ;;  %vm2003_vm4 = vcmp.gt.f32.partialorder %v4226_v54, 0.0 }
 0x1de   : > { %v2654_v23 = vadd.f32 -1.0, %v3518_v10  ;;  %v2772_v13 = vpack.c.bf16 %v2222_v47, %v2221_v50  ;;  %v2161_v18 = vmul.f32 1.6732632, %v2651_v11  ;;  %3523 = vpow2.f32 %v2093_v4 }
 0x1df   : > { %v2195_v25 = vsel %vm2003_vm4, %v4226_v54, %v2163_v46  ;;  %3525 = vpow2.f32 %v2099_v58  ;;  %v2038_v9 = vmin.f32 %v4317_v15, 0.0  ;;  %vm2004_vm5 = vcmp.gt.f32.partialorder %v4252_v20, 0.0 }
 0x1e0   : > { %v2164_v1 = vmul.f32 1.6732632, %v2654_v23  ;;  %2816 = vst [vmem:[%s4148_s11 + $0x40] sm:$0xff] %v2772_v13   ;;  %v4326_v45 = vadd.f32 %v4268_v60, %v1814_v16  ;;  %v4329_v37 = vadd.f32 %v4273_v5, %v1806_v56  ;;  %vm2001_vm6 = vcmp.gt.f32.partialorder %v4231_v12, 0.0 }
 0x1e1   : > { %v2095_v24 = vmul.f32 1.442695, %v2038_v9  ;;  %v3159_v54 = vadd.f32 %v4285_v30, %v4275_v53  ;;  %v2227_v61 = vmul.f32 1.050701, %v2195_v25  ;;  %v2193_v60 = vsel %vm2001_vm6, %v4231_v12, %v2161_v18 }
 0x1e2   : > { %v3520_v52 = vpop.eup %3519  ;;  %v2196_v28 = vsel %vm2004_vm5, %v4252_v20, %v2164_v1  ;;  %v2043_v36 = vmin.f32 %v4326_v45, 0.0  ;;  %v2041_v5 = vmin.f32 %v4329_v37, 0.0  ;;  %v1809_v6 = vadd.f32 %v3153_v43, %v4045_v34 }
 0x1e3   : > { %v2228_v32 = vmul.f32 1.050701, %v2196_v28  ;;  %v2652_v40 = vadd.f32 -1.0, %v3520_v52  ;;  %3527 = vpow2.f32 %v2095_v24  ;;  %v1817_v44 = vadd.f32 %v3159_v54, %v4059_v59 }
 0x1e4   : > { %v3522_v42 = vpop.eup %3521  ;;  %v2105_v35 = vmul.f32 1.442695, %v2043_v36  ;;  %vm2002_vm7 = vcmp.gt.f32.partialorder %v4265_v55, 0.0  ;;  %v2101_v30 = vmul.f32 1.442695, %v2041_v5  ;;  %v1970_v22 = vadd.f32 %v4287_v8, %v1809_v6 }
 0x1e5   : > { %v2787_v62 = vpack.c.bf16 %v2228_v32, %v2227_v61  ;;  %v2162_v20 = vmul.f32 1.6732632, %v2652_v40  ;;  %v2657_v53 = vadd.f32 -1.0, %v3522_v42  ;;  %v1978_v17 = vadd.f32 %v4277_v2, %v1817_v44 }
 0x1e6   : > { %3529 = vpow2.f32 %v2105_v35  ;;  %v2225_v59 = vmul.f32 1.050701, %v2193_v60  ;;  %v2042_v34 = vmin.f32 %v1970_v22, 0.0  ;;  %vm2007_vm8 = vcmp.gt.f32.partialorder %v4283_v26, 0.0 }
 0x1e7   : > { %2819 = vst [vmem:[%s4148_s11 + $0x58] sm:$0xff] %v2787_v62   ;;  %v2194_v12 = vsel %vm2002_vm7, %v4265_v55, %v2162_v20  ;;  %3531 = vpow2.f32 %v2101_v30  ;;  %v2167_v63 = vmul.f32 1.6732632, %v2657_v53  ;;  %v2044_v33 = vmin.f32 %v1978_v17, 0.0 }
 0x1e8   : > { %v2226_v7 = vmul.f32 1.050701, %v2194_v12  ;;  %v3524_v48 = vpop.eup %3523  ;;  %v2103_v2 = vmul.f32 1.442695, %v2042_v34  ;;  %vm2008_vm9 = vcmp.gt.f32.partialorder %v4306_v57, 0.0  ;;  %vm2005_vm10 = vcmp.gt.f32.partialorder %v4303_v38, 0.0 }
 0x1e9   : > { %v3526_v43 = vpop.eup %3525  ;;  %v2655_v49 = vadd.f32 -1.0, %v3524_v48  ;;  %v2107_v0 = vmul.f32 1.442695, %v2044_v33  ;;  %v2199_v55 = vsel %vm2007_vm8, %v4283_v26, %v2167_v63  ;;  %vm2006_vm11 = vcmp.gt.f32.partialorder %v4317_v15, 0.0 }
 0x1ea   : > { %v2782_v51 = vpack.c.bf16 %v2226_v7, %v2225_v59  ;;  %v2658_v27 = vadd.f32 -1.0, %v3526_v43  ;;  %v2231_v3 = vmul.f32 1.050701, %v2199_v55  ;;  %vm2011_vm12 = vcmp.gt.f32.partialorder %v4326_v45, 0.0 }
 0x1eb   : > { %v2165_v19 = vmul.f32 1.6732632, %v2655_v49  ;;  %3533 = vpow2.f32 %v2107_v0  ;;  %vm2009_vm13 = vcmp.gt.f32.partialorder %v4329_v37, 0.0  ;;  %vm2012_vm14 = vcmp.gt.f32.partialorder %v1978_v17, 0.0 }
 0x1ec   : > { %2818 = vst [vmem:[%s4148_s11 + $0x50] sm:$0xff] %v2782_v51   ;;  %v2168_v8 = vmul.f32 1.6732632, %v2658_v27  ;;  %3535 = vpow2.f32 %v2103_v2  ;;  %vm2010_vm15 = vcmp.gt.f32.partialorder %v1970_v22, 0.0 }
 0x1ed   : > { %v3528_v56 = vpop.eup %3527  ;;  %v2197_v29 = vsel %vm2005_vm10, %v4303_v38, %v2165_v19 }
 0x1ee   : > { %v2200_v14 = vsel %vm2008_vm9, %v4306_v57, %v2168_v8  ;;  %v2656_v39 = vadd.f32 -1.0, %v3528_v56  ;;  %v2229_v4 = vmul.f32 1.050701, %v2197_v29 }
 0x1ef   : > { %v2232_v31 = vmul.f32 1.050701, %v2200_v14 }
 0x1f0   : > { %v3530_v50 = vpop.eup %3529  ;;  %v2166_v26 = vmul.f32 1.6732632, %v2656_v39 }
 0x1f1   : > { %v3532_v21 = vpop.eup %3531  ;;  %v2797_v41 = vpack.c.bf16 %v2232_v31, %v2231_v3  ;;  %v2661_v10 = vadd.f32 -1.0, %v3530_v50 }
 0x1f2   : > { %v2198_v47 = vsel %vm2006_vm11, %v4317_v15, %v2166_v26  ;;  %v2659_v11 = vadd.f32 -1.0, %v3532_v21 }
 0x1f3   : > { %2821 = vst [vmem:[%s4148_s11 + $0x68] sm:$0xff] %v2797_v41   ;;  %v2230_v57 = vmul.f32 1.050701, %v2198_v47  ;;  %v2171_v23 = vmul.f32 1.6732632, %v2661_v10 }
 0x1f4   : > { %v2169_v16 = vmul.f32 1.6732632, %v2659_v11 }
 0x1f5   : > { %v2792_v46 = vpack.c.bf16 %v2230_v57, %v2229_v4  ;;  %v3534_v58 = vpop.eup %3533  ;;  %v2203_v25 = vsel %vm2011_vm12, %v4326_v45, %v2171_v23 }
 0x1f6   : > { %v3536_v13 = vpop.eup %3535  ;;  %v2662_v38 = vadd.f32 -1.0, %v3534_v58  ;;  %v2201_v1 = vsel %vm2009_vm13, %v4329_v37, %v2169_v16  ;;  %v2235_v28 = vmul.f32 1.050701, %v2203_v25 }
 0x1f7   : > { %2820 = vst [vmem:[%s4148_s11 + $0x60] sm:$0xff] %v2792_v46   ;;  %v2660_v18 = vadd.f32 -1.0, %v3536_v13  ;;  %v2233_v61 = vmul.f32 1.050701, %v2201_v1 }
 0x1f8   : > { %v2172_v15 = vmul.f32 1.6732632, %v2662_v38 }
 0x1f9   : > { %v2170_v9 = vmul.f32 1.6732632, %v2660_v18 }
 0x1fa   : > { %v2204_v52 = vsel %vm2012_vm14, %v1978_v17, %v2172_v15 }
 0x1fb   : > { %v2236_v24 = vmul.f32 1.050701, %v2204_v52  ;;  %v2202_v54 = vsel %vm2010_vm15, %v1970_v22, %v2170_v9 }
 0x1fc   : > { %v2234_v32 = vmul.f32 1.050701, %v2202_v54 }
 0x1fd   : > { %v2807_v40 = vpack.c.bf16 %v2236_v24, %v2235_v28 }
 0x1fe   : > { %v2802_v36 = vpack.c.bf16 %v2234_v32, %v2233_v61 }
 0x1ff   : > { %2823 = vst [vmem:[%s4148_s11 + $0x78] sm:$0xff] %v2807_v40  }
 0x200   : > { %2822 = vst [vmem:[%s4148_s11 + $0x70] sm:$0xff] %v2802_v36  }
 0x201 PF: > { %s13_s12 = sadd.s32 1, %s3543_s12  }
 0x202   : > { %p10_p4 = scmp.ge.s32.totalorder %s13_s12, 4  }
 0x204   :  { %12 = sbr.rel (!%p10_p4) target bundleno = 1 (0x1), region = 62 }

// kernel: rnd_forward.5
= control target key start
LH: loop header
LB: loop body
LE: loop exit
PB: predicated region body
PF: predicated region fallthrough
CT: control target
= control target key end

     0   :  { %v10543_v47 = vmov 0.0   ;;  %vm10544_vm0 = vmmov 0   ;;  %s13292_s0 = inlined_call_operand.vmem [shape: bf16[80,640], index: 0, kind: input, shape index: {}]   ;;  %s13293_s1 = inlined_call_operand.vmem [shape: bf16[640,128], index: 1, kind: input, shape index: {}]   ;;  %s13294_s2 = inlined_call_operand.vmem [shape: f32[1,128], index: 2, kind: input, shape index: {}]   ;;  %s13295_s3 = inlined_call_operand.vmem [shape: bf16[2304,512], index: 3, kind: input, shape index: {}]   ;;  %s13296_s4 = inlined_call_operand.vmem [shape: f32[1,512], index: 4, kind: input, shape index: {}]   ;;  %s13297_s5 = inlined_call_operand.vmem [shape: bf16[512,256], index: 5, kind: input, shape index: {}]   ;;  %s13298_s6 = inlined_call_operand.vmem [shape: f32[1,256], index: 6, kind: input, shape index: {}]   ;;  %s13299_s7 = inlined_call_operand.vmem [shape: bf16[256,256], index: 7, kind: input, shape index: {}]   ;;  %s13300_s8 = inlined_call_operand.vmem [shape: f32[1,256], index: 8, kind: input, shape index: {}]   ;;  %s13301_s9 = inlined_call_operand.hbm [shape: f32[2,256], index: 9, kind: output, shape index: {}]  }
   0x1   :  { %v9404_v0 = vld [vmem:[%s13293_s1 + $0x40] sm:$0xff]   ;;  %v9406_v2 = vld [vmem:[%s13293_s1 + $0x48] sm:$0xff]   ;;  %v9408_v4 = vld [vmem:[%s13293_s1 + $0x50] sm:$0xff]  }
   0x2   :  { %v9405_v1 = vld [vmem:[%s13293_s1] sm:$0xff]   ;;  %9237 = vmatprep.subr.bf16.mxu0 %v9404_v0  ;;  %v9407_v3 = vld [vmem:[%s13293_s1 + $0x8] sm:$0xff]   ;;  %v9409_v5 = vld [vmem:[%s13293_s1 + $0x10] sm:$0xff]  }
   0x3   :  { %9238 = vmatpush3.bf16.msra.mxu0 %v9405_v1  ;;  %v9410_v6 = vld [vmem:[%s13293_s1 + $0x58] sm:$0xff]   ;;  %v9412_v8 = vld [vmem:[%s13293_s1 + $0x60] sm:$0xff]   ;;  %v9414_v12 = vld [vmem:[%s13293_s1 + $0x68] sm:$0xff]  }
   0x4   :  { %9239 = vmatprep.subr.bf16.mxu0 %v9406_v2  ;;  %v9411_v7 = vld [vmem:[%s13293_s1 + $0x18] sm:$0xff]   ;;  %v9413_v9 = vld [vmem:[%s13293_s1 + $0x20] sm:$0xff]   ;;  %v9415_v13 = vld [vmem:[%s13293_s1 + $0x28] sm:$0xff]  }
   0x5   :  { %v9418_v10 = vld [vmem:[%s13293_s1 + $0xc0] sm:$0xff]   ;;  %v9422_v14 = vld [vmem:[%s13293_s1 + $0xc8] sm:$0xff]   ;;  %v9416_v15 = vld [vmem:[%s13293_s1 + $0x70] sm:$0xff]  }
   0x6   :  { %v9419_v11 = vld [vmem:[%s13293_s1 + $0x80] sm:$0xff]   ;;  %9378 = vmatprep.subr.bf16.mxu1 %v9418_v10  ;;  %v9417_v17 = vld [vmem:[%s13293_s1 + $0x30] sm:$0xff]   ;;  %v9426_v18 = vld [vmem:[%s13293_s1 + $0x88] sm:$0xff]  }
   0x7   :  { %9240 = vmatpush3.bf16.msra.mxu0 %v9407_v3  ;;  %9386 = vmatpush3.bf16.msra.mxu1 %v9419_v11  ;;  %v9425_v16 = vld [vmem:[%s13292_s0 + $0x4] ss:$20 sps:$4 sm:$0xff]   ;;  %v9427_v20 = vld [vmem:[%s13293_s1 + $0xd0] sm:$0xff]   ;;  %v9430_v27 = vld [vmem:[%s13292_s0 + $0x2c] ss:$20 sps:$4 sm:$0xff]  }
   0x8   :  { %9241 = vmatprep.subr.bf16.mxu0 %v9408_v4  ;;  %9379 = vmatprep.subr.bf16.mxu1 %v9422_v14  ;;  %v9420_v19 = vld [vmem:[%s13293_s1 + $0x78] sm:$0xff]   ;;  %v9428_v21 = vld [vmem:[%s13293_s1 + $0x90] sm:$0xff]   ;;  %v9434_v25 = vld [vmem:[%s13293_s1 + $0xe0] sm:$0xff]  }
   0x9   :  { %553 = vmatprep.mubr.bf16.mxu0 %v9425_v16  ;;  %v9429_v22 = vld [vmem:[%s13293_s1 + $0xd8] sm:$0xff]   ;;  %v9423_v26 = vld [vmem:[%s13292_s0] ss:$20 sps:$4 sm:$0xff]   ;;  %v9436_v29 = vld [vmem:[%s13293_s1 + $0xe8] sm:$0xff]  }
   0xa   :  { %v9421_v23 = vld [vmem:[%s13293_s1 + $0x38] sm:$0xff]   ;;  %v9435_v28 = vld [vmem:[%s13293_s1 + $0xa0] sm:$0xff]   ;;  %v9439_v30 = vld [vmem:[%s13293_s1 + $0xa8] sm:$0xff]  }
   0xb   :  { %9242 = vmatpush3.bf16.msra.mxu0 %v9409_v5  ;;  %9387 = vmatpush3.bf16.msra.mxu1 %v9426_v18  ;;  %v9432_v24 = vld [vmem:[%s13293_s1 + $0x98] sm:$0xff]   ;;  %v9441_v31 = vld [vmem:[%s13293_s1 + $0xf0] sm:$0xff]   ;;  %v9454_v41 = vld [vmem:[%s13292_s0 + $0xac] ss:$20 sps:$4 sm:$0xff]  }
   0xc   :  { %9243 = vmatprep.subr.bf16.mxu0 %v9410_v6  ;;  %9380 = vmatprep.subr.bf16.mxu1 %v9427_v20  ;;  %v9433_v32 = vld [vmem:[%s13292_s0 + $0x28] ss:$20 sps:$4 sm:$0xff]   ;;  %v9450_v33 = vld [vmem:[%s13292_s0 + $0x84] ss:$20 sps:$4 sm:$0xff]   ;;  %v9442_v35 = vld [vmem:[%s13293_s1 + $0xb0] sm:$0xff]  }
   0xd   :  { %v9437_v34 = vld [vmem:[%s13292_s0 + $0x54] ss:$20 sps:$4 sm:$0xff]   ;;  %v9443_v36 = vld [vmem:[%s13293_s1 + $0xf8] sm:$0xff]   ;;  %650 = vmatprep.mubr.bf16.mxu1 %v9450_v33  ;;  %v9440_v38 = vld [vmem:[%s13292_s0 + $0x50] ss:$20 sps:$4 sm:$0xff]  }
   0xe   :  { %v9446_v37 = vld [vmem:[%s13293_s1 + $0xb8] sm:$0xff]   ;;  %v9448_v40 = vld [vmem:[%s13292_s0 + $0x80] ss:$20 sps:$4 sm:$0xff]   ;;  %v9461_v51 = vld [vmem:[%s13293_s1 + $0x108] sm:$0xff]  }
   0xf   :  { %9244 = vmatpush3.bf16.msra.mxu0 %v9411_v7  ;;  %9388 = vmatpush3.bf16.msra.mxu1 %v9428_v21  ;;  %v9444_v39 = vld [vmem:[%s13292_s0 + $0x7c] ss:$20 sps:$4 sm:$0xff]   ;;  %v9447_v42 = vld [vmem:[%s13292_s0 + $0x78] ss:$20 sps:$4 sm:$0xff]   ;;  %v9453_v45 = vld [vmem:[%s13292_s0 + $0xa0] ss:$20 sps:$4 sm:$0xff]  }
  0x10   :  { %9245 = vmatprep.subr.bf16.mxu0 %v9412_v8  ;;  %9381 = vmatprep.subr.bf16.mxu1 %v9429_v22  ;;  %v9451_v43 = vld [vmem:[%s13292_s0 + $0xa4] ss:$20 sps:$4 sm:$0xff]   ;;  %v9456_v44 = vld [vmem:[%s13292_s0 + $0xa8] ss:$20 sps:$4 sm:$0xff]   ;;  %v9459_v46 = vld [vmem:[%s13292_s0 + $0xc] ss:$20 sps:$4 sm:$0xff]  }
  0x11   :  { %v9457_v48 = vld [vmem:[%s13292_s0 + $0x8] ss:$20 sps:$4 sm:$0xff]   ;;  %v9460_v49 = vld [vmem:[%s13293_s1 + $0x100] sm:$0xff]   ;;  %v9465_v53 = vld [vmem:[%s13293_s1 + $0x110] sm:$0xff]  }
  0x12   :  { %v9462_v50 = vld [vmem:[%s13292_s0 + $0x34] ss:$20 sps:$4 sm:$0xff]   ;;  %v9464_v52 = vld [vmem:[%s13292_s0 + $0x30] ss:$20 sps:$4 sm:$0xff]   ;;  %v9466_v55 = vld [vmem:[%s13293_s1 + $0x118] sm:$0xff]  }
  0x13   :  { %9246 = vmatpush3.bf16.msra.mxu0 %v9413_v9  ;;  %9389 = vmatpush3.bf16.msra.mxu1 %v9432_v24  ;;  %v9467_v54 = vld [vmem:[%s13292_s0 + $0x5c] ss:$20 sps:$4 sm:$0xff]   ;;  %v9469_v56 = vld [vmem:[%s13292_s0 + $0x58] ss:$20 sps:$4 sm:$0xff]   ;;  %v9470_v57 = vld [vmem:[%s13293_s1 + $0x120] sm:$0xff]  }
  0x14   :  { %9247 = vmatprep.subr.bf16.mxu0 %v9414_v12  ;;  %9382 = vmatprep.subr.bf16.mxu1 %v9434_v25  ;;  %v9471_v58 = vld [vmem:[%s13293_s1 + $0x128] sm:$0xff]   ;;  %v9472_v59 = vld [vmem:[%s13293_s1 + $0x130] sm:$0xff]   ;;  %v9473_v60 = vld [vmem:[%s13293_s1 + $0x138] sm:$0xff]  }
  0x15   :  { %v9474_v61 = vld [vmem:[%s13292_s0 + $0x10] ss:$20 sps:$4 sm:$0xff]   ;;  %v9475_v62 = vld [vmem:[%s13292_s0 + $0x38] ss:$20 sps:$4 sm:$0xff]   ;;  %v9476_v63 = vld [vmem:[%s13292_s0 + $0x60] ss:$20 sps:$4 sm:$0xff]  }
  0x16   :  { %v9477_v0 = vld [vmem:[%s13292_s0 + $0x88] ss:$20 sps:$4 sm:$0xff]   ;;  %v9478_v1 = vld [vmem:[%s13292_s0 + $0xb0] ss:$20 sps:$4 sm:$0xff]  }
  0x17   :  { %9248 = vmatpush3.bf16.msra.mxu0 %v9415_v13  ;;  %9390 = vmatpush3.bf16.msra.mxu1 %v9435_v28  ;;  %v9481_v2 = vld [vmem:[%s13295_s3 + $0xc] ss:$16 sps:$4 sm:$0xff]   ;;  %v9479_v3 = vld [vmem:[%s13295_s3 + $0x8] ss:$16 sps:$4 sm:$0xff]   ;;  %v9484_v4 = vld [vmem:[%s13295_s3 + $0x84] ss:$16 sps:$4 sm:$0xff]  }
  0x18   :  { %9249 = vmatprep.subr.bf16.mxu0 %v9416_v15  ;;  %9383 = vmatprep.subr.bf16.mxu1 %v9436_v29  ;;  %v9482_v5 = vld [vmem:[%s13295_s3 + $0x80] ss:$16 sps:$4 sm:$0xff]   ;;  %v9487_v6 = vld [vmem:[%s13295_s3 + $0x2c] ss:$16 sps:$4 sm:$0xff]   ;;  %v9485_v7 = vld [vmem:[%s13295_s3 + $0x28] ss:$16 sps:$4 sm:$0xff]  }
  0x19   :  { %v9490_v8 = vld [vmem:[%s13295_s3 + $0xa4] ss:$16 sps:$4 sm:$0xff]   ;;  %v9488_v9 = vld [vmem:[%s13295_s3 + $0xa0] ss:$16 sps:$4 sm:$0xff]   ;;  %v9497_v15 = vld [vmem:[%s13295_s3 + $0x68] ss:$16 sps:$4 sm:$0xff]  }
  0x1a   :  { %v9496_v12 = vld [vmem:[%s13295_s3 + $0xc4] ss:$16 sps:$4 sm:$0xff]   ;;  %v9494_v13 = vld [vmem:[%s13295_s3 + $0xc0] ss:$16 sps:$4 sm:$0xff]  }
  0x1b   :  { %9250 = vmatpush3.bf16.msra.mxu0 %v9417_v17  ;;  %9391 = vmatpush3.bf16.msra.mxu1 %v9439_v30  ;;  %v9502_v16 = vld [vmem:[%s13295_s3 + $0xe4] ss:$16 sps:$4 sm:$0xff]   ;;  %v9500_v17 = vld [vmem:[%s13295_s3 + $0xe0] ss:$16 sps:$4 sm:$0xff]  }
  0x1c   :  { %9251 = vmatprep.subr.bf16.mxu0 %v9420_v19  ;;  %9384 = vmatprep.subr.bf16.mxu1 %v9441_v31  ;;  %v10545_v19 = vmov 0  }
  0x1f   :  { %9252 = vmatpush3.bf16.msra.mxu0 %v9421_v23  ;;  %9392 = vmatpush3.bf16.msra.mxu1 %v9442_v35 }
  0x20   :  { %9283 = vmatprep.subr.bf16.mxu0 %v9418_v10  ;;  %9385 = vmatprep.subr.bf16.mxu1 %v9443_v36  ;;  %v9493_v10 = vld [vmem:[%s13295_s3 + $0x4c] ss:$16 sps:$4 sm:$0xff]  }
  0x22   :  { %554 = vmatmul.mubr.bf16.vlgmr.msra.gmra.mrb[0].mxu0 %v9423_v26 }
  0x23   :  { %9284 = vmatpush3.bf16.msra.mxu0 %v9419_v11  ;;  %561 = vmatprep.mubr.bf16.mxu0 %v9430_v27  ;;  %v9491_v11 = vld [vmem:[%s13295_s3 + $0x48] ss:$16 sps:$4 sm:$0xff]  }
  0x24   :  { %9285 = vmatprep.subr.bf16.mxu0 %v9422_v14  ;;  %9393 = vmatpush3.bf16.msra.mxu1 %v9446_v37  ;;  %v9499_v14 = vld [vmem:[%s13295_s3 + $0x6c] ss:$16 sps:$4 sm:$0xff]  }
  0x25   :  { %950 = vmatprep.subr.bf16.mxu1 %v9484_v4 }
  0x27   :  { %9286 = vmatpush3.bf16.msra.mxu0 %v9426_v18  ;;  %651 = vmatmul.mubr.bf16.vlgmr.msra.gmra.mrb[0].mxu1 %v9448_v40  ;;  %v9505_v18 = vld [vmem:[%s13295_s3 + $0x10c] ss:$16 sps:$4 sm:$0xff]  }
  0x28   :  { %9287 = vmatprep.subr.bf16.mxu0 %v9427_v20  ;;  %658 = vmatprep.mubr.bf16.mxu1 %v9454_v41  ;;  %v9508_v20 = vld [vmem:[%s13295_s3 + $0x8c] ss:$16 sps:$4 sm:$0xff]  }
  0x29   :  { %951 = vmatpush1.bf16.msra.mxu1 %v9482_v5 }
  0x2a   :  { %562 = vmatmul.mubr.bf16.gmra.mrb[4].mxu0 %v9433_v32  ;;  %952 = vmatprep.subr.bf16.mxu1 %v9490_v8 }
  0x2b   :  { %9288 = vmatpush3.bf16.msra.mxu0 %v9428_v21  ;;  %569 = vmatprep.mubr.bf16.mxu0 %v9437_v34 }
  0x2c   :  { %9289 = vmatprep.subr.bf16.mxu0 %v9429_v22 }
  0x2d   :  { %953 = vmatpush1.bf16.msra.mxu1 %v9488_v9 }
  0x2e   :  { %954 = vmatprep.subr.bf16.mxu1 %v9496_v12 }
  0x2f   :  { %9290 = vmatpush3.bf16.msra.mxu0 %v9432_v24  ;;  %659 = vmatmul.mubr.bf16.gmra.mrb[4].mxu1 %v9456_v44 }
  0x30   :  { %9291 = vmatprep.subr.bf16.mxu0 %v9434_v25  ;;  %982 = vmatprep.mubr.bf16.mxu1 %v10545_v19 }
  0x31   :  { %955 = vmatpush1.bf16.msra.mxu1 %v9494_v13 }
  0x32   :  { %570 = vmatmul.mubr.bf16.gmra.mrb[8].mxu0 %v9440_v38  ;;  %956 = vmatprep.subr.bf16.mxu1 %v9502_v16 }
  0x33   :  { %9292 = vmatpush3.bf16.msra.mxu0 %v9435_v28  ;;  %577 = vmatprep.mubr.bf16.mxu0 %v9444_v39 }
  0x34   :  { %9293 = vmatprep.subr.bf16.mxu0 %v9436_v29 }
  0x35   :  { %957 = vmatpush1.bf16.msra.mxu1 %v9500_v17 }
  0x36   :  { %991 = vmatprep.subr.bf16.mxu1 %v9508_v20 }
  0x37   :  { %9294 = vmatpush3.bf16.msra.mxu0 %v9439_v30 }
  0x38   :  { %9295 = vmatprep.subr.bf16.mxu0 %v9441_v31 }
  0x3a   :  { %578 = vmatmul.mubr.bf16.gmra.mrb[12].mxu0 %v9447_v42 }
  0x3b   :  { %585 = vmatprep.mubr.bf16.mxu0 %v9451_v43  ;;  %9296 = vmatpush3.bf16.msra.mxu0 %v9442_v35 }
  0x3c   :  { %9297 = vmatprep.subr.bf16.mxu0 %v9443_v36 }
  0x3f   :  { %9298 = vmatpush3.bf16.msra.mxu0 %v9446_v37 }
  0x40   :  { %9342 = vmatprep.subr.bf16.mxu0 %v10543_v47 }
  0x42   :  { %586 = vmatmul.mubr.bf16.gmra.mrb[16].mxu0 %v9453_v45 }
  0x43   :  { %626 = vmatprep.mubr.bf16.mxu0 %v9459_v46 }
  0x4a   :  { %627 = vmatmul.mubr.bf16.vlgmr.msra.gmra.mrb[20].mxu0 %v9457_v48 }
  0x4b   :  { %9343 = vmatpush3.bf16.msra.mxu0 %v9460_v49  ;;  %634 = vmatprep.mubr.bf16.mxu0 %v9462_v50 }
  0x4c   :  { %9344 = vmatprep.subr.bf16.mxu0 %v10543_v47 }
  0x4f   :  { %9345 = vmatpush3.bf16.msra.mxu0 %v9461_v51 }
  0x50   :  { %9346 = vmatprep.subr.bf16.mxu0 %v10543_v47 }
  0x52   :  { %635 = vmatmul.mubr.bf16.gmra.mrb[24].mxu0 %v9464_v52 }
  0x53   :  { %9347 = vmatpush3.bf16.msra.mxu0 %v9465_v53  ;;  %642 = vmatprep.mubr.bf16.mxu0 %v9467_v54 }
  0x54   :  { %9348 = vmatprep.subr.bf16.mxu0 %v10543_v47 }
  0x57   :  { %9349 = vmatpush3.bf16.msra.mxu0 %v9466_v55 }
  0x58   :  { %9350 = vmatprep.subr.bf16.mxu0 %v10543_v47 }
  0x5a   :  { %643 = vmatmul.mubr.bf16.gmra.mrb[28].mxu0 %v9469_v56 }
  0x5b   :  { %9351 = vmatpush3.bf16.msra.mxu0 %v9470_v57  ;;  %9358 = vmatprep.mubr.msk.bf16.mxu0 %vm10544_vm0, %v10543_v47 }
  0x5c   :  { %9352 = vmatprep.subr.bf16.mxu0 %v10543_v47 }
  0x5f   :  { %9353 = vmatpush3.bf16.msra.mxu0 %v9471_v58 }
  0x60   :  { %9354 = vmatprep.subr.bf16.mxu0 %v10543_v47 }
  0x63   :  { %9355 = vmatpush3.bf16.msra.mxu0 %v9472_v59 }
  0x64   :  { %9356 = vmatprep.subr.bf16.mxu0 %v10543_v47 }
  0x67   :  { %9357 = vmatpush3.bf16.msra.mxu0 %v9473_v60 }
  0x68   :  { %1156 = vmatprep.subr.bf16.mxu0 %v9481_v2 }
  0x6a   :  { %9359 = vmatmul.mubr.bf16.vlgmr.msra.gmra.mrb[32].mxu0 %v9474_v61 }
  0x6b   :  { %9362 = vmatprep.mubr.msk.bf16.mxu0 %vm10544_vm0, %v10543_v47  ;;  %1157 = vmatpush1.bf16.msra.mxu0 %v9479_v3 }
  0x6c   :  { %1158 = vmatprep.subr.bf16.mxu0 %v9487_v6 }
  0x6f   :  { %1159 = vmatpush1.bf16.msra.mxu0 %v9485_v7 }
  0x70   :  { %1160 = vmatprep.subr.bf16.mxu0 %v9493_v10 }
  0x72   :  { %9363 = vmatmul.mubr.bf16.gmra.mrb[36].mxu0 %v9475_v62 }
  0x73   :  { %9366 = vmatprep.mubr.msk.bf16.mxu0 %vm10544_vm0, %v10543_v47  ;;  %1161 = vmatpush1.bf16.msra.mxu0 %v9491_v11 }
  0x74   :  { %1162 = vmatprep.subr.bf16.mxu0 %v9499_v14 }
  0x77   :  { %1163 = vmatpush1.bf16.msra.mxu0 %v9497_v15 }
  0x78   :  { %1340 = vmatprep.subr.bf16.mxu0 %v9505_v18 }
  0x7a   :  { %9367 = vmatmul.mubr.bf16.gmra.mrb[40].mxu0 %v9476_v63 }
  0x7b   :  { %9370 = vmatprep.mubr.msk.bf16.mxu0 %vm10544_vm0, %v10543_v47 }
  0x82   :  { %9371 = vmatmul.mubr.bf16.gmra.mrb[44].mxu0 %v9477_v0 }
  0x83   :  { %9374 = vmatprep.mubr.msk.bf16.mxu0 %vm10544_vm0, %v10543_v47  ;;  %v8410_v47 = vld [vmem:[%s13294_s2] ss:$0 sm:$0xff] }
  0x8a   :  { %9375 = vmatmul.mubr.bf16.gmra.mrb[48].mxu0 %v9478_v1 }
  0x8b   :  { %1188 = vmatprep.mubr.bf16.mxu0 %v10545_v19 }
  0xf5   :  { %v9253_v21 = vpop.f32.mrb[0].mxu0 }
  0xf6   :  { %v9254_v22 = vpop.f32.mrb[1].mxu0 }
  0xf7   :  { %v9255_v23 = vadd.f32 %v9254_v22, %v9253_v21  ;;  %v9256_v24 = vpop.f32.mrb[2].mxu0 }
  0xf8   :  { %v9257_v25 = vpop.f32.mrb[3].mxu0 }
  0xf9   :  { %v9258_v26 = vadd.f32 %v9257_v25, %v9256_v24  ;;  %v556_v10 = vadd.f32 %v9255_v23, %v8410_v47 }
  0xfa   :  { %v9317_v37 = vpop.f32.mrb[0].mxu1 }
  0xfb   :  { %v9318_v39 = vpop.f32.mrb[1].mxu1  ;;  %v559_v14 = vadd.f32 %v9258_v26, %v8410_v47 }
  0xfc   :  { %v9319_v41 = vadd.f32 %v9318_v39, %v9317_v37  ;;  %v9320_v42 = vpop.f32.mrb[2].mxu1 }
  0xfd   :  { %v9259_v27 = vpop.f32.mrb[4].mxu0  ;;  %v9321_v43 = vpop.f32.mrb[3].mxu1 }
  0xfe   :  { %v9260_v28 = vpop.f32.mrb[5].mxu0  ;;  %v9322_v44 = vadd.f32 %v9321_v43, %v9320_v42 }
  0xff   :  { %v9261_v29 = vadd.f32 %v9260_v28, %v9259_v27  ;;  %v9262_v30 = vpop.f32.mrb[6].mxu0 }
 0x100   :  { %v9263_v31 = vpop.f32.mrb[7].mxu0 }
 0x101   :  { %v9264_v32 = vadd.f32 %v9263_v31, %v9262_v30  ;;  %v564_v21 = vadd.f32 %v9261_v29, %v8410_v47 }
 0x102   :  { %v9323_v50 = vpop.f32.mrb[4].mxu1 }
 0x103   :  { %v9324_v52 = vpop.f32.mrb[5].mxu1  ;;  %v567_v27 = vadd.f32 %v9264_v32, %v8410_v47 }
 0x104   :  { %v9325_v55 = vadd.f32 %v9324_v52, %v9323_v50  ;;  %v9326_v56 = vpop.f32.mrb[6].mxu1 }
 0x105   :  { %v9265_v33 = vpop.f32.mrb[8].mxu0  ;;  %v9327_v57 = vpop.f32.mrb[7].mxu1 }
 0x106   :  { %v9266_v34 = vpop.f32.mrb[9].mxu0  ;;  %v9328_v59 = vadd.f32 %v9327_v57, %v9326_v56 }
 0x107   :  { %v9267_v35 = vadd.f32 %v9266_v34, %v9265_v33  ;;  %v9268_v36 = vpop.f32.mrb[10].mxu0 }
 0x108   :  { %v9269_v38 = vpop.f32.mrb[11].mxu0 }
 0x109   :  { %v9270_v40 = vadd.f32 %v9269_v38, %v9268_v36  ;;  %v572_v23 = vadd.f32 %v9267_v35, %v8410_v47 }
 0x10b   :  { %v575_v26 = vadd.f32 %v9270_v40, %v8410_v47 }
 0x10d   :  { %v9271_v45 = vpop.f32.mrb[12].mxu0 }
 0x10e   :  { %v9272_v46 = vpop.f32.mrb[13].mxu0 }
 0x10f   :  { %v9273_v48 = vadd.f32 %v9272_v46, %v9271_v45  ;;  %v9274_v49 = vpop.f32.mrb[14].mxu0 }
 0x110   :  { %v9275_v51 = vpop.f32.mrb[15].mxu0 }
 0x111   :  { %v580_v53 = vadd.f32 %v9273_v48, %v8410_v47  ;;  %v9276_v54 = vadd.f32 %v9275_v51, %v9274_v49 }
 0x113   :  { %v583_v58 = vadd.f32 %v9276_v54, %v8410_v47  ;;  %v10856_v60 = vadd.f32 %v9319_v41, %v580_v53 }
 0x115   :  { %v9277_v61 = vpop.f32.mrb[16].mxu0  ;;  %v10858_v62 = vadd.f32 %v9322_v44, %v583_v58 }
 0x116   :  { %v9278_v63 = vpop.f32.mrb[17].mxu0 }
 0x117   :  { %v9279_v0 = vadd.f32 %v9278_v63, %v9277_v61  ;;  %v9280_v1 = vpop.f32.mrb[18].mxu0 }
 0x118   :  { %v9281_v2 = vpop.f32.mrb[19].mxu0 }
 0x119   :  { %v588_v3 = vadd.f32 %v9279_v0, %v8410_v47  ;;  %v9282_v4 = vadd.f32 %v9281_v2, %v9280_v1 }
 0x11b   :  { %v591_v5 = vadd.f32 %v9282_v4, %v8410_v47  ;;  %v10860_v6 = vadd.f32 %v9325_v55, %v588_v3 }
 0x11d   :  { %v9299_v7 = vpop.f32.mrb[20].mxu0  ;;  %v10862_v8 = vadd.f32 %v9328_v59, %v591_v5 }
 0x11e   :  { %v9300_v9 = vpop.f32.mrb[21].mxu0 }
 0x11f   :  { %v9301_v11 = vadd.f32 %v9300_v9, %v9299_v7  ;;  %v9302_v12 = vpop.f32.mrb[22].mxu0 }
 0x120   :  { %v9303_v13 = vpop.f32.mrb[23].mxu0 }
 0x121   :  { %v9304_v15 = vadd.f32 %v9303_v13, %v9302_v12  ;;  %v629_v16 = vadd.f32 %v9301_v11, %v556_v10 }
 0x123   :  { %v632_v17 = vadd.f32 %v9304_v15, %v559_v14 }
 0x125   :  { %v9305_v18 = vpop.f32.mrb[24].mxu0 }
 0x126   :  { %v9306_v20 = vpop.f32.mrb[25].mxu0 }
 0x127   :  { %v9307_v22 = vadd.f32 %v9306_v20, %v9305_v18  ;;  %v9308_v24 = vpop.f32.mrb[26].mxu0 }
 0x128   :  { %v9309_v25 = vpop.f32.mrb[27].mxu0 }
 0x129   :  { %v9310_v28 = vadd.f32 %v9309_v25, %v9308_v24  ;;  %v637_v30 = vadd.f32 %v9307_v22, %v564_v21 }
 0x12b   :  { %v640_v31 = vadd.f32 %v9310_v28, %v567_v27 }
 0x12d   :  { %v9311_v33 = vpop.f32.mrb[28].mxu0 }
 0x12e   :  { %v9312_v34 = vpop.f32.mrb[29].mxu0 }
 0x12f   :  { %v9313_v36 = vadd.f32 %v9312_v34, %v9311_v33  ;;  %v9314_v37 = vpop.f32.mrb[30].mxu0 }
 0x130   :  { %v9315_v38 = vpop.f32.mrb[31].mxu0 }
 0x131   :  { %v9316_v39 = vadd.f32 %v9315_v38, %v9314_v37  ;;  %v645_v41 = vadd.f32 %v9313_v36, %v572_v23 }
 0x133   :  { %v648_v42 = vadd.f32 %v9316_v39, %v575_v26 }
 0x13d   :  { %v701_v43 = vpop.f32.mrb[32].mxu0 }
 0x13e   :  { %v702_v44 = vadd.f32 %v701_v43, %v629_v16  ;;  %v9360_v29 = vpop.f32.mrb[33].mxu0 }
 0x13f   :  { %v704_v45 = vpop.f32.mrb[34].mxu0 }
 0x140   :  { %v750_v46 = vmin.f32 %v702_v44, 0.0  ;;  %v705_v48 = vadd.f32 %v704_v45, %v632_v17  ;;  %v9361_v32 = vpop.f32.mrb[35].mxu0 }
 0x141   :  { %14 = vsyncpa [#allocation4], 0  ;;  %vm740_vm1 = vcmp.gt.f32.partialorder %v702_v44, 0.0  ;;  %v9503_v32 = vld [vmem:[%s13295_s3 + $0x108] ss:$16 sps:$4 sm:$0xff]   ;;  %vm946_vm5 = vcmask 523264  }
 0x142   :  { %v760_v49 = vmul.f32 1.442695, %v750_v46  ;;  %v751_v50 = vmin.f32 %v705_v48, 0.0  ;;  %vm741_vm2 = vcmp.gt.f32.partialorder %v705_v48, 0.0  ;;  %s10546_s25 = smov [#allocation3]  }
 0x143   :  { %s8402_s2 = sshll.u32 %s10546_s25, 4  ;;  %s8403_s2 = int_to_ptr.vmem [resolvable:$true] %s8402_s2 }
 0x144   :  { %10487 = vpow2.f32 %v760_v49  ;;  %v762_v51 = vmul.f32 1.442695, %v751_v50  ;;  %s10519_s26 = scalar_lea.vmem %s8403_s2, 64  ;;  %p10524_p1 = scmp.lt.s32.totalorder %s8403_s2, %s8403_s2 }
 0x145   :  { %v709_v35 = vpop.f32.mrb[36].mxu0  ;;  %p10520_p0 = scmp.ne.s32.totalorder %s8403_s2, %s10519_s26  ;;  %p10525_p2 = scmp.lt.s32.totalorder %s10519_s26, %s10519_s26 }
 0x146   :  { %10489 = vpow2.f32 %v762_v51  ;;  %v710_v52 = vadd.f32 %v709_v35, %v637_v30  ;;  %v9364_v53 = vpop.f32.mrb[37].mxu0 }
 0x147   :  { %v712_v40 = vpop.f32.mrb[38].mxu0  ;;  %p10526_p3 = por %p10525_p2, %p10524_p1 }
 0x148   :  { %v752_v47 = vmin.f32 %v710_v52, 0.0  ;;  %v713_v54 = vadd.f32 %v712_v40, %v640_v31  ;;  %v9365_v55 = vpop.f32.mrb[39].mxu0  ;;  %vm742_vm3 = vcmp.gt.f32.partialorder %v710_v52, 0.0 }
 0x149   :  { %v9509_v55 = vld [vmem:[%s13295_s3 + $0x128] ss:$16 sps:$4 sm:$0xff]   ;;  %p10527_p4 = pnand %p10526_p3, %p10520_p0 }
 0x14a   :  { %v764_v56 = vmul.f32 1.442695, %v752_v47  ;;  %v753_v57 = vmin.f32 %v713_v54, 0.0  ;;  %vm743_vm4 = vcmp.gt.f32.partialorder %v713_v54, 0.0 }
 0x14c   :  { %10491 = vpow2.f32 %v764_v56  ;;  %v766_v58 = vmul.f32 1.442695, %v753_v57 }
 0x14d   :  { %v717_v59 = vpop.f32.mrb[40].mxu0 }
 0x14e   :  { %v10488_v61 = vpop.eup %10487  ;;  %10493 = vpow2.f32 %v766_v58  ;;  %v10864_v63 = vadd.f32 %v717_v59, %v645_v41  ;;  %v9368_v0 = vpop.f32.mrb[41].mxu0 }
 0x14f   :  { %v8476_v1 = vadd.f32 -1.0, %v10488_v61  ;;  %v720_v2 = vpop.f32.mrb[42].mxu0  ;;  %v9514_v0 = vld [vmem:[%s13295_s3 + $0xac] ss:$16 sps:$4 sm:$0xff]  }
 0x150   :  { %v10490_v3 = vpop.eup %10489  ;;  %v754_v4 = vmin.f32 %v10864_v63, 0.0  ;;  %v10867_v5 = vadd.f32 %v720_v2, %v648_v42  ;;  %v9369_v7 = vpop.f32.mrb[43].mxu0  ;;  %vm744_vm6 = vcmp.gt.f32.partialorder %v10864_v63, 0.0  ;;  %v9517_v2 = vld [vmem:[%s13295_s3 + $0x14c] ss:$16 sps:$4 sm:$0xff]  }
 0x151   :  { %v790_v9 = vmul.f32 1.6732632, %v8476_v1  ;;  %v8477_v10 = vadd.f32 -1.0, %v10490_v3 }
 0x152   :  { %v768_v11 = vmul.f32 1.442695, %v754_v4  ;;  %v755_v12 = vmin.f32 %v10867_v5, 0.0  ;;  %vm745_vm7 = vcmp.gt.f32.partialorder %v10867_v5, 0.0 }
 0x153   :  { %v800_v13 = vsel %vm740_vm1, %v702_v44, %v790_v9  ;;  %v791_v14 = vmul.f32 1.6732632, %v8477_v10  ;;  %v9512_v9 = vld [vmem:[%s13295_s3 + $0xa8] ss:$16 sps:$4 sm:$0xff]  }
 0x154   :  { %10495 = vpow2.f32 %v768_v11  ;;  %v770_v15 = vmul.f32 1.442695, %v755_v12  ;;  %v810_v20 = vmul.f32 1.050701, %v800_v13  ;;  %v9520_v11 = vld [vmem:[%s13295_s3 + $0xcc] ss:$16 sps:$4 sm:$0xff]  }
 0x155   :  { %v801_v16 = vsel %vm741_vm2, %v705_v48, %v791_v14  ;;  %v725_v17 = vpop.f32.mrb[44].mxu0  ;;  %v9523_v14 = vld [vmem:[%s13295_s3 + $0x16c] ss:$16 sps:$4 sm:$0xff]  }
 0x156   :  { %v10492_v18 = vpop.eup %10491  ;;  %v811_v21 = vmul.f32 1.050701, %v801_v16  ;;  %10497 = vpow2.f32 %v770_v15  ;;  %v10871_v22 = vadd.f32 %v725_v17, %v10856_v60  ;;  %v9372_v24 = vpop.f32.mrb[45].mxu0  ;;  %v9518_v17 = vld [vmem:[%s13295_s3 + $0xc8] ss:$16 sps:$4 sm:$0xff]  }
 0x157   :  { %v8478_v25 = vadd.f32 -1.0, %v10492_v18  ;;  %v728_v27 = vpop.f32.mrb[46].mxu0  ;;  %v9526_v24 = vld [vmem:[%s13295_s3 + $0xec] ss:$16 sps:$4 sm:$0xff]  }
 0x158   :  { %v10494_v28 = vpop.eup %10493  ;;  %v820_v30 = vpack.c.bf16 %v811_v21, %v810_v20  ;;  %v756_v31 = vmin.f32 %v10871_v22, 0.0  ;;  %v10875_v33 = vadd.f32 %v728_v27, %v10858_v62  ;;  %v9373_v34 = vpop.f32.mrb[47].mxu0  ;;  %vm746_vm8 = vcmp.gt.f32.partialorder %v10871_v22, 0.0  ;;  %v9521_v21 = vld [vmem:[%s13295_s3 + $0x168] ss:$16 sps:$4 sm:$0xff]  }
 0x159   :  { %v792_v23 = vmul.f32 1.6732632, %v8478_v25  ;;  %v8479_v36 = vadd.f32 -1.0, %v10494_v28  ;;  %v9529_v25 = vld [vmem:[%s13295_s3 + $0x18c] ss:$16 sps:$4 sm:$0xff]  }
 0x15a   :  { %825 = vst [vmem:[#allocation2] sm:$0xff] %v820_v30  ;;  %v772_v37 = vmul.f32 1.442695, %v756_v31  ;;  %v757_v38 = vmin.f32 %v10875_v33, 0.0  ;;  %vm747_vm9 = vcmp.gt.f32.partialorder %v10875_v33, 0.0 }
 0x15b   :  { %v802_v60 = vsel %vm742_vm3, %v710_v52, %v792_v23  ;;  %v793_v26 = vmul.f32 1.6732632, %v8479_v36  ;;  %v9511_v52 = vld [vmem:[%s13295_s3 + $0x12c] ss:$16 sps:$4 sm:$0xff]   ;;  %v9524_v34 = vld [vmem:[%s13295_s3 + $0xe8] ss:$16 sps:$4 sm:$0xff]  }
 0x15c   :  { %10499 = vpow2.f32 %v772_v37  ;;  %v774_v39 = vmul.f32 1.442695, %v757_v38  ;;  %v812_v44 = vmul.f32 1.050701, %v802_v60  ;;  %v9527_v36 = vld [vmem:[%s13295_s3 + $0x188] ss:$16 sps:$4 sm:$0xff]  }
 0x15d   :  { %v803_v41 = vsel %vm743_vm4, %v713_v54, %v793_v26  ;;  %v733_v42 = vpop.f32.mrb[48].mxu0  ;;  %v9535_v26 = vld [vmem:[%s13295_s3 + $0x1ac] ss:$16 sps:$4 sm:$0xff]  }
 0x15e   :  { %v10496_v43 = vpop.eup %10495  ;;  %v813_v29 = vmul.f32 1.050701, %v803_v41  ;;  %10501 = vpow2.f32 %v774_v39  ;;  %v10879_v62 = vadd.f32 %v733_v42, %v10860_v6  ;;  %v9376_v45 = vpop.f32.mrb[49].mxu0  ;;  %v9506_v6 = vld [vmem:[%s13295_s3 + $0x88] ss:$16 sps:$4 sm:$0xff]  }
 0x15f   :  { %v8480_v46 = vadd.f32 -1.0, %v10496_v43  ;;  %v736_v48 = vpop.f32.mrb[50].mxu0  ;;  %v9530_v42 = vld [vmem:[%s13295_s3] ss:$16 sps:$4 sm:$0xff]   ;;  %v9538_v45 = vld [vmem:[%s13295_s3 + $0x24] ss:$16 sps:$4 sm:$0xff]  }
 0x160   :  { %v10498_v49 = vpop.eup %10497  ;;  %v821_v50 = vpack.c.bf16 %v813_v29, %v812_v44  ;;  %v758_v51 = vmin.f32 %v10879_v62, 0.0  ;;  %v10886_v35 = vadd.f32 %v736_v48, %v10862_v8  ;;  %v9377_v53 = vpop.f32.mrb[51].mxu0  ;;  %vm748_vm10 = vcmp.gt.f32.partialorder %v10879_v62, 0.0  ;;  %v9533_v29 = vld [vmem:[%s13295_s3 + $0x1a8] ss:$16 sps:$4 sm:$0xff]  }
 0x161   :  { %v794_v40 = vmul.f32 1.6732632, %v8480_v46  ;;  %v8481_v47 = vadd.f32 -1.0, %v10498_v49  ;;  %v10894_v54 = vld [vmem:[#allocation2] sm:$0x1] }
 0x162   :  { %826 = vst [vmem:[#allocation2 + $0x8] sm:$0xff] %v821_v50  ;;  %v776_v8 = vmul.f32 1.442695, %v758_v51  ;;  %v759_v56 = vmin.f32 %v10886_v35, 0.0  ;;  %8521 = vmatmul.mubr.msk.bf16.vlgmr.msra.gmra.mrb[52].mxu0 %vm946_vm5, %v10894_v54  ;;  %v10903_v57 = vld [vmem:[#allocation2] sm:$0x2] }
 0x163   :  { %v804_v58 = vsel %vm744_vm6, %v10864_v63, %v794_v40  ;;  %v795_v59 = vmul.f32 1.6732632, %v8481_v47  ;;  %1341 = vmatpush1.bf16.msra.mxu0 %v9503_v32  ;;  %v865_v61 = vrot.slane %v10903_v57, 1  ;;  %1372 = vmatprep.mubr.bf16.mxu0 %v10545_v19  ;;  %v10948_v27 = vld [vmem:[#allocation2] sm:$0x4]  ;;  %vm749_vm11 = vcmp.gt.f32.partialorder %v10886_v35, 0.0 }
 0x164   :  { %10503 = vpow2.f32 %v776_v8  ;;  %v778_v1 = vmul.f32 1.442695, %v759_v56  ;;  %1342 = vmatprep.subr.bf16.mxu0 %v9511_v52  ;;  %v814_v4 = vmul.f32 1.050701, %v804_v58  ;;  %v1215_v60 = vrot.slane %v10948_v27, 2 }
 0x165   :  { %v805_v63 = vsel %vm745_vm7, %v10867_v5, %v795_v59  ;;  %8502 = vmatmul.mubr.msk.bf16.vlgmr.msra.gmra.mrb[8].mxu1 %vm946_vm5, %v865_v61  ;;  %v9515_v5 = vld [vmem:[%s13295_s3 + $0x148] ss:$16 sps:$4 sm:$0xff]   ;;  %v9541_v46 = vld [vmem:[%s13295_s3 + $0x1cc] ss:$16 sps:$4 sm:$0xff]   ;;  %v9536_v49 = vld [vmem:[%s13295_s3 + $0x20] ss:$16 sps:$4 sm:$0xff]  }
 0x166   :  { %v10500_v3 = vpop.eup %10499  ;;  %v815_v7 = vmul.f32 1.050701, %v805_v63  ;;  %10505 = vpow2.f32 %v778_v1  ;;  %992 = vmatpush1.bf16.msra.mxu1 %v9506_v6  ;;  %1023 = vmatprep.mubr.bf16.mxu1 %v10545_v19  ;;  %v9539_v50 = vld [vmem:[%s13295_s3 + $0x1c8] ss:$16 sps:$4 sm:$0xff]   ;;  %v9544_v51 = vld [vmem:[%s13295_s3 + $0x44] ss:$16 sps:$4 sm:$0xff]  }
 0x167   :  { %v8482_v10 = vadd.f32 -1.0, %v10500_v3  ;;  %1343 = vmatpush1.bf16.msra.mxu0 %v9509_v55  ;;  %993 = vmatprep.subr.bf16.mxu1 %v9514_v0  ;;  %v9547_v6 = vld [vmem:[%s13295_s3 + $0x1ec] ss:$16 sps:$4 sm:$0xff]   ;;  %v9542_v52 = vld [vmem:[%s13295_s3 + $0x40] ss:$16 sps:$4 sm:$0xff]  }
 0x168   :  { %v10502_v12 = vpop.eup %10501  ;;  %v822_v13 = vpack.c.bf16 %v815_v7, %v814_v4  ;;  %1344 = vmatprep.subr.bf16.mxu0 %v9517_v2  ;;  %v9545_v53 = vld [vmem:[%s13295_s3 + $0x1e8] ss:$16 sps:$4 sm:$0xff]   ;;  %v9550_v40 = vld [vmem:[%s13295_s3 + $0x64] ss:$16 sps:$4 sm:$0xff]   ;;  %v9553_v47 = vld [vmem:[%s13295_s3 + $0x20c] ss:$16 sps:$4 sm:$0xff]  }
 0x169   :  { %v796_v15 = vmul.f32 1.6732632, %v8482_v10  ;;  %v8483_v16 = vadd.f32 -1.0, %v10502_v12  ;;  %v11011_v55 = vld [vmem:[#allocation2] sm:$0x8] }
 0x16a   :  { %827 = vst [vmem:[#allocation2 + $0x10] sm:$0xff] %v822_v13  ;;  %994 = vmatpush1.bf16.msra.mxu1 %v9512_v9  ;;  %v9548_v8 = vld [vmem:[%s13295_s3 + $0x60] ss:$16 sps:$4 sm:$0xff]   ;;  %v9551_v56 = vld [vmem:[%s13295_s3 + $0x208] ss:$16 sps:$4 sm:$0xff]   ;;  %v1403_v58 = vrot.slane %v11011_v55, 3 }
 0x16b   :  { %v806_v18 = vsel %vm746_vm8, %v10871_v22, %v796_v15  ;;  %v797_v20 = vmul.f32 1.6732632, %v8483_v16  ;;  %1345 = vmatpush1.bf16.msra.mxu0 %v9515_v5  ;;  %995 = vmatprep.subr.bf16.mxu1 %v9520_v11  ;;  %v9556_v57 = vld [vmem:[%s13295_s3 + $0x104] ss:$16 sps:$4 sm:$0xff]   ;;  %v9559_v59 = vld [vmem:[%s13295_s3 + $0x22c] ss:$16 sps:$4 sm:$0xff]  }
 0x16c   :  { %1346 = vmatprep.subr.bf16.mxu0 %v9523_v14  ;;  %v816_v30 = vmul.f32 1.050701, %v806_v18  ;;  %v9557_v0 = vld [vmem:[%s13295_s3 + $0x228] ss:$16 sps:$4 sm:$0xff]   ;;  %v9562_v1 = vld [vmem:[%s13295_s3 + $0x124] ss:$16 sps:$4 sm:$0xff]  }
 0x16d   :  { %v807_v22 = vsel %vm747_vm9, %v10875_v33, %v797_v20  ;;  %v9532_v33 = vld [vmem:[%s13295_s3 + $0x4] ss:$16 sps:$4 sm:$0xff]   ;;  %v9565_v2 = vld [vmem:[%s13295_s3 + $0x24c] ss:$16 sps:$4 sm:$0xff]   ;;  %v9560_v63 = vld [vmem:[%s13295_s3 + $0x120] ss:$16 sps:$4 sm:$0xff]  }
 0x16e   :  { %v10504_v28 = vpop.eup %10503  ;;  %v817_v31 = vmul.f32 1.050701, %v807_v22  ;;  %996 = vmatpush1.bf16.msra.mxu1 %v9518_v17  ;;  %v9563_v3 = vld [vmem:[%s13295_s3 + $0x248] ss:$16 sps:$4 sm:$0xff]   ;;  %v9568_v4 = vld [vmem:[%s13295_s3 + $0x144] ss:$16 sps:$4 sm:$0xff]  }
 0x16f   :  { %v8484_v23 = vadd.f32 -1.0, %v10504_v28  ;;  %1347 = vmatpush1.bf16.msra.mxu0 %v9521_v21  ;;  %997 = vmatprep.subr.bf16.mxu1 %v9526_v24  ;;  %v9566_v7 = vld [vmem:[%s13295_s3 + $0x140] ss:$16 sps:$4 sm:$0xff]   ;;  %v9569_v9 = vld [vmem:[%s13295_s3 + $0x268] ss:$16 sps:$4 sm:$0xff]  }
 0x170   :  { %v10506_v37 = vpop.eup %10505  ;;  %v823_v38 = vpack.c.bf16 %v817_v31, %v816_v30  ;;  %1528 = vmatprep.subr.bf16.mxu0 %v9529_v25  ;;  %v9574_v10 = vld [vmem:[%s13295_s3 + $0x164] ss:$16 sps:$4 sm:$0xff]   ;;  %v9577_v5 = vld [vmem:[%s13295_s3 + $0x28c] ss:$16 sps:$4 sm:$0xff]   ;;  %v9572_v12 = vld [vmem:[%s13295_s3 + $0x160] ss:$16 sps:$4 sm:$0xff]  }
 0x171   :  { %v798_v39 = vmul.f32 1.6732632, %v8484_v23  ;;  %v8485_v41 = vadd.f32 -1.0, %v10506_v37  ;;  %v11069_v11 = vld [vmem:[#allocation2] sm:$0x10] }
 0x172   :  { %828 = vst [vmem:[#allocation2 + $0x18] sm:$0xff] %v823_v38  ;;  %998 = vmatpush1.bf16.msra.mxu1 %v9524_v34  ;;  %8539 = vmatmul.mubr.msk.bf16.vlgmr.msra.gmra.mrb[56].mxu0 %vm946_vm5, %v1215_v60  ;;  %v9575_v13 = vld [vmem:[%s13295_s3 + $0x288] ss:$16 sps:$4 sm:$0xff]   ;;  %v9580_v14 = vld [vmem:[%s13295_s3 + $0x184] ss:$16 sps:$4 sm:$0xff]   ;;  %v1591_v15 = vrot.slane %v11069_v11, 4 }
 0x173   :  { %v808_v43 = vsel %vm748_vm10, %v10879_v62, %v798_v39  ;;  %v799_v44 = vmul.f32 1.6732632, %v8485_v41  ;;  %1529 = vmatpush1.bf16.msra.mxu0 %v9527_v36  ;;  %1115 = vmatprep.subr.bf16.mxu1 %v9532_v33  ;;  %v9583_v16 = vld [vmem:[%s13295_s3 + $0x2ac] ss:$16 sps:$4 sm:$0xff]   ;;  %v9578_v17 = vld [vmem:[%s13295_s3 + $0x180] ss:$16 sps:$4 sm:$0xff]  }
 0x174   :  { %1530 = vmatprep.subr.bf16.mxu0 %v9535_v26  ;;  %1560 = vmatprep.mubr.bf16.mxu0 %v10545_v19  ;;  %v818_v48 = vmul.f32 1.050701, %v808_v43  ;;  %v9581_v18 = vld [vmem:[%s13295_s3 + $0x2a8] ss:$16 sps:$4 sm:$0xff]   ;;  %v9586_v20 = vld [vmem:[%s13295_s3 + $0x1a4] ss:$16 sps:$4 sm:$0xff]  }
 0x175   :  { %v809_v62 = vsel %vm749_vm11, %v10886_v35, %v799_v44  ;;  %8503 = vmatmul.mubr.msk.bf16.vlgmr.msra.gmra.mrb[12].mxu1 %vm946_vm5, %v865_v61  ;;  %v9554_v61 = vld [vmem:[%s13295_s3 + $0x100] ss:$16 sps:$4 sm:$0xff]   ;;  %v9589_v21 = vld [vmem:[%s13295_s3 + $0x2cc] ss:$16 sps:$4 sm:$0xff]   ;;  %v9587_v25 = vld [vmem:[%s13295_s3 + $0x2c8] ss:$16 sps:$4 sm:$0xff]  }
 0x176   :  { %v819_v32 = vmul.f32 1.050701, %v809_v62  ;;  %1116 = vmatpush1.bf16.msra.mxu1 %v9530_v42  ;;  %1147 = vmatprep.mubr.bf16.mxu1 %v10545_v19  ;;  %v9584_v24 = vld [vmem:[%s13295_s3 + $0x1a0] ss:$16 sps:$4 sm:$0xff]   ;;  %v9592_v22 = vld [vmem:[%s13295_s3 + $0x1c4] ss:$16 sps:$4 sm:$0xff]  }
 0x177   :  { %1531 = vmatpush1.bf16.msra.mxu0 %v9533_v29  ;;  %1117 = vmatprep.subr.bf16.mxu1 %v9538_v45  ;;  %v9595_v27 = vld [vmem:[%s13295_s3 + $0x2ec] ss:$16 sps:$4 sm:$0xff]   ;;  %v9590_v28 = vld [vmem:[%s13295_s3 + $0x1c0] ss:$16 sps:$4 sm:$0xff]   ;;  %v9593_v30 = vld [vmem:[%s13295_s3 + $0x2e8] ss:$16 sps:$4 sm:$0xff]  }
 0x178   :  { %v824_v35 = vpack.c.bf16 %v819_v32, %v818_v48  ;;  %1532 = vmatprep.subr.bf16.mxu0 %v9541_v46  ;;  %v9598_v31 = vld [vmem:[%s13295_s3 + $0x1e4] ss:$16 sps:$4 sm:$0xff]   ;;  %v9601_v34 = vld [vmem:[%s13295_s3 + $0x30c] ss:$16 sps:$4 sm:$0xff]   ;;  %v9596_v36 = vld [vmem:[%s13295_s3 + $0x1e0] ss:$16 sps:$4 sm:$0xff]  }
 0x179   :  { %v11128_v23 = vld [vmem:[#allocation2] sm:$0x20]  ;;  %v9599_v33 = vld [vmem:[%s13295_s3 + $0x308] ss:$16 sps:$4 sm:$0xff]   ;;  %v9602_v26 = vld [vmem:[%s13295_s3 + $0x200] ss:$16 sps:$4 sm:$0xff]  }
 0x17a   :  { %829 = vst [vmem:[#allocation2 + $0x20] sm:$0xff] %v824_v35  ;;  %1118 = vmatpush1.bf16.msra.mxu1 %v9536_v49  ;;  %v9604_v37 = vld [vmem:[%s13295_s3 + $0x204] ss:$16 sps:$4 sm:$0xff]   ;;  %v1779_v38 = vrot.slane %v11128_v23, 5  ;;  %v9605_v39 = vld [vmem:[%s13295_s3 + $0x328] ss:$16 sps:$4 sm:$0xff]  }
 0x17b   :  { %1533 = vmatpush1.bf16.msra.mxu0 %v9539_v50  ;;  %1119 = vmatprep.subr.bf16.mxu1 %v9544_v51  ;;  %v9610_v41 = vld [vmem:[%s13295_s3 + $0x224] ss:$16 sps:$4 sm:$0xff]   ;;  %v9613_v42 = vld [vmem:[%s13295_s3 + $0x34c] ss:$16 sps:$4 sm:$0xff]   ;;  %v9608_v43 = vld [vmem:[%s13295_s3 + $0x220] ss:$16 sps:$4 sm:$0xff]  }
 0x17c   :  { %1534 = vmatprep.subr.bf16.mxu0 %v9547_v6  ;;  %v9611_v44 = vld [vmem:[%s13295_s3 + $0x348] ss:$16 sps:$4 sm:$0xff]   ;;  %v9616_v29 = vld [vmem:[%s13295_s3 + $0x244] ss:$16 sps:$4 sm:$0xff]   ;;  %v9619_v45 = vld [vmem:[%s13295_s3 + $0x36c] ss:$16 sps:$4 sm:$0xff]  }
 0x17d   :  { %v9614_v46 = vld [vmem:[%s13295_s3 + $0x240] ss:$16 sps:$4 sm:$0xff]   ;;  %v9617_v62 = vld [vmem:[%s13295_s3 + $0x368] ss:$16 sps:$4 sm:$0xff]   ;;  %v9622_v48 = vld [vmem:[%s13295_s3 + $0x264] ss:$16 sps:$4 sm:$0xff]  }
 0x17e   :  { %1120 = vmatpush1.bf16.msra.mxu1 %v9542_v52  ;;  %v9625_v32 = vld [vmem:[%s13295_s3 + $0x38c] ss:$16 sps:$4 sm:$0xff]   ;;  %v11187_v49 = vld [vmem:[#allocation2] sm:$0x40]  ;;  %v9620_v50 = vld [vmem:[%s13295_s3 + $0x260] ss:$16 sps:$4 sm:$0xff]  }
 0x17f   :  { %1535 = vmatpush1.bf16.msra.mxu0 %v9545_v53  ;;  %1121 = vmatprep.subr.bf16.mxu1 %v9550_v40  ;;  %v9623_v51 = vld [vmem:[%s13295_s3 + $0x388] ss:$16 sps:$4 sm:$0xff]   ;;  %v9628_v35 = vld [vmem:[%s13295_s3 + $0x284] ss:$16 sps:$4 sm:$0xff]   ;;  %v1967_v6 = vrot.slane %v11187_v49, 6 }
 0x180   :  { %1716 = vmatprep.subr.bf16.mxu0 %v9553_v47  ;;  %v9631_v52 = vld [vmem:[%s13295_s3 + $0x3ac] ss:$16 sps:$4 sm:$0xff]   ;;  %v9626_v53 = vld [vmem:[%s13295_s3 + $0x280] ss:$16 sps:$4 sm:$0xff]   ;;  %v9629_v40 = vld [vmem:[%s13295_s3 + $0x3a8] ss:$16 sps:$4 sm:$0xff]  }
 0x181   :  { %v9634_v47 = vld [vmem:[%s13295_s3 + $0x2a4] ss:$16 sps:$4 sm:$0xff]   ;;  %v9637_v55 = vld [vmem:[%s13295_s3 + $0x3cc] ss:$16 sps:$4 sm:$0xff]   ;;  %v9680_v23 = vld [vmem:[%s13295_s3 + $0x3a0] ss:$16 sps:$4 sm:$0xff]  }
 0x182   :  { %1122 = vmatpush1.bf16.msra.mxu1 %v9548_v8  ;;  %8557 = vmatmul.mubr.msk.bf16.vlgmr.msra.gmra.mrb[60].mxu0 %vm946_vm5, %v1403_v58  ;;  %v9632_v8 = vld [vmem:[%s13295_s3 + $0x2a0] ss:$16 sps:$4 sm:$0xff]   ;;  %v9661_v11 = vld [vmem:[%s13295_s3 + $0x44c] ss:$16 sps:$4 sm:$0xff]  }
 0x183   :  { %1717 = vmatpush1.bf16.msra.mxu0 %v9551_v56  ;;  %1299 = vmatprep.subr.bf16.mxu1 %v9556_v57  ;;  %v9635_v56 = vld [vmem:[%s13295_s3 + $0x3c8] ss:$16 sps:$4 sm:$0xff]   ;;  %v9640_v57 = vld [vmem:[%s13295_s3 + $0x2c4] ss:$16 sps:$4 sm:$0xff]   ;;  %v9704_v49 = vld [vmem:[%s13295_s3 + $0x420] ss:$16 sps:$4 sm:$0xff]  }
 0x184   :  { %1718 = vmatprep.subr.bf16.mxu0 %v9559_v59  ;;  %1748 = vmatprep.mubr.bf16.mxu0 %v10545_v19  ;;  %v9638_v59 = vld [vmem:[%s13295_s3 + $0x2c0] ss:$16 sps:$4 sm:$0xff]  }
 0x185   :  { %8520 = vmatmul.mubr.msk.bf16.vlgmr.msra.gmra.mrb[16].mxu1 %vm946_vm5, %v10894_v54  ;;  %v9571_v54 = vld [vmem:[%s13295_s3 + $0x26c] ss:$16 sps:$4 sm:$0xff]  }
 0x186   :  { %1300 = vmatpush1.bf16.msra.mxu1 %v9554_v61  ;;  %1331 = vmatprep.mubr.bf16.mxu1 %v10545_v19  ;;  %v9641_v61 = vld [vmem:[%s13295_s3 + $0x3e8] ss:$16 sps:$4 sm:$0xff]  }
 0x187   :  { %1719 = vmatpush1.bf16.msra.mxu0 %v9557_v0  ;;  %1301 = vmatprep.subr.bf16.mxu1 %v9562_v1  ;;  %v9646_v0 = vld [vmem:[%s13295_s3 + $0x2e4] ss:$16 sps:$4 sm:$0xff]   ;;  %v9649_v1 = vld [vmem:[%s13295_s3 + $0x40c] ss:$16 sps:$4 sm:$0xff]  }
 0x188   :  { %1720 = vmatprep.subr.bf16.mxu0 %v9565_v2  ;;  %v11246_v2 = vld [vmem:[#allocation2] sm:$0x80] }
 0x18a   :  { %1302 = vmatpush1.bf16.msra.mxu1 %v9560_v63  ;;  %v9644_v63 = vld [vmem:[%s13295_s3 + $0x2e0] ss:$16 sps:$4 sm:$0xff]  }
 0x18b   :  { %1721 = vmatpush1.bf16.msra.mxu0 %v9563_v3  ;;  %1303 = vmatprep.subr.bf16.mxu1 %v9568_v4  ;;  %v9647_v3 = vld [vmem:[%s13295_s3 + $0x408] ss:$16 sps:$4 sm:$0xff]   ;;  %v9652_v4 = vld [vmem:[%s13295_s3 + $0x304] ss:$16 sps:$4 sm:$0xff]  }
 0x18c   :  { %1722 = vmatprep.subr.bf16.mxu0 %v9571_v54  ;;  %v2155_v54 = vrot.slane %v11246_v2, 7  ;;  %v9728_v2 = vld [vmem:[%s13295_s3 + $0x4a0] ss:$16 sps:$4 sm:$0xff]  }
 0x18e   :  { %1304 = vmatpush1.bf16.msra.mxu1 %v9566_v7  ;;  %v9655_v7 = vld [vmem:[%s13295_s3 + $0x42c] ss:$16 sps:$4 sm:$0xff]  }
 0x18f   :  { %1723 = vmatpush1.bf16.msra.mxu0 %v9569_v9  ;;  %1305 = vmatprep.subr.bf16.mxu1 %v9574_v10  ;;  %v9650_v9 = vld [vmem:[%s13295_s3 + $0x300] ss:$16 sps:$4 sm:$0xff]   ;;  %v9653_v10 = vld [vmem:[%s13295_s3 + $0x428] ss:$16 sps:$4 sm:$0xff]  }
 0x190   :  { %1904 = vmatprep.subr.bf16.mxu0 %v9577_v5  ;;  %v9658_v5 = vld [vmem:[%s13295_s3 + $0x324] ss:$16 sps:$4 sm:$0xff]  }
 0x192   :  { %1306 = vmatpush1.bf16.msra.mxu1 %v9572_v12  ;;  %8575 = vmatmul.mubr.msk.bf16.vlgmr.msra.gmra.mrb[64].mxu0 %vm946_vm5, %v1591_v15  ;;  %v9656_v12 = vld [vmem:[%s13295_s3 + $0x320] ss:$16 sps:$4 sm:$0xff]  }
 0x193   :  { %1905 = vmatpush1.bf16.msra.mxu0 %v9575_v13  ;;  %1487 = vmatprep.subr.bf16.mxu1 %v9580_v14  ;;  %v9659_v13 = vld [vmem:[%s13295_s3 + $0x448] ss:$16 sps:$4 sm:$0xff]   ;;  %v9664_v14 = vld [vmem:[%s13295_s3 + $0x344] ss:$16 sps:$4 sm:$0xff]  }
 0x194   :  { %1906 = vmatprep.subr.bf16.mxu0 %v9583_v16  ;;  %1936 = vmatprep.mubr.bf16.mxu0 %v10545_v19  ;;  %v9662_v16 = vld [vmem:[%s13295_s3 + $0x340] ss:$16 sps:$4 sm:$0xff]  }
 0x195   :  { %8538 = vmatmul.mubr.msk.bf16.vlgmr.msra.gmra.mrb[20].mxu1 %vm946_vm5, %v1215_v60  ;;  %v9607_v60 = vld [vmem:[%s13295_s3 + $0x32c] ss:$16 sps:$4 sm:$0xff]  }
 0x196   :  { %1488 = vmatpush1.bf16.msra.mxu1 %v9578_v17  ;;  %1519 = vmatprep.mubr.bf16.mxu1 %v10545_v19  ;;  %v9665_v17 = vld [vmem:[%s13295_s3 + $0x468] ss:$16 sps:$4 sm:$0xff]  }
 0x197   :  { %1907 = vmatpush1.bf16.msra.mxu0 %v9581_v18  ;;  %1489 = vmatprep.subr.bf16.mxu1 %v9586_v20  ;;  %v9670_v18 = vld [vmem:[%s13295_s3 + $0x364] ss:$16 sps:$4 sm:$0xff]   ;;  %v9673_v20 = vld [vmem:[%s13295_s3 + $0x48c] ss:$16 sps:$4 sm:$0xff]  }
 0x198   :  { %1908 = vmatprep.subr.bf16.mxu0 %v9589_v21  ;;  %v9668_v21 = vld [vmem:[%s13295_s3 + $0x360] ss:$16 sps:$4 sm:$0xff]  }
 0x19a   :  { %1490 = vmatpush1.bf16.msra.mxu1 %v9584_v24  ;;  %v9671_v24 = vld [vmem:[%s13295_s3 + $0x488] ss:$16 sps:$4 sm:$0xff]  }
 0x19b   :  { %1909 = vmatpush1.bf16.msra.mxu0 %v9587_v25  ;;  %1491 = vmatprep.subr.bf16.mxu1 %v9592_v22  ;;  %v9676_v25 = vld [vmem:[%s13295_s3 + $0x384] ss:$16 sps:$4 sm:$0xff]   ;;  %v9679_v22 = vld [vmem:[%s13295_s3 + $0x4ac] ss:$16 sps:$4 sm:$0xff]  }
 0x19c   :  { %1910 = vmatprep.subr.bf16.mxu0 %v9595_v27  ;;  %v11317_v27 = vld [vmem:[#allocation2 + $0x8] sm:$0x1] }
 0x19e   :  { %1492 = vmatpush1.bf16.msra.mxu1 %v9590_v28  ;;  %v9674_v28 = vld [vmem:[%s13295_s3 + $0x380] ss:$16 sps:$4 sm:$0xff]  }
 0x19f   :  { %1911 = vmatpush1.bf16.msra.mxu0 %v9593_v30  ;;  %1493 = vmatprep.subr.bf16.mxu1 %v9598_v31  ;;  %v9677_v30 = vld [vmem:[%s13295_s3 + $0x4a8] ss:$16 sps:$4 sm:$0xff]   ;;  %v9682_v31 = vld [vmem:[%s13295_s3 + $0x3a4] ss:$16 sps:$4 sm:$0xff]  }
 0x1a0   :  { %2092 = vmatprep.subr.bf16.mxu0 %v9601_v34  ;;  %v9685_v34 = vld [vmem:[%s13295_s3 + $0x4cc] ss:$16 sps:$4 sm:$0xff]  }
 0x1a2   :  { %1494 = vmatpush1.bf16.msra.mxu1 %v9596_v36  ;;  %8593 = vmatmul.mubr.msk.bf16.vlgmr.msra.gmra.mrb[68].mxu0 %vm946_vm5, %v1779_v38  ;;  %v9683_v36 = vld [vmem:[%s13295_s3 + $0x4c8] ss:$16 sps:$4 sm:$0xff]  }
 0x1a3   :  { %2093 = vmatpush1.bf16.msra.mxu0 %v9599_v33  ;;  %1675 = vmatprep.subr.bf16.mxu1 %v9604_v37  ;;  %v9688_v33 = vld [vmem:[%s13295_s3 + $0x3c4] ss:$16 sps:$4 sm:$0xff]   ;;  %v9691_v37 = vld [vmem:[%s13295_s3 + $0x4ec] ss:$16 sps:$4 sm:$0xff]  }
 0x1a4   :  { %2094 = vmatprep.subr.bf16.mxu0 %v9607_v60  ;;  %2124 = vmatprep.mubr.bf16.mxu0 %v10545_v19  ;;  %v9689_v60 = vld [vmem:[%s13295_s3 + $0x4e8] ss:$16 sps:$4 sm:$0xff]  }
 0x1a5   :  { %8556 = vmatmul.mubr.msk.bf16.vlgmr.msra.gmra.mrb[24].mxu1 %vm946_vm5, %v1403_v58  ;;  %v9643_v58 = vld [vmem:[%s13295_s3 + $0x3ec] ss:$16 sps:$4 sm:$0xff]  }
 0x1a6   :  { %1676 = vmatpush1.bf16.msra.mxu1 %v9602_v26  ;;  %1707 = vmatprep.mubr.bf16.mxu1 %v10545_v19  ;;  %v9694_v26 = vld [vmem:[%s13295_s3 + $0x3e4] ss:$16 sps:$4 sm:$0xff]  }
 0x1a7   :  { %2095 = vmatpush1.bf16.msra.mxu0 %v9605_v39  ;;  %1677 = vmatprep.subr.bf16.mxu1 %v9610_v41  ;;  %v9697_v39 = vld [vmem:[%s13295_s3 + $0x50c] ss:$16 sps:$4 sm:$0xff]   ;;  %v11362_v41 = vld [vmem:[#allocation2 + $0x8] sm:$0x2] }
 0x1a8   :  { %2096 = vmatprep.subr.bf16.mxu0 %v9613_v42  ;;  %v9692_v42 = vld [vmem:[%s13295_s3 + $0x3e0] ss:$16 sps:$4 sm:$0xff]  }
 0x1aa   :  { %1678 = vmatpush1.bf16.msra.mxu1 %v9608_v43  ;;  %v9695_v43 = vld [vmem:[%s13295_s3 + $0x508] ss:$16 sps:$4 sm:$0xff]  }
 0x1ab   :  { %2097 = vmatpush1.bf16.msra.mxu0 %v9611_v44  ;;  %1679 = vmatprep.subr.bf16.mxu1 %v9616_v29  ;;  %v9700_v44 = vld [vmem:[%s13295_s3 + $0x404] ss:$16 sps:$4 sm:$0xff]   ;;  %v2529_v29 = vrot.slane %v11362_v41, 1  ;;  %v9781_v41 = vld [vmem:[%s13295_s3 + $0x6cc] ss:$16 sps:$4 sm:$0xff]  }
 0x1ac   :  { %2098 = vmatprep.subr.bf16.mxu0 %v9619_v45  ;;  %v9703_v45 = vld [vmem:[%s13295_s3 + $0x52c] ss:$16 sps:$4 sm:$0xff]  }
 0x1ae   :  { %1680 = vmatpush1.bf16.msra.mxu1 %v9614_v46  ;;  %v9698_v46 = vld [vmem:[%s13295_s3 + $0x400] ss:$16 sps:$4 sm:$0xff]  }
 0x1af   :  { %2099 = vmatpush1.bf16.msra.mxu0 %v9617_v62  ;;  %1681 = vmatprep.subr.bf16.mxu1 %v9622_v48  ;;  %v9701_v62 = vld [vmem:[%s13295_s3 + $0x528] ss:$16 sps:$4 sm:$0xff]   ;;  %v9706_v48 = vld [vmem:[%s13295_s3 + $0x424] ss:$16 sps:$4 sm:$0xff]  }
 0x1b0   :  { %2280 = vmatprep.subr.bf16.mxu0 %v9625_v32  ;;  %v9709_v32 = vld [vmem:[%s13295_s3 + $0x54c] ss:$16 sps:$4 sm:$0xff]  }
 0x1b2   :  { %1682 = vmatpush1.bf16.msra.mxu1 %v9620_v50  ;;  %8611 = vmatmul.mubr.msk.bf16.vlgmr.msra.gmra.mrb[72].mxu0 %vm946_vm5, %v1967_v6  ;;  %v9707_v50 = vld [vmem:[%s13295_s3 + $0x548] ss:$16 sps:$4 sm:$0xff]  }
 0x1b3   :  { %2281 = vmatpush1.bf16.msra.mxu0 %v9623_v51  ;;  %1863 = vmatprep.subr.bf16.mxu1 %v9628_v35  ;;  %v9712_v51 = vld [vmem:[%s13295_s3 + $0x444] ss:$16 sps:$4 sm:$0xff]   ;;  %v9715_v35 = vld [vmem:[%s13295_s3 + $0x56c] ss:$16 sps:$4 sm:$0xff]  }
 0x1b4   :  { %2282 = vmatprep.subr.bf16.mxu0 %v9631_v52  ;;  %2312 = vmatprep.mubr.bf16.mxu0 %v10545_v19  ;;  %v9713_v52 = vld [vmem:[%s13295_s3 + $0x568] ss:$16 sps:$4 sm:$0xff]  }
 0x1b5   :  { %8574 = vmatmul.mubr.msk.bf16.vlgmr.msra.gmra.mrb[28].mxu1 %vm946_vm5, %v1591_v15  ;;  %v9667_v15 = vld [vmem:[%s13295_s3 + $0x46c] ss:$16 sps:$4 sm:$0xff]  }
 0x1b6   :  { %1864 = vmatpush1.bf16.msra.mxu1 %v9626_v53  ;;  %1895 = vmatprep.mubr.bf16.mxu1 %v10545_v19  ;;  %v9718_v53 = vld [vmem:[%s13295_s3 + $0x464] ss:$16 sps:$4 sm:$0xff]  }
 0x1b7   :  { %2283 = vmatpush1.bf16.msra.mxu0 %v9629_v40  ;;  %1865 = vmatprep.subr.bf16.mxu1 %v9634_v47  ;;  %v9721_v40 = vld [vmem:[%s13295_s3 + $0x58c] ss:$16 sps:$4 sm:$0xff]   ;;  %v11421_v47 = vld [vmem:[#allocation2 + $0x8] sm:$0x4] }
 0x1b8   :  { %2284 = vmatprep.subr.bf16.mxu0 %v9637_v55  ;;  %v9716_v55 = vld [vmem:[%s13295_s3 + $0x460] ss:$16 sps:$4 sm:$0xff]  }
 0x1ba   :  { %1866 = vmatpush1.bf16.msra.mxu1 %v9632_v8  ;;  %v9719_v8 = vld [vmem:[%s13295_s3 + $0x588] ss:$16 sps:$4 sm:$0xff]  }
 0x1bb   :  { %2285 = vmatpush1.bf16.msra.mxu0 %v9635_v56  ;;  %1867 = vmatprep.subr.bf16.mxu1 %v9640_v57  ;;  %v9724_v56 = vld [vmem:[%s13295_s3 + $0x484] ss:$16 sps:$4 sm:$0xff]   ;;  %v2717_v57 = vrot.slane %v11421_v47, 2  ;;  %v9805_v47 = vld [vmem:[%s13295_s3 + $0x74c] ss:$16 sps:$4 sm:$0xff]  }
 0x1bc   :  { %2286 = vmatprep.subr.bf16.mxu0 %v9643_v58  ;;  %v9727_v58 = vld [vmem:[%s13295_s3 + $0x5ac] ss:$16 sps:$4 sm:$0xff]  }
 0x1be   :  { %1868 = vmatpush1.bf16.msra.mxu1 %v9638_v59  ;;  %v9722_v59 = vld [vmem:[%s13295_s3 + $0x480] ss:$16 sps:$4 sm:$0xff]  }
 0x1bf   :  { %2287 = vmatpush1.bf16.msra.mxu0 %v9641_v61  ;;  %1869 = vmatprep.subr.bf16.mxu1 %v9646_v0  ;;  %v9725_v61 = vld [vmem:[%s13295_s3 + $0x5a8] ss:$16 sps:$4 sm:$0xff]   ;;  %v9730_v0 = vld [vmem:[%s13295_s3 + $0x4a4] ss:$16 sps:$4 sm:$0xff]  }
 0x1c0   :  { %2466 = vmatprep.subr.bf16.mxu0 %v9649_v1  ;;  %v9733_v1 = vld [vmem:[%s13295_s3 + $0x5cc] ss:$16 sps:$4 sm:$0xff]  }
 0x1c2   :  { %1870 = vmatpush1.bf16.msra.mxu1 %v9644_v63  ;;  %8629 = vmatmul.mubr.msk.bf16.vlgmr.msra.gmra.mrb[76].mxu0 %vm946_vm5, %v2155_v54  ;;  %v9731_v63 = vld [vmem:[%s13295_s3 + $0x5c8] ss:$16 sps:$4 sm:$0xff]  }
 0x1c3   :  { %2467 = vmatpush1.bf16.msra.mxu0 %v9647_v3  ;;  %2051 = vmatprep.subr.bf16.mxu1 %v9652_v4  ;;  %v9736_v3 = vld [vmem:[%s13295_s3 + $0x4c4] ss:$16 sps:$4 sm:$0xff]   ;;  %v9739_v4 = vld [vmem:[%s13295_s3 + $0x5ec] ss:$16 sps:$4 sm:$0xff]  }
 0x1c4   :  { %2468 = vmatprep.subr.bf16.mxu0 %v9655_v7  ;;  %2498 = vmatprep.mubr.bf16.mxu0 %v10545_v19  ;;  %v9737_v7 = vld [vmem:[%s13295_s3 + $0x5e8] ss:$16 sps:$4 sm:$0xff]  }
 0x1c5   :  { %8592 = vmatmul.mubr.msk.bf16.vlgmr.msra.gmra.mrb[32].mxu1 %vm946_vm5, %v1779_v38  ;;  %v9686_v38 = vld [vmem:[%s13295_s3 + $0x3c0] ss:$16 sps:$4 sm:$0xff]  }
 0x1c6   :  { %2052 = vmatpush1.bf16.msra.mxu1 %v9650_v9  ;;  %2083 = vmatprep.mubr.bf16.mxu1 %v10545_v19  ;;  %v9742_v9 = vld [vmem:[%s13295_s3 + $0x4e4] ss:$16 sps:$4 sm:$0xff]  }
 0x1c7   :  { %2469 = vmatpush1.bf16.msra.mxu0 %v9653_v10  ;;  %2053 = vmatprep.subr.bf16.mxu1 %v9658_v5  ;;  %v9745_v10 = vld [vmem:[%s13295_s3 + $0x60c] ss:$16 sps:$4 sm:$0xff]   ;;  %v11479_v5 = vld [vmem:[#allocation2 + $0x8] sm:$0x8] }
 0x1c8   :  { %2470 = vmatprep.subr.bf16.mxu0 %v9661_v11  ;;  %v9740_v11 = vld [vmem:[%s13295_s3 + $0x4e0] ss:$16 sps:$4 sm:$0xff]  }
 0x1ca   :  { %2054 = vmatpush1.bf16.msra.mxu1 %v9656_v12  ;;  %v9743_v12 = vld [vmem:[%s13295_s3 + $0x608] ss:$16 sps:$4 sm:$0xff]  }
 0x1cb   :  { %2471 = vmatpush1.bf16.msra.mxu0 %v9659_v13  ;;  %2055 = vmatprep.subr.bf16.mxu1 %v9664_v14  ;;  %v9748_v13 = vld [vmem:[%s13295_s3 + $0x504] ss:$16 sps:$4 sm:$0xff]   ;;  %v2905_v14 = vrot.slane %v11479_v5, 3  ;;  %v9829_v5 = vld [vmem:[%s13295_s3 + $0x7cc] ss:$16 sps:$4 sm:$0xff]  }
 0x1cc   :  { %2472 = vmatprep.subr.bf16.mxu0 %v9667_v15  ;;  %v9751_v15 = vld [vmem:[%s13295_s3 + $0x62c] ss:$16 sps:$4 sm:$0xff]  }
 0x1ce   :  { %2056 = vmatpush1.bf16.msra.mxu1 %v9662_v16  ;;  %v9746_v16 = vld [vmem:[%s13295_s3 + $0x500] ss:$16 sps:$4 sm:$0xff]  }
 0x1cf   :  { %2473 = vmatpush1.bf16.msra.mxu0 %v9665_v17  ;;  %2057 = vmatprep.subr.bf16.mxu1 %v9670_v18  ;;  %v9749_v17 = vld [vmem:[%s13295_s3 + $0x628] ss:$16 sps:$4 sm:$0xff]   ;;  %v9754_v18 = vld [vmem:[%s13295_s3 + $0x524] ss:$16 sps:$4 sm:$0xff]  }
 0x1d0   :  { %2654 = vmatprep.subr.bf16.mxu0 %v9673_v20  ;;  %v9757_v20 = vld [vmem:[%s13295_s3 + $0x64c] ss:$16 sps:$4 sm:$0xff]  }
 0x1d2   :  { %2058 = vmatpush1.bf16.msra.mxu1 %v9668_v21  ;;  %8647 = vmatmul.mubr.msk.bf16.vlgmr.msra.gmra.mrb[80].mxu0 %vm946_vm5, %v11317_v27  ;;  %v9752_v21 = vld [vmem:[%s13295_s3 + $0x520] ss:$16 sps:$4 sm:$0xff]  }
 0x1d3   :  { %2655 = vmatpush1.bf16.msra.mxu0 %v9671_v24  ;;  %2239 = vmatprep.subr.bf16.mxu1 %v9676_v25  ;;  %v9755_v24 = vld [vmem:[%s13295_s3 + $0x648] ss:$16 sps:$4 sm:$0xff]   ;;  %v9760_v25 = vld [vmem:[%s13295_s3 + $0x544] ss:$16 sps:$4 sm:$0xff]  }
 0x1d4   :  { %2656 = vmatprep.subr.bf16.mxu0 %v9679_v22  ;;  %2686 = vmatprep.mubr.bf16.mxu0 %v10545_v19  ;;  %v9763_v22 = vld [vmem:[%s13295_s3 + $0x66c] ss:$16 sps:$4 sm:$0xff]  }
 0x1d5   :  { %8610 = vmatmul.mubr.msk.bf16.vlgmr.msra.gmra.mrb[36].mxu1 %vm946_vm5, %v1967_v6  ;;  %v9710_v6 = vld [vmem:[%s13295_s3 + $0x440] ss:$16 sps:$4 sm:$0xff]  }
 0x1d6   :  { %2240 = vmatpush1.bf16.msra.mxu1 %v9674_v28  ;;  %2271 = vmatprep.mubr.bf16.mxu1 %v10545_v19  ;;  %v9761_v28 = vld [vmem:[%s13295_s3 + $0x668] ss:$16 sps:$4 sm:$0xff]  }
 0x1d7   :  { %2657 = vmatpush1.bf16.msra.mxu0 %v9677_v30  ;;  %2241 = vmatprep.subr.bf16.mxu1 %v9682_v31  ;;  %v9766_v30 = vld [vmem:[%s13295_s3 + $0x564] ss:$16 sps:$4 sm:$0xff]   ;;  %v9769_v31 = vld [vmem:[%s13295_s3 + $0x68c] ss:$16 sps:$4 sm:$0xff]  }
 0x1d8   :  { %2658 = vmatprep.subr.bf16.mxu0 %v9685_v34  ;;  %v11538_v34 = vld [vmem:[#allocation2 + $0x8] sm:$0x10] }
 0x1da   :  { %2242 = vmatpush1.bf16.msra.mxu1 %v9680_v23  ;;  %v9764_v23 = vld [vmem:[%s13295_s3 + $0x560] ss:$16 sps:$4 sm:$0xff]  }
 0x1db   :  { %2659 = vmatpush1.bf16.msra.mxu0 %v9683_v36  ;;  %2243 = vmatprep.subr.bf16.mxu1 %v9688_v33  ;;  %v9767_v36 = vld [vmem:[%s13295_s3 + $0x688] ss:$16 sps:$4 sm:$0xff]   ;;  %v9772_v33 = vld [vmem:[%s13295_s3 + $0x584] ss:$16 sps:$4 sm:$0xff]  }
 0x1dc   :  { %2660 = vmatprep.subr.bf16.mxu0 %v9691_v37  ;;  %v3093_v37 = vrot.slane %v11538_v34, 4  ;;  %v9836_v34 = vld [vmem:[%s13295_s3 + $0x6e0] ss:$16 sps:$4 sm:$0xff]  }
 0x1de   :  { %2244 = vmatpush1.bf16.msra.mxu1 %v9686_v38  ;;  %v9775_v38 = vld [vmem:[%s13295_s3 + $0x6ac] ss:$16 sps:$4 sm:$0xff]  }
 0x1df   :  { %2661 = vmatpush1.bf16.msra.mxu0 %v9689_v60  ;;  %2245 = vmatprep.subr.bf16.mxu1 %v9694_v26  ;;  %v9770_v60 = vld [vmem:[%s13295_s3 + $0x580] ss:$16 sps:$4 sm:$0xff]   ;;  %v9773_v26 = vld [vmem:[%s13295_s3 + $0x6a8] ss:$16 sps:$4 sm:$0xff]  }
 0x1e0   :  { %2842 = vmatprep.subr.bf16.mxu0 %v9697_v39  ;;  %v9778_v39 = vld [vmem:[%s13295_s3 + $0x5a4] ss:$16 sps:$4 sm:$0xff]  }
 0x1e2   :  { %2246 = vmatpush1.bf16.msra.mxu1 %v9692_v42  ;;  %8665 = vmatmul.mubr.msk.bf16.vlgmr.msra.gmra.mrb[84].mxu0 %vm946_vm5, %v2529_v29  ;;  %v9776_v42 = vld [vmem:[%s13295_s3 + $0x5a0] ss:$16 sps:$4 sm:$0xff]  }
 0x1e3   :  { %2843 = vmatpush1.bf16.msra.mxu0 %v9695_v43  ;;  %2425 = vmatprep.subr.bf16.mxu1 %v9700_v44  ;;  %v9779_v43 = vld [vmem:[%s13295_s3 + $0x6c8] ss:$16 sps:$4 sm:$0xff]   ;;  %v9784_v44 = vld [vmem:[%s13295_s3 + $0x5c4] ss:$16 sps:$4 sm:$0xff]  }
 0x1e4   :  { %2844 = vmatprep.subr.bf16.mxu0 %v9703_v45  ;;  %2874 = vmatprep.mubr.bf16.mxu0 %v10545_v19  ;;  %v9782_v45 = vld [vmem:[%s13295_s3 + $0x5c0] ss:$16 sps:$4 sm:$0xff]  }
 0x1e5   :  { %8628 = vmatmul.mubr.msk.bf16.vlgmr.msra.gmra.mrb[40].mxu1 %vm946_vm5, %v2155_v54  ;;  %v9734_v54 = vld [vmem:[%s13295_s3 + $0x4c0] ss:$16 sps:$4 sm:$0xff]  }
 0x1e6   :  { %2426 = vmatpush1.bf16.msra.mxu1 %v9698_v46  ;;  %2457 = vmatprep.mubr.bf16.mxu1 %v10545_v19  ;;  %v9785_v46 = vld [vmem:[%s13295_s3 + $0x6e8] ss:$16 sps:$4 sm:$0xff]  }
 0x1e7   :  { %2845 = vmatpush1.bf16.msra.mxu0 %v9701_v62  ;;  %2427 = vmatprep.subr.bf16.mxu1 %v9706_v48  ;;  %v9790_v62 = vld [vmem:[%s13295_s3 + $0x5e4] ss:$16 sps:$4 sm:$0xff]   ;;  %v9793_v48 = vld [vmem:[%s13295_s3 + $0x70c] ss:$16 sps:$4 sm:$0xff]  }
 0x1e8   :  { %2846 = vmatprep.subr.bf16.mxu0 %v9709_v32  ;;  %v11597_v32 = vld [vmem:[#allocation2 + $0x8] sm:$0x20] }
 0x1ea   :  { %2428 = vmatpush1.bf16.msra.mxu1 %v9704_v49  ;;  %v9788_v49 = vld [vmem:[%s13295_s3 + $0x5e0] ss:$16 sps:$4 sm:$0xff]  }
 0x1eb   :  { %2847 = vmatpush1.bf16.msra.mxu0 %v9707_v50  ;;  %2429 = vmatprep.subr.bf16.mxu1 %v9712_v51  ;;  %v9791_v50 = vld [vmem:[%s13295_s3 + $0x708] ss:$16 sps:$4 sm:$0xff]   ;;  %v9796_v51 = vld [vmem:[%s13295_s3 + $0x604] ss:$16 sps:$4 sm:$0xff]  }
 0x1ec   :  { %2848 = vmatprep.subr.bf16.mxu0 %v9715_v35  ;;  %v3281_v35 = vrot.slane %v11597_v32, 5 }
 0x1ee   :  { %2430 = vmatpush1.bf16.msra.mxu1 %v9710_v6  ;;  %v9799_v6 = vld [vmem:[%s13295_s3 + $0x72c] ss:$16 sps:$4 sm:$0xff]  }
 0x1ef   :  { %2849 = vmatpush1.bf16.msra.mxu0 %v9713_v52  ;;  %2431 = vmatprep.subr.bf16.mxu1 %v9718_v53  ;;  %v9794_v52 = vld [vmem:[%s13295_s3 + $0x600] ss:$16 sps:$4 sm:$0xff]   ;;  %v9797_v53 = vld [vmem:[%s13295_s3 + $0x728] ss:$16 sps:$4 sm:$0xff]  }
 0x1f0   :  { %3030 = vmatprep.subr.bf16.mxu0 %v9721_v40  ;;  %v9802_v40 = vld [vmem:[%s13295_s3 + $0x624] ss:$16 sps:$4 sm:$0xff]  }
 0x1f2   :  { %2432 = vmatpush1.bf16.msra.mxu1 %v9716_v55  ;;  %8683 = vmatmul.mubr.msk.bf16.vlgmr.msra.gmra.mrb[88].mxu0 %vm946_vm5, %v2717_v57  ;;  %v9800_v55 = vld [vmem:[%s13295_s3 + $0x620] ss:$16 sps:$4 sm:$0xff]  }
 0x1f3   :  { %3031 = vmatpush1.bf16.msra.mxu0 %v9719_v8  ;;  %2613 = vmatprep.subr.bf16.mxu1 %v9724_v56  ;;  %v9803_v8 = vld [vmem:[%s13295_s3 + $0x748] ss:$16 sps:$4 sm:$0xff]   ;;  %v9808_v56 = vld [vmem:[%s13295_s3 + $0x644] ss:$16 sps:$4 sm:$0xff]  }
 0x1f4   :  { %3032 = vmatprep.subr.bf16.mxu0 %v9727_v58  ;;  %3062 = vmatprep.mubr.bf16.mxu0 %v10545_v19  ;;  %v9806_v58 = vld [vmem:[%s13295_s3 + $0x640] ss:$16 sps:$4 sm:$0xff]  }
 0x1f5   :  { %8646 = vmatmul.mubr.msk.bf16.vlgmr.msra.gmra.mrb[44].mxu1 %vm946_vm5, %v11317_v27  ;;  %v9758_v27 = vld [vmem:[%s13295_s3 + $0x540] ss:$16 sps:$4 sm:$0xff]  }
 0x1f6   :  { %2614 = vmatpush1.bf16.msra.mxu1 %v9722_v59  ;;  %2645 = vmatprep.mubr.bf16.mxu1 %v10545_v19  ;;  %v9809_v59 = vld [vmem:[%s13295_s3 + $0x768] ss:$16 sps:$4 sm:$0xff]  }
 0x1f7   :  { %3033 = vmatpush1.bf16.msra.mxu0 %v9725_v61  ;;  %2615 = vmatprep.subr.bf16.mxu1 %v9730_v0  ;;  %v9814_v61 = vld [vmem:[%s13295_s3 + $0x664] ss:$16 sps:$4 sm:$0xff]   ;;  %v9817_v0 = vld [vmem:[%s13295_s3 + $0x78c] ss:$16 sps:$4 sm:$0xff]  }
 0x1f8   :  { %3034 = vmatprep.subr.bf16.mxu0 %v9733_v1  ;;  %v11656_v1 = vld [vmem:[#allocation2 + $0x8] sm:$0x40] }
 0x1fa   :  { %2616 = vmatpush1.bf16.msra.mxu1 %v9728_v2  ;;  %v9812_v2 = vld [vmem:[%s13295_s3 + $0x660] ss:$16 sps:$4 sm:$0xff]  }
 0x1fb   :  { %3035 = vmatpush1.bf16.msra.mxu0 %v9731_v63  ;;  %2617 = vmatprep.subr.bf16.mxu1 %v9736_v3  ;;  %v9815_v63 = vld [vmem:[%s13295_s3 + $0x788] ss:$16 sps:$4 sm:$0xff]   ;;  %v9820_v3 = vld [vmem:[%s13295_s3 + $0x684] ss:$16 sps:$4 sm:$0xff]  }
 0x1fc   :  { %3036 = vmatprep.subr.bf16.mxu0 %v9739_v4  ;;  %v3469_v4 = vrot.slane %v11656_v1, 6  ;;  %v9875_v1 = vld [vmem:[%s13295_s3 + $0x8c8] ss:$16 sps:$4 sm:$0xff]  }
 0x1fe   :  { %2618 = vmatpush1.bf16.msra.mxu1 %v9734_v54  ;;  %v9823_v54 = vld [vmem:[%s13295_s3 + $0x7ac] ss:$16 sps:$4 sm:$0xff]  }
 0x1ff   :  { %3037 = vmatpush1.bf16.msra.mxu0 %v9737_v7  ;;  %2619 = vmatprep.subr.bf16.mxu1 %v9742_v9  ;;  %v9818_v7 = vld [vmem:[%s13295_s3 + $0x680] ss:$16 sps:$4 sm:$0xff]   ;;  %v9821_v9 = vld [vmem:[%s13295_s3 + $0x7a8] ss:$16 sps:$4 sm:$0xff]  }
 0x200   :  { %3218 = vmatprep.subr.bf16.mxu0 %v9745_v10  ;;  %v9826_v10 = vld [vmem:[%s13295_s3 + $0x6a4] ss:$16 sps:$4 sm:$0xff]  }
 0x202   :  { %2620 = vmatpush1.bf16.msra.mxu1 %v9740_v11  ;;  %8701 = vmatmul.mubr.msk.bf16.vlgmr.msra.gmra.mrb[92].mxu0 %vm946_vm5, %v2905_v14 }
 0x203   :  { %3219 = vmatpush1.bf16.msra.mxu0 %v9743_v12  ;;  %2801 = vmatprep.subr.bf16.mxu1 %v9748_v13  ;;  %v9824_v13 = vld [vmem:[%s13295_s3 + $0x6a0] ss:$16 sps:$4 sm:$0xff]  }
 0x204   :  { %3220 = vmatprep.subr.bf16.mxu0 %v9751_v15  ;;  %3250 = vmatprep.mubr.bf16.mxu0 %v10545_v19  ;;  %v9827_v15 = vld [vmem:[%s13295_s3 + $0x7c8] ss:$16 sps:$4 sm:$0xff]  }
 0x205   :  { %8664 = vmatmul.mubr.msk.bf16.vlgmr.msra.gmra.mrb[48].mxu1 %vm946_vm5, %v2529_v29  ;;  %v9787_v29 = vld [vmem:[%s13295_s3 + $0x6ec] ss:$16 sps:$4 sm:$0xff]  }
 0x206   :  { %2802 = vmatpush1.bf16.msra.mxu1 %v9746_v16  ;;  %2833 = vmatprep.mubr.bf16.mxu1 %v10545_v19  ;;  %v9832_v16 = vld [vmem:[%s13295_s3 + $0x6c4] ss:$16 sps:$4 sm:$0xff]  }
 0x207   :  { %3221 = vmatpush1.bf16.msra.mxu0 %v9749_v17  ;;  %2803 = vmatprep.subr.bf16.mxu1 %v9754_v18 }
 0x208   :  { %3222 = vmatprep.subr.bf16.mxu0 %v9757_v20  ;;  %v9835_v20 = vld [vmem:[%s13295_s3 + $0x7ec] ss:$16 sps:$4 sm:$0xff]  }
 0x20a   :  { %2804 = vmatpush1.bf16.msra.mxu1 %v9752_v21 }
 0x20b   :  { %3223 = vmatpush1.bf16.msra.mxu0 %v9755_v24  ;;  %2805 = vmatprep.subr.bf16.mxu1 %v9760_v25  ;;  %v9830_v25 = vld [vmem:[%s13295_s3 + $0x6c0] ss:$16 sps:$4 sm:$0xff]  }
 0x20c   :  { %3224 = vmatprep.subr.bf16.mxu0 %v9763_v22 }
 0x20e   :  { %2806 = vmatpush1.bf16.msra.mxu1 %v9758_v27  ;;  %v9833_v27 = vld [vmem:[%s13295_s3 + $0x7e8] ss:$16 sps:$4 sm:$0xff]  }
 0x20f   :  { %3225 = vmatpush1.bf16.msra.mxu0 %v9761_v28  ;;  %2807 = vmatprep.subr.bf16.mxu1 %v9766_v30  ;;  %v9838_v28 = vld [vmem:[%s13295_s3 + $0x6e4] ss:$16 sps:$4 sm:$0xff]   ;;  %v9841_v30 = vld [vmem:[%s13295_s3 + $0x80c] ss:$16 sps:$4 sm:$0xff]  }
 0x210   :  { %3406 = vmatprep.subr.bf16.mxu0 %v9769_v31  ;;  %v11719_v31 = vld [vmem:[#allocation2 + $0x8] sm:$0x80] }
 0x212   :  { %2808 = vmatpush1.bf16.msra.mxu1 %v9764_v23  ;;  %8719 = vmatmul.mubr.msk.bf16.vlgmr.msra.gmra.mrb[96].mxu0 %vm946_vm5, %v3093_v37  ;;  %v9839_v23 = vld [vmem:[%s13295_s3 + $0x808] ss:$16 sps:$4 sm:$0xff]  }
 0x213   :  { %3407 = vmatpush1.bf16.msra.mxu0 %v9767_v36  ;;  %2989 = vmatprep.subr.bf16.mxu1 %v9772_v33  ;;  %v9844_v36 = vld [vmem:[%s13295_s3 + $0x704] ss:$16 sps:$4 sm:$0xff]   ;;  %v3657_v33 = vrot.slane %v11719_v31, 7  ;;  %v9899_v31 = vld [vmem:[%s13295_s3 + $0x948] ss:$16 sps:$4 sm:$0xff]  }
 0x214   :  { %3408 = vmatprep.subr.bf16.mxu0 %v9775_v38  ;;  %3438 = vmatprep.mubr.bf16.mxu0 %v10545_v19  ;;  %v9842_v38 = vld [vmem:[%s13295_s3 + $0x700] ss:$16 sps:$4 sm:$0xff]  }
 0x215   :  { %8682 = vmatmul.mubr.msk.bf16.vlgmr.msra.gmra.mrb[52].mxu1 %vm946_vm5, %v2717_v57  ;;  %v9811_v57 = vld [vmem:[%s13295_s3 + $0x76c] ss:$16 sps:$4 sm:$0xff]  }
 0x216   :  { %2990 = vmatpush1.bf16.msra.mxu1 %v9770_v60  ;;  %3021 = vmatprep.mubr.bf16.mxu1 %v10545_v19  ;;  %v9845_v60 = vld [vmem:[%s13295_s3 + $0x828] ss:$16 sps:$4 sm:$0xff]  }
 0x217   :  { %3409 = vmatpush1.bf16.msra.mxu0 %v9773_v26  ;;  %2991 = vmatprep.subr.bf16.mxu1 %v9778_v39  ;;  %v9850_v26 = vld [vmem:[%s13295_s3 + $0x724] ss:$16 sps:$4 sm:$0xff]   ;;  %v9853_v39 = vld [vmem:[%s13295_s3 + $0x84c] ss:$16 sps:$4 sm:$0xff]  }
 0x218   :  { %3410 = vmatprep.subr.bf16.mxu0 %v9781_v41 }
 0x21a   :  { %2992 = vmatpush1.bf16.msra.mxu1 %v9776_v42 }
 0x21b   :  { %3411 = vmatpush1.bf16.msra.mxu0 %v9779_v43  ;;  %2993 = vmatprep.subr.bf16.mxu1 %v9784_v44  ;;  %v9848_v43 = vld [vmem:[%s13295_s3 + $0x720] ss:$16 sps:$4 sm:$0xff]  }
 0x21c   :  { %3412 = vmatprep.subr.bf16.mxu0 %v9787_v29  ;;  %v9851_v29 = vld [vmem:[%s13295_s3 + $0x848] ss:$16 sps:$4 sm:$0xff]  }
 0x21e   :  { %2994 = vmatpush1.bf16.msra.mxu1 %v9782_v45  ;;  %v9856_v45 = vld [vmem:[%s13295_s3 + $0x744] ss:$16 sps:$4 sm:$0xff]  }
 0x21f   :  { %3413 = vmatpush1.bf16.msra.mxu0 %v9785_v46  ;;  %2995 = vmatprep.subr.bf16.mxu1 %v9790_v62 }
 0x220   :  { %3594 = vmatprep.subr.bf16.mxu0 %v9793_v48  ;;  %v9859_v48 = vld [vmem:[%s13295_s3 + $0x86c] ss:$16 sps:$4 sm:$0xff]  }
 0x222   :  { %2996 = vmatpush1.bf16.msra.mxu1 %v9788_v49  ;;  %8737 = vmatmul.mubr.msk.bf16.vlgmr.msra.gmra.mrb[100].mxu0 %vm946_vm5, %v3281_v35 }
 0x223   :  { %3595 = vmatpush1.bf16.msra.mxu0 %v9791_v50  ;;  %3177 = vmatprep.subr.bf16.mxu1 %v9796_v51 }
 0x224   :  { %3596 = vmatprep.subr.bf16.mxu0 %v9799_v6  ;;  %3626 = vmatprep.mubr.bf16.mxu0 %v10545_v19 }
 0x225   :  { %8700 = vmatmul.mubr.msk.bf16.vlgmr.msra.gmra.mrb[56].mxu1 %vm946_vm5, %v2905_v14 }
 0x226   :  { %3178 = vmatpush1.bf16.msra.mxu1 %v9794_v52  ;;  %3209 = vmatprep.mubr.bf16.mxu1 %v10545_v19 }
 0x227   :  { %3597 = vmatpush1.bf16.msra.mxu0 %v9797_v53  ;;  %3179 = vmatprep.subr.bf16.mxu1 %v9802_v40  ;;  %v9857_v53 = vld [vmem:[%s13295_s3 + $0x868] ss:$16 sps:$4 sm:$0xff]   ;;  %v9862_v40 = vld [vmem:[%s13295_s3 + $0x764] ss:$16 sps:$4 sm:$0xff]  }
 0x228   :  { %3598 = vmatprep.subr.bf16.mxu0 %v9805_v47 }
 0x22a   :  { %3180 = vmatpush1.bf16.msra.mxu1 %v9800_v55  ;;  %v9865_v55 = vld [vmem:[%s13295_s3 + $0x88c] ss:$16 sps:$4 sm:$0xff]  }
 0x22b   :  { %3599 = vmatpush1.bf16.msra.mxu0 %v9803_v8  ;;  %3181 = vmatprep.subr.bf16.mxu1 %v9808_v56  ;;  %v9860_v8 = vld [vmem:[%s13295_s3 + $0x760] ss:$16 sps:$4 sm:$0xff]   ;;  %v9863_v56 = vld [vmem:[%s13295_s3 + $0x888] ss:$16 sps:$4 sm:$0xff]  }
 0x22c   :  { %3600 = vmatprep.subr.bf16.mxu0 %v9811_v57  ;;  %v9868_v57 = vld [vmem:[%s13295_s3 + $0x784] ss:$16 sps:$4 sm:$0xff]  }
 0x22e   :  { %3182 = vmatpush1.bf16.msra.mxu1 %v9806_v58  ;;  %v9871_v58 = vld [vmem:[%s13295_s3 + $0x8ac] ss:$16 sps:$4 sm:$0xff]  }
 0x22f   :  { %3601 = vmatpush1.bf16.msra.mxu0 %v9809_v59  ;;  %3183 = vmatprep.subr.bf16.mxu1 %v9814_v61  ;;  %v11790_v59 = vld [vmem:[#allocation2 + $0x10] sm:$0x1] }
 0x230   :  { %3782 = vmatprep.subr.bf16.mxu0 %v9817_v0  ;;  %v9866_v61 = vld [vmem:[%s13295_s3 + $0x780] ss:$16 sps:$4 sm:$0xff]   ;;  %v9869_v0 = vld [vmem:[%s13295_s3 + $0x8a8] ss:$16 sps:$4 sm:$0xff]  }
 0x232   :  { %3184 = vmatpush1.bf16.msra.mxu1 %v9812_v2  ;;  %8755 = vmatmul.mubr.msk.bf16.vlgmr.msra.gmra.mrb[104].mxu0 %vm946_vm5, %v3469_v4  ;;  %v9874_v2 = vld [vmem:[%s13295_s3 + $0x7a4] ss:$16 sps:$4 sm:$0xff]  }
 0x233   :  { %3783 = vmatpush1.bf16.msra.mxu0 %v9815_v63  ;;  %3365 = vmatprep.subr.bf16.mxu1 %v9820_v3  ;;  %v9877_v63 = vld [vmem:[%s13295_s3 + $0x8cc] ss:$16 sps:$4 sm:$0xff]  }
 0x234   :  { %3784 = vmatprep.subr.bf16.mxu0 %v9823_v54  ;;  %3814 = vmatprep.mubr.bf16.mxu0 %v10545_v19 }
 0x235   :  { %8718 = vmatmul.mubr.msk.bf16.vlgmr.msra.gmra.mrb[60].mxu1 %vm946_vm5, %v3093_v37  ;;  %v1190_v11 = vpop.f32.mrb[52].mxu0  ;;  %v9847_v37 = vld [vmem:[%s13295_s3 + $0x82c] ss:$16 sps:$4 sm:$0xff]  }
 0x236   :  { %3366 = vmatpush1.bf16.msra.mxu1 %v9818_v7  ;;  %v1192_v12 = vpop.f32.mrb[53].mxu0  ;;  %3397 = vmatprep.mubr.bf16.mxu1 %v10545_v19 }
 0x237   :  { %3785 = vmatpush1.bf16.msra.mxu0 %v9821_v9  ;;  %v1194_v14 = vpop.f32.mrb[54].mxu0  ;;  %3367 = vmatprep.subr.bf16.mxu1 %v9826_v10  ;;  %v9872_v9 = vld [vmem:[%s13295_s3 + $0x7a0] ss:$16 sps:$4 sm:$0xff]  }
 0x238   :  { %v11700_v17 = vpop.f32.mrb[8].mxu1  ;;  %v1195_v18 = vpop.f32.mrb[55].mxu0  ;;  %3786 = vmatprep.subr.bf16.mxu0 %v9829_v5 }
 0x239   :  { %v11705_v21 = vpop.f32.mrb[9].mxu1 }
 0x23a   :  { %3368 = vmatpush1.bf16.msra.mxu1 %v9824_v13  ;;  %v988_v24 = vpop.f32.mrb[10].mxu1  ;;  %v9883_v13 = vld [vmem:[%s13295_s3 + $0x8ec] ss:$16 sps:$4 sm:$0xff]  }
 0x23b   :  { %v989_v22 = vpop.f32.mrb[11].mxu1  ;;  %3787 = vmatpush1.bf16.msra.mxu0 %v9827_v15  ;;  %3369 = vmatprep.subr.bf16.mxu1 %v9832_v16 }
 0x23c   :  { %3788 = vmatprep.subr.bf16.mxu0 %v9835_v20  ;;  %v9878_v20 = vld [vmem:[%s13295_s3 + $0x7c0] ss:$16 sps:$4 sm:$0xff]  }
 0x23d   :  { %v11837_v22 = vld [vmem:[#allocation2 + $0x10] sm:$0x2] }
 0x23e   :  { %3370 = vmatpush1.bf16.msra.mxu1 %v9830_v25  ;;  %v9881_v25 = vld [vmem:[%s13295_s3 + $0x8e8] ss:$16 sps:$4 sm:$0xff]  }
 0x23f   :  { %3789 = vmatpush1.bf16.msra.mxu0 %v9833_v27  ;;  %3371 = vmatprep.subr.bf16.mxu1 %v9838_v28  ;;  %v9884_v27 = vld [vmem:[%s13295_s3 + $0x7e0] ss:$16 sps:$4 sm:$0xff]   ;;  %v9887_v28 = vld [vmem:[%s13295_s3 + $0x908] ss:$16 sps:$4 sm:$0xff]  }
 0x240   :  { %3968 = vmatprep.subr.bf16.mxu0 %v9841_v30  ;;  %v9892_v30 = vld [vmem:[%s13295_s3 + $0x804] ss:$16 sps:$4 sm:$0xff]  }
 0x242   :  { %3372 = vmatpush1.bf16.msra.mxu1 %v9836_v34  ;;  %8773 = vmatmul.mubr.msk.bf16.vlgmr.msra.gmra.mrb[108].mxu0 %vm946_vm5, %v3657_v33  ;;  %v4031_v34 = vrot.slane %v11837_v22, 1  ;;  %v9947_v22 = vld [vmem:[%s13295_s3 + $0xa48] ss:$16 sps:$4 sm:$0xff]  }
 0x243   :  { %3969 = vmatpush1.bf16.msra.mxu0 %v9839_v23  ;;  %3553 = vmatprep.subr.bf16.mxu1 %v9844_v36  ;;  %v9895_v23 = vld [vmem:[%s13295_s3 + $0x92c] ss:$16 sps:$4 sm:$0xff]   ;;  %v9890_v36 = vld [vmem:[%s13295_s3 + $0x800] ss:$16 sps:$4 sm:$0xff]  }
 0x244   :  { %3970 = vmatprep.subr.bf16.mxu0 %v9847_v37  ;;  %4000 = vmatprep.mubr.bf16.mxu0 %v10545_v19  ;;  %v9893_v37 = vld [vmem:[%s13295_s3 + $0x928] ss:$16 sps:$4 sm:$0xff]  }
 0x245   :  { %8736 = vmatmul.mubr.msk.bf16.vlgmr.msra.gmra.mrb[64].mxu1 %vm946_vm5, %v3281_v35  ;;  %v1374_v41 = vpop.f32.mrb[56].mxu0  ;;  %v9854_v35 = vld [vmem:[%s13295_s3 + $0x740] ss:$16 sps:$4 sm:$0xff]  }
 0x246   :  { %3554 = vmatpush1.bf16.msra.mxu1 %v9842_v38  ;;  %v1376_v42 = vpop.f32.mrb[57].mxu0  ;;  %3585 = vmatprep.mubr.bf16.mxu1 %v10545_v19  ;;  %v9898_v38 = vld [vmem:[%s13295_s3 + $0x824] ss:$16 sps:$4 sm:$0xff]  }
 0x247   :  { %v1378_v44 = vpop.f32.mrb[58].mxu0  ;;  %3971 = vmatpush1.bf16.msra.mxu0 %v9845_v60  ;;  %3555 = vmatprep.subr.bf16.mxu1 %v9850_v26  ;;  %v9901_v60 = vld [vmem:[%s13295_s3 + $0x94c] ss:$16 sps:$4 sm:$0xff]  }
 0x248   :  { %v1025_v46 = vpop.f32.mrb[12].mxu1  ;;  %v1379_v62 = vpop.f32.mrb[59].mxu0  ;;  %3972 = vmatprep.subr.bf16.mxu0 %v9853_v39 }
 0x249   :  { %v1191_v32 = vadd.f32 %v1190_v11, %v1025_v46  ;;  %v1027_v49 = vpop.f32.mrb[13].mxu1  ;;  %v9907_v46 = vld [vmem:[%s13295_s3 + $0x96c] ss:$16 sps:$4 sm:$0xff]  }
 0x24a   :  { %v1193_v50 = vadd.f32 %v1192_v12, %v1027_v49  ;;  %v1029_v51 = vpop.f32.mrb[14].mxu1  ;;  %3556 = vmatpush1.bf16.msra.mxu1 %v9848_v43 }
 0x24b   :  { %v1383_v6 = vadd.f32 %v1374_v41, %v1191_v32  ;;  %v1030_v52 = vpop.f32.mrb[15].mxu1  ;;  %3973 = vmatpush1.bf16.msra.mxu0 %v9851_v29  ;;  %3557 = vmatprep.subr.bf16.mxu1 %v9856_v45 }
 0x24c   :  { %v1384_v47 = vadd.f32 %v1376_v42, %v1193_v50  ;;  %3974 = vmatprep.subr.bf16.mxu0 %v9859_v48  ;;  %v9896_v42 = vld [vmem:[%s13295_s3 + $0x820] ss:$16 sps:$4 sm:$0xff]   ;;  %v9913_v52 = vld [vmem:[%s13295_s3 + $0x98c] ss:$16 sps:$4 sm:$0xff]  }
 0x24d   :  { %v9902_v50 = vld [vmem:[%s13295_s3 + $0x840] ss:$16 sps:$4 sm:$0xff]  }
 0x24e   :  { %3558 = vmatpush1.bf16.msra.mxu1 %v9854_v35  ;;  %v9905_v35 = vld [vmem:[%s13295_s3 + $0x968] ss:$16 sps:$4 sm:$0xff]  }
 0x24f   :  { %3975 = vmatpush1.bf16.msra.mxu0 %v9857_v53  ;;  %3559 = vmatprep.subr.bf16.mxu1 %v9862_v40  ;;  %v11896_v53 = vld [vmem:[#allocation2 + $0x10] sm:$0x4] }
 0x250   :  { %4156 = vmatprep.subr.bf16.mxu0 %v9865_v55  ;;  %v9908_v40 = vld [vmem:[%s13295_s3 + $0x860] ss:$16 sps:$4 sm:$0xff]   ;;  %v9916_v55 = vld [vmem:[%s13295_s3 + $0x884] ss:$16 sps:$4 sm:$0xff]  }
 0x252   :  { %3560 = vmatpush1.bf16.msra.mxu1 %v9860_v8  ;;  %8791 = vmatmul.mubr.msk.bf16.vlgmr.msra.gmra.mrb[112].mxu0 %vm946_vm5, %v11790_v59  ;;  %v4219_v8 = vrot.slane %v11896_v53, 2  ;;  %v9971_v53 = vld [vmem:[%s13295_s3 + $0xac8] ss:$16 sps:$4 sm:$0xff]  }
 0x253   :  { %4157 = vmatpush1.bf16.msra.mxu0 %v9863_v56  ;;  %3741 = vmatprep.subr.bf16.mxu1 %v9868_v57  ;;  %v9919_v56 = vld [vmem:[%s13295_s3 + $0x9ac] ss:$16 sps:$4 sm:$0xff]   ;;  %v9914_v57 = vld [vmem:[%s13295_s3 + $0x880] ss:$16 sps:$4 sm:$0xff]  }
 0x254   :  { %4158 = vmatprep.subr.bf16.mxu0 %v9871_v58  ;;  %4188 = vmatprep.mubr.bf16.mxu0 %v10545_v19  ;;  %v9917_v58 = vld [vmem:[%s13295_s3 + $0x9a8] ss:$16 sps:$4 sm:$0xff]  }
 0x255   :  { %8754 = vmatmul.mubr.msk.bf16.vlgmr.msra.gmra.mrb[68].mxu1 %vm946_vm5, %v3469_v4  ;;  %v1562_v3 = vpop.f32.mrb[60].mxu0  ;;  %v9880_v4 = vld [vmem:[%s13295_s3 + $0x7c4] ss:$16 sps:$4 sm:$0xff]  }
 0x256   :  { %v1571_v54 = vadd.f32 %v1562_v3, %v1383_v6  ;;  %3742 = vmatpush1.bf16.msra.mxu1 %v9866_v61  ;;  %v1564_v7 = vpop.f32.mrb[61].mxu0  ;;  %3773 = vmatprep.mubr.bf16.mxu1 %v10545_v19  ;;  %v9910_v6 = vld [vmem:[%s13295_s3 + $0x864] ss:$16 sps:$4 sm:$0xff]  }
 0x257   :  { %v1572_v10 = vadd.f32 %v1564_v7, %v1384_v47  ;;  %v1566_v5 = vpop.f32.mrb[62].mxu0  ;;  %4159 = vmatpush1.bf16.msra.mxu0 %v9869_v0  ;;  %3743 = vmatprep.subr.bf16.mxu1 %v9874_v2  ;;  %v9911_v47 = vld [vmem:[%s13295_s3 + $0x988] ss:$16 sps:$4 sm:$0xff]   ;;  %v9922_v61 = vld [vmem:[%s13295_s3 + $0x8a4] ss:$16 sps:$4 sm:$0xff]  }
 0x258   :  { %v1149_v11 = vpop.f32.mrb[16].mxu1  ;;  %v1567_v12 = vpop.f32.mrb[63].mxu0  ;;  %4160 = vmatprep.subr.bf16.mxu0 %v9877_v63  ;;  %v9925_v0 = vld [vmem:[%s13295_s3 + $0x9cc] ss:$16 sps:$4 sm:$0xff]  }
 0x259   :  { %v1150_v14 = vadd.f32 %v1149_v11, %v11700_v17  ;;  %v1151_v15 = vpop.f32.mrb[17].mxu1  ;;  %v9886_v17 = vld [vmem:[%s13295_s3 + $0x7e4] ss:$16 sps:$4 sm:$0xff]  }
 0x25a   :  { %v1152_v16 = vadd.f32 %v1151_v15, %v11705_v21  ;;  %v1153_v18 = vpop.f32.mrb[18].mxu1  ;;  %3744 = vmatpush1.bf16.msra.mxu1 %v9872_v9  ;;  %v9889_v21 = vld [vmem:[%s13295_s3 + $0x90c] ss:$16 sps:$4 sm:$0xff]   ;;  %v9926_v15 = vld [vmem:[%s13295_s3 + $0x8c0] ss:$16 sps:$4 sm:$0xff]  }
 0x25b   :  { %v1154_v24 = vpop.f32.mrb[19].mxu1  ;;  %4161 = vmatpush1.bf16.msra.mxu0 %v9875_v1  ;;  %3745 = vmatprep.subr.bf16.mxu1 %v9880_v4  ;;  %v9931_v4 = vld [vmem:[%s13295_s3 + $0x9ec] ss:$16 sps:$4 sm:$0xff]   ;;  %v9929_v18 = vld [vmem:[%s13295_s3 + $0x9e8] ss:$16 sps:$4 sm:$0xff]  }
 0x25c   :  { %4162 = vmatprep.subr.bf16.mxu0 %v9883_v13  ;;  %v9937_v24 = vld [vmem:[%s13295_s3 + $0xa0c] ss:$16 sps:$4 sm:$0xff]  }
 0x25e   :  { %3746 = vmatpush1.bf16.msra.mxu1 %v9878_v20  ;;  %v9934_v20 = vld [vmem:[%s13295_s3 + $0x8e4] ss:$16 sps:$4 sm:$0xff]  }
 0x25f   :  { %4163 = vmatpush1.bf16.msra.mxu0 %v9881_v25  ;;  %3747 = vmatprep.subr.bf16.mxu1 %v9886_v17  ;;  %v11954_v25 = vld [vmem:[#allocation2 + $0x10] sm:$0x8] }
 0x260   :  { %4344 = vmatprep.subr.bf16.mxu0 %v9889_v21  ;;  %v9932_v17 = vld [vmem:[%s13295_s3 + $0x8e0] ss:$16 sps:$4 sm:$0xff]   ;;  %v9935_v21 = vld [vmem:[%s13295_s3 + $0xa08] ss:$16 sps:$4 sm:$0xff]  }
 0x262   :  { %3748 = vmatpush1.bf16.msra.mxu1 %v9884_v27  ;;  %8809 = vmatmul.mubr.msk.bf16.vlgmr.msra.gmra.mrb[116].mxu0 %vm946_vm5, %v4031_v34  ;;  %v9940_v27 = vld [vmem:[%s13295_s3 + $0x904] ss:$16 sps:$4 sm:$0xff]  }
 0x263   :  { %4345 = vmatpush1.bf16.msra.mxu0 %v9887_v28  ;;  %3927 = vmatprep.subr.bf16.mxu1 %v9892_v30  ;;  %v4407_v28 = vrot.slane %v11954_v25, 3  ;;  %v9943_v30 = vld [vmem:[%s13295_s3 + $0xa2c] ss:$16 sps:$4 sm:$0xff]   ;;  %v9995_v25 = vld [vmem:[%s13295_s3 + $0xb48] ss:$16 sps:$4 sm:$0xff]  }
 0x264   :  { %4346 = vmatprep.subr.bf16.mxu0 %v9895_v23  ;;  %4376 = vmatprep.mubr.bf16.mxu0 %v10545_v19  ;;  %v9938_v23 = vld [vmem:[%s13295_s3 + $0x900] ss:$16 sps:$4 sm:$0xff]  }
 0x265   :  { %8772 = vmatmul.mubr.msk.bf16.vlgmr.msra.gmra.mrb[72].mxu1 %vm946_vm5, %v3657_v33  ;;  %v1750_v26 = vpop.f32.mrb[64].mxu0  ;;  %v9904_v33 = vld [vmem:[%s13295_s3 + $0x844] ss:$16 sps:$4 sm:$0xff]  }
 0x266   :  { %v1759_v39 = vadd.f32 %v1750_v26, %v1571_v54  ;;  %3928 = vmatpush1.bf16.msra.mxu1 %v9890_v36  ;;  %v1752_v41 = vpop.f32.mrb[65].mxu0  ;;  %3959 = vmatprep.mubr.bf16.mxu1 %v10545_v19  ;;  %v9920_v54 = vld [vmem:[%s13295_s3 + $0x8a0] ss:$16 sps:$4 sm:$0xff]   ;;  %v9941_v36 = vld [vmem:[%s13295_s3 + $0xa28] ss:$16 sps:$4 sm:$0xff]  }
 0x267   :  { %v1760_v43 = vadd.f32 %v1752_v41, %v1572_v10  ;;  %v1754_v44 = vpop.f32.mrb[66].mxu0  ;;  %4347 = vmatpush1.bf16.msra.mxu0 %v9893_v37  ;;  %3929 = vmatprep.subr.bf16.mxu1 %v9898_v38  ;;  %v9923_v10 = vld [vmem:[%s13295_s3 + $0x9c8] ss:$16 sps:$4 sm:$0xff]   ;;  %v9946_v37 = vld [vmem:[%s13295_s3 + $0x924] ss:$16 sps:$4 sm:$0xff]  }
 0x268   :  { %v1333_v29 = vpop.f32.mrb[20].mxu1  ;;  %v1755_v45 = vpop.f32.mrb[67].mxu0  ;;  %4348 = vmatprep.subr.bf16.mxu0 %v9901_v60  ;;  %v9949_v38 = vld [vmem:[%s13295_s3 + $0xa4c] ss:$16 sps:$4 sm:$0xff]   ;;  %v9944_v41 = vld [vmem:[%s13295_s3 + $0x920] ss:$16 sps:$4 sm:$0xff]  }
 0x269   :  { %v1381_v62 = vadd.f32 %v1333_v29, %v1150_v14  ;;  %v1335_v48 = vpop.f32.mrb[21].mxu1 }
 0x26a   :  { %v1382_v32 = vadd.f32 %v1335_v48, %v1152_v16  ;;  %v1337_v49 = vpop.f32.mrb[22].mxu1  ;;  %3930 = vmatpush1.bf16.msra.mxu1 %v9896_v42  ;;  %v9950_v48 = vld [vmem:[%s13295_s3 + $0x940] ss:$16 sps:$4 sm:$0xff]  }
 0x26b   :  { %v1338_v51 = vpop.f32.mrb[23].mxu1  ;;  %4349 = vmatpush1.bf16.msra.mxu0 %v9899_v31  ;;  %3931 = vmatprep.subr.bf16.mxu1 %v9904_v33  ;;  %v9955_v33 = vld [vmem:[%s13295_s3 + $0xa6c] ss:$16 sps:$4 sm:$0xff]   ;;  %v9953_v49 = vld [vmem:[%s13295_s3 + $0xa68] ss:$16 sps:$4 sm:$0xff]  }
 0x26c   :  { %4350 = vmatprep.subr.bf16.mxu0 %v9907_v46  ;;  %v9961_v51 = vld [vmem:[%s13295_s3 + $0xa8c] ss:$16 sps:$4 sm:$0xff]  }
 0x26e   :  { %3932 = vmatpush1.bf16.msra.mxu1 %v9902_v50  ;;  %v9958_v50 = vld [vmem:[%s13295_s3 + $0x964] ss:$16 sps:$4 sm:$0xff]  }
 0x26f   :  { %4351 = vmatpush1.bf16.msra.mxu0 %v9905_v35  ;;  %3933 = vmatprep.subr.bf16.mxu1 %v9910_v6  ;;  %v12013_v35 = vld [vmem:[#allocation2 + $0x10] sm:$0x10]  ;;  %v9956_v6 = vld [vmem:[%s13295_s3 + $0x960] ss:$16 sps:$4 sm:$0xff]  }
 0x270   :  { %4532 = vmatprep.subr.bf16.mxu0 %v9913_v52  ;;  %v9959_v52 = vld [vmem:[%s13295_s3 + $0xa88] ss:$16 sps:$4 sm:$0xff]  }
 0x272   :  { %3934 = vmatpush1.bf16.msra.mxu1 %v9908_v40  ;;  %8827 = vmatmul.mubr.msk.bf16.vlgmr.msra.gmra.mrb[120].mxu0 %vm946_vm5, %v4219_v8  ;;  %v9964_v40 = vld [vmem:[%s13295_s3 + $0x984] ss:$16 sps:$4 sm:$0xff]  }
 0x273   :  { %4533 = vmatpush1.bf16.msra.mxu0 %v9911_v47  ;;  %4115 = vmatprep.subr.bf16.mxu1 %v9916_v55  ;;  %v4595_v47 = vrot.slane %v12013_v35, 4  ;;  %v9967_v55 = vld [vmem:[%s13295_s3 + $0xaac] ss:$16 sps:$4 sm:$0xff]   ;;  %v10019_v35 = vld [vmem:[%s13295_s3 + $0xbc8] ss:$16 sps:$4 sm:$0xff]  }
 0x274   :  { %4534 = vmatprep.subr.bf16.mxu0 %v9919_v56  ;;  %4564 = vmatprep.mubr.bf16.mxu0 %v10545_v19  ;;  %v9962_v56 = vld [vmem:[%s13295_s3 + $0x980] ss:$16 sps:$4 sm:$0xff]  }
 0x275   :  { %8790 = vmatmul.mubr.msk.bf16.vlgmr.msra.gmra.mrb[76].mxu1 %vm946_vm5, %v11790_v59  ;;  %v1938_v2 = vpop.f32.mrb[68].mxu0  ;;  %v9928_v59 = vld [vmem:[%s13295_s3 + $0x8c4] ss:$16 sps:$4 sm:$0xff]  }
 0x276   :  { %v1947_v63 = vadd.f32 %v1938_v2, %v1759_v39  ;;  %4116 = vmatpush1.bf16.msra.mxu1 %v9914_v57  ;;  %v1940_v3 = vpop.f32.mrb[69].mxu0  ;;  %4147 = vmatprep.mubr.bf16.mxu1 %v10545_v19  ;;  %v9965_v57 = vld [vmem:[%s13295_s3 + $0xaa8] ss:$16 sps:$4 sm:$0xff]  }
 0x277   :  { %v1948_v7 = vadd.f32 %v1940_v3, %v1760_v43  ;;  %v1942_v9 = vpop.f32.mrb[70].mxu0  ;;  %4535 = vmatpush1.bf16.msra.mxu0 %v9917_v58  ;;  %4117 = vmatprep.subr.bf16.mxu1 %v9922_v61  ;;  %v9970_v58 = vld [vmem:[%s13295_s3 + $0x9a4] ss:$16 sps:$4 sm:$0xff]   ;;  %v9973_v61 = vld [vmem:[%s13295_s3 + $0xacc] ss:$16 sps:$4 sm:$0xff]  }
 0x278   :  { %v1521_v5 = vpop.f32.mrb[24].mxu1  ;;  %v1943_v1 = vpop.f32.mrb[71].mxu0  ;;  %4536 = vmatprep.subr.bf16.mxu0 %v9925_v0  ;;  %v9968_v3 = vld [vmem:[%s13295_s3 + $0x9a0] ss:$16 sps:$4 sm:$0xff]  }
 0x279   :  { %v1569_v11 = vadd.f32 %v1521_v5, %v1381_v62  ;;  %v1523_v12 = vpop.f32.mrb[25].mxu1 }
 0x27a   :  { %v1570_v13 = vadd.f32 %v1523_v12, %v1382_v32  ;;  %v1525_v14 = vpop.f32.mrb[26].mxu1  ;;  %4118 = vmatpush1.bf16.msra.mxu1 %v9920_v54  ;;  %v9974_v12 = vld [vmem:[%s13295_s3 + $0x9c0] ss:$16 sps:$4 sm:$0xff]  }
 0x27b   :  { %v1526_v16 = vpop.f32.mrb[27].mxu1  ;;  %4537 = vmatpush1.bf16.msra.mxu0 %v9923_v10  ;;  %4119 = vmatprep.subr.bf16.mxu1 %v9928_v59  ;;  %v9979_v59 = vld [vmem:[%s13295_s3 + $0xaec] ss:$16 sps:$4 sm:$0xff]   ;;  %v9977_v14 = vld [vmem:[%s13295_s3 + $0xae8] ss:$16 sps:$4 sm:$0xff]  }
 0x27c   :  { %4538 = vmatprep.subr.bf16.mxu0 %v9931_v4  ;;  %v9985_v16 = vld [vmem:[%s13295_s3 + $0xb0c] ss:$16 sps:$4 sm:$0xff]  }
 0x27e   :  { %4120 = vmatpush1.bf16.msra.mxu1 %v9926_v15  ;;  %v9982_v15 = vld [vmem:[%s13295_s3 + $0x9e4] ss:$16 sps:$4 sm:$0xff]  }
 0x27f   :  { %4539 = vmatpush1.bf16.msra.mxu0 %v9929_v18  ;;  %4121 = vmatprep.subr.bf16.mxu1 %v9934_v20  ;;  %v12072_v18 = vld [vmem:[#allocation2 + $0x10] sm:$0x20]  ;;  %v9980_v20 = vld [vmem:[%s13295_s3 + $0x9e0] ss:$16 sps:$4 sm:$0xff]  }
 0x280   :  { %4720 = vmatprep.subr.bf16.mxu0 %v9937_v24  ;;  %v9983_v24 = vld [vmem:[%s13295_s3 + $0xb08] ss:$16 sps:$4 sm:$0xff]  }
 0x282   :  { %4122 = vmatpush1.bf16.msra.mxu1 %v9932_v17  ;;  %8845 = vmatmul.mubr.msk.bf16.vlgmr.msra.gmra.mrb[124].mxu0 %vm946_vm5, %v4407_v28  ;;  %v9988_v17 = vld [vmem:[%s13295_s3 + $0xa04] ss:$16 sps:$4 sm:$0xff]  }
 0x283   :  { %4721 = vmatpush1.bf16.msra.mxu0 %v9935_v21  ;;  %4303 = vmatprep.subr.bf16.mxu1 %v9940_v27  ;;  %v4783_v21 = vrot.slane %v12072_v18, 5  ;;  %v9991_v27 = vld [vmem:[%s13295_s3 + $0xb2c] ss:$16 sps:$4 sm:$0xff]   ;;  %v10043_v18 = vld [vmem:[%s13295_s3 + $0xc48] ss:$16 sps:$4 sm:$0xff]  }
 0x284   :  { %4722 = vmatprep.subr.bf16.mxu0 %v9943_v30  ;;  %4752 = vmatprep.mubr.bf16.mxu0 %v10545_v19  ;;  %v9986_v30 = vld [vmem:[%s13295_s3 + $0xa00] ss:$16 sps:$4 sm:$0xff]  }
 0x285   :  { %8808 = vmatmul.mubr.msk.bf16.vlgmr.msra.gmra.mrb[80].mxu1 %vm946_vm5, %v4031_v34  ;;  %v2126_v60 = vpop.f32.mrb[72].mxu0  ;;  %v9952_v34 = vld [vmem:[%s13295_s3 + $0x944] ss:$16 sps:$4 sm:$0xff]  }
 0x286   :  { %v2135_v26 = vadd.f32 %v2126_v60, %v1947_v63  ;;  %4304 = vmatpush1.bf16.msra.mxu1 %v9938_v23  ;;  %v2128_v39 = vpop.f32.mrb[73].mxu0  ;;  %4335 = vmatprep.mubr.bf16.mxu1 %v10545_v19  ;;  %v9989_v23 = vld [vmem:[%s13295_s3 + $0xb28] ss:$16 sps:$4 sm:$0xff]  }
 0x287   :  { %v2136_v42 = vadd.f32 %v2128_v39, %v1948_v7  ;;  %v2130_v43 = vpop.f32.mrb[74].mxu0  ;;  %4723 = vmatpush1.bf16.msra.mxu0 %v9941_v36  ;;  %4305 = vmatprep.subr.bf16.mxu1 %v9946_v37  ;;  %v9994_v36 = vld [vmem:[%s13295_s3 + $0xa24] ss:$16 sps:$4 sm:$0xff]   ;;  %v9997_v37 = vld [vmem:[%s13295_s3 + $0xb4c] ss:$16 sps:$4 sm:$0xff]  }
 0x288   :  { %v1709_v44 = vpop.f32.mrb[28].mxu1  ;;  %v2131_v31 = vpop.f32.mrb[75].mxu0  ;;  %4724 = vmatprep.subr.bf16.mxu0 %v9949_v38  ;;  %v9992_v39 = vld [vmem:[%s13295_s3 + $0xa20] ss:$16 sps:$4 sm:$0xff]  }
 0x289   :  { %v1757_v29 = vadd.f32 %v1709_v44, %v1569_v11  ;;  %v1711_v45 = vpop.f32.mrb[29].mxu1 }
 0x28a   :  { %v1758_v46 = vadd.f32 %v1711_v45, %v1570_v13  ;;  %v1713_v62 = vpop.f32.mrb[30].mxu1  ;;  %4306 = vmatpush1.bf16.msra.mxu1 %v9944_v41  ;;  %v9998_v45 = vld [vmem:[%s13295_s3 + $0xa40] ss:$16 sps:$4 sm:$0xff]  }
 0x28b   :  { %v1714_v32 = vpop.f32.mrb[31].mxu1  ;;  %4725 = vmatpush1.bf16.msra.mxu0 %v9947_v22  ;;  %4307 = vmatprep.subr.bf16.mxu1 %v9952_v34  ;;  %v10003_v34 = vld [vmem:[%s13295_s3 + $0xb6c] ss:$16 sps:$4 sm:$0xff]   ;;  %v10001_v62 = vld [vmem:[%s13295_s3 + $0xb68] ss:$16 sps:$4 sm:$0xff]  }
 0x28c   :  { %4726 = vmatprep.subr.bf16.mxu0 %v9955_v33  ;;  %v10009_v32 = vld [vmem:[%s13295_s3 + $0xb8c] ss:$16 sps:$4 sm:$0xff]  }
 0x28e   :  { %4308 = vmatpush1.bf16.msra.mxu1 %v9950_v48  ;;  %v10006_v48 = vld [vmem:[%s13295_s3 + $0xa64] ss:$16 sps:$4 sm:$0xff]  }
 0x28f   :  { %4727 = vmatpush1.bf16.msra.mxu0 %v9953_v49  ;;  %4309 = vmatprep.subr.bf16.mxu1 %v9958_v50  ;;  %v12131_v49 = vld [vmem:[#allocation2 + $0x10] sm:$0x40]  ;;  %v10004_v50 = vld [vmem:[%s13295_s3 + $0xa60] ss:$16 sps:$4 sm:$0xff]  }
 0x290   :  { %4908 = vmatprep.subr.bf16.mxu0 %v9961_v51  ;;  %v10007_v51 = vld [vmem:[%s13295_s3 + $0xb88] ss:$16 sps:$4 sm:$0xff]  }
 0x292   :  { %4310 = vmatpush1.bf16.msra.mxu1 %v9956_v6  ;;  %8863 = vmatmul.mubr.msk.bf16.vlgmr.msra.gmra.mrb[128].mxu0 %vm946_vm5, %v4595_v47  ;;  %v10012_v6 = vld [vmem:[%s13295_s3 + $0xa84] ss:$16 sps:$4 sm:$0xff]  }
 0x293   :  { %4909 = vmatpush1.bf16.msra.mxu0 %v9959_v52  ;;  %4491 = vmatprep.subr.bf16.mxu1 %v9964_v40  ;;  %v4971_v52 = vrot.slane %v12131_v49, 6  ;;  %v10015_v40 = vld [vmem:[%s13295_s3 + $0xbac] ss:$16 sps:$4 sm:$0xff]   ;;  %v10067_v49 = vld [vmem:[%s13295_s3 + $0xcc8] ss:$16 sps:$4 sm:$0xff]  }
 0x294   :  { %4910 = vmatprep.subr.bf16.mxu0 %v9967_v55  ;;  %4940 = vmatprep.mubr.bf16.mxu0 %v10545_v19  ;;  %v10010_v55 = vld [vmem:[%s13295_s3 + $0xa80] ss:$16 sps:$4 sm:$0xff]  }
 0x295   :  { %8826 = vmatmul.mubr.msk.bf16.vlgmr.msra.gmra.mrb[84].mxu1 %vm946_vm5, %v4219_v8  ;;  %v2314_v0 = vpop.f32.mrb[76].mxu0  ;;  %v9976_v8 = vld [vmem:[%s13295_s3 + $0x9c4] ss:$16 sps:$4 sm:$0xff]  }
 0x296   :  { %v2323_v2 = vadd.f32 %v2314_v0, %v2135_v26  ;;  %4492 = vmatpush1.bf16.msra.mxu1 %v9962_v56  ;;  %v2316_v63 = vpop.f32.mrb[77].mxu0  ;;  %4523 = vmatprep.mubr.bf16.mxu1 %v10545_v19  ;;  %v10013_v56 = vld [vmem:[%s13295_s3 + $0xba8] ss:$16 sps:$4 sm:$0xff]  }
 0x297   :  { %v2324_v54 = vadd.f32 %v2316_v63, %v2136_v42  ;;  %v2318_v7 = vpop.f32.mrb[78].mxu0  ;;  %4911 = vmatpush1.bf16.msra.mxu0 %v9965_v57  ;;  %4493 = vmatprep.subr.bf16.mxu1 %v9970_v58  ;;  %v10018_v57 = vld [vmem:[%s13295_s3 + $0xaa4] ss:$16 sps:$4 sm:$0xff]   ;;  %v10021_v58 = vld [vmem:[%s13295_s3 + $0xbcc] ss:$16 sps:$4 sm:$0xff]  }
 0x298   :  { %v1897_v9 = vpop.f32.mrb[32].mxu1  ;;  %v2319_v10 = vpop.f32.mrb[79].mxu0  ;;  %4912 = vmatprep.subr.bf16.mxu0 %v9973_v61  ;;  %v10016_v63 = vld [vmem:[%s13295_s3 + $0xaa0] ss:$16 sps:$4 sm:$0xff]  }
 0x299   :  { %v1945_v5 = vadd.f32 %v1897_v9, %v1757_v29  ;;  %v1899_v1 = vpop.f32.mrb[33].mxu1 }
 0x29a   :  { %v1946_v4 = vadd.f32 %v1899_v1, %v1758_v46  ;;  %v1901_v11 = vpop.f32.mrb[34].mxu1  ;;  %4494 = vmatpush1.bf16.msra.mxu1 %v9968_v3  ;;  %v10022_v1 = vld [vmem:[%s13295_s3 + $0xac0] ss:$16 sps:$4 sm:$0xff]  }
 0x29b   :  { %v1902_v13 = vpop.f32.mrb[35].mxu1  ;;  %4913 = vmatpush1.bf16.msra.mxu0 %v9971_v53  ;;  %4495 = vmatprep.subr.bf16.mxu1 %v9976_v8  ;;  %v10027_v8 = vld [vmem:[%s13295_s3 + $0xbec] ss:$16 sps:$4 sm:$0xff]   ;;  %v10025_v11 = vld [vmem:[%s13295_s3 + $0xbe8] ss:$16 sps:$4 sm:$0xff]  }
 0x29c   :  { %4914 = vmatprep.subr.bf16.mxu0 %v9979_v59  ;;  %v10033_v13 = vld [vmem:[%s13295_s3 + $0xc0c] ss:$16 sps:$4 sm:$0xff]  }
 0x29e   :  { %4496 = vmatpush1.bf16.msra.mxu1 %v9974_v12  ;;  %v10030_v12 = vld [vmem:[%s13295_s3 + $0xae4] ss:$16 sps:$4 sm:$0xff]  }
 0x29f   :  { %4915 = vmatpush1.bf16.msra.mxu0 %v9977_v14  ;;  %4497 = vmatprep.subr.bf16.mxu1 %v9982_v15  ;;  %v12190_v14 = vld [vmem:[#allocation2 + $0x10] sm:$0x80]  ;;  %v10028_v15 = vld [vmem:[%s13295_s3 + $0xae0] ss:$16 sps:$4 sm:$0xff]  }
 0x2a0   :  { %5096 = vmatprep.subr.bf16.mxu0 %v9985_v16  ;;  %v10031_v16 = vld [vmem:[%s13295_s3 + $0xc08] ss:$16 sps:$4 sm:$0xff]  }
 0x2a2   :  { %4498 = vmatpush1.bf16.msra.mxu1 %v9980_v20  ;;  %8881 = vmatmul.mubr.msk.bf16.vlgmr.msra.gmra.mrb[132].mxu0 %vm946_vm5, %v4783_v21  ;;  %v10036_v20 = vld [vmem:[%s13295_s3 + $0xb04] ss:$16 sps:$4 sm:$0xff]  }
 0x2a3   :  { %5097 = vmatpush1.bf16.msra.mxu0 %v9983_v24  ;;  %4679 = vmatprep.subr.bf16.mxu1 %v9988_v17  ;;  %v5159_v24 = vrot.slane %v12190_v14, 7  ;;  %v10039_v17 = vld [vmem:[%s13295_s3 + $0xc2c] ss:$16 sps:$4 sm:$0xff]   ;;  %v10091_v14 = vld [vmem:[%s13295_s3 + $0xd48] ss:$16 sps:$4 sm:$0xff]  }
 0x2a4   :  { %5098 = vmatprep.subr.bf16.mxu0 %v9991_v27  ;;  %5128 = vmatprep.mubr.bf16.mxu0 %v10545_v19  ;;  %v10034_v27 = vld [vmem:[%s13295_s3 + $0xb00] ss:$16 sps:$4 sm:$0xff]  }
 0x2a5   :  { %8844 = vmatmul.mubr.msk.bf16.vlgmr.msra.gmra.mrb[88].mxu1 %vm946_vm5, %v4407_v28  ;;  %v2500_v38 = vpop.f32.mrb[80].mxu0  ;;  %v10000_v28 = vld [vmem:[%s13295_s3 + $0xa44] ss:$16 sps:$4 sm:$0xff]  }
 0x2a6   :  { %v2509_v60 = vadd.f32 %v2500_v38, %v2323_v2  ;;  %4680 = vmatpush1.bf16.msra.mxu1 %v9986_v30  ;;  %v2502_v26 = vpop.f32.mrb[81].mxu0  ;;  %4711 = vmatprep.mubr.bf16.mxu1 %v10545_v19  ;;  %v10037_v30 = vld [vmem:[%s13295_s3 + $0xc28] ss:$16 sps:$4 sm:$0xff]  }
 0x2a7   :  { %v2510_v41 = vadd.f32 %v2502_v26, %v2324_v54  ;;  %v2504_v42 = vpop.f32.mrb[82].mxu0  ;;  %5099 = vmatpush1.bf16.msra.mxu0 %v9989_v23  ;;  %4681 = vmatprep.subr.bf16.mxu1 %v9994_v36  ;;  %v10042_v23 = vld [vmem:[%s13295_s3 + $0xb24] ss:$16 sps:$4 sm:$0xff]   ;;  %v10045_v36 = vld [vmem:[%s13295_s3 + $0xc4c] ss:$16 sps:$4 sm:$0xff]  }
 0x2a8   :  { %v2085_v43 = vpop.f32.mrb[36].mxu1  ;;  %v2505_v22 = vpop.f32.mrb[83].mxu0  ;;  %5100 = vmatprep.subr.bf16.mxu0 %v9997_v37  ;;  %v10040_v26 = vld [vmem:[%s13295_s3 + $0xb20] ss:$16 sps:$4 sm:$0xff]  }
 0x2a9   :  { %v2133_v44 = vadd.f32 %v2085_v43, %v1945_v5  ;;  %v2087_v31 = vpop.f32.mrb[37].mxu1 }
 0x2aa   :  { %v2134_v33 = vadd.f32 %v2087_v31, %v1946_v4  ;;  %v2089_v29 = vpop.f32.mrb[38].mxu1  ;;  %4682 = vmatpush1.bf16.msra.mxu1 %v9992_v39  ;;  %v10046_v31 = vld [vmem:[%s13295_s3 + $0xb40] ss:$16 sps:$4 sm:$0xff]  }
 0x2ab   :  { %v2090_v46 = vpop.f32.mrb[39].mxu1  ;;  %5101 = vmatpush1.bf16.msra.mxu0 %v9995_v25  ;;  %4683 = vmatprep.subr.bf16.mxu1 %v10000_v28  ;;  %v10051_v28 = vld [vmem:[%s13295_s3 + $0xc6c] ss:$16 sps:$4 sm:$0xff]   ;;  %v10049_v29 = vld [vmem:[%s13295_s3 + $0xc68] ss:$16 sps:$4 sm:$0xff]  }
 0x2ac   :  { %5102 = vmatprep.subr.bf16.mxu0 %v10003_v34  ;;  %v10057_v46 = vld [vmem:[%s13295_s3 + $0xc8c] ss:$16 sps:$4 sm:$0xff]  }
 0x2ae   :  { %4684 = vmatpush1.bf16.msra.mxu1 %v9998_v45  ;;  %v10054_v45 = vld [vmem:[%s13295_s3 + $0xb64] ss:$16 sps:$4 sm:$0xff]  }
 0x2af   :  { %5103 = vmatpush1.bf16.msra.mxu0 %v10001_v62  ;;  %4685 = vmatprep.subr.bf16.mxu1 %v10006_v48  ;;  %v10052_v62 = vld [vmem:[%s13295_s3 + $0xb60] ss:$16 sps:$4 sm:$0xff]   ;;  %v10055_v48 = vld [vmem:[%s13295_s3 + $0xc88] ss:$16 sps:$4 sm:$0xff]  }
 0x2b0   :  { %5284 = vmatprep.subr.bf16.mxu0 %v10009_v32  ;;  %v10060_v32 = vld [vmem:[%s13295_s3 + $0xb84] ss:$16 sps:$4 sm:$0xff]  }
 0x2b2   :  { %4686 = vmatpush1.bf16.msra.mxu1 %v10004_v50  ;;  %8899 = vmatmul.mubr.msk.bf16.vlgmr.msra.gmra.mrb[136].mxu0 %vm946_vm5, %v4971_v52  ;;  %v10063_v50 = vld [vmem:[%s13295_s3 + $0xcac] ss:$16 sps:$4 sm:$0xff]  }
 0x2b3   :  { %5285 = vmatpush1.bf16.msra.mxu0 %v10007_v51  ;;  %4867 = vmatprep.subr.bf16.mxu1 %v10012_v6  ;;  %v12261_v51 = vld [vmem:[#allocation2 + $0x18] sm:$0x1]  ;;  %v10058_v6 = vld [vmem:[%s13295_s3 + $0xb80] ss:$16 sps:$4 sm:$0xff]  }
 0x2b4   :  { %5286 = vmatprep.subr.bf16.mxu0 %v10015_v40  ;;  %5316 = vmatprep.mubr.bf16.mxu0 %v10545_v19  ;;  %v10061_v40 = vld [vmem:[%s13295_s3 + $0xca8] ss:$16 sps:$4 sm:$0xff]  }
 0x2b5   :  { %8862 = vmatmul.mubr.msk.bf16.vlgmr.msra.gmra.mrb[92].mxu1 %vm946_vm5, %v4595_v47  ;;  %v2688_v61 = vpop.f32.mrb[84].mxu0  ;;  %v10024_v47 = vld [vmem:[%s13295_s3 + $0xac4] ss:$16 sps:$4 sm:$0xff]  }
 0x2b6   :  { %v2697_v0 = vadd.f32 %v2688_v61, %v2509_v60  ;;  %4868 = vmatpush1.bf16.msra.mxu1 %v10010_v55  ;;  %v2690_v2 = vpop.f32.mrb[85].mxu0  ;;  %4899 = vmatprep.mubr.bf16.mxu1 %v10545_v19  ;;  %v10066_v55 = vld [vmem:[%s13295_s3 + $0xba4] ss:$16 sps:$4 sm:$0xff]  }
 0x2b7   :  { %v2698_v3 = vadd.f32 %v2690_v2, %v2510_v41  ;;  %v2692_v54 = vpop.f32.mrb[86].mxu0  ;;  %5287 = vmatpush1.bf16.msra.mxu0 %v10013_v56  ;;  %4869 = vmatprep.subr.bf16.mxu1 %v10018_v57  ;;  %v10069_v56 = vld [vmem:[%s13295_s3 + $0xccc] ss:$16 sps:$4 sm:$0xff]  }
 0x2b8   :  { %v2273_v7 = vpop.f32.mrb[40].mxu1  ;;  %v2693_v53 = vpop.f32.mrb[87].mxu0  ;;  %5288 = vmatprep.subr.bf16.mxu0 %v10021_v58 }
 0x2b9   :  { %v2321_v9 = vadd.f32 %v2273_v7, %v2133_v44  ;;  %v2275_v10 = vpop.f32.mrb[41].mxu1 }
 0x2ba   :  { %v2322_v59 = vadd.f32 %v2275_v10, %v2134_v33  ;;  %v2277_v5 = vpop.f32.mrb[42].mxu1  ;;  %4870 = vmatpush1.bf16.msra.mxu1 %v10016_v63 }
 0x2bb   :  { %v2278_v4 = vpop.f32.mrb[43].mxu1  ;;  %5289 = vmatpush1.bf16.msra.mxu0 %v10019_v35  ;;  %4871 = vmatprep.subr.bf16.mxu1 %v10024_v47  ;;  %v10075_v35 = vld [vmem:[%s13295_s3 + $0xcec] ss:$16 sps:$4 sm:$0xff]   ;;  %v10078_v5 = vld [vmem:[%s13295_s3 + $0xbe4] ss:$16 sps:$4 sm:$0xff]  }
 0x2bc   :  { %5290 = vmatprep.subr.bf16.mxu0 %v10027_v8  ;;  %v12306_v4 = vld [vmem:[#allocation2 + $0x18] sm:$0x2] }
 0x2be   :  { %4872 = vmatpush1.bf16.msra.mxu1 %v10022_v1  ;;  %v10081_v1 = vld [vmem:[%s13295_s3 + $0xd0c] ss:$16 sps:$4 sm:$0xff]  }
 0x2bf   :  { %5291 = vmatpush1.bf16.msra.mxu0 %v10025_v11  ;;  %4873 = vmatprep.subr.bf16.mxu1 %v10030_v12  ;;  %v10076_v11 = vld [vmem:[%s13295_s3 + $0xbe0] ss:$16 sps:$4 sm:$0xff]   ;;  %v10079_v12 = vld [vmem:[%s13295_s3 + $0xd08] ss:$16 sps:$4 sm:$0xff]  }
 0x2c0   :  { %5470 = vmatprep.subr.bf16.mxu0 %v10033_v13  ;;  %v10084_v13 = vld [vmem:[%s13295_s3 + $0xc04] ss:$16 sps:$4 sm:$0xff]  }
 0x2c2   :  { %4874 = vmatpush1.bf16.msra.mxu1 %v10028_v15  ;;  %8917 = vmatmul.mubr.msk.bf16.vlgmr.msra.gmra.mrb[140].mxu0 %vm946_vm5, %v5159_v24  ;;  %v5533_v15 = vrot.slane %v12306_v4, 1  ;;  %v10139_v4 = vld [vmem:[%s13295_s3 + $0xe48] ss:$16 sps:$4 sm:$0xff]  }
 0x2c3   :  { %5471 = vmatpush1.bf16.msra.mxu0 %v10031_v16  ;;  %5055 = vmatprep.subr.bf16.mxu1 %v10036_v20  ;;  %v10087_v16 = vld [vmem:[%s13295_s3 + $0xd2c] ss:$16 sps:$4 sm:$0xff]   ;;  %v10082_v20 = vld [vmem:[%s13295_s3 + $0xc00] ss:$16 sps:$4 sm:$0xff]  }
 0x2c4   :  { %5472 = vmatprep.subr.bf16.mxu0 %v10039_v17  ;;  %5502 = vmatprep.mubr.bf16.mxu0 %v10545_v19  ;;  %v10085_v17 = vld [vmem:[%s13295_s3 + $0xd28] ss:$16 sps:$4 sm:$0xff]  }
 0x2c5   :  { %8880 = vmatmul.mubr.msk.bf16.vlgmr.msra.gmra.mrb[96].mxu1 %vm946_vm5, %v4783_v21  ;;  %v2876_v37 = vpop.f32.mrb[88].mxu0  ;;  %v10048_v21 = vld [vmem:[%s13295_s3 + $0xb44] ss:$16 sps:$4 sm:$0xff]  }
 0x2c6   :  { %v2885_v38 = vadd.f32 %v2876_v37, %v2697_v0  ;;  %5056 = vmatpush1.bf16.msra.mxu1 %v10034_v27  ;;  %v2878_v60 = vpop.f32.mrb[89].mxu0  ;;  %5087 = vmatprep.mubr.bf16.mxu1 %v10545_v19  ;;  %v10064_v0 = vld [vmem:[%s13295_s3 + $0xba0] ss:$16 sps:$4 sm:$0xff]   ;;  %v10090_v27 = vld [vmem:[%s13295_s3 + $0xc24] ss:$16 sps:$4 sm:$0xff]  }
 0x2c7   :  { %v2886_v39 = vadd.f32 %v2878_v60, %v2698_v3  ;;  %v2880_v41 = vpop.f32.mrb[90].mxu0  ;;  %5473 = vmatpush1.bf16.msra.mxu0 %v10037_v30  ;;  %5057 = vmatprep.subr.bf16.mxu1 %v10042_v23  ;;  %v10093_v30 = vld [vmem:[%s13295_s3 + $0xd4c] ss:$16 sps:$4 sm:$0xff]  }
 0x2c8   :  { %v2459_v42 = vpop.f32.mrb[44].mxu1  ;;  %v2881_v25 = vpop.f32.mrb[91].mxu0  ;;  %5474 = vmatprep.subr.bf16.mxu0 %v10045_v36 }
 0x2c9   :  { %v2507_v43 = vadd.f32 %v2459_v42, %v2321_v9  ;;  %v2461_v22 = vpop.f32.mrb[45].mxu1  ;;  %v10070_v9 = vld [vmem:[%s13295_s3 + $0xbc0] ss:$16 sps:$4 sm:$0xff]  }
 0x2ca   :  { %v2508_v34 = vadd.f32 %v2461_v22, %v2322_v59  ;;  %v2463_v44 = vpop.f32.mrb[46].mxu1  ;;  %5058 = vmatpush1.bf16.msra.mxu1 %v10040_v26  ;;  %v10073_v59 = vld [vmem:[%s13295_s3 + $0xce8] ss:$16 sps:$4 sm:$0xff]  }
 0x2cb   :  { %v2464_v33 = vpop.f32.mrb[47].mxu1  ;;  %5475 = vmatpush1.bf16.msra.mxu0 %v10043_v18  ;;  %5059 = vmatprep.subr.bf16.mxu1 %v10048_v21  ;;  %v10099_v18 = vld [vmem:[%s13295_s3 + $0xd6c] ss:$16 sps:$4 sm:$0xff]   ;;  %v10102_v44 = vld [vmem:[%s13295_s3 + $0xc64] ss:$16 sps:$4 sm:$0xff]  }
 0x2cc   :  { %5476 = vmatprep.subr.bf16.mxu0 %v10051_v28  ;;  %v12365_v33 = vld [vmem:[#allocation2 + $0x18] sm:$0x4] }
 0x2ce   :  { %5060 = vmatpush1.bf16.msra.mxu1 %v10046_v31  ;;  %v10105_v31 = vld [vmem:[%s13295_s3 + $0xd8c] ss:$16 sps:$4 sm:$0xff]  }
 0x2cf   :  { %5477 = vmatpush1.bf16.msra.mxu0 %v10049_v29  ;;  %5061 = vmatprep.subr.bf16.mxu1 %v10054_v45  ;;  %v10100_v29 = vld [vmem:[%s13295_s3 + $0xc60] ss:$16 sps:$4 sm:$0xff]   ;;  %v10103_v45 = vld [vmem:[%s13295_s3 + $0xd88] ss:$16 sps:$4 sm:$0xff]  }
 0x2d0   :  { %5658 = vmatprep.subr.bf16.mxu0 %v10057_v46  ;;  %v10108_v46 = vld [vmem:[%s13295_s3 + $0xc84] ss:$16 sps:$4 sm:$0xff]  }
 0x2d2   :  { %5062 = vmatpush1.bf16.msra.mxu1 %v10052_v62  ;;  %8935 = vmatmul.mubr.msk.bf16.vlgmr.msra.gmra.mrb[144].mxu0 %vm946_vm5, %v12261_v51  ;;  %v5721_v62 = vrot.slane %v12365_v33, 2  ;;  %v10163_v33 = vld [vmem:[%s13295_s3 + $0xec8] ss:$16 sps:$4 sm:$0xff]  }
 0x2d3   :  { %5659 = vmatpush1.bf16.msra.mxu0 %v10055_v48  ;;  %5243 = vmatprep.subr.bf16.mxu1 %v10060_v32  ;;  %v10111_v48 = vld [vmem:[%s13295_s3 + $0xdac] ss:$16 sps:$4 sm:$0xff]   ;;  %v10106_v32 = vld [vmem:[%s13295_s3 + $0xc80] ss:$16 sps:$4 sm:$0xff]  }
 0x2d4   :  { %5660 = vmatprep.subr.bf16.mxu0 %v10063_v50  ;;  %5690 = vmatprep.mubr.bf16.mxu0 %v10545_v19  ;;  %v10109_v50 = vld [vmem:[%s13295_s3 + $0xda8] ss:$16 sps:$4 sm:$0xff]  }
 0x2d5   :  { %8898 = vmatmul.mubr.msk.bf16.vlgmr.msra.gmra.mrb[100].mxu1 %vm946_vm5, %v4971_v52  ;;  %v3064_v57 = vpop.f32.mrb[92].mxu0  ;;  %v10072_v52 = vld [vmem:[%s13295_s3 + $0xbc4] ss:$16 sps:$4 sm:$0xff]  }
 0x2d6   :  { %v3073_v58 = vadd.f32 %v3064_v57, %v2885_v38  ;;  %5244 = vmatpush1.bf16.msra.mxu1 %v10058_v6  ;;  %v3066_v61 = vpop.f32.mrb[93].mxu0  ;;  %5275 = vmatprep.mubr.bf16.mxu1 %v10545_v19  ;;  %v10088_v38 = vld [vmem:[%s13295_s3 + $0xc20] ss:$16 sps:$4 sm:$0xff]   ;;  %v10114_v6 = vld [vmem:[%s13295_s3 + $0xca4] ss:$16 sps:$4 sm:$0xff]  }
 0x2d7   :  { %v3074_v2 = vadd.f32 %v3066_v61, %v2886_v39  ;;  %v3068_v63 = vpop.f32.mrb[94].mxu0  ;;  %5661 = vmatpush1.bf16.msra.mxu0 %v10061_v40  ;;  %5245 = vmatprep.subr.bf16.mxu1 %v10066_v55  ;;  %v10117_v40 = vld [vmem:[%s13295_s3 + $0xdcc] ss:$16 sps:$4 sm:$0xff]  }
 0x2d8   :  { %v2647_v3 = vpop.f32.mrb[48].mxu1  ;;  %v3069_v54 = vpop.f32.mrb[95].mxu0  ;;  %5662 = vmatprep.subr.bf16.mxu0 %v10069_v56 }
 0x2d9   :  { %v2695_v47 = vadd.f32 %v2647_v3, %v2507_v43  ;;  %v2649_v7 = vpop.f32.mrb[49].mxu1  ;;  %v10094_v43 = vld [vmem:[%s13295_s3 + $0xc40] ss:$16 sps:$4 sm:$0xff]  }
 0x2da   :  { %v2696_v53 = vadd.f32 %v2649_v7, %v2508_v34  ;;  %v2651_v8 = vpop.f32.mrb[50].mxu1  ;;  %5246 = vmatpush1.bf16.msra.mxu1 %v10064_v0  ;;  %v10097_v34 = vld [vmem:[%s13295_s3 + $0xd68] ss:$16 sps:$4 sm:$0xff]   ;;  %v10118_v7 = vld [vmem:[%s13295_s3 + $0xcc0] ss:$16 sps:$4 sm:$0xff]  }
 0x2db   :  { %v2652_v10 = vpop.f32.mrb[51].mxu1  ;;  %5663 = vmatpush1.bf16.msra.mxu0 %v10067_v49  ;;  %5247 = vmatprep.subr.bf16.mxu1 %v10072_v52  ;;  %v10123_v52 = vld [vmem:[%s13295_s3 + $0xdec] ss:$16 sps:$4 sm:$0xff]   ;;  %v10121_v8 = vld [vmem:[%s13295_s3 + $0xde8] ss:$16 sps:$4 sm:$0xff]  }
 0x2dc   :  { %5664 = vmatprep.subr.bf16.mxu0 %v10075_v35  ;;  %v10129_v10 = vld [vmem:[%s13295_s3 + $0xe0c] ss:$16 sps:$4 sm:$0xff]  }
 0x2de   :  { %5248 = vmatpush1.bf16.msra.mxu1 %v10070_v9  ;;  %v10126_v9 = vld [vmem:[%s13295_s3 + $0xce4] ss:$16 sps:$4 sm:$0xff]  }
 0x2df   :  { %5665 = vmatpush1.bf16.msra.mxu0 %v10073_v59  ;;  %5249 = vmatprep.subr.bf16.mxu1 %v10078_v5  ;;  %v12423_v59 = vld [vmem:[#allocation2 + $0x18] sm:$0x8]  ;;  %v10124_v5 = vld [vmem:[%s13295_s3 + $0xce0] ss:$16 sps:$4 sm:$0xff]  }
 0x2e0   :  { %5846 = vmatprep.subr.bf16.mxu0 %v10081_v1  ;;  %v10127_v1 = vld [vmem:[%s13295_s3 + $0xe08] ss:$16 sps:$4 sm:$0xff]  }
 0x2e2   :  { %5250 = vmatpush1.bf16.msra.mxu1 %v10076_v11  ;;  %8953 = vmatmul.mubr.msk.bf16.vlgmr.msra.gmra.mrb[148].mxu0 %vm946_vm5, %v5533_v15  ;;  %v10132_v11 = vld [vmem:[%s13295_s3 + $0xd04] ss:$16 sps:$4 sm:$0xff]  }
 0x2e3   :  { %5847 = vmatpush1.bf16.msra.mxu0 %v10079_v12  ;;  %5429 = vmatprep.subr.bf16.mxu1 %v10084_v13  ;;  %v5909_v12 = vrot.slane %v12423_v59, 3  ;;  %v10135_v13 = vld [vmem:[%s13295_s3 + $0xe2c] ss:$16 sps:$4 sm:$0xff]   ;;  %v10187_v59 = vld [vmem:[%s13295_s3 + $0xf48] ss:$16 sps:$4 sm:$0xff]  }
 0x2e4   :  { %5848 = vmatprep.subr.bf16.mxu0 %v10087_v16  ;;  %5878 = vmatprep.mubr.bf16.mxu0 %v10545_v19  ;;  %v10130_v16 = vld [vmem:[%s13295_s3 + $0xd00] ss:$16 sps:$4 sm:$0xff]  }
 0x2e5   :  { %8916 = vmatmul.mubr.msk.bf16.vlgmr.msra.gmra.mrb[104].mxu1 %vm946_vm5, %v5159_v24  ;;  %v3252_v23 = vpop.f32.mrb[96].mxu0  ;;  %v10096_v24 = vld [vmem:[%s13295_s3 + $0xc44] ss:$16 sps:$4 sm:$0xff]  }
 0x2e6   :  { %v3261_v36 = vadd.f32 %v3252_v23, %v3073_v58  ;;  %5430 = vmatpush1.bf16.msra.mxu1 %v10082_v20  ;;  %v3254_v37 = vpop.f32.mrb[97].mxu0  ;;  %5461 = vmatprep.mubr.bf16.mxu1 %v10545_v19  ;;  %v10112_v58 = vld [vmem:[%s13295_s3 + $0xca0] ss:$16 sps:$4 sm:$0xff]   ;;  %v10133_v20 = vld [vmem:[%s13295_s3 + $0xe28] ss:$16 sps:$4 sm:$0xff]  }
 0x2e7   :  { %v3262_v60 = vadd.f32 %v3254_v37, %v3074_v2  ;;  %v3256_v26 = vpop.f32.mrb[98].mxu0  ;;  %5849 = vmatpush1.bf16.msra.mxu0 %v10085_v17  ;;  %5431 = vmatprep.subr.bf16.mxu1 %v10090_v27  ;;  %v10115_v2 = vld [vmem:[%s13295_s3 + $0xdc8] ss:$16 sps:$4 sm:$0xff]   ;;  %v10138_v17 = vld [vmem:[%s13295_s3 + $0xd24] ss:$16 sps:$4 sm:$0xff]  }
 0x2e8   :  { %v2835_v39 = vpop.f32.mrb[52].mxu1  ;;  %v3257_v41 = vpop.f32.mrb[99].mxu0  ;;  %5850 = vmatprep.subr.bf16.mxu0 %v10093_v30  ;;  %v10141_v27 = vld [vmem:[%s13295_s3 + $0xe4c] ss:$16 sps:$4 sm:$0xff]   ;;  %v10136_v37 = vld [vmem:[%s13295_s3 + $0xd20] ss:$16 sps:$4 sm:$0xff]  }
 0x2e9   :  { %v2883_v21 = vadd.f32 %v2835_v39, %v2695_v47  ;;  %v2837_v42 = vpop.f32.mrb[53].mxu1 }
 0x2ea   :  { %v2884_v25 = vadd.f32 %v2837_v42, %v2696_v53  ;;  %v2839_v28 = vpop.f32.mrb[54].mxu1  ;;  %5432 = vmatpush1.bf16.msra.mxu1 %v10088_v38  ;;  %v10142_v42 = vld [vmem:[%s13295_s3 + $0xd40] ss:$16 sps:$4 sm:$0xff]  }
 0x2eb   :  { %v2840_v22 = vpop.f32.mrb[55].mxu1  ;;  %5851 = vmatpush1.bf16.msra.mxu0 %v10091_v14  ;;  %5433 = vmatprep.subr.bf16.mxu1 %v10096_v24  ;;  %v10147_v24 = vld [vmem:[%s13295_s3 + $0xe6c] ss:$16 sps:$4 sm:$0xff]   ;;  %v10145_v28 = vld [vmem:[%s13295_s3 + $0xe68] ss:$16 sps:$4 sm:$0xff]  }
 0x2ec   :  { %5852 = vmatprep.subr.bf16.mxu0 %v10099_v18  ;;  %v10153_v22 = vld [vmem:[%s13295_s3 + $0xe8c] ss:$16 sps:$4 sm:$0xff]  }
 0x2ee   :  { %5434 = vmatpush1.bf16.msra.mxu1 %v10094_v43  ;;  %v10150_v43 = vld [vmem:[%s13295_s3 + $0xd64] ss:$16 sps:$4 sm:$0xff]  }
 0x2ef   :  { %5853 = vmatpush1.bf16.msra.mxu0 %v10097_v34  ;;  %5435 = vmatprep.subr.bf16.mxu1 %v10102_v44  ;;  %v12482_v34 = vld [vmem:[#allocation2 + $0x18] sm:$0x10]  ;;  %v10148_v44 = vld [vmem:[%s13295_s3 + $0xd60] ss:$16 sps:$4 sm:$0xff]  }
 0x2f0   :  { %6034 = vmatprep.subr.bf16.mxu0 %v10105_v31  ;;  %v10151_v31 = vld [vmem:[%s13295_s3 + $0xe88] ss:$16 sps:$4 sm:$0xff]  }
 0x2f2   :  { %5436 = vmatpush1.bf16.msra.mxu1 %v10100_v29  ;;  %8971 = vmatmul.mubr.msk.bf16.vlgmr.msra.gmra.mrb[152].mxu0 %vm946_vm5, %v5721_v62  ;;  %v10156_v29 = vld [vmem:[%s13295_s3 + $0xd84] ss:$16 sps:$4 sm:$0xff]  }
 0x2f3   :  { %6035 = vmatpush1.bf16.msra.mxu0 %v10103_v45  ;;  %5617 = vmatprep.subr.bf16.mxu1 %v10108_v46  ;;  %v6097_v45 = vrot.slane %v12482_v34, 4  ;;  %v10159_v46 = vld [vmem:[%s13295_s3 + $0xeac] ss:$16 sps:$4 sm:$0xff]   ;;  %v10211_v34 = vld [vmem:[%s13295_s3 + $0xfc8] ss:$16 sps:$4 sm:$0xff]  }
 0x2f4   :  { %6036 = vmatprep.subr.bf16.mxu0 %v10111_v48  ;;  %6066 = vmatprep.mubr.bf16.mxu0 %v10545_v19  ;;  %v10154_v48 = vld [vmem:[%s13295_s3 + $0xd80] ss:$16 sps:$4 sm:$0xff]  }
 0x2f5   :  { %8934 = vmatmul.mubr.msk.bf16.vlgmr.msra.gmra.mrb[108].mxu1 %vm946_vm5, %v12261_v51  ;;  %v3440_v55 = vpop.f32.mrb[100].mxu0  ;;  %v10120_v51 = vld [vmem:[%s13295_s3 + $0xcc4] ss:$16 sps:$4 sm:$0xff]  }
 0x2f6   :  { %v3449_v56 = vadd.f32 %v3440_v55, %v3261_v36  ;;  %5618 = vmatpush1.bf16.msra.mxu1 %v10106_v32  ;;  %v3442_v57 = vpop.f32.mrb[101].mxu0  ;;  %5649 = vmatprep.mubr.bf16.mxu1 %v10545_v19  ;;  %v10157_v32 = vld [vmem:[%s13295_s3 + $0xea8] ss:$16 sps:$4 sm:$0xff]  }
 0x2f7   :  { %v3450_v61 = vadd.f32 %v3442_v57, %v3262_v60  ;;  %v3444_v0 = vpop.f32.mrb[102].mxu0  ;;  %6037 = vmatpush1.bf16.msra.mxu0 %v10109_v50  ;;  %5619 = vmatprep.subr.bf16.mxu1 %v10114_v6  ;;  %v10162_v50 = vld [vmem:[%s13295_s3 + $0xda4] ss:$16 sps:$4 sm:$0xff]   ;;  %v10165_v6 = vld [vmem:[%s13295_s3 + $0xecc] ss:$16 sps:$4 sm:$0xff]  }
 0x2f8   :  { %v3023_v63 = vpop.f32.mrb[56].mxu1  ;;  %v3445_v49 = vpop.f32.mrb[103].mxu0  ;;  %6038 = vmatprep.subr.bf16.mxu0 %v10117_v40  ;;  %v10160_v57 = vld [vmem:[%s13295_s3 + $0xda0] ss:$16 sps:$4 sm:$0xff]  }
 0x2f9   :  { %v3071_v3 = vadd.f32 %v3023_v63, %v2883_v21  ;;  %v3025_v54 = vpop.f32.mrb[57].mxu1 }
 0x2fa   :  { %v3072_v35 = vadd.f32 %v3025_v54, %v2884_v25  ;;  %v3027_v47 = vpop.f32.mrb[58].mxu1  ;;  %5620 = vmatpush1.bf16.msra.mxu1 %v10112_v58  ;;  %v10166_v54 = vld [vmem:[%s13295_s3 + $0xdc0] ss:$16 sps:$4 sm:$0xff]  }
 0x2fb   :  { %v3028_v53 = vpop.f32.mrb[59].mxu1  ;;  %6039 = vmatpush1.bf16.msra.mxu0 %v10115_v2  ;;  %5621 = vmatprep.subr.bf16.mxu1 %v10120_v51  ;;  %v10171_v51 = vld [vmem:[%s13295_s3 + $0xeec] ss:$16 sps:$4 sm:$0xff]   ;;  %v10169_v47 = vld [vmem:[%s13295_s3 + $0xee8] ss:$16 sps:$4 sm:$0xff]  }
 0x2fc   :  { %6040 = vmatprep.subr.bf16.mxu0 %v10123_v52  ;;  %v10177_v53 = vld [vmem:[%s13295_s3 + $0xf0c] ss:$16 sps:$4 sm:$0xff]  }
 0x2fe   :  { %5622 = vmatpush1.bf16.msra.mxu1 %v10118_v7  ;;  %v10174_v7 = vld [vmem:[%s13295_s3 + $0xde4] ss:$16 sps:$4 sm:$0xff]  }
 0x2ff   :  { %6041 = vmatpush1.bf16.msra.mxu0 %v10121_v8  ;;  %5623 = vmatprep.subr.bf16.mxu1 %v10126_v9  ;;  %v12541_v8 = vld [vmem:[#allocation2 + $0x18] sm:$0x20]  ;;  %v10172_v9 = vld [vmem:[%s13295_s3 + $0xde0] ss:$16 sps:$4 sm:$0xff]  }
 0x300   :  { %6222 = vmatprep.subr.bf16.mxu0 %v10129_v10  ;;  %v10175_v10 = vld [vmem:[%s13295_s3 + $0xf08] ss:$16 sps:$4 sm:$0xff]  }
 0x302   :  { %5624 = vmatpush1.bf16.msra.mxu1 %v10124_v5  ;;  %8989 = vmatmul.mubr.msk.bf16.vlgmr.msra.gmra.mrb[156].mxu0 %vm946_vm5, %v5909_v12  ;;  %v10180_v5 = vld [vmem:[%s13295_s3 + $0xe04] ss:$16 sps:$4 sm:$0xff]  }
 0x303   :  { %6223 = vmatpush1.bf16.msra.mxu0 %v10127_v1  ;;  %5805 = vmatprep.subr.bf16.mxu1 %v10132_v11  ;;  %v6285_v1 = vrot.slane %v12541_v8, 5  ;;  %v10183_v11 = vld [vmem:[%s13295_s3 + $0xf2c] ss:$16 sps:$4 sm:$0xff]   ;;  %v10235_v8 = vld [vmem:[%s13295_s3 + $0x1048] ss:$16 sps:$4 sm:$0xff]  }
 0x304   :  { %6224 = vmatprep.subr.bf16.mxu0 %v10135_v13  ;;  %6254 = vmatprep.mubr.bf16.mxu0 %v10545_v19  ;;  %v10178_v13 = vld [vmem:[%s13295_s3 + $0xe00] ss:$16 sps:$4 sm:$0xff]  }
 0x305   :  { %8952 = vmatmul.mubr.msk.bf16.vlgmr.msra.gmra.mrb[112].mxu1 %vm946_vm5, %v5533_v15  ;;  %v3628_v30 = vpop.f32.mrb[104].mxu0  ;;  %v10144_v15 = vld [vmem:[%s13295_s3 + $0xd44] ss:$16 sps:$4 sm:$0xff]  }
 0x306   :  { %v3637_v23 = vadd.f32 %v3628_v30, %v3449_v56  ;;  %5806 = vmatpush1.bf16.msra.mxu1 %v10130_v16  ;;  %v3630_v36 = vpop.f32.mrb[105].mxu0  ;;  %5837 = vmatprep.mubr.bf16.mxu1 %v10545_v19  ;;  %v10181_v16 = vld [vmem:[%s13295_s3 + $0xf28] ss:$16 sps:$4 sm:$0xff]  }
 0x307   :  { %v3638_v38 = vadd.f32 %v3630_v36, %v3450_v61  ;;  %v3632_v60 = vpop.f32.mrb[106].mxu0  ;;  %6225 = vmatpush1.bf16.msra.mxu0 %v10133_v20  ;;  %5807 = vmatprep.subr.bf16.mxu1 %v10138_v17  ;;  %v10186_v20 = vld [vmem:[%s13295_s3 + $0xe24] ss:$16 sps:$4 sm:$0xff]   ;;  %v10189_v17 = vld [vmem:[%s13295_s3 + $0xf4c] ss:$16 sps:$4 sm:$0xff]  }
 0x308   :  { %v3211_v26 = vpop.f32.mrb[60].mxu1  ;;  %v3633_v14 = vpop.f32.mrb[107].mxu0  ;;  %6226 = vmatprep.subr.bf16.mxu0 %v10141_v27  ;;  %v10184_v36 = vld [vmem:[%s13295_s3 + $0xe20] ss:$16 sps:$4 sm:$0xff]  }
 0x309   :  { %v3259_v39 = vadd.f32 %v3211_v26, %v3071_v3  ;;  %v3213_v41 = vpop.f32.mrb[61].mxu1 }
 0x30a   :  { %v3260_v18 = vadd.f32 %v3213_v41, %v3072_v35  ;;  %v3215_v21 = vpop.f32.mrb[62].mxu1  ;;  %5808 = vmatpush1.bf16.msra.mxu1 %v10136_v37  ;;  %v10190_v41 = vld [vmem:[%s13295_s3 + $0xe40] ss:$16 sps:$4 sm:$0xff]  }
 0x30b   :  { %v3216_v25 = vpop.f32.mrb[63].mxu1  ;;  %6227 = vmatpush1.bf16.msra.mxu0 %v10139_v4  ;;  %5809 = vmatprep.subr.bf16.mxu1 %v10144_v15  ;;  %v10195_v15 = vld [vmem:[%s13295_s3 + $0xf6c] ss:$16 sps:$4 sm:$0xff]   ;;  %v10193_v21 = vld [vmem:[%s13295_s3 + $0xf68] ss:$16 sps:$4 sm:$0xff]  }
 0x30c   :  { %6228 = vmatprep.subr.bf16.mxu0 %v10147_v24  ;;  %v10201_v25 = vld [vmem:[%s13295_s3 + $0xf8c] ss:$16 sps:$4 sm:$0xff]  }
 0x30e   :  { %5810 = vmatpush1.bf16.msra.mxu1 %v10142_v42  ;;  %v10198_v42 = vld [vmem:[%s13295_s3 + $0xe64] ss:$16 sps:$4 sm:$0xff]  }
 0x30f   :  { %6229 = vmatpush1.bf16.msra.mxu0 %v10145_v28  ;;  %5811 = vmatprep.subr.bf16.mxu1 %v10150_v43  ;;  %v12600_v28 = vld [vmem:[#allocation2 + $0x18] sm:$0x40]  ;;  %v10196_v43 = vld [vmem:[%s13295_s3 + $0xe60] ss:$16 sps:$4 sm:$0xff]  }
 0x310   :  { %6410 = vmatprep.subr.bf16.mxu0 %v10153_v22  ;;  %v10199_v22 = vld [vmem:[%s13295_s3 + $0xf88] ss:$16 sps:$4 sm:$0xff]  }
 0x312   :  { %5812 = vmatpush1.bf16.msra.mxu1 %v10148_v44  ;;  %9007 = vmatmul.mubr.msk.bf16.vlgmr.msra.gmra.mrb[160].mxu0 %vm946_vm5, %v6097_v45  ;;  %v10204_v44 = vld [vmem:[%s13295_s3 + $0xe84] ss:$16 sps:$4 sm:$0xff]  }
 0x313   :  { %6411 = vmatpush1.bf16.msra.mxu0 %v10151_v31  ;;  %5993 = vmatprep.subr.bf16.mxu1 %v10156_v29  ;;  %v6473_v31 = vrot.slane %v12600_v28, 6  ;;  %v10207_v29 = vld [vmem:[%s13295_s3 + $0xfac] ss:$16 sps:$4 sm:$0xff]   ;;  %v10259_v28 = vld [vmem:[%s13295_s3 + $0x10c8] ss:$16 sps:$4 sm:$0xff]  }
 0x314   :  { %6412 = vmatprep.subr.bf16.mxu0 %v10159_v46  ;;  %6442 = vmatprep.mubr.bf16.mxu0 %v10545_v19  ;;  %v10202_v46 = vld [vmem:[%s13295_s3 + $0xe80] ss:$16 sps:$4 sm:$0xff]  }
 0x315   :  { %8970 = vmatmul.mubr.msk.bf16.vlgmr.msra.gmra.mrb[116].mxu1 %vm946_vm5, %v5721_v62  ;;  %v3816_v40 = vpop.f32.mrb[108].mxu0  ;;  %v10168_v62 = vld [vmem:[%s13295_s3 + $0xdc4] ss:$16 sps:$4 sm:$0xff]  }
 0x316   :  { %v3825_v55 = vadd.f32 %v3816_v40, %v3637_v23  ;;  %5994 = vmatpush1.bf16.msra.mxu1 %v10154_v48  ;;  %v3818_v56 = vpop.f32.mrb[109].mxu0  ;;  %6025 = vmatprep.mubr.bf16.mxu1 %v10545_v19  ;;  %v10205_v48 = vld [vmem:[%s13295_s3 + $0xfa8] ss:$16 sps:$4 sm:$0xff]  }
 0x317   :  { %v3826_v58 = vadd.f32 %v3818_v56, %v3638_v38  ;;  %v3820_v61 = vpop.f32.mrb[110].mxu0  ;;  %6413 = vmatpush1.bf16.msra.mxu0 %v10157_v32  ;;  %5995 = vmatprep.subr.bf16.mxu1 %v10162_v50  ;;  %v10210_v32 = vld [vmem:[%s13295_s3 + $0xea4] ss:$16 sps:$4 sm:$0xff]   ;;  %v10213_v50 = vld [vmem:[%s13295_s3 + $0xfcc] ss:$16 sps:$4 sm:$0xff]  }
 0x318   :  { %v3399_v0 = vpop.f32.mrb[64].mxu1  ;;  %v3821_v2 = vpop.f32.mrb[111].mxu0  ;;  %6414 = vmatprep.subr.bf16.mxu0 %v10165_v6  ;;  %v10208_v56 = vld [vmem:[%s13295_s3 + $0xea0] ss:$16 sps:$4 sm:$0xff]  }
 0x319   :  { %v3447_v63 = vadd.f32 %v3399_v0, %v3259_v39  ;;  %v3401_v49 = vpop.f32.mrb[65].mxu1 }
 0x31a   :  { %v3448_v52 = vadd.f32 %v3401_v49, %v3260_v18  ;;  %v3403_v3 = vpop.f32.mrb[66].mxu1  ;;  %5996 = vmatpush1.bf16.msra.mxu1 %v10160_v57  ;;  %v10214_v49 = vld [vmem:[%s13295_s3 + $0xec0] ss:$16 sps:$4 sm:$0xff]  }
 0x31b   :  { %v3404_v35 = vpop.f32.mrb[67].mxu1  ;;  %6415 = vmatpush1.bf16.msra.mxu0 %v10163_v33  ;;  %5997 = vmatprep.subr.bf16.mxu1 %v10168_v62  ;;  %v10219_v62 = vld [vmem:[%s13295_s3 + $0xfec] ss:$16 sps:$4 sm:$0xff]   ;;  %v10217_v3 = vld [vmem:[%s13295_s3 + $0xfe8] ss:$16 sps:$4 sm:$0xff]  }
 0x31c   :  { %6416 = vmatprep.subr.bf16.mxu0 %v10171_v51  ;;  %v10225_v35 = vld [vmem:[%s13295_s3 + $0x100c] ss:$16 sps:$4 sm:$0xff]  }
 0x31e   :  { %5998 = vmatpush1.bf16.msra.mxu1 %v10166_v54  ;;  %v10222_v54 = vld [vmem:[%s13295_s3 + $0xee4] ss:$16 sps:$4 sm:$0xff]  }
 0x31f   :  { %6417 = vmatpush1.bf16.msra.mxu0 %v10169_v47  ;;  %5999 = vmatprep.subr.bf16.mxu1 %v10174_v7  ;;  %v12659_v47 = vld [vmem:[#allocation2 + $0x18] sm:$0x80]  ;;  %v10220_v7 = vld [vmem:[%s13295_s3 + $0xee0] ss:$16 sps:$4 sm:$0xff]  }
 0x320   :  { %6598 = vmatprep.subr.bf16.mxu0 %v10177_v53  ;;  %v10223_v53 = vld [vmem:[%s13295_s3 + $0x1008] ss:$16 sps:$4 sm:$0xff]  }
 0x322   :  { %6000 = vmatpush1.bf16.msra.mxu1 %v10172_v9  ;;  %9025 = vmatmul.mubr.msk.bf16.vlgmr.msra.gmra.mrb[164].mxu0 %vm946_vm5, %v6285_v1  ;;  %v10228_v9 = vld [vmem:[%s13295_s3 + $0xf04] ss:$16 sps:$4 sm:$0xff]  }
 0x323   :  { %6599 = vmatpush1.bf16.msra.mxu0 %v10175_v10  ;;  %6181 = vmatprep.subr.bf16.mxu1 %v10180_v5  ;;  %v6661_v10 = vrot.slane %v12659_v47, 7  ;;  %v10231_v5 = vld [vmem:[%s13295_s3 + $0x102c] ss:$16 sps:$4 sm:$0xff]   ;;  %v10283_v47 = vld [vmem:[%s13295_s3 + $0x1148] ss:$16 sps:$4 sm:$0xff]  }
 0x324   :  { %6600 = vmatprep.subr.bf16.mxu0 %v10183_v11  ;;  %6630 = vmatprep.mubr.bf16.mxu0 %v10545_v19  ;;  %v10226_v11 = vld [vmem:[%s13295_s3 + $0xf00] ss:$16 sps:$4 sm:$0xff]  }
 0x325   :  { %8988 = vmatmul.mubr.msk.bf16.vlgmr.msra.gmra.mrb[120].mxu1 %vm946_vm5, %v5909_v12  ;;  %v4002_v27 = vpop.f32.mrb[112].mxu0  ;;  %v10192_v12 = vld [vmem:[%s13295_s3 + $0xe44] ss:$16 sps:$4 sm:$0xff]  }
 0x326   :  { %v4011_v30 = vadd.f32 %v4002_v27, %v3825_v55  ;;  %6182 = vmatpush1.bf16.msra.mxu1 %v10178_v13  ;;  %v4004_v23 = vpop.f32.mrb[113].mxu0  ;;  %6213 = vmatprep.mubr.bf16.mxu1 %v10545_v19  ;;  %v10229_v13 = vld [vmem:[%s13295_s3 + $0x1028] ss:$16 sps:$4 sm:$0xff]  }
 0x327   :  { %v4012_v37 = vadd.f32 %v4004_v23, %v3826_v58  ;;  %v4006_v38 = vpop.f32.mrb[114].mxu0  ;;  %6601 = vmatpush1.bf16.msra.mxu0 %v10181_v16  ;;  %6183 = vmatprep.subr.bf16.mxu1 %v10186_v20  ;;  %v10234_v16 = vld [vmem:[%s13295_s3 + $0xf24] ss:$16 sps:$4 sm:$0xff]   ;;  %v10237_v20 = vld [vmem:[%s13295_s3 + $0x104c] ss:$16 sps:$4 sm:$0xff]  }
 0x328   :  { %v3587_v60 = vpop.f32.mrb[68].mxu1  ;;  %v4007_v4 = vpop.f32.mrb[115].mxu0  ;;  %6602 = vmatprep.subr.bf16.mxu0 %v10189_v17  ;;  %v10232_v23 = vld [vmem:[%s13295_s3 + $0xf20] ss:$16 sps:$4 sm:$0xff]  }
 0x329   :  { %v3635_v26 = vadd.f32 %v3587_v60, %v3447_v63  ;;  %v3589_v14 = vpop.f32.mrb[69].mxu1 }
 0x32a   :  { %v3636_v24 = vadd.f32 %v3589_v14, %v3448_v52  ;;  %v3591_v39 = vpop.f32.mrb[70].mxu1  ;;  %6184 = vmatpush1.bf16.msra.mxu1 %v10184_v36  ;;  %v10238_v14 = vld [vmem:[%s13295_s3 + $0xf40] ss:$16 sps:$4 sm:$0xff]  }
 0x32b   :  { %v3592_v18 = vpop.f32.mrb[71].mxu1  ;;  %6603 = vmatpush1.bf16.msra.mxu0 %v10187_v59  ;;  %6185 = vmatprep.subr.bf16.mxu1 %v10192_v12  ;;  %v10243_v12 = vld [vmem:[%s13295_s3 + $0x106c] ss:$16 sps:$4 sm:$0xff]   ;;  %v10241_v39 = vld [vmem:[%s13295_s3 + $0x1068] ss:$16 sps:$4 sm:$0xff]  }
 0x32c   :  { %6604 = vmatprep.subr.bf16.mxu0 %v10195_v15  ;;  %v10249_v18 = vld [vmem:[%s13295_s3 + $0x108c] ss:$16 sps:$4 sm:$0xff]  }
 0x32e   :  { %6186 = vmatpush1.bf16.msra.mxu1 %v10190_v41  ;;  %v10246_v41 = vld [vmem:[%s13295_s3 + $0xf64] ss:$16 sps:$4 sm:$0xff]  }
 0x32f   :  { %6605 = vmatpush1.bf16.msra.mxu0 %v10193_v21  ;;  %6187 = vmatprep.subr.bf16.mxu1 %v10198_v42  ;;  %v10244_v21 = vld [vmem:[%s13295_s3 + $0xf60] ss:$16 sps:$4 sm:$0xff]   ;;  %v10247_v42 = vld [vmem:[%s13295_s3 + $0x1088] ss:$16 sps:$4 sm:$0xff]  }
 0x330   :  { %6786 = vmatprep.subr.bf16.mxu0 %v10201_v25  ;;  %v10252_v25 = vld [vmem:[%s13295_s3 + $0xf84] ss:$16 sps:$4 sm:$0xff]  }
 0x332   :  { %6188 = vmatpush1.bf16.msra.mxu1 %v10196_v43  ;;  %9043 = vmatmul.mubr.msk.bf16.vlgmr.msra.gmra.mrb[168].mxu0 %vm946_vm5, %v6473_v31  ;;  %v10255_v43 = vld [vmem:[%s13295_s3 + $0x10ac] ss:$16 sps:$4 sm:$0xff]  }
 0x333   :  { %6787 = vmatpush1.bf16.msra.mxu0 %v10199_v22  ;;  %6369 = vmatprep.subr.bf16.mxu1 %v10204_v44  ;;  %v12730_v22 = vld [vmem:[#allocation2 + $0x20] sm:$0x1] }
 0x334   :  { %6788 = vmatprep.subr.bf16.mxu0 %v10207_v29  ;;  %6818 = vmatprep.mubr.bf16.mxu0 %v10545_v19  ;;  %v10250_v44 = vld [vmem:[%s13295_s3 + $0xf80] ss:$16 sps:$4 sm:$0xff]   ;;  %v10253_v29 = vld [vmem:[%s13295_s3 + $0x10a8] ss:$16 sps:$4 sm:$0xff]  }
 0x335   :  { %9006 = vmatmul.mubr.msk.bf16.vlgmr.msra.gmra.mrb[124].mxu1 %vm946_vm5, %v6097_v45  ;;  %v4190_v6 = vpop.f32.mrb[116].mxu0  ;;  %v10216_v45 = vld [vmem:[%s13295_s3 + $0xec4] ss:$16 sps:$4 sm:$0xff]  }
 0x336   :  { %v4199_v40 = vadd.f32 %v4190_v6, %v4011_v30  ;;  %6370 = vmatpush1.bf16.msra.mxu1 %v10202_v46  ;;  %v4192_v55 = vpop.f32.mrb[117].mxu0  ;;  %6401 = vmatprep.mubr.bf16.mxu1 %v10545_v19  ;;  %v10258_v46 = vld [vmem:[%s13295_s3 + $0xfa4] ss:$16 sps:$4 sm:$0xff]  }
 0x337   :  { %v4200_v57 = vadd.f32 %v4192_v55, %v4012_v37  ;;  %v4194_v58 = vpop.f32.mrb[118].mxu0  ;;  %6789 = vmatpush1.bf16.msra.mxu0 %v10205_v48  ;;  %6371 = vmatprep.subr.bf16.mxu1 %v10210_v32  ;;  %v10261_v48 = vld [vmem:[%s13295_s3 + $0x10cc] ss:$16 sps:$4 sm:$0xff]  }
 0x338   :  { %v3775_v61 = vpop.f32.mrb[72].mxu1  ;;  %v4195_v33 = vpop.f32.mrb[119].mxu0  ;;  %6790 = vmatprep.subr.bf16.mxu0 %v10213_v50 }
 0x339   :  { %v3823_v0 = vadd.f32 %v3775_v61, %v3635_v26  ;;  %v3777_v2 = vpop.f32.mrb[73].mxu1 }
 0x33a   :  { %v3824_v51 = vadd.f32 %v3777_v2, %v3636_v24  ;;  %v3779_v63 = vpop.f32.mrb[74].mxu1  ;;  %6372 = vmatpush1.bf16.msra.mxu1 %v10208_v56 }
 0x33b   :  { %v3780_v52 = vpop.f32.mrb[75].mxu1  ;;  %6791 = vmatpush1.bf16.msra.mxu0 %v10211_v34  ;;  %6373 = vmatprep.subr.bf16.mxu1 %v10216_v45  ;;  %v10267_v34 = vld [vmem:[%s13295_s3 + $0x10ec] ss:$16 sps:$4 sm:$0xff]   ;;  %v10270_v63 = vld [vmem:[%s13295_s3 + $0xfe4] ss:$16 sps:$4 sm:$0xff]  }
 0x33c   :  { %6792 = vmatprep.subr.bf16.mxu0 %v10219_v62  ;;  %v12775_v52 = vld [vmem:[#allocation2 + $0x20] sm:$0x2] }
 0x33e   :  { %6374 = vmatpush1.bf16.msra.mxu1 %v10214_v49  ;;  %v10273_v49 = vld [vmem:[%s13295_s3 + $0x110c] ss:$16 sps:$4 sm:$0xff]  }
 0x33f   :  { %6793 = vmatpush1.bf16.msra.mxu0 %v10217_v3  ;;  %6375 = vmatprep.subr.bf16.mxu1 %v10222_v54  ;;  %v10268_v3 = vld [vmem:[%s13295_s3 + $0xfe0] ss:$16 sps:$4 sm:$0xff]   ;;  %v10271_v54 = vld [vmem:[%s13295_s3 + $0x1108] ss:$16 sps:$4 sm:$0xff]  }
 0x340   :  { %6972 = vmatprep.subr.bf16.mxu0 %v10225_v35  ;;  %v10276_v35 = vld [vmem:[%s13295_s3 + $0x1004] ss:$16 sps:$4 sm:$0xff]  }
 0x342   :  { %6376 = vmatpush1.bf16.msra.mxu1 %v10220_v7  ;;  %9061 = vmatmul.mubr.msk.bf16.vlgmr.msra.gmra.mrb[172].mxu0 %vm946_vm5, %v6661_v10  ;;  %v7035_v7 = vrot.slane %v12775_v52, 1 }
 0x343   :  { %6973 = vmatpush1.bf16.msra.mxu0 %v10223_v53  ;;  %6557 = vmatprep.subr.bf16.mxu1 %v10228_v9  ;;  %v10279_v53 = vld [vmem:[%s13295_s3 + $0x112c] ss:$16 sps:$4 sm:$0xff]   ;;  %v10274_v9 = vld [vmem:[%s13295_s3 + $0x1000] ss:$16 sps:$4 sm:$0xff]  }
 0x344   :  { %6974 = vmatprep.subr.bf16.mxu0 %v10231_v5  ;;  %7004 = vmatprep.mubr.bf16.mxu0 %v10545_v19  ;;  %v10277_v5 = vld [vmem:[%s13295_s3 + $0x1128] ss:$16 sps:$4 sm:$0xff]  }
 0x345   :  { %9024 = vmatmul.mubr.msk.bf16.vlgmr.msra.gmra.mrb[128].mxu1 %vm946_vm5, %v6285_v1  ;;  %v4378_v17 = vpop.f32.mrb[120].mxu0  ;;  %v10240_v1 = vld [vmem:[%s13295_s3 + $0xf44] ss:$16 sps:$4 sm:$0xff]  }
 0x346   :  { %v4387_v27 = vadd.f32 %v4378_v17, %v4199_v40  ;;  %6558 = vmatpush1.bf16.msra.mxu1 %v10226_v11  ;;  %v4380_v30 = vpop.f32.mrb[121].mxu0  ;;  %6589 = vmatprep.mubr.bf16.mxu1 %v10545_v19  ;;  %v10256_v40 = vld [vmem:[%s13295_s3 + $0xfa0] ss:$16 sps:$4 sm:$0xff]   ;;  %v10282_v11 = vld [vmem:[%s13295_s3 + $0x1024] ss:$16 sps:$4 sm:$0xff]  }
 0x347   :  { %v4388_v36 = vadd.f32 %v4380_v30, %v4200_v57  ;;  %v4382_v37 = vpop.f32.mrb[122].mxu0  ;;  %6975 = vmatpush1.bf16.msra.mxu0 %v10229_v13  ;;  %6559 = vmatprep.subr.bf16.mxu1 %v10234_v16  ;;  %v10285_v13 = vld [vmem:[%s13295_s3 + $0x114c] ss:$16 sps:$4 sm:$0xff]  }
 0x348   :  { %v3961_v38 = vpop.f32.mrb[76].mxu1  ;;  %v4383_v59 = vpop.f32.mrb[123].mxu0  ;;  %6976 = vmatprep.subr.bf16.mxu0 %v10237_v20 }
 0x349   :  { %v4009_v60 = vadd.f32 %v3961_v38, %v3823_v0  ;;  %v3963_v4 = vpop.f32.mrb[77].mxu1  ;;  %v10262_v0 = vld [vmem:[%s13295_s3 + $0xfc0] ss:$16 sps:$4 sm:$0xff]  }
 0x34a   :  { %v4010_v15 = vadd.f32 %v3963_v4, %v3824_v51  ;;  %v3965_v26 = vpop.f32.mrb[78].mxu1  ;;  %6560 = vmatpush1.bf16.msra.mxu1 %v10232_v23  ;;  %v10265_v51 = vld [vmem:[%s13295_s3 + $0x10e8] ss:$16 sps:$4 sm:$0xff]  }
 0x34b   :  { %v3966_v24 = vpop.f32.mrb[79].mxu1  ;;  %6977 = vmatpush1.bf16.msra.mxu0 %v10235_v8  ;;  %6561 = vmatprep.subr.bf16.mxu1 %v10240_v1  ;;  %v10291_v8 = vld [vmem:[%s13295_s3 + $0x116c] ss:$16 sps:$4 sm:$0xff]   ;;  %v10294_v26 = vld [vmem:[%s13295_s3 + $0x1064] ss:$16 sps:$4 sm:$0xff]  }
 0x34c   :  { %6978 = vmatprep.subr.bf16.mxu0 %v10243_v12  ;;  %v12834_v24 = vld [vmem:[#allocation2 + $0x20] sm:$0x4] }
 0x34e   :  { %6562 = vmatpush1.bf16.msra.mxu1 %v10238_v14  ;;  %v10297_v14 = vld [vmem:[%s13295_s3 + $0x118c] ss:$16 sps:$4 sm:$0xff]  }
 0x34f   :  { %6979 = vmatpush1.bf16.msra.mxu0 %v10241_v39  ;;  %6563 = vmatprep.subr.bf16.mxu1 %v10246_v41  ;;  %v10292_v39 = vld [vmem:[%s13295_s3 + $0x1060] ss:$16 sps:$4 sm:$0xff]   ;;  %v10295_v41 = vld [vmem:[%s13295_s3 + $0x1188] ss:$16 sps:$4 sm:$0xff]  }
 0x350   :  { %7160 = vmatprep.subr.bf16.mxu0 %v10249_v18  ;;  %v10300_v18 = vld [vmem:[%s13295_s3 + $0x1084] ss:$16 sps:$4 sm:$0xff]  }
 0x352   :  { %6564 = vmatpush1.bf16.msra.mxu1 %v10244_v21  ;;  %9079 = vmatmul.mubr.msk.bf16.vlgmr.msra.gmra.mrb[176].mxu0 %vm946_vm5, %v12730_v22  ;;  %v7223_v21 = vrot.slane %v12834_v24, 2 }
 0x353   :  { %7161 = vmatpush1.bf16.msra.mxu0 %v10247_v42  ;;  %6745 = vmatprep.subr.bf16.mxu1 %v10252_v25  ;;  %v10303_v42 = vld [vmem:[%s13295_s3 + $0x11ac] ss:$16 sps:$4 sm:$0xff]   ;;  %v10298_v25 = vld [vmem:[%s13295_s3 + $0x1080] ss:$16 sps:$4 sm:$0xff]  }
 0x354   :  { %7162 = vmatprep.subr.bf16.mxu0 %v10255_v43  ;;  %7192 = vmatprep.mubr.bf16.mxu0 %v10545_v19  ;;  %v10301_v43 = vld [vmem:[%s13295_s3 + $0x11a8] ss:$16 sps:$4 sm:$0xff]  }
 0x355   :  { %9042 = vmatmul.mubr.msk.bf16.vlgmr.msra.gmra.mrb[132].mxu1 %vm946_vm5, %v6473_v31  ;;  %v4566_v32 = vpop.f32.mrb[124].mxu0  ;;  %v10264_v31 = vld [vmem:[%s13295_s3 + $0xfc4] ss:$16 sps:$4 sm:$0xff]  }
 0x356   :  { %v4575_v50 = vadd.f32 %v4566_v32, %v4387_v27  ;;  %6746 = vmatpush1.bf16.msra.mxu1 %v10250_v44  ;;  %v4568_v6 = vpop.f32.mrb[125].mxu0  ;;  %6777 = vmatprep.mubr.bf16.mxu1 %v10545_v19  ;;  %v10280_v27 = vld [vmem:[%s13295_s3 + $0x1020] ss:$16 sps:$4 sm:$0xff]   ;;  %v10306_v44 = vld [vmem:[%s13295_s3 + $0x10a4] ss:$16 sps:$4 sm:$0xff]  }
 0x357   :  { %v4576_v55 = vadd.f32 %v4568_v6, %v4388_v36  ;;  %v4570_v56 = vpop.f32.mrb[126].mxu0  ;;  %7163 = vmatpush1.bf16.msra.mxu0 %v10253_v29  ;;  %6747 = vmatprep.subr.bf16.mxu1 %v10258_v46  ;;  %v10309_v29 = vld [vmem:[%s13295_s3 + $0x11cc] ss:$16 sps:$4 sm:$0xff]  }
 0x358   :  { %v4149_v57 = vpop.f32.mrb[80].mxu1  ;;  %v4571_v58 = vpop.f32.mrb[127].mxu0  ;;  %7164 = vmatprep.subr.bf16.mxu0 %v10261_v48 }
 0x359   :  { %v4197_v45 = vadd.f32 %v4149_v57, %v4009_v60  ;;  %v4151_v61 = vpop.f32.mrb[81].mxu1  ;;  %v10286_v60 = vld [vmem:[%s13295_s3 + $0x1040] ss:$16 sps:$4 sm:$0xff]  }
 0x35a   :  { %v4198_v33 = vadd.f32 %v4151_v61, %v4010_v15  ;;  %v4153_v62 = vpop.f32.mrb[82].mxu1  ;;  %6748 = vmatpush1.bf16.msra.mxu1 %v10256_v40  ;;  %v10289_v15 = vld [vmem:[%s13295_s3 + $0x1168] ss:$16 sps:$4 sm:$0xff]   ;;  %v10310_v61 = vld [vmem:[%s13295_s3 + $0x10c0] ss:$16 sps:$4 sm:$0xff]  }
 0x35b   :  { %v4154_v2 = vpop.f32.mrb[83].mxu1  ;;  %7165 = vmatpush1.bf16.msra.mxu0 %v10259_v28  ;;  %6749 = vmatprep.subr.bf16.mxu1 %v10264_v31  ;;  %v10315_v31 = vld [vmem:[%s13295_s3 + $0x11ec] ss:$16 sps:$4 sm:$0xff]   ;;  %v10313_v62 = vld [vmem:[%s13295_s3 + $0x11e8] ss:$16 sps:$4 sm:$0xff]  }
 0x35c   :  { %7166 = vmatprep.subr.bf16.mxu0 %v10267_v34  ;;  %v12889_v2 = vld [vmem:[#allocation2 + $0x20] sm:$0x8] }
 0x35e   :  { %6750 = vmatpush1.bf16.msra.mxu1 %v10262_v0  ;;  %v10318_v0 = vld [vmem:[%s13295_s3 + $0x10e4] ss:$16 sps:$4 sm:$0xff]  }
 0x35f   :  { %7167 = vmatpush1.bf16.msra.mxu0 %v10265_v51  ;;  %6751 = vmatprep.subr.bf16.mxu1 %v10270_v63  ;;  %v10316_v51 = vld [vmem:[%s13295_s3 + $0x10e0] ss:$16 sps:$4 sm:$0xff]   ;;  %v10321_v63 = vld [vmem:[%s13295_s3 + $0x1104] ss:$16 sps:$4 sm:$0xff]  }
 0x360   :  { %7348 = vmatprep.subr.bf16.mxu0 %v10273_v49  ;;  %v7411_v49 = vrot.slane %v12889_v2, 3 }
 0x362   :  { %6752 = vmatpush1.bf16.msra.mxu1 %v10268_v3  ;;  %9097 = vmatmul.mubr.msk.bf16.vlgmr.msra.gmra.mrb[180].mxu0 %vm946_vm5, %v7035_v7  ;;  %v10319_v3 = vld [vmem:[%s13295_s3 + $0x1100] ss:$16 sps:$4 sm:$0xff]  }
 0x363   :  { %7349 = vmatpush1.bf16.msra.mxu0 %v10271_v54  ;;  %6931 = vmatprep.subr.bf16.mxu1 %v10276_v35  ;;  %v10324_v54 = vld [vmem:[%s13295_s3 + $0x1124] ss:$16 sps:$4 sm:$0xff]  }
 0x364   :  { %7350 = vmatprep.subr.bf16.mxu0 %v10279_v53  ;;  %7380 = vmatprep.mubr.bf16.mxu0 %v10545_v19 }
 0x365   :  { %9060 = vmatmul.mubr.msk.bf16.vlgmr.msra.gmra.mrb[136].mxu1 %vm946_vm5, %v6661_v10  ;;  %v4754_v16 = vpop.f32.mrb[128].mxu0  ;;  %v10288_v10 = vld [vmem:[%s13295_s3 + $0x1044] ss:$16 sps:$4 sm:$0xff]  }
 0x366   :  { %v4763_v20 = vadd.f32 %v4754_v16, %v4575_v50  ;;  %6932 = vmatpush1.bf16.msra.mxu1 %v10274_v9  ;;  %v4756_v17 = vpop.f32.mrb[129].mxu0  ;;  %6963 = vmatprep.mubr.bf16.mxu1 %v10545_v19  ;;  %v10304_v50 = vld [vmem:[%s13295_s3 + $0x10a0] ss:$16 sps:$4 sm:$0xff]   ;;  %v10327_v16 = vld [vmem:[%s13295_s3 + $0x1144] ss:$16 sps:$4 sm:$0xff]  }
 0x367   :  { %v4764_v30 = vadd.f32 %v4756_v17, %v4576_v55  ;;  %v4758_v23 = vpop.f32.mrb[130].mxu0  ;;  %7351 = vmatpush1.bf16.msra.mxu0 %v10277_v5  ;;  %6933 = vmatprep.subr.bf16.mxu1 %v10282_v11  ;;  %v10307_v55 = vld [vmem:[%s13295_s3 + $0x11c8] ss:$16 sps:$4 sm:$0xff]   ;;  %v10322_v5 = vld [vmem:[%s13295_s3 + $0x1120] ss:$16 sps:$4 sm:$0xff]  }
 0x368   :  { %v4337_v36 = vpop.f32.mrb[84].mxu1  ;;  %v4759_v37 = vpop.f32.mrb[131].mxu0  ;;  %7352 = vmatprep.subr.bf16.mxu0 %v10285_v13  ;;  %v10325_v23 = vld [vmem:[%s13295_s3 + $0x1140] ss:$16 sps:$4 sm:$0xff]  }
 0x369   :  { %v4385_v1 = vadd.f32 %v4337_v36, %v4197_v45  ;;  %v4339_v38 = vpop.f32.mrb[85].mxu1  ;;  %v10328_v36 = vld [vmem:[%s13295_s3 + $0x1160] ss:$16 sps:$4 sm:$0xff]   ;;  %v10333_v37 = vld [vmem:[%s13295_s3 + $0x1184] ss:$16 sps:$4 sm:$0xff]  }
 0x36a   :  { %v4386_v59 = vadd.f32 %v4339_v38, %v4198_v33  ;;  %v4341_v12 = vpop.f32.mrb[86].mxu1  ;;  %6934 = vmatpush1.bf16.msra.mxu1 %v10280_v27 }
 0x36b   :  { %v4342_v4 = vpop.f32.mrb[87].mxu1  ;;  %7353 = vmatpush1.bf16.msra.mxu0 %v10283_v47  ;;  %6935 = vmatprep.subr.bf16.mxu1 %v10288_v10  ;;  %v10330_v10 = vld [vmem:[%s13295_s3 + $0x1164] ss:$16 sps:$4 sm:$0xff]  }
 0x36c   :  { %7354 = vmatprep.subr.bf16.mxu0 %v10291_v8  ;;  %v10331_v8 = vld [vmem:[%s13295_s3 + $0x1180] ss:$16 sps:$4 sm:$0xff]  }
 0x36e   :  { %6936 = vmatpush1.bf16.msra.mxu1 %v10286_v60  ;;  %v10334_v60 = vld [vmem:[%s13295_s3 + $0x11a0] ss:$16 sps:$4 sm:$0xff]  }
 0x36f   :  { %7355 = vmatpush1.bf16.msra.mxu0 %v10289_v15  ;;  %6937 = vmatprep.subr.bf16.mxu1 %v10294_v26  ;;  %v10339_v26 = vld [vmem:[%s13295_s3 + $0x11c4] ss:$16 sps:$4 sm:$0xff]  }
 0x370   :  { %7536 = vmatprep.subr.bf16.mxu0 %v10297_v14 }
 0x372   :  { %6938 = vmatpush1.bf16.msra.mxu1 %v10292_v39  ;;  %9115 = vmatmul.mubr.msk.bf16.vlgmr.msra.gmra.mrb[184].mxu0 %vm946_vm5, %v7223_v21 }
 0x373   :  { %7537 = vmatpush1.bf16.msra.mxu0 %v10295_v41  ;;  %7119 = vmatprep.subr.bf16.mxu1 %v10300_v18 }
 0x374   :  { %7538 = vmatprep.subr.bf16.mxu0 %v10303_v42  ;;  %7568 = vmatprep.mubr.bf16.mxu0 %v10545_v19  ;;  %v10337_v42 = vld [vmem:[%s13295_s3 + $0x11c0] ss:$16 sps:$4 sm:$0xff]  }
 0x375   :  { %9078 = vmatmul.mubr.msk.bf16.vlgmr.msra.gmra.mrb[140].mxu1 %vm946_vm5, %v12730_v22  ;;  %v4942_v46 = vpop.f32.mrb[132].mxu0  ;;  %v10312_v22 = vld [vmem:[%s13295_s3 + $0x10c4] ss:$16 sps:$4 sm:$0xff]  }
 0x376   :  { %v4951_v48 = vadd.f32 %v4942_v46, %v4763_v20  ;;  %7120 = vmatpush1.bf16.msra.mxu1 %v10298_v25  ;;  %v4944_v32 = vpop.f32.mrb[133].mxu0  ;;  %7151 = vmatprep.mubr.bf16.mxu1 %v10545_v19 }
 0x377   :  { %v4952_v6 = vadd.f32 %v4944_v32, %v4764_v30  ;;  %v4946_v40 = vpop.f32.mrb[134].mxu0  ;;  %7539 = vmatpush1.bf16.msra.mxu0 %v10301_v43  ;;  %7121 = vmatprep.subr.bf16.mxu1 %v10306_v44  ;;  %v10340_v43 = vld [vmem:[%s13295_s3 + $0x11e0] ss:$16 sps:$4 sm:$0xff]  }
 0x378   :  { %v4525_v56 = vpop.f32.mrb[88].mxu1  ;;  %v4947_v28 = vpop.f32.mrb[135].mxu0  ;;  %7540 = vmatprep.subr.bf16.mxu0 %v10309_v29 }
 0x379   :  { %v4573_v57 = vadd.f32 %v4525_v56, %v4385_v1  ;;  %v4527_v58 = vpop.f32.mrb[89].mxu1  ;;  %v10336_v1 = vld [vmem:[%s13295_s3 + $0x11a4] ss:$16 sps:$4 sm:$0xff]  }
 0x37a   :  { %v4574_v34 = vadd.f32 %v4527_v58, %v4386_v59  ;;  %v4529_v45 = vpop.f32.mrb[90].mxu1  ;;  %7122 = vmatpush1.bf16.msra.mxu1 %v10304_v50 }
 0x37b   :  { %v4530_v33 = vpop.f32.mrb[91].mxu1  ;;  %7541 = vmatpush1.bf16.msra.mxu0 %v10307_v55  ;;  %7123 = vmatprep.subr.bf16.mxu1 %v10312_v22 }
 0x37c   :  { %7542 = vmatprep.subr.bf16.mxu0 %v10315_v31 }
 0x37e   :  { %7124 = vmatpush1.bf16.msra.mxu1 %v10310_v61 }
 0x37f   :  { %7543 = vmatpush1.bf16.msra.mxu0 %v10313_v62  ;;  %7125 = vmatprep.subr.bf16.mxu1 %v10318_v0 }
 0x382   :  { %7126 = vmatpush1.bf16.msra.mxu1 %v10316_v51  ;;  %9133 = vmatmul.mubr.msk.bf16.vlgmr.msra.gmra.mrb[188].mxu0 %vm946_vm5, %v7411_v49 }
 0x383   :  { %7307 = vmatprep.subr.bf16.mxu1 %v10321_v63 }
 0x385   :  { %9096 = vmatmul.mubr.msk.bf16.vlgmr.msra.gmra.mrb[144].mxu1 %vm946_vm5, %v7035_v7  ;;  %v5130_v35 = vpop.f32.mrb[136].mxu0 }
 0x386   :  { %v5139_v53 = vadd.f32 %v5130_v35, %v4951_v48  ;;  %7308 = vmatpush1.bf16.msra.mxu1 %v10319_v3  ;;  %v5132_v9 = vpop.f32.mrb[137].mxu0  ;;  %7339 = vmatprep.mubr.bf16.mxu1 %v10545_v19 }
 0x387   :  { %v5140_v11 = vadd.f32 %v5132_v9, %v4952_v6  ;;  %v5134_v13 = vpop.f32.mrb[138].mxu0  ;;  %7309 = vmatprep.subr.bf16.mxu1 %v10324_v54 }
 0x388   :  { %v4713_v52 = vpop.f32.mrb[92].mxu1  ;;  %v5135_v20 = vpop.f32.mrb[139].mxu0 }
 0x389   :  { %v4761_v7 = vadd.f32 %v4713_v52, %v4573_v57  ;;  %v4715_v17 = vpop.f32.mrb[93].mxu1 }
 0x38a   :  { %v4762_v27 = vadd.f32 %v4715_v17, %v4574_v34  ;;  %v4717_v30 = vpop.f32.mrb[94].mxu1  ;;  %7310 = vmatpush1.bf16.msra.mxu1 %v10322_v5 }
 0x38b   :  { %v4718_v47 = vpop.f32.mrb[95].mxu1  ;;  %7311 = vmatprep.subr.bf16.mxu1 %v10327_v16  ;;  %v7583_v30 = vlaneseq }
 0x38e   :  { %7312 = vmatpush1.bf16.msra.mxu1 %v10325_v23 }
 0x38f   :  { %7313 = vmatprep.subr.bf16.mxu1 %v10330_v10 }
 0x392   :  { %7314 = vmatpush1.bf16.msra.mxu1 %v10328_v36 }
 0x393   :  { %7495 = vmatprep.subr.bf16.mxu1 %v10333_v37  ;;  %v12953_v37 = vshrl.u32 %v7583_v30, 7 }
 0x395   :  { %9114 = vmatmul.mubr.msk.bf16.vlgmr.msra.gmra.mrb[148].mxu1 %vm946_vm5, %v7223_v21  ;;  %v5318_v38 = vpop.f32.mrb[140].mxu0 }
 0x396   :  { %v5327_v59 = vadd.f32 %v5318_v38, %v5139_v53  ;;  %7496 = vmatpush1.bf16.msra.mxu1 %v10331_v8  ;;  %v5320_v12 = vpop.f32.mrb[141].mxu0  ;;  %7527 = vmatprep.mubr.bf16.mxu1 %v10545_v19  ;;  %v10342_v19 = vld [vmem:[%s13295_s3 + $0x11e4] ss:$16 sps:$4 sm:$0xff]   ;;  %v12958_v38 = vld [vmem:[%s13296_s4] sm:$0xf] }
 0x397   :  { %v5328_v4 = vadd.f32 %v5320_v12, %v5140_v11  ;;  %v5322_v15 = vpop.f32.mrb[142].mxu0  ;;  %7497 = vmatprep.subr.bf16.mxu1 %v10336_v1 }
 0x398   :  { %v4901_v14 = vpop.f32.mrb[96].mxu1  ;;  %v5323_v24 = vpop.f32.mrb[143].mxu0 }
 0x399   :  { %v4949_v39 = vadd.f32 %v4901_v14, %v4761_v7  ;;  %v4903_v41 = vpop.f32.mrb[97].mxu1  ;;  %v10343_v14 = vld [vmem:[%s13297_s5] ss:$8 sps:$4 sm:$0xff]   ;;  %v10348_v24 = vld [vmem:[%s13297_s5 + $0x14] ss:$8 sps:$4 sm:$0xff]  }
 0x39a   :  { %v4950_v18 = vadd.f32 %v4903_v41, %v4762_v27  ;;  %v4905_v21 = vpop.f32.mrb[98].mxu1  ;;  %7498 = vmatpush1.bf16.msra.mxu1 %v10334_v60  ;;  %v7593_v60 = vsub.s32 2, %v12953_v37  ;;  %v10346_v41 = vld [vmem:[%s13297_s5 + $0x10] ss:$8 sps:$4 sm:$0xff]  }
 0x39b   :  { %v4906_v25 = vpop.f32.mrb[99].mxu1  ;;  %7499 = vmatprep.subr.bf16.mxu1 %v10339_v26  ;;  %v10345_v26 = vld [vmem:[%s13297_s5 + $0x4] ss:$8 sps:$4 sm:$0xff]  }
 0x39c   :  { %v12962_v15 = vrot.slane %v12958_v38, %v7593_v60  ;;  %v10376_v60 = vld [vmem:[%s13297_s5 + $0xb0] ss:$8 sps:$4 sm:$0xff]  }
 0x39e   :  { %7500 = vmatpush1.bf16.msra.mxu1 %v10337_v42 }
 0x39f   :  { %7501 = vmatprep.subr.bf16.mxu1 %v10342_v19 }
 0x3a2   :  { %7502 = vmatpush1.bf16.msra.mxu1 %v10340_v43 }
 0x3a3   :  { %8039 = vmatprep.subr.bf16.mxu1 %v10345_v26  ;;  %v10379_v26 = vld [vmem:[%s13297_s5 + $0xc0] ss:$8 sps:$4 sm:$0xff]  }
 0x3a5   :  { %9132 = vmatmul.mubr.msk.bf16.vlgmr.msra.gmra.mrb[152].mxu1 %vm946_vm5, %v7411_v49  ;;  %v5504_v44 = vpop.f32.mrb[144].mxu0 }
 0x3a6   :  { %v5513_v29 = vadd.f32 %v5504_v44, %v5327_v59  ;;  %v5506_v46 = vpop.f32.mrb[145].mxu0  ;;  %8040 = vmatpush1.bf16.msra.mxu1 %v10343_v14  ;;  %v10351_v44 = vld [vmem:[%s13297_s5 + $0x24] ss:$8 sps:$4 sm:$0xff]   ;;  %v10384_v14 = vld [vmem:[%s13297_s5 + $0xd4] ss:$8 sps:$4 sm:$0xff]  }
 0x3a7   :  { %v5514_v48 = vadd.f32 %v5506_v46, %v5328_v4  ;;  %v5508_v32 = vpop.f32.mrb[146].mxu0  ;;  %8041 = vmatprep.subr.bf16.mxu1 %v10348_v24  ;;  %v10382_v24 = vld [vmem:[%s13297_s5 + $0xd0] ss:$8 sps:$4 sm:$0xff]  }
 0x3a8   :  { %v5089_v50 = vpop.f32.mrb[100].mxu1  ;;  %v5509_v6 = vpop.f32.mrb[147].mxu0 }
 0x3a9   :  { %v5137_v40 = vadd.f32 %v5089_v50, %v4949_v39  ;;  %v5091_v55 = vpop.f32.mrb[101].mxu1 }
 0x3aa   :  { %v5138_v22 = vadd.f32 %v5091_v55, %v4950_v18  ;;  %v5093_v56 = vpop.f32.mrb[102].mxu1  ;;  %8042 = vmatpush1.bf16.msra.mxu1 %v10346_v41  ;;  %v10352_v55 = vld [vmem:[%s13297_s5 + $0x30] ss:$8 sps:$4 sm:$0xff]  }
 0x3ab   :  { %v5094_v28 = vpop.f32.mrb[103].mxu1  ;;  %8043 = vmatprep.subr.bf16.mxu1 %v10351_v44  ;;  %v10355_v56 = vld [vmem:[%s13297_s5 + $0x40] ss:$8 sps:$4 sm:$0xff]  }
 0x3ac   :  { %v10360_v28 = vld [vmem:[%s13297_s5 + $0x54] ss:$8 sps:$4 sm:$0xff]  }
 0x3b5   :  { %v5692_v31 = vpop.f32.mrb[148].mxu0 }
 0x3b6   :  { %v5701_v57 = vadd.f32 %v5692_v31, %v5513_v29  ;;  %v5694_v58 = vpop.f32.mrb[149].mxu0  ;;  %v10358_v31 = vld [vmem:[%s13297_s5 + $0x50] ss:$8 sps:$4 sm:$0xff]  }
 0x3b7   :  { %v5702_v34 = vadd.f32 %v5694_v58, %v5514_v48  ;;  %v5696_v45 = vpop.f32.mrb[150].mxu0  ;;  %v10349_v48 = vld [vmem:[%s13297_s5 + $0x20] ss:$8 sps:$4 sm:$0xff]  }
 0x3b8   :  { %v5277_v61 = vpop.f32.mrb[104].mxu1  ;;  %v5697_v33 = vpop.f32.mrb[151].mxu0  ;;  %8044 = vmatpush1.bf16.msra.mxu1 %v10349_v48 }
 0x3b9   :  { %v5325_v62 = vadd.f32 %v5277_v61, %v5137_v40  ;;  %v5279_v0 = vpop.f32.mrb[105].mxu1  ;;  %v10354_v40 = vld [vmem:[%s13297_s5 + $0x34] ss:$8 sps:$4 sm:$0xff]  }
 0x3ba   :  { %v5326_v2 = vadd.f32 %v5279_v0, %v5138_v22  ;;  %v5281_v51 = vpop.f32.mrb[106].mxu1  ;;  %8045 = vmatprep.subr.bf16.mxu1 %v10354_v40  ;;  %v10357_v22 = vld [vmem:[%s13297_s5 + $0x44] ss:$8 sps:$4 sm:$0xff]   ;;  %v10388_v40 = vld [vmem:[%s13297_s5 + $0xf0] ss:$8 sps:$4 sm:$0xff]  }
 0x3bb   :  { %v5282_v63 = vpop.f32.mrb[107].mxu1  ;;  %v10366_v51 = vld [vmem:[%s13297_s5 + $0x74] ss:$8 sps:$4 sm:$0xff]  }
 0x3bc   :  { %8046 = vmatpush1.bf16.msra.mxu1 %v10352_v55  ;;  %v10393_v55 = vld [vmem:[%s13297_s5 + $0x104] ss:$8 sps:$4 sm:$0xff]  }
 0x3bd   :  { %8047 = vmatprep.subr.bf16.mxu1 %v10357_v22 }
 0x3c0   :  { %8048 = vmatpush1.bf16.msra.mxu1 %v10355_v56 }
 0x3c1   :  { %8049 = vmatprep.subr.bf16.mxu1 %v10360_v28 }
 0x3c4   :  { %8050 = vmatpush1.bf16.msra.mxu1 %v10358_v31 }
 0x3c5   :  { %v5880_v49 = vpop.f32.mrb[152].mxu0 }
 0x3c6   :  { %v5889_v3 = vadd.f32 %v5880_v49, %v5701_v57  ;;  %v5882_v54 = vpop.f32.mrb[153].mxu0  ;;  %v10363_v57 = vld [vmem:[%s13297_s5 + $0x64] ss:$8 sps:$4 sm:$0xff]  }
 0x3c7   :  { %v5890_v35 = vadd.f32 %v5882_v54, %v5702_v34  ;;  %v5884_v53 = vpop.f32.mrb[154].mxu0  ;;  %8051 = vmatprep.subr.bf16.mxu1 %v10363_v57 }
 0x3c8   :  { %v5463_v9 = vpop.f32.mrb[108].mxu1  ;;  %v5885_v5 = vpop.f32.mrb[155].mxu0  ;;  %v10364_v53 = vld [vmem:[%s13297_s5 + $0x70] ss:$8 sps:$4 sm:$0xff]  }
 0x3c9   :  { %v5511_v11 = vadd.f32 %v5463_v9, %v5325_v62  ;;  %v5465_v13 = vpop.f32.mrb[109].mxu1  ;;  %v10361_v62 = vld [vmem:[%s13297_s5 + $0x60] ss:$8 sps:$4 sm:$0xff]   ;;  %v10369_v9 = vld [vmem:[%s13297_s5 + $0x84] ss:$8 sps:$4 sm:$0xff]  }
 0x3ca   :  { %v5512_v16 = vadd.f32 %v5465_v13, %v5326_v2  ;;  %v5467_v52 = vpop.f32.mrb[110].mxu1  ;;  %8052 = vmatpush1.bf16.msra.mxu1 %v10361_v62  ;;  %v10367_v5 = vld [vmem:[%s13297_s5 + $0x80] ss:$8 sps:$4 sm:$0xff]  }
 0x3cb   :  { %v5468_v20 = vpop.f32.mrb[111].mxu1  ;;  %8053 = vmatprep.subr.bf16.mxu1 %v10366_v51 }
 0x3ce   :  { %8054 = vmatpush1.bf16.msra.mxu1 %v10364_v53 }
 0x3cf   :  { %8055 = vmatprep.subr.bf16.mxu1 %v10369_v9 }
 0x3d2   :  { %8056 = vmatpush1.bf16.msra.mxu1 %v10367_v5 }
 0x3d5   :  { %v6068_v7 = vpop.f32.mrb[156].mxu0 }
 0x3d6   :  { %v6077_v17 = vadd.f32 %v6068_v7, %v5889_v3  ;;  %v6070_v27 = vpop.f32.mrb[157].mxu0 }
 0x3d7   :  { %v6078_v23 = vadd.f32 %v6070_v27, %v5890_v35  ;;  %v6072_v47 = vpop.f32.mrb[158].mxu0 }
 0x3d8   :  { %v5651_v10 = vpop.f32.mrb[112].mxu1  ;;  %v6073_v36 = vpop.f32.mrb[159].mxu0 }
 0x3d9   :  { %v5699_v8 = vadd.f32 %v5651_v10, %v5511_v11  ;;  %v5653_v1 = vpop.f32.mrb[113].mxu1  ;;  %v10372_v11 = vld [vmem:[%s13297_s5 + $0x94] ss:$8 sps:$4 sm:$0xff]   ;;  %v10373_v36 = vld [vmem:[%s13297_s5 + $0xa0] ss:$8 sps:$4 sm:$0xff]  }
 0x3da   :  { %v5700_v59 = vadd.f32 %v5653_v1, %v5512_v16  ;;  %v5655_v12 = vpop.f32.mrb[114].mxu1  ;;  %v10370_v16 = vld [vmem:[%s13297_s5 + $0x90] ss:$8 sps:$4 sm:$0xff]   ;;  %8057 = vmatprep.subr.bf16.mxu1 %v10372_v11 }
 0x3db   :  { %v5656_v4 = vpop.f32.mrb[115].mxu1  ;;  %8058 = vmatpush1.bf16.msra.mxu1 %v10370_v16  ;;  %v10378_v12 = vld [vmem:[%s13297_s5 + $0xb4] ss:$8 sps:$4 sm:$0xff]  }
 0x3dc   :  { %v10381_v4 = vld [vmem:[%s13297_s5 + $0xc4] ss:$8 sps:$4 sm:$0xff]  }
 0x3e5   :  { %v6256_v39 = vpop.f32.mrb[160].mxu0 }
 0x3e6   :  { %v6265_v18 = vadd.f32 %v6256_v39, %v6077_v17  ;;  %v6258_v21 = vpop.f32.mrb[161].mxu0  ;;  %v10387_v39 = vld [vmem:[%s13297_s5 + $0xe4] ss:$8 sps:$4 sm:$0xff]  }
 0x3e7   :  { %v6266_v42 = vadd.f32 %v6258_v21, %v6078_v23  ;;  %v6260_v25 = vpop.f32.mrb[162].mxu0  ;;  %v10375_v23 = vld [vmem:[%s13297_s5 + $0xa4] ss:$8 sps:$4 sm:$0xff]  }
 0x3e8   :  { %v5839_v19 = vpop.f32.mrb[116].mxu1  ;;  %v6261_v43 = vpop.f32.mrb[163].mxu0  ;;  %8059 = vmatprep.subr.bf16.mxu1 %v10375_v23 }
 0x3e9   :  { %v5887_v29 = vadd.f32 %v5839_v19, %v5699_v8  ;;  %v5841_v46 = vpop.f32.mrb[117].mxu1  ;;  %8060 = vmatpush1.bf16.msra.mxu1 %v10373_v36  ;;  %v10385_v19 = vld [vmem:[%s13297_s5 + $0xe0] ss:$8 sps:$4 sm:$0xff]  }
 0x3ea   :  { %v5888_v32 = vadd.f32 %v5841_v46, %v5700_v59  ;;  %v5843_v50 = vpop.f32.mrb[118].mxu1  ;;  %8061 = vmatprep.subr.bf16.mxu1 %v10378_v12 }
 0x3eb   :  { %v5844_v6 = vpop.f32.mrb[119].mxu1 }
 0x3ed   :  { %8062 = vmatpush1.bf16.msra.mxu1 %v10376_v60 }
 0x3ee   :  { %8063 = vmatprep.subr.bf16.mxu1 %v10381_v4 }
 0x3f1   :  { %8064 = vmatpush1.bf16.msra.mxu1 %v10379_v26  ;;  %v10439_v26 = vld [vmem:[%s13299_s7] ss:$8 sps:$4 sm:$0xff]  }
 0x3f2   :  { %8065 = vmatprep.subr.bf16.mxu1 %v10384_v14  ;;  %v10441_v14 = vld [vmem:[%s13299_s7 + $0x4] ss:$8 sps:$4 sm:$0xff]  }
 0x3f3   :  { %8343 = vmatprep.subr.bf16.mxu0 %v10441_v14 }
 0x3f4   :  { %8344 = vmatpush1.bf16.msra.mxu0 %v10439_v26 }
 0x3f5   :  { %v6444_v58 = vpop.f32.mrb[164].mxu0  ;;  %8066 = vmatpush1.bf16.msra.mxu1 %v10382_v24 }
 0x3f6   :  { %v6453_v34 = vadd.f32 %v6444_v58, %v6265_v18  ;;  %v6446_v45 = vpop.f32.mrb[165].mxu0  ;;  %8067 = vmatprep.subr.bf16.mxu1 %v10387_v39 }
 0x3f7   :  { %v6454_v61 = vadd.f32 %v6446_v45, %v6266_v42  ;;  %v6448_v33 = vpop.f32.mrb[166].mxu0 }
 0x3f8   :  { %v6027_v0 = vpop.f32.mrb[120].mxu1  ;;  %v6449_v2 = vpop.f32.mrb[167].mxu0 }
 0x3f9   :  { %v6075_v63 = vadd.f32 %v6027_v0, %v5887_v29  ;;  %v6029_v49 = vpop.f32.mrb[121].mxu1  ;;  %v10390_v29 = vld [vmem:[%s13297_s5 + $0xf4] ss:$8 sps:$4 sm:$0xff]   ;;  %8068 = vmatpush1.bf16.msra.mxu1 %v10385_v19 }
 0x3fa   :  { %v6076_v3 = vadd.f32 %v6029_v49, %v5888_v32  ;;  %v6031_v54 = vpop.f32.mrb[122].mxu1  ;;  %8069 = vmatprep.subr.bf16.mxu1 %v10390_v29  ;;  %v10445_v29 = vld [vmem:[%s13299_s7 + $0x20] ss:$8 sps:$4 sm:$0xff]  }
 0x3fb   :  { %v6032_v35 = vpop.f32.mrb[123].mxu1 }
 0x3fd   :  { %8070 = vmatpush1.bf16.msra.mxu1 %v10388_v40  ;;  %v10456_v40 = vld [vmem:[%s13299_s7 + $0x54] ss:$8 sps:$4 sm:$0xff]  }
 0x3fe   :  { %8080 = vmatprep.subr.bf16.mxu1 %v10393_v55 }
 0x405   :  { %v6632_v13 = vpop.f32.mrb[168].mxu0 }
 0x406   :  { %v6641_v52 = vadd.f32 %v6632_v13, %v6453_v34  ;;  %v6634_v20 = vpop.f32.mrb[169].mxu0 }
 0x407   :  { %v6642_v7 = vadd.f32 %v6634_v20, %v6454_v61  ;;  %v6636_v17 = vpop.f32.mrb[170].mxu0 }
 0x408   :  { %v6215_v27 = vpop.f32.mrb[124].mxu1  ;;  %v6637_v30 = vpop.f32.mrb[171].mxu0 }
 0x409   :  { %v6263_v47 = vadd.f32 %v6215_v27, %v6075_v63  ;;  %v6217_v10 = vpop.f32.mrb[125].mxu1 }
 0x40a   :  { %v6264_v8 = vadd.f32 %v6217_v10, %v6076_v3  ;;  %v6219_v1 = vpop.f32.mrb[126].mxu1 }
 0x40b   :  { %v6220_v59 = vpop.f32.mrb[127].mxu1 }
 0x415   :  { %v6820_v41 = vpop.f32.mrb[172].mxu0 }
 0x416   :  { %v6829_v18 = vadd.f32 %v6820_v41, %v6641_v52  ;;  %v6822_v21 = vpop.f32.mrb[173].mxu0 }
 0x417   :  { %v6830_v42 = vadd.f32 %v6822_v21, %v6642_v7  ;;  %v6824_v25 = vpop.f32.mrb[174].mxu0 }
 0x418   :  { %v6403_v43 = vpop.f32.mrb[128].mxu1  ;;  %v6825_v44 = vpop.f32.mrb[175].mxu0 }
 0x419   :  { %v6451_v46 = vadd.f32 %v6403_v43, %v6263_v47  ;;  %v6405_v48 = vpop.f32.mrb[129].mxu1  ;;  %v10442_v43 = vld [vmem:[%s13299_s7 + $0x10] ss:$8 sps:$4 sm:$0xff]  }
 0x41a   :  { %v6452_v32 = vadd.f32 %v6405_v48, %v6264_v8  ;;  %v6407_v50 = vpop.f32.mrb[130].mxu1  ;;  %v10448_v48 = vld [vmem:[%s13299_s7 + $0x30] ss:$8 sps:$4 sm:$0xff]  }
 0x41b   :  { %v6408_v6 = vpop.f32.mrb[131].mxu1  ;;  %v7597_v50 = vsub.s32 3, %v12953_v37 }
 0x41c   :  { %v10451_v6 = vld [vmem:[%s13299_s7 + $0x40] ss:$8 sps:$4 sm:$0xff]  }
 0x425   :  { %v7006_v22 = vpop.f32.mrb[176].mxu0 }
 0x426   :  { %v7015_v56 = vadd.f32 %v7006_v22, %v6829_v18  ;;  %v7008_v28 = vpop.f32.mrb[177].mxu0  ;;  %v10444_v18 = vld [vmem:[%s13299_s7 + $0x14] ss:$8 sps:$4 sm:$0xff]  }
 0x427   :  { %v7016_v31 = vadd.f32 %v7008_v28, %v6830_v42  ;;  %v7010_v57 = vpop.f32.mrb[178].mxu0  ;;  %8345 = vmatprep.subr.bf16.mxu0 %v10444_v18  ;;  %v7598_v28 = vrot.slane %v12958_v38, %v7597_v50  ;;  %v10408_v50 = vld [vmem:[%s13297_s5 + $0x154] ss:$8 sps:$4 sm:$0xff]  }
 0x428   :  { %v6591_v58 = vpop.f32.mrb[132].mxu1  ;;  %v7011_v34 = vpop.f32.mrb[179].mxu0  ;;  %8346 = vmatpush1.bf16.msra.mxu0 %v10442_v43  ;;  %v10394_v43 = vld [vmem:[%s13297_s5 + $0x110] ss:$8 sps:$4 sm:$0xff]  }
 0x429   :  { %v6639_v45 = vadd.f32 %v6591_v58, %v6451_v46  ;;  %v6593_v61 = vpop.f32.mrb[133].mxu1  ;;  %v10450_v46 = vld [vmem:[%s13299_s7 + $0x34] ss:$8 sps:$4 sm:$0xff]   ;;  %v10454_v58 = vld [vmem:[%s13299_s7 + $0x50] ss:$8 sps:$4 sm:$0xff]  }
 0x42a   :  { %v6640_v33 = vadd.f32 %v6593_v61, %v6452_v32  ;;  %v6595_v62 = vpop.f32.mrb[134].mxu1  ;;  %v10453_v32 = vld [vmem:[%s13299_s7 + $0x44] ss:$8 sps:$4 sm:$0xff]  }
 0x42b   :  { %v6596_v0 = vpop.f32.mrb[135].mxu1  ;;  %v10462_v62 = vld [vmem:[%s13299_s7 + $0x74] ss:$8 sps:$4 sm:$0xff]  }
 0x435   :  { %v7194_v2 = vpop.f32.mrb[180].mxu0 }
 0x436   :  { %v7203_v51 = vadd.f32 %v7194_v2, %v7015_v56  ;;  %v7196_v63 = vpop.f32.mrb[181].mxu0  ;;  %v10460_v2 = vld [vmem:[%s13299_s7 + $0x70] ss:$8 sps:$4 sm:$0xff]  }
 0x437   :  { %v7204_v49 = vadd.f32 %v7196_v63, %v7016_v31  ;;  %v7198_v3 = vpop.f32.mrb[182].mxu0  ;;  %v10465_v63 = vld [vmem:[%s13299_s7 + $0x84] ss:$8 sps:$4 sm:$0xff]  }
 0x438   :  { %v6779_v54 = vpop.f32.mrb[136].mxu1  ;;  %v7199_v35 = vpop.f32.mrb[183].mxu0 }
 0x439   :  { %v6827_v53 = vadd.f32 %v6779_v54, %v6639_v45  ;;  %v6781_v9 = vpop.f32.mrb[137].mxu1  ;;  %v10459_v45 = vld [vmem:[%s13299_s7 + $0x64] ss:$8 sps:$4 sm:$0xff]   ;;  %v10463_v54 = vld [vmem:[%s13299_s7 + $0x80] ss:$8 sps:$4 sm:$0xff]  }
 0x43a   :  { %v6828_v5 = vadd.f32 %v6781_v9, %v6640_v33  ;;  %v6783_v11 = vpop.f32.mrb[138].mxu1  ;;  %v10457_v33 = vld [vmem:[%s13299_s7 + $0x60] ss:$8 sps:$4 sm:$0xff]  }
 0x43b   :  { %v6784_v13 = vpop.f32.mrb[139].mxu1 }
 0x445   :  { %v7382_v16 = vpop.f32.mrb[184].mxu0 }
 0x446   :  { %v7391_v52 = vadd.f32 %v7382_v16, %v7203_v51  ;;  %v7384_v20 = vpop.f32.mrb[185].mxu0  ;;  %v13117_v51 = vsub.s32 0, %v12953_v37 }
 0x447   :  { %v7392_v7 = vadd.f32 %v7384_v20, %v7204_v49  ;;  %v7386_v17 = vpop.f32.mrb[186].mxu0  ;;  %v13123_v49 = vsub.s32 1, %v12953_v37 }
 0x448   :  { %v6965_v27 = vpop.f32.mrb[140].mxu1  ;;  %v7387_v30 = vpop.f32.mrb[187].mxu0  ;;  %v7586_v35 = vrot.slane %v12958_v38, %v13117_v51 }
 0x449   :  { %v7013_v23 = vadd.f32 %v6965_v27, %v6827_v53  ;;  %v6967_v47 = vpop.f32.mrb[141].mxu1  ;;  %v7590_v9 = vrot.slane %v12958_v38, %v13123_v49 }
 0x44a   :  { %v7014_v10 = vadd.f32 %v6967_v47, %v6828_v5  ;;  %v6969_v36 = vpop.f32.mrb[142].mxu1 }
 0x44b   :  { %v6970_v8 = vpop.f32.mrb[143].mxu1 }
 0x455   :  { %v7570_v1 = vpop.f32.mrb[188].mxu0 }
 0x456   :  { %v7579_v59 = vadd.f32 %v7570_v1, %v7391_v52  ;;  %v7572_v12 = vpop.f32.mrb[189].mxu0 }
 0x457   :  { %v7580_v60 = vadd.f32 %v7572_v12, %v7392_v7  ;;  %v7574_v4 = vpop.f32.mrb[190].mxu0 }
 0x458   :  { %v13070_v24 = vadd.f32 %v12962_v15, %v7579_v59  ;;  %v7153_v39 = vpop.f32.mrb[144].mxu1  ;;  %v7575_v41 = vpop.f32.mrb[191].mxu0  ;;  %v10447_v15 = vld [vmem:[%s13299_s7 + $0x24] ss:$8 sps:$4 sm:$0xff]  }
 0x459   :  { %v7201_v21 = vadd.f32 %v7153_v39, %v7013_v23  ;;  %v7155_v42 = vpop.f32.mrb[145].mxu1  ;;  %8347 = vmatprep.subr.bf16.mxu0 %v10447_v15  ;;  %v7606_v61 = vadd.f32 %v7598_v28, %v7580_v60  ;;  %v10397_v15 = vld [vmem:[%s13297_s5 + $0x120] ss:$8 sps:$4 sm:$0xff]  }
 0x45a   :  { %v7202_v25 = vadd.f32 %v7155_v42, %v7014_v10  ;;  %v7157_v19 = vpop.f32.mrb[146].mxu1  ;;  %8348 = vmatpush1.bf16.msra.mxu0 %v10445_v29  ;;  %v10402_v29 = vld [vmem:[%s13297_s5 + $0x134] ss:$8 sps:$4 sm:$0xff]   ;;  %v7613_v28 = vmin.f32 %v13070_v24, 0.0  ;;  %vm7609_vm15 = vcmp.gt.f32.partialorder %v13070_v24, 0.0 }
 0x45b   :  { %v7158_v44 = vpop.f32.mrb[147].mxu1  ;;  %8349 = vmatprep.subr.bf16.mxu0 %v10450_v46  ;;  %v7614_v0 = vmin.f32 %v7606_v61, 0.0  ;;  %vm7610_vm12 = vcmp.gt.f32.partialorder %v7606_v61, 0.0  ;;  %v10400_v46 = vld [vmem:[%s13297_s5 + $0x130] ss:$8 sps:$4 sm:$0xff]  }
 0x45c   :  { %v10399_v44 = vld [vmem:[%s13297_s5 + $0x124] ss:$8 sps:$4 sm:$0xff]  }
 0x45d   :  { %v7621_v3 = vmul.f32 1.442695, %v7614_v0  ;;  %v10424_v0 = vld [vmem:[%s13297_s5 + $0x1b0] ss:$8 sps:$4 sm:$0xff]  }
 0x45e   :  { %8350 = vmatpush1.bf16.msra.mxu0 %v10448_v48  ;;  %v10405_v48 = vld [vmem:[%s13297_s5 + $0x144] ss:$8 sps:$4 sm:$0xff]  }
 0x45f   :  { %8351 = vmatprep.subr.bf16.mxu0 %v10453_v32  ;;  %10507 = vpow2.f32 %v7621_v3  ;;  %v10403_v32 = vld [vmem:[%s13297_s5 + $0x140] ss:$8 sps:$4 sm:$0xff]  }
 0x460   :  { %v10427_v3 = vld [vmem:[%s13297_s5 + $0x1c0] ss:$8 sps:$4 sm:$0xff]  }
 0x462   :  { %8352 = vmatpush1.bf16.msra.mxu0 %v10451_v6  ;;  %v10406_v6 = vld [vmem:[%s13297_s5 + $0x150] ss:$8 sps:$4 sm:$0xff]  }
 0x463   :  { %8353 = vmatprep.subr.bf16.mxu0 %v10456_v40  ;;  %v10411_v40 = vld [vmem:[%s13297_s5 + $0x164] ss:$8 sps:$4 sm:$0xff]  }
 0x466   :  { %8354 = vmatpush1.bf16.msra.mxu0 %v10454_v58  ;;  %v7619_v58 = vmul.f32 1.442695, %v7613_v28 }
 0x467   :  { %8355 = vmatprep.subr.bf16.mxu0 %v10459_v45  ;;  %v10418_v45 = vld [vmem:[%s13297_s5 + $0x190] ss:$8 sps:$4 sm:$0xff]  }
 0x468   :  { %v7341_v55 = vpop.f32.mrb[148].mxu1 }
 0x469   :  { %v7389_v22 = vadd.f32 %v7341_v55, %v7201_v21  ;;  %v7343_v56 = vpop.f32.mrb[149].mxu1  ;;  %v10508_v23 = vpop.eup %10507  ;;  %v10391_v21 = vld [vmem:[%s13297_s5 + $0x100] ss:$8 sps:$4 sm:$0xff]  }
 0x46a   :  { %v7390_v31 = vadd.f32 %v7343_v56, %v7202_v25  ;;  %v7345_v57 = vpop.f32.mrb[150].mxu1  ;;  %8356 = vmatpush1.bf16.msra.mxu0 %v10457_v33  ;;  %v9137_v47 = vadd.f32 -1.0, %v10508_v23  ;;  %v10396_v25 = vld [vmem:[%s13297_s5 + $0x114] ss:$8 sps:$4 sm:$0xff]   ;;  %v10409_v55 = vld [vmem:[%s13297_s5 + $0x160] ss:$8 sps:$4 sm:$0xff]  }
 0x46b   :  { %v7346_v34 = vpop.f32.mrb[151].mxu1  ;;  %8357 = vmatprep.subr.bf16.mxu0 %v10462_v62  ;;  %v10412_v56 = vld [vmem:[%s13297_s5 + $0x170] ss:$8 sps:$4 sm:$0xff]   ;;  %v10415_v57 = vld [vmem:[%s13297_s5 + $0x180] ss:$8 sps:$4 sm:$0xff]  }
 0x46c   :  { %v7630_v36 = vmul.f32 1.6732632, %v9137_v47  ;;  %v10420_v34 = vld [vmem:[%s13297_s5 + $0x194] ss:$8 sps:$4 sm:$0xff]   ;;  %v10421_v33 = vld [vmem:[%s13297_s5 + $0x1a0] ss:$8 sps:$4 sm:$0xff]  }
 0x46d   :  { %v10426_v62 = vld [vmem:[%s13297_s5 + $0x1b4] ss:$8 sps:$4 sm:$0xff]   ;;  %v10472_v23 = vld [vmem:[%s13299_s7 + $0xb0] ss:$8 sps:$4 sm:$0xff]   ;;  %v10477_v47 = vld [vmem:[%s13299_s7 + $0xc4] ss:$8 sps:$4 sm:$0xff]  }
 0x46e   :  { %8358 = vmatpush1.bf16.msra.mxu0 %v10460_v2  ;;  %v7634_v60 = vsel %vm7610_vm12, %v7606_v61, %v7630_v36  ;;  %v10423_v61 = vld [vmem:[%s13297_s5 + $0x1a4] ss:$8 sps:$4 sm:$0xff]   ;;  %v10478_v36 = vld [vmem:[%s13299_s7 + $0xd0] ss:$8 sps:$4 sm:$0xff]  }
 0x46f   :  { %8359 = vmatprep.subr.bf16.mxu0 %v10465_v63  ;;  %v7638_v41 = vmul.f32 1.050701, %v7634_v60  ;;  %v10429_v2 = vld [vmem:[%s13297_s5 + $0x1c4] ss:$8 sps:$4 sm:$0xff]   ;;  %v7707_v60 = vld [vmem:[%s13298_s6] sm:$0x3] }
 0x471   :  { %v7642_v19 = vpack.c.bf16 %v7638_v41, %v7638_v41 }
 0x472   :  { %8360 = vmatpush1.bf16.msra.mxu0 %v10463_v54  ;;  %v10432_v54 = vld [vmem:[%s13297_s5 + $0x1d4] ss:$8 sps:$4 sm:$0xff]  }
 0x478   :  { %v7529_v53 = vpop.f32.mrb[152].mxu1 }
 0x479   :  { %v7577_v5 = vadd.f32 %v7529_v53, %v7389_v22  ;;  %v7531_v11 = vpop.f32.mrb[153].mxu1  ;;  %v10414_v22 = vld [vmem:[%s13297_s5 + $0x174] ss:$8 sps:$4 sm:$0xff]   ;;  %v10430_v53 = vld [vmem:[%s13297_s5 + $0x1d0] ss:$8 sps:$4 sm:$0xff]  }
 0x47a   :  { %v7578_v13 = vadd.f32 %v7531_v11, %v7390_v31  ;;  %v7533_v37 = vpop.f32.mrb[154].mxu1  ;;  %v10417_v31 = vld [vmem:[%s13297_s5 + $0x184] ss:$8 sps:$4 sm:$0xff]   ;;  %v10433_v11 = vld [vmem:[%s13297_s5 + $0x1e0] ss:$8 sps:$4 sm:$0xff]  }
 0x47b   :  { %v7603_v16 = vadd.f32 %v7586_v35, %v7577_v5  ;;  %v7534_v52 = vpop.f32.mrb[155].mxu1 }
 0x47c   :  { %v7604_v20 = vadd.f32 %v7590_v9, %v7578_v13  ;;  %v10435_v9 = vld [vmem:[%s13297_s5 + $0x1e4] ss:$8 sps:$4 sm:$0xff]   ;;  %v10438_v13 = vld [vmem:[%s13297_s5 + $0x1f4] ss:$8 sps:$4 sm:$0xff]  }
 0x47d   :  { %v7611_v7 = vmin.f32 %v7603_v16, 0.0  ;;  %vm7607_vm13 = vcmp.gt.f32.partialorder %v7603_v16, 0.0 }
 0x47e   :  { %v7612_v17 = vmin.f32 %v7604_v20, 0.0  ;;  %vm7608_vm14 = vcmp.gt.f32.partialorder %v7604_v20, 0.0 }
 0x47f   :  { %v7615_v27 = vmul.f32 1.442695, %v7611_v7  ;;  %v10468_v7 = vld [vmem:[%s13299_s7 + $0x94] ss:$8 sps:$4 sm:$0xff]  }
 0x480   :  { %v7617_v30 = vmul.f32 1.442695, %v7612_v17  ;;  %v10466_v17 = vld [vmem:[%s13299_s7 + $0x90] ss:$8 sps:$4 sm:$0xff]   ;;  %8361 = vmatprep.subr.bf16.mxu0 %v10468_v7 }
 0x481   :  { %10509 = vpow2.f32 %v7615_v27  ;;  %8362 = vmatpush1.bf16.msra.mxu0 %v10466_v17  ;;  %v10469_v27 = vld [vmem:[%s13299_s7 + $0xa0] ss:$8 sps:$4 sm:$0xff]  }
 0x482   :  { %10511 = vpow2.f32 %v7617_v30  ;;  %v10474_v30 = vld [vmem:[%s13299_s7 + $0xb4] ss:$8 sps:$4 sm:$0xff]  }
 0x483   :  { %10513 = vpow2.f32 %v7619_v58 }
 0x48b   :  { %v10510_v10 = vpop.eup %10509 }
 0x48c   :  { %v10512_v38 = vpop.eup %10511  ;;  %v9134_v8 = vadd.f32 -1.0, %v10510_v10  ;;  %v10475_v10 = vld [vmem:[%s13299_s7 + $0xc0] ss:$8 sps:$4 sm:$0xff]  }
 0x48d   :  { %v9135_v1 = vadd.f32 -1.0, %v10512_v38  ;;  %v10514_v63 = vpop.eup %10513  ;;  %v10480_v38 = vld [vmem:[%s13299_s7 + $0xd4] ss:$8 sps:$4 sm:$0xff]  }
 0x48e   :  { %v7627_v59 = vmul.f32 1.6732632, %v9134_v8  ;;  %v9136_v35 = vadd.f32 -1.0, %v10514_v63  ;;  %v10483_v8 = vld [vmem:[%s13299_s7 + $0xe4] ss:$8 sps:$4 sm:$0xff]  }
 0x48f   :  { %v7628_v12 = vmul.f32 1.6732632, %v9135_v1  ;;  %v10481_v1 = vld [vmem:[%s13299_s7 + $0xe0] ss:$8 sps:$4 sm:$0xff]  }
 0x490   :  { %v7631_v4 = vsel %vm7607_vm13, %v7603_v16, %v7627_v59  ;;  %v7629_v5 = vmul.f32 1.6732632, %v9136_v35  ;;  %v10436_v16 = vld [vmem:[%s13297_s5 + $0x1f0] ss:$8 sps:$4 sm:$0xff]   ;;  %v10486_v59 = vld [vmem:[%s13299_s7 + $0xf4] ss:$8 sps:$4 sm:$0xff]  }
 0x491   :  { %v7635_v26 = vmul.f32 1.050701, %v7631_v4  ;;  %v7632_v14 = vsel %vm7608_vm14, %v7604_v20, %v7628_v12  ;;  %v10484_v12 = vld [vmem:[%s13299_s7 + $0xf0] ss:$8 sps:$4 sm:$0xff]   ;;  %v7712_v4 = vrot.slane %v7707_v60, %v13117_v51 }
 0x492   :  { %v7636_v39 = vmul.f32 1.050701, %v7632_v14  ;;  %v7633_v37 = vsel %vm7609_vm15, %v13070_v24, %v7629_v5  ;;  %v10471_v24 = vld [vmem:[%s13299_s7 + $0xa4] ss:$8 sps:$4 sm:$0xff]  }
 0x493   :  { %v7639_v42 = vpack.c.bf16 %v7635_v26, %v7635_v26  ;;  %v7637_v52 = vmul.f32 1.050701, %v7633_v37  ;;  %8363 = vmatprep.subr.bf16.mxu0 %v10471_v24  ;;  %v7716_v26 = vrot.slane %v7707_v60, %v13123_v49 }
 0x494   :  { %v7640_v18 = vpack.c.bf16 %v7636_v39, %v7636_v39  ;;  %8364 = vmatpush1.bf16.msra.mxu0 %v10469_v27 }
 0x495   :  { %v7641_v20 = vpack.c.bf16 %v7637_v52, %v7637_v52  ;;  %8365 = vmatprep.subr.bf16.mxu0 %v10474_v30 }
 0x496   :  { %8071 = vmatprep.mubr.bf16.mxu1 %v7640_v18 }
 0x497   :  { %8072 = vmatmul.mubr.bf16.vlgmr.msra.gmra.mrb[156].mxu1 %v7639_v42 }
 0x498   :  { %8081 = vmatpush1.bf16.msra.mxu1 %v10391_v21  ;;  %8112 = vmatprep.mubr.bf16.mxu1 %v7642_v19 }
 0x499   :  { %8082 = vmatprep.subr.bf16.mxu1 %v10396_v25  ;;  %8366 = vmatpush1.bf16.msra.mxu0 %v10472_v23 }
 0x49a   :  { %8367 = vmatprep.subr.bf16.mxu0 %v10477_v47 }
 0x49c   :  { %8083 = vmatpush1.bf16.msra.mxu1 %v10394_v43 }
 0x49d   :  { %8084 = vmatprep.subr.bf16.mxu1 %v10399_v44  ;;  %8368 = vmatpush1.bf16.msra.mxu0 %v10475_v10 }
 0x49e   :  { %8369 = vmatprep.subr.bf16.mxu0 %v10480_v38 }
 0x4a0   :  { %8085 = vmatpush1.bf16.msra.mxu1 %v10397_v15 }
 0x4a1   :  { %8086 = vmatprep.subr.bf16.mxu1 %v10402_v29  ;;  %8370 = vmatpush1.bf16.msra.mxu0 %v10478_v36 }
 0x4a2   :  { %8371 = vmatprep.subr.bf16.mxu0 %v10483_v8 }
 0x4a4   :  { %8087 = vmatpush1.bf16.msra.mxu1 %v10400_v46 }
 0x4a5   :  { %8088 = vmatprep.subr.bf16.mxu1 %v10405_v48  ;;  %8372 = vmatpush1.bf16.msra.mxu0 %v10481_v1 }
 0x4a6   :  { %8373 = vmatprep.subr.bf16.mxu0 %v10486_v59 }
 0x4a8   :  { %8089 = vmatpush1.bf16.msra.mxu1 %v10403_v32 }
 0x4a9   :  { %8090 = vmatprep.subr.bf16.mxu1 %v10408_v50  ;;  %8374 = vmatpush1.bf16.msra.mxu0 %v10484_v12 }
 0x4ac   :  { %8091 = vmatpush1.bf16.msra.mxu1 %v10406_v6 }
 0x4ad   :  { %8092 = vmatprep.subr.bf16.mxu1 %v10411_v40 }
 0x4b0   :  { %8093 = vmatpush1.bf16.msra.mxu1 %v10409_v55 }
 0x4b1   :  { %8094 = vmatprep.subr.bf16.mxu1 %v10414_v22 }
 0x4b4   :  { %8095 = vmatpush1.bf16.msra.mxu1 %v10412_v56 }
 0x4b5   :  { %8096 = vmatprep.subr.bf16.mxu1 %v10417_v31  ;;  %v8171_v31 = vld [vmem:[%s13300_s8] sm:$0x3] }
 0x4b6   :  { %v8180_v58 = vrot.slane %v8171_v31, %v13123_v49 }
 0x4b8   :  { %8097 = vmatpush1.bf16.msra.mxu1 %v10415_v57  ;;  %v8176_v57 = vrot.slane %v8171_v31, %v13117_v51 }
 0x4b9   :  { %8098 = vmatprep.subr.bf16.mxu1 %v10420_v34 }
 0x4bc   :  { %8099 = vmatpush1.bf16.msra.mxu1 %v10418_v45 }
 0x4bd   :  { %8100 = vmatprep.subr.bf16.mxu1 %v10423_v61 }
 0x4c0   :  { %8101 = vmatpush1.bf16.msra.mxu1 %v10421_v33 }
 0x4c1   :  { %8102 = vmatprep.subr.bf16.mxu1 %v10426_v62 }
 0x4c4   :  { %8103 = vmatpush1.bf16.msra.mxu1 %v10424_v0 }
 0x4c5   :  { %8104 = vmatprep.subr.bf16.mxu1 %v10429_v2 }
 0x4c8   :  { %8105 = vmatpush1.bf16.msra.mxu1 %v10427_v3 }
 0x4c9   :  { %8106 = vmatprep.subr.bf16.mxu1 %v10432_v54 }
 0x4cc   :  { %8107 = vmatpush1.bf16.msra.mxu1 %v10430_v53 }
 0x4cd   :  { %8108 = vmatprep.subr.bf16.mxu1 %v10435_v9 }
 0x4d0   :  { %8109 = vmatpush1.bf16.msra.mxu1 %v10433_v11 }
 0x4d1   :  { %8110 = vmatprep.subr.bf16.mxu1 %v10438_v13 }
 0x4d4   :  { %8111 = vmatpush1.bf16.msra.mxu1 %v10436_v16 }
 0x4d7   :  { %8113 = vmatmul.mubr.bf16.vlgmr.msra.gmra.mrb[156].mxu1 %v7641_v20 }
 0x5aa   :  { %v8114_v14 = vpop.f32.mrb[156].mxu1 }
 0x5ab   :  { %v9394_v39 = vadd.f32 %v8114_v14, %v7712_v4  ;;  %v8116_v41 = vpop.f32.mrb[157].mxu1 }
 0x5ac   :  { %v9395_v18 = vadd.f32 %v8116_v41, %v7716_v26  ;;  %v8118_v21 = vpop.f32.mrb[158].mxu1 }
 0x5ad   :  { %v8123_v42 = vmin.f32 %v9394_v39, 0.0  ;;  %v8119_v25 = vpop.f32.mrb[159].mxu1  ;;  %vm8121_vm0 = vcmp.gt.f32.partialorder %v9394_v39, 0.0 }
 0x5ae   :  { %v8124_v19 = vmin.f32 %v9395_v18, 0.0  ;;  %vm8122_vm1 = vcmp.gt.f32.partialorder %v9395_v18, 0.0 }
 0x5af   :  { %v8125_v43 = vmul.f32 1.442695, %v8123_v42 }
 0x5b0   :  { %v8127_v44 = vmul.f32 1.442695, %v8124_v19 }
 0x5b1   :  { %10515 = vpow2.f32 %v8125_v43 }
 0x5b2   :  { %10517 = vpow2.f32 %v8127_v44 }
 0x5bb   :  { %v10516_v15 = vpop.eup %10515 }
 0x5bc   :  { %v10518_v29 = vpop.eup %10517  ;;  %v9202_v46 = vadd.f32 -1.0, %v10516_v15 }
 0x5bd   :  { %v9203_v48 = vadd.f32 -1.0, %v10518_v29 }
 0x5be   :  { %v8131_v32 = vmul.f32 1.6732632, %v9202_v46 }
 0x5bf   :  { %v8132_v50 = vmul.f32 1.6732632, %v9203_v48 }
 0x5c0   :  { %v8133_v6 = vsel %vm8121_vm0, %v9394_v39, %v8131_v32 }
 0x5c1   :  { %v8135_v40 = vmul.f32 1.050701, %v8133_v6  ;;  %v8134_v55 = vsel %vm8122_vm1, %v9395_v18, %v8132_v50 }
 0x5c2   :  { %v8136_v22 = vmul.f32 1.050701, %v8134_v55 }
 0x5c3   :  { %v8137_v28 = vpack.c.bf16 %v8135_v40, %v8135_v40 }
 0x5c4   :  { %v8138_v56 = vpack.c.bf16 %v8136_v22, %v8136_v22 }
 0x5c6   :  { %8375 = vmatprep.mubr.bf16.mxu0 %v8138_v56 }
 0x5c7   :  { %8376 = vmatmul.mubr.bf16.vlgmr.msra.gmra.mrb[192].mxu0 %v8137_v28 }
 0x69a   :  { %v8377_v34 = vpop.f32.mrb[192].mxu0 }
 0x69b   :  { %v8378_v45 = vadd.f32 %v8377_v34, %v8176_v57  ;;  %v8379_v61 = vpop.f32.mrb[193].mxu0 }
 0x69c   :  { %v8380_v33 = vadd.f32 %v8379_v61, %v8180_v58  ;;  %v8381_v62 = vpop.f32.mrb[194].mxu0 }
 0x69d   :  { %v8382_v0 = vpop.f32.mrb[195].mxu0 }
 0x69e   :  { %v8386_v2 = vcombine.low %v8378_v45, %v8380_v33 }
 0x6a0   :  { %9236 = vst.sshfl [vmem:[#allocation3] sm:$0x33 pattern:$0x76325410] %v8386_v2 }
 0x6a1   :  { %10530 = shalt.err (!%p10527_p4)
}
 0x6a2   :  { %s10531_s27 = scalar_lea.hbm %s13301_s9, 64 }
 0x6a3   :  { %p10532_p5 = scmp.ne.s32.totalorder %s13301_s9, %s10531_s27  ;;  %p10535_p6 = scmp.lt.u32.totalorder %s10531_s27, %s13301_s9 }
 0x6a5   :  { %p10537_p7 = pnand %p10535_p6, %p10532_p5 }
 0x6a7   :  { %10540 = shalt.err (!%p10537_p7)
}
 0x6a8   :  { %8405 = dma.vmem_to_hbm [thread:$0]  %s8403_s2, 64, %s13301_s9, [#allocation4]  }
 0x6a9   :  { %10541 = dma.done.wait [#allocation4], 64  }
 0x6aa   :  { %10542 = vsyncadd [#allocation4], 4294967232 }
 0x6ab   :  { %8409 = vsyncpa [#allocation4], 1 }

</bundles_post_ra>
